<compile_context>
chip_gen: v5e
topology: v5e:2x2
jax: 0.10.0
libtpu: 0.0.40
codegen_flags: <defaults>
</compile_context>

<pallas_src>
import jax
import jax.numpy as jnp
from jax import lax
from jax.experimental import pallas as pl
from jax.experimental.pallas import tpu as pltpu

D = 512          # ASP feature dim (fixed by Attentive_Statistics_Pooling(512))
D_OUT = 512      # Linear(1024, 512) output dim
EPS = 1e-5


def _make_asp_kernel(t_valid):
    """t_valid: number of real (un-padded) time frames in each block's T axis."""

    def asp_kernel(x_ref, wsap_ref, bsap_ref, att_ref, wtop_ref, wbot_ref,
                   blin_ref, out_ref):
        bt, t, d = x_ref.shape
        x_bf = x_ref[...]                                  # (bt, T_pad, D) bf16
        x2 = x_bf.reshape(bt * t, d)                       # free: T_pad % 16 == 0

        # Attention MLP on the MXU (bf16 operands, f32 accumulation); tanh on the
        # EUP; cast to bf16 immediately so no large f32 h buffer stays live.
        h_bf = jnp.tanh(
            jnp.dot(x2, wsap_ref[...], preferred_element_type=jnp.float32)
            + bsap_ref[...]
        ).astype(jnp.bfloat16)                             # (bt*T_pad, D)

        # Attention scores as an N=1 MXU matmul (MXU is otherwise idle here).
        scores = jnp.dot(h_bf, att_ref[...],
                         preferred_element_type=jnp.float32)   # (bt*T_pad, 1)
        scores = scores.reshape(bt, t, 1)                  # free: T_pad % 8 == 0 (f32)

        # Mask padded frames, then softmax over time in f32.
        if t_valid < t:
            valid = lax.broadcasted_iota(jnp.int32, (1, t, 1), 1) < t_valid
            scores = jnp.where(valid, scores, -1e30)
        scores = scores - jnp.max(scores, axis=1, keepdims=True)
        e = jnp.exp(scores)
        w = e * pl.reciprocal(jnp.sum(e, axis=1, keepdims=True), approx=True)

        # Weighted moments (f32 via promotion); reuse xw for both mu and E[x^2].
        xw = x_bf * w                                      # bf16 * f32 -> f32, (bt, T_pad, D)
        mu = jnp.sum(xw, axis=1)                           # (bt, D) f32
        ex2 = jnp.sum(xw * x_bf, axis=1)                   # (bt, D) f32
        sigma = jnp.sqrt(jnp.maximum(ex2 - mu * mu, EPS))  # (bt, D) f32

        # Linear(1024, 512) without a lane-axis concat:
        #   out = mu @ W_lin[:, :D]^T + sigma @ W_lin[:, D:]^T + b_lin
        out = jnp.dot(mu.astype(jnp.bfloat16), wtop_ref[...],
                      preferred_element_type=jnp.float32)
        out = out + jnp.dot(sigma.astype(jnp.bfloat16), wbot_ref[...],
                            preferred_element_type=jnp.float32)
        out = out + blin_ref[...]
        out_ref[...] = out.astype(out_ref.dtype)           # (b_tile, D_OUT) full-tile store

    return asp_kernel


def _round_up(v, m):
    return ((v + m - 1) // m) * m


def _choose_b_tile(B, T_pad, *, target_rows=256, max_rows=2048):
    """Pick the batch tile so that bt*T_pad is ~128-2048 rows into the flattened
    MXU matmul (>=128 saturates every generation's MXU M dim; <=2048 keeps the
    double-buffered bf16 x tile + f32 intermediates comfortably inside the
    smallest scoped-VMEM budgets), bt is a multiple of 8 (sublane-dense output
    block), and the batch spans >=2 grid steps (v7x has 2 TensorCores)."""
    bt = _round_up(max(1, target_rows // max(T_pad, 1)), 8)
    bt_cap = max(8, (max_rows // max(T_pad, 1)) // 8 * 8)
    bt = min(bt, bt_cap)
    if B >= 16:
        bt = min(bt, max(8, (_round_up(B, 16) // 2) // 8 * 8))
    else:
        bt = 8
    # Prefer a tile that divides B exactly with >=2 steps (avoids padding x).
    for cand in range(bt, 7, -8):
        if B % cand == 0 and B // cand >= 2:
            return cand
    return max(8, bt)


def prepare_asp_params(w_sap, b_sap, attention, w_lin, b_lin):
    """One-time parameter prep (hoisted out of the per-call wrapper):
    transposes, bf16 casts for MXU operands, W_lin split into mu/sigma halves.
    PyTorch conventions: w_sap (D,D), b_sap (D,), attention (D,1),
    w_lin (D_OUT, 2D), b_lin (D_OUT,)."""
    wsap_t = jnp.asarray(w_sap, jnp.float32).T.astype(jnp.bfloat16)        # (D, D)
    bsap = jnp.asarray(b_sap, jnp.float32).reshape(1, D)                   # (1, D) f32
    att = jnp.asarray(attention, jnp.float32).reshape(D, 1).astype(jnp.bfloat16)  # (D, 1)
    w_lin = jnp.asarray(w_lin, jnp.float32)                                # (D_OUT, 2D)
    wtop = w_lin[:, :D].T.astype(jnp.bfloat16)                             # (D, D_OUT)
    wbot = w_lin[:, D:].T.astype(jnp.bfloat16)                             # (D, D_OUT)
    blin = jnp.asarray(b_lin, jnp.float32).reshape(1, D_OUT)               # (1, D_OUT) f32
    return (wsap_t, bsap, att, wtop, wbot, blin)


def asp_model_forward(x, params, *, b_tile=None):
    """x: (B, T, D) float32/bfloat16; params: output of prepare_asp_params."""
    wsap_t, bsap, att, wtop, wbot, blin = params
    B, T, d = x.shape
    assert d == D

    # Pad T to a multiple of 16 so the bf16 (bt,T,D)<->(bt*T,D) reshape is a
    # layout no-op; padded frames are masked to -inf-equivalent in the kernel.
    T_pad = _round_up(T, 16)
    if b_tile is None:
        b_tile = _choose_b_tile(B, T_pad)

    grid_b = max(2, -(-B // b_tile))      # >=2 steps so v7x's 2nd TensorCore gets work
    B_pad = grid_b * b_tile

    # Single fused downcast(+pad) pass over x in the wrapper.
    x_bf = jnp.asarray(x).astype(jnp.bfloat16)
    if (B_pad, T_pad) != (B, T):
        x_bf = jnp.pad(x_bf, ((0, B_pad - B), (0, T_pad - T), (0, 0)))

    # Explicit scoped-VMEM limit derived from the chosen tile (default is only
    # 16 MiB on v5e / 32 MiB on v6e+).
    rows = b_tile * T_pad
    x_block_bytes = rows * D * 2                      # bf16 x tile
    interm_bytes = rows * D * (2 + 4)                 # bf16 h + one f32 product
    weight_bytes = 2 * 2 * (D * D + 2 * D * D_OUT)    # double-buffered bf16 weights
    need = 2 * x_block_bytes + interm_bytes + weight_bytes + (2 << 20)
    vmem_limit = int(min(max(2 * need, 32 << 20), 64 << 20))

    grid_spec = pltpu.PrefetchScalarGridSpec(
        num_scalar_prefetch=0,
        grid=(grid_b,),
        in_specs=[
            pl.BlockSpec((b_tile, T_pad, D), lambda b: (b, 0, 0)),   # x (bf16), one batch tile/step
            pl.BlockSpec((D, D), lambda b: (0, 0)),                  # W_sap^T (bf16, resident)
            pl.BlockSpec((1, D), lambda b: (0, 0)),                  # b_sap (f32)
            pl.BlockSpec((D, 1), lambda b: (0, 0)),                  # attention column (bf16)
            pl.BlockSpec((D, D_OUT), lambda b: (0, 0)),              # W_lin mu-half^T (bf16)
            pl.BlockSpec((D, D_OUT), lambda b: (0, 0)),              # W_lin sigma-half^T (bf16)
            pl.BlockSpec((1, D_OUT), lambda b: (0, 0)),              # b_lin (f32)
        ],
        out_specs=pl.BlockSpec((b_tile, D_OUT), lambda b: (b, 0)),
    )

    out = pl.pallas_call(
        _make_asp_kernel(T),
        out_shape=jax.ShapeDtypeStruct((B_pad, D_OUT), jnp.float32),
        grid_spec=grid_spec,
        compiler_params=pltpu.CompilerParams(
            dimension_semantics=("parallel",),
            vmem_limit_bytes=vmem_limit,
        ),
    )(x_bf, wsap_t, bsap, att, wtop, wbot, blin)

    return out[:B]


def asp_model_reference(x, w_sap, b_sap, attention, w_lin, b_lin):
    """Pure-JAX f32 reference mirroring the PyTorch forward."""
    h = jnp.tanh(jnp.einsum("btd,ed->bte", x, w_sap) + b_sap)      # (B, T, D)
    scores = jnp.einsum("btd,dk->btk", h, attention)               # (B, T, 1)
    w = jax.nn.softmax(scores, axis=1)                             # (B, T, 1)
    mu = jnp.sum(x * w, axis=1)                                    # (B, D)
    sigma = jnp.sqrt(jnp.clip(jnp.sum(x * x * w, axis=1) - mu * mu, EPS, None))
    feat = jnp.concatenate([mu, sigma], axis=-1)                   # (B, 2D)
    return jnp.einsum("bf,of->bo", feat, w_lin) + b_lin            # (B, D_OUT)


if __name__ == "__main__":
    key = jax.random.PRNGKey(0)
    k_x, k_ws, k_bs, k_att, k_wl, k_bl = jax.random.split(key, 6)

    B, T = 16, 8  # small batch / sequence; feature dims fixed at 512 by the module
    x = jax.random.normal(k_x, (B, T, D), dtype=jnp.float32)

    # Deterministic synthetic parameters (PyTorch weight conventions).
    w_sap = 0.05 * jax.random.normal(k_ws, (D, D), dtype=jnp.float32)          # Linear(512,512).weight
    b_sap = 0.01 * jax.random.normal(k_bs, (D,), dtype=jnp.float32)            # Linear(512,512).bias
    attention = 0.05 * jax.random.normal(k_att, (D, 1), dtype=jnp.float32)     # attention vector
    w_lin = 0.05 * jax.random.normal(k_wl, (D_OUT, 2 * D), dtype=jnp.float32)  # Linear(1024,512).weight
    b_lin = 0.01 * jax.random.normal(k_bl, (D_OUT,), dtype=jnp.float32)        # Linear(1024,512).bias

    params = prepare_asp_params(w_sap, b_sap, attention, w_lin, b_lin)  # one-time prep
    out = asp_model_forward(x, params)
    out = jax.block_until_ready(out)

    ref = asp_model_reference(x, w_sap, b_sap, attention, w_lin, b_lin)
    assert out.shape == (B, D_OUT)
    # x and all MXU operands are bf16 (f32 accumulation / softmax / moments), so
    # compare against the exact f32 reference with a bf16-appropriate tolerance.
    assert jnp.allclose(out, ref, atol=7.5e-2, rtol=7.5e-2), "Pallas output mismatch vs reference"

    print("KERNEL_OK")
</pallas_src>

<mosaic_0001>
module attributes {stable_mosaic.version = 11 : i64} {
  func.func @asp_kernel(%arg0: i32, %arg1: memref<8x16x512xbf16, #tpu.memory_space<vmem>>, %arg2: memref<512x512xbf16, #tpu.memory_space<vmem>>, %arg3: memref<1x512xf32, #tpu.memory_space<vmem>>, %arg4: memref<512x1xbf16, #tpu.memory_space<vmem>>, %arg5: memref<512x512xbf16, #tpu.memory_space<vmem>>, %arg6: memref<512x512xbf16, #tpu.memory_space<vmem>>, %arg7: memref<1x512xf32, #tpu.memory_space<vmem>>, %arg8: memref<8x512xf32, #tpu.memory_space<vmem>>) attributes {dimension_semantics = [#tpu.dimension_semantics<parallel>], iteration_bounds = array<i64: 2>, scalar_prefetch = 0 : i64, scratch_operands = 0 : i64, tpu.core_type = #tpu.core_type<tc>, window_params = [{transform_indices = @transform_0, window_bounds = array<i64: 8, 16, 512>}, {pipeline_mode = #tpu.pipeline_mode<synchronous>, transform_indices = @transform_1, window_bounds = array<i64: 512, 512>}, {pipeline_mode = #tpu.pipeline_mode<synchronous>, transform_indices = @transform_2, window_bounds = array<i64: 1, 512>}, {pipeline_mode = #tpu.pipeline_mode<synchronous>, transform_indices = @transform_3, window_bounds = array<i64: 512, 1>}, {pipeline_mode = #tpu.pipeline_mode<synchronous>, transform_indices = @transform_4, window_bounds = array<i64: 512, 512>}, {pipeline_mode = #tpu.pipeline_mode<synchronous>, transform_indices = @transform_5, window_bounds = array<i64: 512, 512>}, {pipeline_mode = #tpu.pipeline_mode<synchronous>, transform_indices = @transform_6, window_bounds = array<i64: 1, 512>}, {transform_indices = @transform_7, window_bounds = array<i64: 8, 512>}]} {
    %c0 = arith.constant 0 : index
    %c0_0 = arith.constant 0 : index
    %c0_1 = arith.constant 0 : index
    %0 = vector.load %arg1[%c0, %c0_0, %c0_1] : memref<8x16x512xbf16, #tpu.memory_space<vmem>>, vector<8x16x512xbf16>
    %1 = vector.shape_cast %0 : vector<8x16x512xbf16> to vector<128x512xbf16>
    %c0_2 = arith.constant 0 : index
    %c0_3 = arith.constant 0 : index
    %2 = vector.load %arg2[%c0_2, %c0_3] : memref<512x512xbf16, #tpu.memory_space<vmem>>, vector<512x512xbf16>
    %cst = arith.constant dense<0.000000e+00> : vector<128x512xf32>
    %3 = tpu.matmul %1, %2, %cst {dimension_numbers = #tpu.dot_dimension_numbers<[1], [0], [0], [1], [0, 0, 1, 1], [], []>} : vector<128x512xbf16>, vector<512x512xbf16>, vector<128x512xf32> -> vector<128x512xf32>
    %c0_4 = arith.constant 0 : index
    %c0_5 = arith.constant 0 : index
    %4 = vector.load %arg3[%c0_4, %c0_5] : memref<1x512xf32, #tpu.memory_space<vmem>>, vector<1x512xf32>
    %5 = vector.broadcast %4 : vector<1x512xf32> to vector<128x512xf32>
    %6 = arith.addf %3, %5 : vector<128x512xf32>
    %7 = math.tanh %6 : vector<128x512xf32>
    %8 = arith.truncf %7 : vector<128x512xf32> to vector<128x512xbf16>
    %c0_6 = arith.constant 0 : index
    %c0_7 = arith.constant 0 : index
    %9 = vector.load %arg4[%c0_6, %c0_7] : memref<512x1xbf16, #tpu.memory_space<vmem>>, vector<512x1xbf16>
    %cst_8 = arith.constant dense<0.000000e+00> : vector<128x1xf32>
    %10 = tpu.matmul %8, %9, %cst_8 {dimension_numbers = #tpu.dot_dimension_numbers<[1], [0], [0], [1], [0, 0, 1, 1], [], []>} : vector<128x512xbf16>, vector<512x1xbf16>, vector<128x1xf32> -> vector<128x1xf32>
    %11 = vector.shape_cast %10 : vector<128x1xf32> to vector<8x16x1xf32>
    %12 = tpu.iota {dimensions = array<i32: 1>} : vector<1x16x1xi32>
    %c8_i32 = arith.constant 8 : i32
    %13 = vector.broadcast %c8_i32 : i32 to vector<1x16x1xi32>
    %14 = arith.cmpi slt, %12, %13 : vector<1x16x1xi32>
    %cst_9 = arith.constant -1.000000e+30 : f32
    %15 = vector.shape_cast %14 : vector<1x16x1xi1> to vector<1x16x1xi1>
    %16 = vector.broadcast %15 : vector<1x16x1xi1> to vector<8x16x1xi1>
    %17 = vector.broadcast %cst_9 : f32 to vector<8x16x1xf32>
    %18 = arith.select %16, %11, %17 : vector<8x16x1xi1>, vector<8x16x1xf32>
    %cst_10 = arith.constant dense<0xFF800000> : vector<8x1xf32>
    %19 = vector.multi_reduction <maximumf>, %18, %cst_10 [1] : vector<8x16x1xf32> to vector<8x1xf32>
    %20 = vector.shape_cast %19 : vector<8x1xf32> to vector<8x1x1xf32>
    %21 = vector.broadcast %20 : vector<8x1x1xf32> to vector<8x16x1xf32>
    %22 = arith.subf %18, %21 : vector<8x16x1xf32>
    %23 = math.exp %22 : vector<8x16x1xf32>
    %cst_11 = arith.constant dense<0.000000e+00> : vector<8x1xf32>
    %24 = vector.multi_reduction <add>, %23, %cst_11 [1] : vector<8x16x1xf32> to vector<8x1xf32>
    %25 = vector.shape_cast %24 : vector<8x1xf32> to vector<8x1x1xf32>
    %26 = tpu.reciprocal %25 {approx = true} : vector<8x1x1xf32> -> vector<8x1x1xf32>
    %27 = vector.broadcast %26 : vector<8x1x1xf32> to vector<8x16x1xf32>
    %28 = arith.mulf %23, %27 : vector<8x16x1xf32>
    %29 = arith.extf %0 : vector<8x16x512xbf16> to vector<8x16x512xf32>
    %30 = vector.broadcast %28 : vector<8x16x1xf32> to vector<8x16x512xf32>
    %31 = arith.mulf %29, %30 : vector<8x16x512xf32>
    %cst_12 = arith.constant dense<0.000000e+00> : vector<8x512xf32>
    %32 = vector.multi_reduction <add>, %31, %cst_12 [1] : vector<8x16x512xf32> to vector<8x512xf32>
    %33 = arith.extf %0 : vector<8x16x512xbf16> to vector<8x16x512xf32>
    %34 = arith.mulf %31, %33 : vector<8x16x512xf32>
    %cst_13 = arith.constant dense<0.000000e+00> : vector<8x512xf32>
    %35 = vector.multi_reduction <add>, %34, %cst_13 [1] : vector<8x16x512xf32> to vector<8x512xf32>
    %36 = arith.mulf %32, %32 : vector<8x512xf32>
    %37 = arith.subf %35, %36 : vector<8x512xf32>
    %cst_14 = arith.constant 9.99999974E-6 : f32
    %38 = vector.broadcast %cst_14 : f32 to vector<8x512xf32>
    %39 = arith.maximumf %37, %38 : vector<8x512xf32>
    %40 = math.sqrt %39 : vector<8x512xf32>
    %41 = arith.truncf %32 : vector<8x512xf32> to vector<8x512xbf16>
    %c0_15 = arith.constant 0 : index
    %c0_16 = arith.constant 0 : index
    %42 = vector.load %arg5[%c0_15, %c0_16] : memref<512x512xbf16, #tpu.memory_space<vmem>>, vector<512x512xbf16>
    %cst_17 = arith.constant dense<0.000000e+00> : vector<8x512xf32>
    %43 = tpu.matmul %41, %42, %cst_17 {dimension_numbers = #tpu.dot_dimension_numbers<[1], [0], [0], [1], [0, 0, 1, 1], [], []>} : vector<8x512xbf16>, vector<512x512xbf16>, vector<8x512xf32> -> vector<8x512xf32>
    %44 = arith.truncf %40 : vector<8x512xf32> to vector<8x512xbf16>
    %c0_18 = arith.constant 0 : index
    %c0_19 = arith.constant 0 : index
    %45 = vector.load %arg6[%c0_18, %c0_19] : memref<512x512xbf16, #tpu.memory_space<vmem>>, vector<512x512xbf16>
    %cst_20 = arith.constant dense<0.000000e+00> : vector<8x512xf32>
    %46 = tpu.matmul %44, %45, %cst_20 {dimension_numbers = #tpu.dot_dimension_numbers<[1], [0], [0], [1], [0, 0, 1, 1], [], []>} : vector<8x512xbf16>, vector<512x512xbf16>, vector<8x512xf32> -> vector<8x512xf32>
    %47 = arith.addf %43, %46 : vector<8x512xf32>
    %c0_21 = arith.constant 0 : index
    %c0_22 = arith.constant 0 : index
    %48 = vector.load %arg7[%c0_21, %c0_22] : memref<1x512xf32, #tpu.memory_space<vmem>>, vector<1x512xf32>
    %49 = vector.broadcast %48 : vector<1x512xf32> to vector<8x512xf32>
    %50 = arith.addf %47, %49 : vector<8x512xf32>
    %c0_23 = arith.constant 0 : index
    %c0_24 = arith.constant 0 : index
    %51 = vector.load %arg8[%c0_23, %c0_24] : memref<8x512xf32, #tpu.memory_space<vmem>>, vector<8x512xf32>
    tpu.vector_store %arg8[%c0_23, %c0_24], %50 {strides = array<i32>} : memref<8x512xf32, #tpu.memory_space<vmem>>, vector<8x512xf32>,
    return
  }
  func.func @transform_0(%arg0: i32) -> (i32, i32, i32) {
    %c0_i32 = arith.constant 0 : i32
    %c0_i32_0 = arith.constant 0 : i32
    %c0_i32_1 = arith.constant 0 : i32
    return %arg0, %c0_i32, %c0_i32_0 : i32, i32, i32
  }
  func.func @transform_1(%arg0: i32) -> (i32, i32) {
    %c0_i32 = arith.constant 0 : i32
    %c0_i32_0 = arith.constant 0 : i32
    %c0_i32_1 = arith.constant 0 : i32
    return %c0_i32, %c0_i32_0 : i32, i32
  }
  func.func @transform_2(%arg0: i32) -> (i32, i32) {
    %c0_i32 = arith.constant 0 : i32
    %c0_i32_0 = arith.constant 0 : i32
    %c0_i32_1 = arith.constant 0 : i32
    return %c0_i32, %c0_i32_0 : i32, i32
  }
  func.func @transform_3(%arg0: i32) -> (i32, i32) {
    %c0_i32 = arith.constant 0 : i32
    %c0_i32_0 = arith.constant 0 : i32
    %c0_i32_1 = arith.constant 0 : i32
    return %c0_i32, %c0_i32_0 : i32, i32
  }
  func.func @transform_4(%arg0: i32) -> (i32, i32) {
    %c0_i32 = arith.constant 0 : i32
    %c0_i32_0 = arith.constant 0 : i32
    %c0_i32_1 = arith.constant 0 : i32
    return %c0_i32, %c0_i32_0 : i32, i32
  }
  func.func @transform_5(%arg0: i32) -> (i32, i32) {
    %c0_i32 = arith.constant 0 : i32
    %c0_i32_0 = arith.constant 0 : i32
    %c0_i32_1 = arith.constant 0 : i32
    return %c0_i32, %c0_i32_0 : i32, i32
  }
  func.func @transform_6(%arg0: i32) -> (i32, i32) {
    %c0_i32 = arith.constant 0 : i32
    %c0_i32_0 = arith.constant 0 : i32
    %c0_i32_1 = arith.constant 0 : i32
    return %c0_i32, %c0_i32_0 : i32, i32
  }
  func.func @transform_7(%arg0: i32) -> (i32, i32) {
    %c0_i32 = arith.constant 0 : i32
    %c0_i32_0 = arith.constant 0 : i32
    return %arg0, %c0_i32 : i32, i32
  }
}

</mosaic_0001>

<bundles_post_ra>
// kernel: tpu_custom_call.1
= control target key start
LH: loop header
LB: loop body
LE: loop exit
PB: predicated region body
PF: predicated region fallthrough
CT: control target
= control target key end

     0   :  { %s11887_s0 = inlined_call_operand.hbm [shape: bf16[16,16,512], index: 0, kind: input, shape index: {}]   ;;  %s11888_s1 = inlined_call_operand.hbm [shape: bf16[512,512], index: 1, kind: input, shape index: {}]   ;;  %s11889_s2 = inlined_call_operand.vmem [shape: f32[1,512], index: 2, kind: input, shape index: {}]   ;;  %s11890_s3 = inlined_call_operand.vmem [shape: bf16[512,1], index: 3, kind: input, shape index: {}]   ;;  %s11891_s4 = inlined_call_operand.hbm [shape: bf16[512,512], index: 4, kind: input, shape index: {}]   ;;  %s11892_s5 = inlined_call_operand.hbm [shape: bf16[512,512], index: 5, kind: input, shape index: {}]   ;;  %s11893_s6 = inlined_call_operand.vmem [shape: f32[1,512], index: 6, kind: input, shape index: {}]   ;;  %s11894_s7 = inlined_call_operand.hbm [shape: f32[16,512], index: 7, kind: output, shape index: {}]  }
   0x1   :  { %12056 = sst [smem:[#allocation129_spill]] %s11888_s1 }
   0x2   :  { %12 = vsyncpa [#allocation3], 0 }
   0x3   :  { %14 = vsyncpa [#allocation3 + $0x1], 0 }
   0x4   :  { %15 = vsyncpa [#allocation6], 0 }
   0x5   :  { %16 = vsyncpa [#allocation9], 0 }
   0x6   :  { %17 = vsyncpa [#allocation4], 0 }
   0x7   :  { %19 = vsyncpa [#allocation4 + $0x1], 0  ;;  %s9284_s24 = smov 0   ;;  %s9286_s25 = smov 0  }
   0x8   :  { %s9288_s26 = smov 0   ;;  %s9290_s27 = smov 0  }
   0x9 LB: > { %s9305_s28 = sadd.s32 4294967295, %s9235_s27   ;;  %s6452_s29 = sadd.s32 4294967294, %s9235_s27   ;;  %s9235_s27 = sphi %s9290_s27, %s12431_s27   ;;  %s9231_s26 = sphi %s9288_s26, %s12430_s26   ;;  %s9227_s25 = sphi %s9286_s25, %s12429_s25   ;;  %s9223_s24 = sphi %s9284_s24, %s12428_s24  }
   0xa   : > { %p45_p0 = scmp.ne.s32.totalorder %s9227_s25, %s9223_s24  ;;  %p46_p1 = scmp.eq.s32.totalorder %s9305_s28, 0 }
   0xb   : > { %p195_p2 = scmp.eq.s32.totalorder %s9305_s28, 1  ;;  %p201_p3 = scmp.eq.s32.totalorder %s6452_s29, 1 }
   0xc   : > { %p9314_p4 = por %p46_p1, %p45_p0  ;;  %p6453_p5 = scmp.ge.s32.totalorder %s9235_s27, 1 }
   0xd   : > { %p9319_p6 = por %p201_p3, %p45_p0  ;;  %p208_p7 = scmp.lt.s32.totalorder %s9235_s27, 3 }
   0xe   : > { %s12059_s1 = sld [smem:[#allocation129_spill]]  ;;  %s9237_s13 = smov [#allocation5]  }
   0xf   : > { %p9327_p8 = pnand %p6453_p5, %p208_p7  ;;  %s221_s14 = sshll.u32 %s9237_s13, 4  ;;  %s222_s14 = int_to_ptr.vmem [resolvable:$true] %s221_s14 }
  0x10   : > { %s239_s18 = sshll.u32 %s11891_s4, 4  ;;  %s11895_s19 = smov 256   ;;  %s240_s18 = int_to_ptr.hbm [resolvable:$true] %s239_s18 }
  0x11   : > { %p8732_p9 = pneg %p9327_p8  ;;  %s11896_s20 = smov 16  }
  0x12   : > { %s9240_s21 = smov [#allocation7]   ;;  %s253_s9 = sshll.u32 %s11892_s5, 4  ;;  %s254_s9 = int_to_ptr.hbm [resolvable:$true] %s253_s9 }
  0x13   : > { %p9335_p10 = pnand %p8732_p9, %p46_p1  ;;  %s241_s22 = sshll.u32 %s9240_s21, 4  ;;  %s242_s22 = int_to_ptr.vmem [resolvable:$true] %s241_s22 }
  0x14   : > { %s219_s11 = sshll.u32 %s12059_s1, 4  ;;  %s9241_s10 = smov [#allocation8]   ;;  %s220_s11 = int_to_ptr.hbm [resolvable:$true] %s219_s11 }
  0x15   : > { %8735 = dma.hbm_to_vmem [thread:$0]  (!%p9335_p10), %s220_s11, 16384, %s222_s14, [#allocation6], %s11895_s19, %s11895_s19, %s11896_s20  }
  0x16   : > { %8738 = dma.hbm_to_vmem [thread:$0]  (!%p9335_p10), %s240_s18, 16384, %s242_s22, [#allocation6], %s11895_s19, %s11895_s19, %s11896_s20  }
  0x17   : > { %s255_s11 = sshll.u32 %s9241_s10, 4  ;;  %s9357_s13 = sadd.s32 1, %s9235_s27   ;;  %s256_s11 = int_to_ptr.vmem [resolvable:$true] %s255_s11 }
  0x18   : > { %8741 = dma.hbm_to_vmem [thread:$0]  (!%p9335_p10), %s254_s9, 16384, %s256_s11, [#allocation9], %s11895_s19, %s11895_s19, %s11896_s20  }
  0x19   : > { %s29_s14 = ssub.s32 %s9235_s27, %s9357_s13  ;;  %s32_s16 = sadd.s32 1, %s9231_s26 }
  0x1a   : > { %p30_p12 = scmp.eq.s32.totalorder %s29_s14, 0  ;;  %p39_p13 = scmp.ne.s32.totalorder %s9231_s26, %s9227_s25 }
  0x1b   : > { %p40_p0 = scmp.eq.s32.totalorder %s9235_s27, 0  ;;  %p8753_p5 = scmp.lt.s32.totalorder %s9235_s27, 2 }
  0x1c   : > { %s9371_s17 = scalar_select %p30_p12, %s9231_s26, %s32_s16  }
  0x1d   : > { %p9375_p3 = por %p195_p2, %p39_p13  ;;  %s272_s21 = sand.u32 1, %s9231_s26  }
  0x1e   : > { %s8266_s15 = sshll.u32 %s9235_s27, 8  ;;  %p41_p7 = por %p40_p0, %p39_p13 }
  0x1f   : > { %s6458_s22 = sshll.u32 %s272_s21, 8  ;;  %s282_s9 = scalar_lea.hbm %s11887_s0, %s8266_s15 }
  0x20   : > { %s283_s10 = sshll.u32 %s282_s9, 4  ;;  %s276_s11 = scalar_lea.vmem [#allocation2], %s6458_s22  ;;  %s284_s10 = int_to_ptr.hbm [resolvable:$true] %s283_s10 }
  0x21   : > { %s285_s14 = sshll.u32 %s276_s11, 4  ;;  %p9385_p9 = pnand %p8753_p5, %p41_p7  ;;  %s286_s14 = int_to_ptr.vmem [resolvable:$true] %s285_s14 }
  0x22   : > { %s273_s19 = scalar_lea.sflag [#allocation3], %s272_s21  ;;  %s9131_s20 = sshra.s32 %s284_s10, 4  ;;  %s9132_s20 = int_to_ptr.hbm [resolvable:$true] %s9131_s20 }
  0x23   : > { %s9133_s1 = scalar_lea.hbm %s9132_s20, 256  ;;  %p9135_p10 = pneg %p9385_p9 }
  0x24   : > { %p9134_p2 = scmp.ne.s32.totalorder %s9132_s20, %s9133_s1  ;;  %s9138_s22 = scalar_lea.hbm %s11887_s0, 512 }
  0x25   : > { %p9139_p0 = scmp.lt.s32.totalorder %s9132_s20, %s11887_s0  ;;  %p9140_p5 = scmp.lt.s32.totalorder %s9138_s22, %s9133_s1 }
  0x26   : > { %p9136_p12 = pnand %p9135_p10, %p9134_p2 }
  0x27   : > { %p9141_p7 = por %p9140_p5, %p9139_p0 }
  0x28   : > { %p9137_p13 = pneg %p9136_p12 }
  0x2a   : > { %p9142_p11 = pnand %p9141_p7, %p9137_p13 }
  0x2c   : > { %9145 = shalt.err (!%p9142_p11)
}
  0x2d   : > { %s12064_s21 = smov 16   ;;  %s12065_s11 = smov 256  }
  0x2e   : > { %8745 = dma.hbm_to_vmem [thread:$0]  (!%p9385_p9), %s284_s10, 4096, %s286_s14, %s273_s19, %s12065_s11, %s12065_s11, %s12064_s21  }
  0x2f   : > { %297 = sbr.rel (%p9327_p8) target bundleno = 1646 (0x66e), region = 48 }
  0x34   : > { %s9405_s15 = sand.u32 1, %s9227_s25  }
  0x35   : > { %s6463_s20 = sshll.u32 %s9405_s15, 8  ;;  %s300_s1 = scalar_lea.sflag [#allocation3], %s9405_s15 }
  0x36   : > { %s9409_s23 = scalar_lea.vmem [#allocation2], %s6463_s20 }
  0x37   : > { %9206 = dma.done.wait (%p9314_p4), %s300_s1, 4096  }
  0x38   : > { %9208 = vsyncadd (%p9314_p4), %s300_s1, 4294963200 }
  0x39   : > { %9210 = dma.done.wait (%p46_p1), [#allocation6], 32768  }
  0x3a   : > { %9212 = vsyncadd (%p46_p1), [#allocation6], 4294934528 }
  0x3b   : > { %9214 = dma.done.wait (%p46_p1), [#allocation9], 16384  }
  0x3c   : > { %9216 = vsyncadd (%p46_p1), [#allocation9], 4294950912  ;;  %v6710_v0 = vld [vmem:[#allocation5 + $0xe0] sm:$0xf]  ;;  %v8329_v1 = vld [vmem:[#allocation5 + $0xec] sm:$0xf0] }
  0x3d   : > { %v6838_v2 = vld [vmem:[#allocation5 + $0x1e0] sm:$0xf]  ;;  %v6711_v3 = vor.u32 %v8329_v1, %v6710_v0  ;;  %v8361_v4 = vld [vmem:[#allocation5 + $0x1ec] sm:$0xf0]  ;;  %vm2678_vm0 = vcmask 7168   ;;  %vm4479_vm1 = vcmask 1041409  }
  0x3e   : > { %v6966_v5 = vld [vmem:[#allocation5 + $0x2e0] sm:$0xf]  ;;  %v8393_v6 = vld [vmem:[#allocation5 + $0x2ec] sm:$0xf0]  ;;  %v6839_v7 = vor.u32 %v8361_v4, %v6838_v2  ;;  %vm4481_vm2 = vcmask 1042434   ;;  %vm4483_vm3 = vcmask 1043459  }
  0x3f   : > { %v6967_v8 = vor.u32 %v8393_v6, %v6966_v5  ;;  %v7094_v9 = vld [vmem:[#allocation5 + $0x3e0] sm:$0xf]  ;;  %v8425_v10 = vld [vmem:[#allocation5 + $0x3ec] sm:$0xf0]  ;;  %1321 = vmatpush.bf16.msra.mxu0 %v6711_v3  ;;  %s6467_s14 = sshll.u32 %s9405_s15, 5  ;;  %s8715_s22 = sshll.u32 %s9305_s28, 5 }
  0x40   : > { %v6694_v11 = vld [vmem:[#allocation5 + $0xc0] sm:$0xf]  ;;  %v7095_v12 = vor.u32 %v8425_v10, %v7094_v9  ;;  %v8325_v13 = vld [vmem:[#allocation5 + $0xcc] sm:$0xf0]  ;;  %1370 = vmatpush.bf16.msra.mxu1 %v6839_v7  ;;  %s11846_s16 = scalar_lea.vmem [#allocation10], %s6467_s14  ;;  %s6348_s21 = scalar_lea.hbm %s11894_s7, %s8715_s22 }
  0x41   : > { %v6822_v14 = vld [vmem:[#allocation5 + $0x1c0] sm:$0xf]  ;;  %v8357_v15 = vld [vmem:[#allocation5 + $0x1cc] sm:$0xf0]  ;;  %1419 = vmatpush.bf16.msra.mxu2 %v6967_v8  ;;  %v6695_v16 = vor.u32 %v8325_v13, %v6694_v11  ;;  %s6350_s11 = sshll.u32 %s11846_s16, 4  ;;  %s6352_s20 = sshll.u32 %s6348_s21, 4  ;;  %s6351_s11 = int_to_ptr.vmem [resolvable:$true] %s6350_s11  ;;  %s6353_s20 = int_to_ptr.hbm [resolvable:$true] %s6352_s20 }
  0x42   : > { %v6823_v17 = vor.u32 %v8357_v15, %v6822_v14  ;;  %v6950_v18 = vld [vmem:[#allocation5 + $0x2c0] sm:$0xf]  ;;  %v8389_v19 = vld [vmem:[#allocation5 + $0x2cc] sm:$0xf0]  ;;  %1468 = vmatpush.bf16.msra.mxu3 %v7095_v12  ;;  %s6337_s1 = scalar_lea.sflag [#allocation4], %s9405_s15  ;;  %s9175_s30 = sshra.s32 %s6353_s20, 4  ;;  %s9176_s30 = int_to_ptr.hbm [resolvable:$true] %s9175_s30 }
  0x43   : > { %v7078_v20 = vld [vmem:[#allocation5 + $0x3c0] sm:$0xf]  ;;  %v6951_v21 = vor.u32 %v8389_v19, %v6950_v18  ;;  %v8421_v22 = vld [vmem:[#allocation5 + $0x3cc] sm:$0xf0]  ;;  %1322 = vmatpush.bf16.msra.mxu0 %v6695_v16  ;;  %s9177_s28 = scalar_lea.hbm %s9176_s30, 32  ;;  %p9182_p11 = scmp.lt.s32.totalorder %s9176_s30, %s11894_s7 }
  0x44   : > { %v6678_v23 = vld [vmem:[#allocation5 + $0xa0] sm:$0xf]  ;;  %v8321_v24 = vld [vmem:[#allocation5 + $0xac] sm:$0xf0]  ;;  %v7079_v25 = vor.u32 %v8421_v22, %v7078_v20  ;;  %1371 = vmatpush.bf16.msra.mxu1 %v6823_v17  ;;  %p9178_p1 = scmp.ne.s32.totalorder %s9176_s30, %s9177_s28 }
  0x45   : > { %v6806_v26 = vld [vmem:[#allocation5 + $0x1a0] sm:$0xf]  ;;  %v8353_v27 = vld [vmem:[#allocation5 + $0x1ac] sm:$0xf0]  ;;  %v6679_v29 = vor.u32 %v8321_v24, %v6678_v23  ;;  %1420 = vmatpush.bf16.msra.mxu2 %v6951_v21 }
  0x46   : > { %v6934_v28 = vld [vmem:[#allocation5 + $0x2a0] sm:$0xf]  ;;  %v8385_v30 = vld [vmem:[#allocation5 + $0x2ac] sm:$0xf0]  ;;  %v6807_v33 = vor.u32 %v8353_v27, %v6806_v26  ;;  %1469 = vmatpush.bf16.msra.mxu3 %v7079_v25  ;;  %p9179_p4 = pnand %p9178_p1, %p9375_p3 }
  0x47   : > { %v7062_v31 = vld [vmem:[#allocation5 + $0x3a0] sm:$0xf]  ;;  %v8417_v32 = vld [vmem:[#allocation5 + $0x3ac] sm:$0xf0]  ;;  %v6935_v34 = vor.u32 %v8385_v30, %v6934_v28  ;;  %1323 = vmatpush.bf16.msra.mxu0 %v6679_v29 }
  0x48   : > { %v6662_v35 = vld [vmem:[#allocation5 + $0x80] sm:$0xf]  ;;  %v8317_v36 = vld [vmem:[#allocation5 + $0x8c] sm:$0xf0]  ;;  %v7063_v38 = vor.u32 %v8417_v32, %v7062_v31  ;;  %1372 = vmatpush.bf16.msra.mxu1 %v6807_v33  ;;  %v8267_v31 = vld [vmem:[%s9409_s23 + $0x4] sm:$0xf]  ;;  %p9180_p8 = pneg %p9179_p4 }
  0x49   : > { %v6790_v37 = vld [vmem:[#allocation5 + $0x180] sm:$0xf]  ;;  %v8349_v39 = vld [vmem:[#allocation5 + $0x18c] sm:$0xf0]  ;;  %v6663_v44 = vor.u32 %v8317_v36, %v6662_v35  ;;  %1421 = vmatpush.bf16.msra.mxu2 %v6935_v34  ;;  %v6472_v34 = vld [vmem:[%s9409_s23 + $0x10] sm:$0xf0] }
  0x4a   : > { %v6918_v40 = vld [vmem:[#allocation5 + $0x280] sm:$0xf]  ;;  %v8381_v41 = vld [vmem:[#allocation5 + $0x28c] sm:$0xf0]  ;;  %v6791_v45 = vor.u32 %v8349_v39, %v6790_v37  ;;  %1470 = vmatpush.bf16.msra.mxu3 %v7063_v38  ;;  %v6478_v35 = vld [vmem:[%s9409_s23 + $0x8] sm:$0xf] }
  0x4b   : > { %v7046_v42 = vld [vmem:[#allocation5 + $0x380] sm:$0xf]  ;;  %v8413_v43 = vld [vmem:[#allocation5 + $0x38c] sm:$0xf0]  ;;  %v6919_v46 = vor.u32 %v8381_v41, %v6918_v40  ;;  %1324 = vmatpush.bf16.msra.mxu0 %v6663_v44  ;;  %v8270_v36 = vld [vmem:[%s9409_s23 + $0x14] sm:$0xf0]  ;;  %v9433_v41 = vor.u32 %v8267_v31, %v6472_v34 }
  0x4c   : > { %v6646_v47 = vld [vmem:[#allocation5 + $0x60] sm:$0xf]  ;;  %v8313_v48 = vld [vmem:[#allocation5 + $0x6c] sm:$0xf0]  ;;  %v7047_v50 = vor.u32 %v8413_v43, %v7046_v42  ;;  %1373 = vmatpush.bf16.msra.mxu1 %v6791_v45  ;;  %v8268_v38 = vld [vmem:[%s9409_s23 + $0xc] sm:$0xf]  ;;  %v9435_v42 = vor.u32 %v8270_v36, %v6478_v35 }
  0x4d   : > { %v6774_v49 = vld [vmem:[#allocation5 + $0x160] sm:$0xf]  ;;  %v8345_v51 = vld [vmem:[#allocation5 + $0x16c] sm:$0xf0]  ;;  %v6647_v56 = vor.u32 %v8313_v48, %v6646_v47  ;;  %1422 = vmatpush.bf16.msra.mxu2 %v6919_v46  ;;  %v6480_v39 = vld [vmem:[%s9409_s23 + $0x18] sm:$0xf0] }
  0x4e   : > { %v6902_v52 = vld [vmem:[#allocation5 + $0x260] sm:$0xf]  ;;  %v8377_v53 = vld [vmem:[#allocation5 + $0x26c] sm:$0xf0]  ;;  %v6775_v57 = vor.u32 %v8345_v51, %v6774_v49  ;;  %1471 = vmatpush.bf16.msra.mxu3 %v7047_v50  ;;  %v9437_v43 = vor.u32 %v8268_v38, %v6480_v39  ;;  %v8271_v46 = vld [vmem:[%s9409_s23 + $0x24] sm:$0xf] }
  0x4f   : > { %v7030_v54 = vld [vmem:[#allocation5 + $0x360] sm:$0xf]  ;;  %v8409_v55 = vld [vmem:[#allocation5 + $0x36c] sm:$0xf0]  ;;  %v6903_v58 = vor.u32 %v8377_v53, %v6902_v52  ;;  %1325 = vmatpush.bf16.msra.mxu0 %v6647_v56  ;;  %v6488_v47 = vld [vmem:[%s9409_s23 + $0x30] sm:$0xf0] }
  0x50   : > { %v6630_v59 = vld [vmem:[#allocation5 + $0x40] sm:$0xf]  ;;  %v8309_v60 = vld [vmem:[#allocation5 + $0x4c] sm:$0xf0]  ;;  %v7031_v62 = vor.u32 %v8409_v55, %v7030_v54  ;;  %1374 = vmatpush.bf16.msra.mxu1 %v6775_v57  ;;  %v6494_v48 = vld [vmem:[%s9409_s23 + $0x28] sm:$0xf]  ;;  %v9453_v53 = vor.u32 %v8271_v46, %v6488_v47 }
  0x51   : > { %v6758_v61 = vld [vmem:[#allocation5 + $0x140] sm:$0xf]  ;;  %v8341_v63 = vld [vmem:[#allocation5 + $0x14c] sm:$0xf0]  ;;  %v6631_v4 = vor.u32 %v8309_v60, %v6630_v59  ;;  %1423 = vmatpush.bf16.msra.mxu2 %v6903_v58  ;;  %v8274_v49 = vld [vmem:[%s9409_s23 + $0x34] sm:$0xf0] }
  0x52   : > { %v6886_v0 = vld [vmem:[#allocation5 + $0x240] sm:$0xf]  ;;  %v8373_v1 = vld [vmem:[#allocation5 + $0x24c] sm:$0xf0]  ;;  %v6759_v5 = vor.u32 %v8341_v63, %v6758_v61  ;;  %1472 = vmatpush.bf16.msra.mxu3 %v7031_v62  ;;  %v8272_v50 = vld [vmem:[%s9409_s23 + $0x2c] sm:$0xf]  ;;  %v9455_v54 = vor.u32 %v8274_v49, %v6494_v48 }
  0x53   : > { %v7014_v2 = vld [vmem:[#allocation5 + $0x340] sm:$0xf]  ;;  %v8405_v3 = vld [vmem:[#allocation5 + $0x34c] sm:$0xf0]  ;;  %v6887_v6 = vor.u32 %v8373_v1, %v6886_v0  ;;  %1326 = vmatpush.bf16.msra.mxu0 %v6631_v4  ;;  %v6496_v51 = vld [vmem:[%s9409_s23 + $0x38] sm:$0xf0] }
  0x54   : > { %v6614_v7 = vld [vmem:[#allocation5 + $0x20] sm:$0xf]  ;;  %v8305_v8 = vld [vmem:[#allocation5 + $0x2c] sm:$0xf0]  ;;  %v7015_v10 = vor.u32 %v8405_v3, %v7014_v2  ;;  %1375 = vmatpush.bf16.msra.mxu1 %v6759_v5  ;;  %v9457_v55 = vor.u32 %v8272_v50, %v6496_v51  ;;  %v8275_v58 = vld [vmem:[%s9409_s23 + $0x44] sm:$0xf] }
  0x55   : > { %v6742_v9 = vld [vmem:[#allocation5 + $0x120] sm:$0xf]  ;;  %v8337_v11 = vld [vmem:[#allocation5 + $0x12c] sm:$0xf0]  ;;  %v6615_v16 = vor.u32 %v8305_v8, %v6614_v7  ;;  %1424 = vmatpush.bf16.msra.mxu2 %v6887_v6  ;;  %v6504_v59 = vld [vmem:[%s9409_s23 + $0x50] sm:$0xf0] }
  0x56   : > { %v6870_v12 = vld [vmem:[#allocation5 + $0x220] sm:$0xf]  ;;  %v8369_v13 = vld [vmem:[#allocation5 + $0x22c] sm:$0xf0]  ;;  %v6743_v17 = vor.u32 %v8337_v11, %v6742_v9  ;;  %1473 = vmatpush.bf16.msra.mxu3 %v7015_v10  ;;  %v6510_v60 = vld [vmem:[%s9409_s23 + $0x48] sm:$0xf]  ;;  %v9473_v1 = vor.u32 %v8275_v58, %v6504_v59 }
  0x57   : > { %v6998_v14 = vld [vmem:[#allocation5 + $0x320] sm:$0xf]  ;;  %v8401_v15 = vld [vmem:[#allocation5 + $0x32c] sm:$0xf0]  ;;  %v6871_v18 = vor.u32 %v8369_v13, %v6870_v12  ;;  %1327 = vmatpush.bf16.msra.mxu0 %v6615_v16  ;;  %v8278_v61 = vld [vmem:[%s9409_s23 + $0x54] sm:$0xf0] }
  0x58   : > { %v6598_v19 = vld [vmem:[#allocation5] sm:$0xf]  ;;  %v8301_v20 = vld [vmem:[#allocation5 + $0xc] sm:$0xf0]  ;;  %v6999_v22 = vor.u32 %v8401_v15, %v6998_v14  ;;  %1376 = vmatpush.bf16.msra.mxu1 %v6743_v17  ;;  %v8276_v62 = vld [vmem:[%s9409_s23 + $0x4c] sm:$0xf]  ;;  %v9475_v2 = vor.u32 %v8278_v61, %v6510_v60 }
  0x59   : > { %v6726_v21 = vld [vmem:[#allocation5 + $0x100] sm:$0xf]  ;;  %v8333_v23 = vld [vmem:[#allocation5 + $0x10c] sm:$0xf0]  ;;  %v6599_v28 = vor.u32 %v8301_v20, %v6598_v19  ;;  %1425 = vmatpush.bf16.msra.mxu2 %v6871_v18  ;;  %v6512_v63 = vld [vmem:[%s9409_s23 + $0x58] sm:$0xf0] }
  0x5a   : > { %v6854_v24 = vld [vmem:[#allocation5 + $0x200] sm:$0xf]  ;;  %v8365_v25 = vld [vmem:[#allocation5 + $0x20c] sm:$0xf0]  ;;  %v6727_v32 = vor.u32 %v8333_v23, %v6726_v21  ;;  %1474 = vmatpush.bf16.msra.mxu3 %v6999_v22  ;;  %v9477_v3 = vor.u32 %v8276_v62, %v6512_v63  ;;  %v8391_v4 = vld [vmem:[#allocation5 + $0x2e4] sm:$0xf] }
  0x5b   : > { %v6982_v26 = vld [vmem:[#allocation5 + $0x300] sm:$0xf]  ;;  %v8397_v27 = vld [vmem:[#allocation5 + $0x30c] sm:$0xf0]  ;;  %v6855_v33 = vor.u32 %v8365_v25, %v6854_v24  ;;  %1328 = vmatpush.bf16.msra.mxu0 %v6599_v28  ;;  %v6968_v5 = vld [vmem:[#allocation5 + $0x2f0] sm:$0xf0] }
  0x5c   : > { %v6470_v29 = vld [vmem:[%s9409_s23] sm:$0xf]  ;;  %v8269_v30 = vld [vmem:[%s9409_s23 + $0xc] sm:$0xf0]  ;;  %v6983_v37 = vor.u32 %v8397_v27, %v6982_v26  ;;  %1377 = vmatpush.bf16.msra.mxu1 %v6727_v32  ;;  %v8327_v6 = vld [vmem:[#allocation5 + $0xe4] sm:$0xf]  ;;  %v6971_v7 = vor.u32 %v8391_v4, %v6968_v5 }
  0x5d   : > { %v9431_v40 = vor.u32 %v8269_v30, %v6470_v29  ;;  %1426 = vmatpush.bf16.msra.mxu2 %v6855_v33  ;;  %v6486_v44 = vld [vmem:[%s9409_s23 + $0x20] sm:$0xf]  ;;  %v8273_v45 = vld [vmem:[%s9409_s23 + $0x2c] sm:$0xf0]  ;;  %v6712_v8 = vld [vmem:[#allocation5 + $0xf0] sm:$0xf0] }
  0x5e   : > { %1475 = vmatpush.bf16.msra.mxu3 %v6983_v37  ;;  %v9451_v52 = vor.u32 %v8273_v45, %v6486_v44  ;;  %v6502_v56 = vld [vmem:[%s9409_s23 + $0x40] sm:$0xf]  ;;  %v8277_v57 = vld [vmem:[%s9409_s23 + $0x4c] sm:$0xf0]  ;;  %v8423_v9 = vld [vmem:[#allocation5 + $0x3e4] sm:$0xf]  ;;  %v6715_v11 = vor.u32 %v8327_v6, %v6712_v8 }
  0x5f   : > { %1329 = vmatmul.bf16.vlgmr.msra.gmra.mxu0 %v9431_v40  ;;  %1378 = vmatmul.bf16.vlgmr.msra.gmra.mxu1 %v9433_v41  ;;  %v9471_v0 = vor.u32 %v8277_v57, %v6502_v56  ;;  %v7096_v10 = vld [vmem:[#allocation5 + $0x3f0] sm:$0xf0]  ;;  %v8359_v13 = vld [vmem:[#allocation5 + $0x1e4] sm:$0xf]  ;;  %v6518_v16 = vld [vmem:[%s9409_s23 + $0x60] sm:$0xf] }
  0x60   : > { %1427 = vmatmul.bf16.vlgmr.msra.gmra.mxu2 %v9435_v42  ;;  %v7099_v12 = vor.u32 %v8423_v9, %v7096_v10  ;;  %v6840_v14 = vld [vmem:[#allocation5 + $0x1f0] sm:$0xf0]  ;;  %1517 = vmatpush.bf16.msrb.mxu0 %v6715_v11  ;;  %v8281_v17 = vld [vmem:[%s9409_s23 + $0x6c] sm:$0xf0]  ;;  %v8279_v18 = vld [vmem:[%s9409_s23 + $0x64] sm:$0xf] }
  0x61   : > { %1476 = vmatmul.bf16.vlgmr.msra.gmra.mxu3 %v9437_v43  ;;  %1615 = vmatpush.bf16.msrb.mxu2 %v6971_v7  ;;  %v6843_v15 = vor.u32 %v8359_v13, %v6840_v14  ;;  %v6520_v19 = vld [vmem:[%s9409_s23 + $0x70] sm:$0xf0]  ;;  %v6526_v20 = vld [vmem:[%s9409_s23 + $0x68] sm:$0xf]  ;;  %v8282_v21 = vld [vmem:[%s9409_s23 + $0x74] sm:$0xf0]  ;;  %v9491_v24 = vor.u32 %v8281_v17, %v6518_v16 }
  0x62   : > { %1664 = vmatpush.bf16.msrb.mxu3 %v7099_v12  ;;  %v8280_v22 = vld [vmem:[%s9409_s23 + $0x6c] sm:$0xf]  ;;  %v6528_v23 = vld [vmem:[%s9409_s23 + $0x78] sm:$0xf0]  ;;  %v9493_v25 = vor.u32 %v8279_v18, %v6520_v19  ;;  %v9495_v26 = vor.u32 %v8282_v21, %v6526_v20  ;;  %v8387_v28 = vld [vmem:[#allocation5 + $0x2c4] sm:$0xf] }
  0x63   : > { %1566 = vmatpush.bf16.msrb.mxu1 %v6843_v15  ;;  %v9497_v27 = vor.u32 %v8280_v22, %v6528_v23  ;;  %v6952_v29 = vld [vmem:[#allocation5 + $0x2d0] sm:$0xf0]  ;;  %v8323_v30 = vld [vmem:[#allocation5 + $0xc4] sm:$0xf]  ;;  %v6534_v44 = vld [vmem:[%s9409_s23 + $0x80] sm:$0xf] }
  0x64   : > { %v6955_v31 = vor.u32 %v8387_v28, %v6952_v29  ;;  %v6696_v32 = vld [vmem:[#allocation5 + $0xd0] sm:$0xf0]  ;;  %v8419_v33 = vld [vmem:[#allocation5 + $0x3c4] sm:$0xf]  ;;  %v8285_v45 = vld [vmem:[%s9409_s23 + $0x8c] sm:$0xf0] }
  0x65   : > { %v7080_v34 = vld [vmem:[#allocation5 + $0x3d0] sm:$0xf0]  ;;  %v6699_v35 = vor.u32 %v8323_v30, %v6696_v32  ;;  %v8355_v37 = vld [vmem:[#allocation5 + $0x1c4] sm:$0xf]  ;;  %v6542_v48 = vld [vmem:[%s9409_s23 + $0x88] sm:$0xf]  ;;  %v9511_v56 = vor.u32 %v8285_v45, %v6534_v44 }
  0x66   : > { %v7083_v36 = vor.u32 %v8419_v33, %v7080_v34  ;;  %v6824_v38 = vld [vmem:[#allocation5 + $0x1d0] sm:$0xf0]  ;;  %1616 = vmatpush.bf16.msrb.mxu2 %v6955_v31  ;;  %v8283_v46 = vld [vmem:[%s9409_s23 + $0x84] sm:$0xf]  ;;  %v8286_v49 = vld [vmem:[%s9409_s23 + $0x94] sm:$0xf0] }
  0x67   : > { %v6827_v39 = vor.u32 %v8355_v37, %v6824_v38  ;;  %1518 = vmatpush.bf16.msrb.mxu0 %v6699_v35  ;;  %v6536_v47 = vld [vmem:[%s9409_s23 + $0x90] sm:$0xf0]  ;;  %v8284_v50 = vld [vmem:[%s9409_s23 + $0x8c] sm:$0xf]  ;;  %v6544_v51 = vld [vmem:[%s9409_s23 + $0x98] sm:$0xf0]  ;;  %v9515_v58 = vor.u32 %v8286_v49, %v6542_v48 }
  0x68   : > { %1665 = vmatpush.bf16.msrb.mxu3 %v7083_v36  ;;  %v9513_v57 = vor.u32 %v8283_v46, %v6536_v47  ;;  %v9517_v59 = vor.u32 %v8284_v50, %v6544_v51  ;;  %v8383_v60 = vld [vmem:[#allocation5 + $0x2a4] sm:$0xf]  ;;  %v6936_v61 = vld [vmem:[#allocation5 + $0x2b0] sm:$0xf0]  ;;  %v6550_v28 = vld [vmem:[%s9409_s23 + $0xa0] sm:$0xf] }
  0x69   : > { %1567 = vmatpush.bf16.msrb.mxu1 %v6827_v39  ;;  %v8319_v62 = vld [vmem:[#allocation5 + $0xa4] sm:$0xf]  ;;  %v6939_v63 = vor.u32 %v8383_v60, %v6936_v61  ;;  %v6680_v4 = vld [vmem:[#allocation5 + $0xb0] sm:$0xf0]  ;;  %v8289_v29 = vld [vmem:[%s9409_s23 + $0xac] sm:$0xf0] }
  0x6a   : > { %v8415_v5 = vld [vmem:[#allocation5 + $0x3a4] sm:$0xf]  ;;  %v7064_v6 = vld [vmem:[#allocation5 + $0x3b0] sm:$0xf0]  ;;  %v6683_v7 = vor.u32 %v8319_v62, %v6680_v4  ;;  %v6558_v32 = vld [vmem:[%s9409_s23 + $0xa8] sm:$0xf]  ;;  %v9531_v36 = vor.u32 %v8289_v29, %v6550_v28 }
  0x6b   : > { %v7067_v8 = vor.u32 %v8415_v5, %v7064_v6  ;;  %v8351_v9 = vld [vmem:[#allocation5 + $0x1a4] sm:$0xf]  ;;  %v6808_v10 = vld [vmem:[#allocation5 + $0x1b0] sm:$0xf0]  ;;  %1617 = vmatpush.bf16.msrb.mxu2 %v6939_v63  ;;  %v8290_v33 = vld [vmem:[%s9409_s23 + $0xb4] sm:$0xf0] }
  0x6c   : > { %v8315_v11 = vld [vmem:[#allocation5 + $0x84] sm:$0xf]  ;;  %v6811_v12 = vor.u32 %v8351_v9, %v6808_v10  ;;  %v6664_v13 = vld [vmem:[#allocation5 + $0x90] sm:$0xf0]  ;;  %1519 = vmatpush.bf16.msrb.mxu0 %v6683_v7  ;;  %v8288_v34 = vld [vmem:[%s9409_s23 + $0xac] sm:$0xf]  ;;  %v9535_v38 = vor.u32 %v8290_v33, %v6558_v32 }
  0x6d   : > { %v8347_v14 = vld [vmem:[#allocation5 + $0x184] sm:$0xf]  ;;  %v6792_v15 = vld [vmem:[#allocation5 + $0x190] sm:$0xf0]  ;;  %1666 = vmatpush.bf16.msrb.mxu3 %v7067_v8  ;;  %v6667_v16 = vor.u32 %v8315_v11, %v6664_v13  ;;  %v6560_v35 = vld [vmem:[%s9409_s23 + $0xb8] sm:$0xf0] }
  0x6e   : > { %v8379_v17 = vld [vmem:[#allocation5 + $0x284] sm:$0xf]  ;;  %v6920_v18 = vld [vmem:[#allocation5 + $0x290] sm:$0xf0]  ;;  %1568 = vmatpush.bf16.msrb.mxu1 %v6811_v12  ;;  %v6795_v20 = vor.u32 %v8347_v14, %v6792_v15  ;;  %v9537_v39 = vor.u32 %v8288_v34, %v6560_v35  ;;  %v6566_v29 = vld [vmem:[%s9409_s23 + $0xc0] sm:$0xf] }
  0x6f   : > { %1334 = vmatmul.bf16.gmra.mxu0 %v9451_v52  ;;  %1383 = vmatmul.bf16.gmra.mxu1 %v9453_v53  ;;  %v8411_v19 = vld [vmem:[#allocation5 + $0x384] sm:$0xf]  ;;  %v6923_v21 = vor.u32 %v8379_v17, %v6920_v18  ;;  %v7048_v22 = vld [vmem:[#allocation5 + $0x390] sm:$0xf0]  ;;  %v6574_v35 = vld [vmem:[%s9409_s23 + $0xc8] sm:$0xf] }
  0x70   : > { %1432 = vmatmul.bf16.gmra.mxu2 %v9455_v54  ;;  %v7051_v23 = vor.u32 %v8411_v19, %v7048_v22  ;;  %v8287_v30 = vld [vmem:[%s9409_s23 + $0xa4] sm:$0xf]  ;;  %v6552_v31 = vld [vmem:[%s9409_s23 + $0xb0] sm:$0xf0]  ;;  %1520 = vmatpush.bf16.msrb.mxu0 %v6667_v16 }
  0x71   : > { %1481 = vmatmul.bf16.gmra.mxu3 %v9457_v55  ;;  %1618 = vmatpush.bf16.msrb.mxu2 %v6923_v21  ;;  %v9533_v37 = vor.u32 %v8287_v30, %v6552_v31  ;;  %v8311_v44 = vld [vmem:[#allocation5 + $0x64] sm:$0xf]  ;;  %v6648_v45 = vld [vmem:[#allocation5 + $0x70] sm:$0xf0]  ;;  %v8293_v30 = vld [vmem:[%s9409_s23 + $0xcc] sm:$0xf0] }
  0x72   : > { %1667 = vmatpush.bf16.msrb.mxu3 %v7051_v23  ;;  %1569 = vmatpush.bf16.msrb.mxu1 %v6795_v20  ;;  %v8343_v46 = vld [vmem:[#allocation5 + $0x164] sm:$0xf]  ;;  %v6651_v47 = vor.u32 %v8311_v44, %v6648_v45  ;;  %v6776_v48 = vld [vmem:[#allocation5 + $0x170] sm:$0xf0]  ;;  %v8294_v44 = vld [vmem:[%s9409_s23 + $0xd4] sm:$0xf0] }
  0x73   : > { %v8375_v49 = vld [vmem:[#allocation5 + $0x264] sm:$0xf]  ;;  %v6904_v50 = vld [vmem:[#allocation5 + $0x270] sm:$0xf0]  ;;  %v6779_v51 = vor.u32 %v8343_v46, %v6776_v48  ;;  %v8292_v46 = vld [vmem:[%s9409_s23 + $0xcc] sm:$0xf]  ;;  %v9551_v48 = vor.u32 %v8293_v30, %v6566_v29 }
  0x74   : > { %v6907_v60 = vor.u32 %v8375_v49, %v6904_v50  ;;  %v8407_v61 = vld [vmem:[#allocation5 + $0x364] sm:$0xf]  ;;  %v7032_v62 = vld [vmem:[#allocation5 + $0x370] sm:$0xf0]  ;;  %1521 = vmatpush.bf16.msrb.mxu0 %v6651_v47  ;;  %v6576_v47 = vld [vmem:[%s9409_s23 + $0xd8] sm:$0xf0] }
  0x75   : > { %v8307_v63 = vld [vmem:[#allocation5 + $0x44] sm:$0xf]  ;;  %v7035_v4 = vor.u32 %v8407_v61, %v7032_v62  ;;  %v6632_v5 = vld [vmem:[#allocation5 + $0x50] sm:$0xf0]  ;;  %v9555_v61 = vor.u32 %v8294_v44, %v6574_v35 }
  0x76   : > { %v8339_v6 = vld [vmem:[#allocation5 + $0x144] sm:$0xf]  ;;  %v6760_v7 = vld [vmem:[#allocation5 + $0x150] sm:$0xf0]  ;;  %1570 = vmatpush.bf16.msrb.mxu1 %v6779_v51  ;;  %1619 = vmatpush.bf16.msrb.mxu2 %v6907_v60  ;;  %v6635_v8 = vor.u32 %v8307_v63, %v6632_v5  ;;  %v9557_v5 = vor.u32 %v8292_v46, %v6576_v47 }
  0x77   : > { %v6763_v9 = vor.u32 %v8339_v6, %v6760_v7  ;;  %v8371_v10 = vld [vmem:[#allocation5 + $0x244] sm:$0xf]  ;;  %v6888_v11 = vld [vmem:[#allocation5 + $0x250] sm:$0xf0]  ;;  %1668 = vmatpush.bf16.msrb.mxu3 %v7035_v4 }
  0x78   : > { %v8403_v12 = vld [vmem:[#allocation5 + $0x344] sm:$0xf]  ;;  %v6891_v13 = vor.u32 %v8371_v10, %v6888_v11  ;;  %v7016_v14 = vld [vmem:[#allocation5 + $0x350] sm:$0xf0]  ;;  %1522 = vmatpush.bf16.msrb.mxu0 %v6635_v8 }
  0x79   : > { %v8303_v15 = vld [vmem:[#allocation5 + $0x24] sm:$0xf]  ;;  %v6616_v16 = vld [vmem:[#allocation5 + $0x30] sm:$0xf0]  ;;  %v7019_v17 = vor.u32 %v8403_v12, %v7016_v14  ;;  %v6582_v12 = vld [vmem:[%s9409_s23 + $0xe0] sm:$0xf] }
  0x7a   : > { %v8335_v18 = vld [vmem:[#allocation5 + $0x124] sm:$0xf]  ;;  %v6744_v19 = vld [vmem:[#allocation5 + $0x130] sm:$0xf0]  ;;  %v6619_v21 = vor.u32 %v8303_v15, %v6616_v16  ;;  %1571 = vmatpush.bf16.msrb.mxu1 %v6763_v9  ;;  %1620 = vmatpush.bf16.msrb.mxu2 %v6891_v13  ;;  %v8297_v13 = vld [vmem:[%s9409_s23 + $0xec] sm:$0xf0] }
  0x7b   : > { %v8367_v20 = vld [vmem:[#allocation5 + $0x224] sm:$0xf]  ;;  %v6872_v22 = vld [vmem:[#allocation5 + $0x230] sm:$0xf0]  ;;  %v6747_v32 = vor.u32 %v8335_v18, %v6744_v19  ;;  %1669 = vmatpush.bf16.msrb.mxu3 %v7019_v17  ;;  %v6590_v16 = vld [vmem:[%s9409_s23 + $0xe8] sm:$0xf] }
  0x7c   : > { %v8399_v23 = vld [vmem:[#allocation5 + $0x324] sm:$0xf]  ;;  %v7000_v28 = vld [vmem:[#allocation5 + $0x330] sm:$0xf0]  ;;  %v6875_v33 = vor.u32 %v8367_v20, %v6872_v22  ;;  %1523 = vmatpush.bf16.msrb.mxu0 %v6619_v21  ;;  %v8298_v17 = vld [vmem:[%s9409_s23 + $0xf4] sm:$0xf0]  ;;  %v9571_v20 = vor.u32 %v8297_v13, %v6582_v12 }
  0x7d   : > { %v8291_v31 = vld [vmem:[%s9409_s23 + $0xc4] sm:$0xf]  ;;  %v6568_v34 = vld [vmem:[%s9409_s23 + $0xd0] sm:$0xf0]  ;;  %v7003_v45 = vor.u32 %v8399_v23, %v7000_v28  ;;  %v8296_v18 = vld [vmem:[%s9409_s23 + $0xec] sm:$0xf]  ;;  %v9575_v22 = vor.u32 %v8298_v17, %v6590_v16 }
  0x7e   : > { %v8299_v49 = vld [vmem:[#allocation5 + $0x4] sm:$0xf]  ;;  %v6600_v50 = vld [vmem:[#allocation5 + $0x10] sm:$0xf0]  ;;  %v9553_v60 = vor.u32 %v8291_v31, %v6568_v34  ;;  %1572 = vmatpush.bf16.msrb.mxu1 %v6747_v32  ;;  %1621 = vmatpush.bf16.msrb.mxu2 %v6875_v33  ;;  %v6592_v19 = vld [vmem:[%s9409_s23 + $0xf8] sm:$0xf0] }
  0x7f   : > { %1339 = vmatmul.bf16.gmra.mxu0 %v9471_v0  ;;  %1388 = vmatmul.bf16.gmra.mxu1 %v9473_v1  ;;  %v8331_v51 = vld [vmem:[#allocation5 + $0x104] sm:$0xf]  ;;  %v6728_v62 = vld [vmem:[#allocation5 + $0x110] sm:$0xf0]  ;;  %v6603_v6 = vor.u32 %v8299_v49, %v6600_v50  ;;  %v9577_v23 = vor.u32 %v8296_v18, %v6592_v19  ;;  %v9586_v28 = vld [vmem:[%s11889_s2] sm:$0xf] }
  0x80   : > { %1437 = vmatmul.bf16.gmra.mxu2 %v9475_v2  ;;  %v8363_v63 = vld [vmem:[#allocation5 + $0x204] sm:$0xf]  ;;  %v6856_v4 = vld [vmem:[#allocation5 + $0x210] sm:$0xf0]  ;;  %1670 = vmatpush.bf16.msrb.mxu3 %v7003_v45  ;;  %v6731_v9 = vor.u32 %v8331_v51, %v6728_v62  ;;  %v9589_v29 = vperm.slane %v9586_v28, 0 }
  0x81   : > { %1486 = vmatmul.bf16.gmra.mxu3 %v9477_v3  ;;  %v8395_v7 = vld [vmem:[#allocation5 + $0x304] sm:$0xf]  ;;  %v6984_v8 = vld [vmem:[#allocation5 + $0x310] sm:$0xf0]  ;;  %v6859_v10 = vor.u32 %v8363_v63, %v6856_v4  ;;  %1524 = vmatpush.bf16.msrb.mxu0 %v6603_v6  ;;  %v7054_v19 = vld [vmem:[#allocation5 + $0x388] sm:$0xf] }
  0x82   : > { %v6987_v11 = vor.u32 %v8395_v7, %v6984_v8  ;;  %1573 = vmatpush.bf16.msrb.mxu1 %v6731_v9  ;;  %v8295_v14 = vld [vmem:[%s9409_s23 + $0xe4] sm:$0xf]  ;;  %v6584_v15 = vld [vmem:[%s9409_s23 + $0xf0] sm:$0xf0] }
  0x83   : > { %1622 = vmatpush.bf16.msrb.mxu2 %v6859_v10  ;;  %v9573_v21 = vor.u32 %v8295_v14, %v6584_v15 }
  0x84   : > { %1671 = vmatpush.bf16.msrb.mxu3 %v6987_v11 }
  0x8f   : > { %1344 = vmatmul.bf16.gmra.mxu0 %v9491_v24  ;;  %1393 = vmatmul.bf16.gmra.mxu1 %v9493_v25 }
  0x90   : > { %1442 = vmatmul.bf16.gmra.mxu2 %v9495_v26 }
  0x91   : > { %1491 = vmatmul.bf16.gmra.mxu3 %v9497_v27 }
  0x9f   : > { %1349 = vmatmul.bf16.gmra.mxu0 %v9511_v56  ;;  %1398 = vmatmul.bf16.gmra.mxu1 %v9513_v57 }
  0xa0   : > { %1447 = vmatmul.bf16.gmra.mxu2 %v9515_v58 }
  0xa1   : > { %1496 = vmatmul.bf16.gmra.mxu3 %v9517_v59 }
  0xaf   : > { %1354 = vmatmul.bf16.gmra.mxu0 %v9531_v36  ;;  %1403 = vmatmul.bf16.gmra.mxu1 %v9533_v37 }
  0xb0   : > { %1452 = vmatmul.bf16.gmra.mxu2 %v9535_v38 }
  0xb1   : > { %1501 = vmatmul.bf16.gmra.mxu3 %v9537_v39 }
  0xbf   : > { %1359 = vmatmul.bf16.gmra.mxu0 %v9551_v48  ;;  %1408 = vmatmul.bf16.gmra.mxu1 %v9553_v60 }
  0xc0   : > { %1457 = vmatmul.bf16.gmra.mxu2 %v9555_v61 }
  0xc1   : > { %1506 = vmatmul.bf16.gmra.mxu3 %v9557_v5 }
  0xcf   : > { %1364 = vmatmul.bf16.gmra.mxu0 %v9571_v20  ;;  %1413 = vmatmul.bf16.gmra.mxu1 %v9573_v21 }
  0xd0   : > { %1462 = vmatmul.bf16.gmra.mxu2 %v9575_v22 }
  0xd1   : > { %1511 = vmatmul.bf16.gmra.mxu3 %v9577_v23 }
  0xdc   : > { %v1330_v30 = vpop.f32.mrf.mxu0  ;;  %v1379_v32 = vpop.f32.mrf.mxu1 }
  0xdd   : > { %v1331_v31 = vadd.f32 %v1330_v30, %v9589_v29 }
  0xdf   : > { %v1380_v33 = vadd.f32 %v1379_v32, %v1331_v31  ;;  %1525 = vmatmul.bf16.vlgmr.msrb.gmra.mxu0 %v9431_v40  ;;  %1574 = vmatmul.bf16.vlgmr.msrb.gmra.mxu1 %v9433_v41 }
  0xe0   : > { %1623 = vmatmul.bf16.vlgmr.msrb.gmra.mxu2 %v9435_v42 }
  0xe1   : > { %1672 = vmatmul.bf16.vlgmr.msrb.gmra.mxu3 %v9437_v43 }
  0xe3   : > { %v1428_v34 = vpop.f32.mrf.mxu2 }
  0xe4   : > { %v1429_v35 = vadd.f32 %v1428_v34, %v1380_v33  ;;  %v1477_v44 = vpop.f32.mrf.mxu3  ;;  %v1332_v45 = vpop.f32.mrf.mxu0 }
  0xe5   : > { %v1333_v46 = vadd.f32 %v1332_v45, %v9589_v29  ;;  %v1381_v47 = vpop.f32.mrf.mxu1 }
  0xe6   : > { %v1478_v49 = vadd.f32 %v1477_v44, %v1429_v35 }
  0xe7   : > { %v1382_v50 = vadd.f32 %v1381_v47, %v1333_v46  ;;  %v6974_v47 = vld [vmem:[#allocation5 + $0x2e8] sm:$0xf] }
  0xe8   : > { %8800 = vtanh.f32 %v1478_v49  ;;  %v8394_v49 = vld [vmem:[#allocation5 + $0x2f4] sm:$0xf0] }
  0xeb   : > { %v1430_v51 = vpop.f32.mrf.mxu2 }
  0xec   : > { %v1431_v62 = vadd.f32 %v1430_v51, %v1382_v50  ;;  %v1479_v63 = vpop.f32.mrf.mxu3  ;;  %v1335_v4 = vpop.f32.mrf.mxu0  ;;  %v6718_v50 = vld [vmem:[#allocation5 + $0xe8] sm:$0xf]  ;;  %v6975_v51 = vor.u32 %v8394_v49, %v6974_v47 }
  0xed   : > { %v1336_v6 = vadd.f32 %v1335_v4, %v9589_v29  ;;  %v1384_v7 = vpop.f32.mrf.mxu1  ;;  %v8426_v4 = vld [vmem:[#allocation5 + $0x3f4] sm:$0xf0] }
  0xee   : > { %v1480_v8 = vadd.f32 %v1479_v63, %v1431_v62  ;;  %v9602_v14 = vpop.eup %8800  ;;  %v8330_v62 = vld [vmem:[#allocation5 + $0xf4] sm:$0xf0]  ;;  %v7102_v63 = vld [vmem:[#allocation5 + $0x3e8] sm:$0xf]  ;;  %1811 = vmatpush.bf16.msra.mxu2 %v6975_v51 }
  0xef   : > { %v1385_v9 = vadd.f32 %v1384_v7, %v1336_v6  ;;  %1530 = vmatmul.bf16.gmra.mxu0 %v9451_v52  ;;  %1579 = vmatmul.bf16.gmra.mxu1 %v9453_v53  ;;  %v6719_v7 = vor.u32 %v8330_v62, %v6718_v50  ;;  %v6958_v62 = vld [vmem:[#allocation5 + $0x2c8] sm:$0xf] }
  0xf0   : > { %8802 = vtanh.f32 %v1480_v8  ;;  %1628 = vmatmul.bf16.gmra.mxu2 %v9455_v54  ;;  %v7103_v8 = vor.u32 %v8426_v4, %v7102_v63  ;;  %v8390_v63 = vld [vmem:[#allocation5 + $0x2d4] sm:$0xf0]  ;;  %v6702_v4 = vld [vmem:[#allocation5 + $0xc8] sm:$0xf] }
  0xf1   : > { %1677 = vmatmul.bf16.gmra.mxu3 %v9457_v55  ;;  %1713 = vmatpush.bf16.msra.mxu0 %v6719_v7  ;;  %v8326_v7 = vld [vmem:[#allocation5 + $0xd4] sm:$0xf0] }
  0xf2   : > { %1860 = vmatpush.bf16.msra.mxu3 %v7103_v8  ;;  %v7086_v8 = vld [vmem:[#allocation5 + $0x3c8] sm:$0xf] }
  0xf3   : > { %v1433_v10 = vpop.f32.mrf.mxu2 }
  0xf4   : > { %v1434_v11 = vadd.f32 %v1433_v10, %v1385_v9  ;;  %v1482_v12 = vpop.f32.mrf.mxu3  ;;  %v1337_v13 = vpop.f32.mrf.mxu0 }
  0xf5   : > { %v1338_v15 = vadd.f32 %v1337_v13, %v9589_v29  ;;  %v1386_v16 = vpop.f32.mrf.mxu1 }
  0xf6   : > { %v9605_v17 = vpop.eup %8802  ;;  %v1483_v18 = vadd.f32 %v1482_v12, %v1434_v11 }
  0xf7   : > { %v1387_v30 = vadd.f32 %v1386_v16, %v1338_v15 }
  0xf8   : > { %8804 = vtanh.f32 %v1483_v18 }
  0xfb   : > { %v1435_v31 = vpop.f32.mrf.mxu2 }
  0xfc   : > { %v1436_v32 = vadd.f32 %v1435_v31, %v1387_v30  ;;  %v1484_v33 = vpop.f32.mrf.mxu3  ;;  %v1340_v34 = vpop.f32.mrf.mxu0  ;;  %v8382_v31 = vld [vmem:[#allocation5 + $0x294] sm:$0xf0] }
  0xfd   : > { %v1341_v35 = vadd.f32 %v1340_v34, %v9589_v29  ;;  %v1389_v44 = vpop.f32.mrf.mxu1 }
  0xfe   : > { %v1485_v45 = vadd.f32 %v1484_v33, %v1436_v32  ;;  %v9614_v12 = vpop.eup %8804  ;;  %v6846_v32 = vld [vmem:[#allocation5 + $0x1e8] sm:$0xf]  ;;  %v8362_v33 = vld [vmem:[#allocation5 + $0x1f4] sm:$0xf0] }
  0xff   : > { %v1390_v46 = vadd.f32 %v1389_v44, %v1341_v35  ;;  %1535 = vmatmul.bf16.gmra.mxu0 %v9471_v0  ;;  %1584 = vmatmul.bf16.gmra.mxu1 %v9473_v1  ;;  %12066 = vst [vmem:[#allocation15_spill] sm:$0xff] %v9614_v12  ;;  %v6847_v34 = vor.u32 %v8362_v33, %v6846_v32  ;;  %v8400_v12 = vld [vmem:[#allocation5 + $0x32c] sm:$0xf] }
 0x100   : > { %8806 = vtanh.f32 %v1485_v45  ;;  %1633 = vmatmul.bf16.gmra.mxu2 %v9475_v2 }
 0x101   : > { %1682 = vmatmul.bf16.gmra.mxu3 %v9477_v3  ;;  %1762 = vmatpush.bf16.msra.mxu1 %v6847_v34 }
 0x103   : > { %v1438_v6 = vpop.f32.mrf.mxu2 }
 0x104   : > { %v1439_v9 = vadd.f32 %v1438_v6, %v1390_v46  ;;  %v1487_v10 = vpop.f32.mrf.mxu3  ;;  %v1342_v11 = vpop.f32.mrf.mxu0  ;;  %v6959_v6 = vor.u32 %v8390_v63, %v6958_v62 }
 0x105   : > { %v1343_v13 = vadd.f32 %v1342_v11, %v9589_v29  ;;  %v1391_v15 = vpop.f32.mrf.mxu1  ;;  %v6703_v11 = vor.u32 %v8326_v7, %v6702_v4 }
 0x106   : > { %v9617_v16 = vpop.eup %8806  ;;  %v1488_v18 = vadd.f32 %v1487_v10, %v1439_v9  ;;  %v8422_v9 = vld [vmem:[#allocation5 + $0x3d4] sm:$0xf0]  ;;  %1812 = vmatpush.bf16.msra.mxu2 %v6959_v6 }
 0x107   : > { %v1392_v30 = vadd.f32 %v1391_v15, %v1343_v13  ;;  %v7087_v13 = vor.u32 %v8422_v9, %v7086_v8  ;;  %1714 = vmatpush.bf16.msra.mxu0 %v6703_v11  ;;  %v8386_v11 = vld [vmem:[#allocation5 + $0x2b4] sm:$0xf0] }
 0x108   : > { %8808 = vtanh.f32 %v1488_v18 }
 0x109   : > { %1861 = vmatpush.bf16.msra.mxu3 %v7087_v13  ;;  %v6686_v13 = vld [vmem:[#allocation5 + $0xa8] sm:$0xf] }
 0x10b   : > { %v1440_v35 = vpop.f32.mrf.mxu2 }
 0x10c   : > { %v1441_v44 = vadd.f32 %v1440_v35, %v1392_v30  ;;  %v1489_v45 = vpop.f32.mrf.mxu3  ;;  %v1345_v46 = vpop.f32.mrf.mxu0 }
 0x10d   : > { %v1346_v47 = vadd.f32 %v1345_v46, %v9589_v29  ;;  %v1394_v49 = vpop.f32.mrf.mxu1  ;;  %v6926_v46 = vld [vmem:[#allocation5 + $0x288] sm:$0xf] }
 0x10e   : > { %v1490_v50 = vadd.f32 %v1489_v45, %v1441_v44  ;;  %v9626_v32 = vpop.eup %8808 }
 0x10f   : > { %v1395_v51 = vadd.f32 %v1394_v49, %v1346_v47  ;;  %1540 = vmatmul.bf16.gmra.mxu0 %v9491_v24  ;;  %1589 = vmatmul.bf16.gmra.mxu1 %v9493_v25  ;;  %12067 = vst [vmem:[#allocation16_spill] sm:$0xff] %v9626_v32  ;;  %v6830_v47 = vld [vmem:[#allocation5 + $0x1c8] sm:$0xf]  ;;  %v8358_v49 = vld [vmem:[#allocation5 + $0x1d4] sm:$0xf0] }
 0x110   : > { %8810 = vtanh.f32 %v1490_v50  ;;  %1638 = vmatmul.bf16.gmra.mxu2 %v9495_v26  ;;  %v6831_v50 = vor.u32 %v8358_v49, %v6830_v47 }
 0x111   : > { %1687 = vmatmul.bf16.gmra.mxu3 %v9497_v27 }
 0x112   : > { %1763 = vmatpush.bf16.msra.mxu1 %v6831_v50 }
 0x113   : > { %v1443_v10 = vpop.f32.mrf.mxu2 }
 0x114   : > { %v1444_v15 = vadd.f32 %v1443_v10, %v1395_v51  ;;  %v1492_v18 = vpop.f32.mrf.mxu3  ;;  %v1347_v30 = vpop.f32.mrf.mxu0  ;;  %v6942_v10 = vld [vmem:[#allocation5 + $0x2a8] sm:$0xf] }
 0x115   : > { %v1348_v33 = vadd.f32 %v1347_v30, %v9589_v29  ;;  %v1396_v34 = vpop.f32.mrf.mxu1  ;;  %v7070_v30 = vld [vmem:[#allocation5 + $0x3a8] sm:$0xf] }
 0x116   : > { %v9629_v35 = vpop.eup %8810  ;;  %v1493_v44 = vadd.f32 %v1492_v18, %v1444_v15  ;;  %v6943_v15 = vor.u32 %v8386_v11, %v6942_v10  ;;  %v8322_v18 = vld [vmem:[#allocation5 + $0xb4] sm:$0xf0] }
 0x117   : > { %12068 = vst [vmem:[#allocation17_spill] sm:$0xff] %v9629_v35  ;;  %v1397_v45 = vadd.f32 %v1396_v34, %v1348_v33  ;;  %v8418_v33 = vld [vmem:[#allocation5 + $0x3b4] sm:$0xf0]  ;;  %v7006_v35 = vld [vmem:[#allocation5 + $0x328] sm:$0xf] }
 0x118   : > { %8812 = vtanh.f32 %v1493_v44  ;;  %v7071_v44 = vor.u32 %v8418_v33, %v7070_v30  ;;  %1813 = vmatpush.bf16.msra.mxu2 %v6943_v15  ;;  %v8354_v10 = vld [vmem:[#allocation5 + $0x1b4] sm:$0xf0]  ;;  %v6670_v15 = vld [vmem:[#allocation5 + $0x88] sm:$0xf] }
 0x119   : > { %v6798_v30 = vld [vmem:[#allocation5 + $0x188] sm:$0xf]  ;;  %v8414_v11 = vld [vmem:[#allocation5 + $0x394] sm:$0xf0] }
 0x11a   : > { %1862 = vmatpush.bf16.msra.mxu3 %v7071_v44  ;;  %v8350_v44 = vld [vmem:[#allocation5 + $0x194] sm:$0xf0] }
 0x11b   : > { %v1445_v51 = vpop.f32.mrf.mxu2 }
 0x11c   : > { %v1446_v62 = vadd.f32 %v1445_v51, %v1397_v45  ;;  %v1494_v63 = vpop.f32.mrf.mxu3  ;;  %v1350_v4 = vpop.f32.mrf.mxu0  ;;  %v6687_v45 = vor.u32 %v8322_v18, %v6686_v13  ;;  %v8318_v18 = vld [vmem:[#allocation5 + $0x94] sm:$0xf0] }
 0x11d   : > { %v1351_v6 = vadd.f32 %v1350_v4, %v9589_v29  ;;  %v1399_v7 = vpop.f32.mrf.mxu1 }
 0x11e   : > { %v1495_v8 = vadd.f32 %v1494_v63, %v1446_v62  ;;  %v9638_v51 = vpop.eup %8812  ;;  %1715 = vmatpush.bf16.msra.mxu0 %v6687_v45  ;;  %v6671_v45 = vor.u32 %v8318_v18, %v6670_v15  ;;  %v6782_v15 = vld [vmem:[#allocation5 + $0x168] sm:$0xf] }
 0x11f   : > { %v1400_v9 = vadd.f32 %v1399_v7, %v1351_v6  ;;  %1545 = vmatmul.bf16.gmra.mxu0 %v9511_v56  ;;  %1594 = vmatmul.bf16.gmra.mxu1 %v9513_v57  ;;  %12069 = vst [vmem:[#allocation18_spill] sm:$0xff] %v9638_v51  ;;  %v6894_v51 = vld [vmem:[#allocation5 + $0x248] sm:$0xf] }
 0x120   : > { %8814 = vtanh.f32 %v1495_v8  ;;  %1643 = vmatmul.bf16.gmra.mxu2 %v9515_v58  ;;  %v6814_v8 = vld [vmem:[#allocation5 + $0x1a8] sm:$0xf] }
 0x121   : > { %1692 = vmatmul.bf16.gmra.mxu3 %v9517_v59 }
 0x122   : > { %1716 = vmatpush.bf16.msra.mxu0 %v6671_v45  ;;  %v6638_v45 = vld [vmem:[#allocation5 + $0x48] sm:$0xf] }
 0x123   : > { %v1448_v34 = vpop.f32.mrf.mxu2 }
 0x124   : > { %v1449_v47 = vadd.f32 %v1448_v34, %v1400_v9  ;;  %v1497_v49 = vpop.f32.mrf.mxu3  ;;  %v1352_v50 = vpop.f32.mrf.mxu0  ;;  %v6815_v9 = vor.u32 %v8354_v10, %v6814_v8  ;;  %v7055_v10 = vor.u32 %v8414_v11, %v7054_v19  ;;  %v7038_v11 = vld [vmem:[#allocation5 + $0x368] sm:$0xf] }
 0x125   : > { %v1353_v62 = vadd.f32 %v1352_v50, %v9589_v29  ;;  %v1401_v63 = vpop.f32.mrf.mxu1 }
 0x126   : > { %v9641_v4 = vpop.eup %8814  ;;  %v1498_v6 = vadd.f32 %v1497_v49, %v1449_v47  ;;  %1764 = vmatpush.bf16.msra.mxu1 %v6815_v9  ;;  %1863 = vmatpush.bf16.msra.mxu3 %v7055_v10 }
 0x127   : > { %12070 = vst [vmem:[#allocation19_spill] sm:$0xff] %v9641_v4  ;;  %v1402_v7 = vadd.f32 %v1401_v63, %v1353_v62  ;;  %v6799_v62 = vor.u32 %v8350_v44, %v6798_v30  ;;  %v6927_v63 = vor.u32 %v8382_v31, %v6926_v46  ;;  %v8346_v31 = vld [vmem:[#allocation5 + $0x174] sm:$0xf0]  ;;  %v6910_v46 = vld [vmem:[#allocation5 + $0x268] sm:$0xf] }
 0x128   : > { %8816 = vtanh.f32 %v1498_v6  ;;  %v8378_v30 = vld [vmem:[#allocation5 + $0x274] sm:$0xf0]  ;;  %v6783_v19 = vor.u32 %v8346_v31, %v6782_v15 }
 0x129   : > { %1814 = vmatpush.bf16.msra.mxu2 %v6927_v63  ;;  %v6911_v6 = vor.u32 %v8378_v30, %v6910_v46  ;;  %v8310_v44 = vld [vmem:[#allocation5 + $0x54] sm:$0xf0]  ;;  %v7022_v46 = vld [vmem:[#allocation5 + $0x348] sm:$0xf] }
 0x12a   : > { %1765 = vmatpush.bf16.msra.mxu1 %v6799_v62  ;;  %v8374_v4 = vld [vmem:[#allocation5 + $0x254] sm:$0xf0] }
 0x12b   : > { %v1450_v13 = vpop.f32.mrf.mxu2  ;;  %v8406_v30 = vld [vmem:[#allocation5 + $0x354] sm:$0xf0] }
 0x12c   : > { %v1451_v33 = vadd.f32 %v1450_v13, %v1402_v7  ;;  %v1499_v34 = vpop.f32.mrf.mxu3  ;;  %v1355_v50 = vpop.f32.mrf.mxu0  ;;  %v6654_v7 = vld [vmem:[#allocation5 + $0x68] sm:$0xf]  ;;  %v8314_v13 = vld [vmem:[#allocation5 + $0x74] sm:$0xf0] }
 0x12d   : > { %v1356_v47 = vadd.f32 %v1355_v50, %v9589_v29  ;;  %v1404_v49 = vpop.f32.mrf.mxu1  ;;  %v6655_v18 = vor.u32 %v8314_v13, %v6654_v7  ;;  %v6639_v7 = vor.u32 %v8310_v44, %v6638_v45  ;;  %v8342_v13 = vld [vmem:[#allocation5 + $0x154] sm:$0xf0]  ;;  %1815 = vmatpush.bf16.msra.mxu2 %v6911_v6  ;;  %v6750_v44 = vld [vmem:[#allocation5 + $0x128] sm:$0xf] }
 0x12e   : > { %v1500_v8 = vadd.f32 %v1499_v34, %v1451_v33  ;;  %v8410_v33 = vld [vmem:[#allocation5 + $0x374] sm:$0xf0]  ;;  %1766 = vmatpush.bf16.msra.mxu1 %v6783_v19  ;;  %v9650_v63 = vpop.eup %8816 }
 0x12f   : > { %v1405_v9 = vadd.f32 %v1404_v49, %v1356_v47  ;;  %1550 = vmatmul.bf16.gmra.mxu0 %v9531_v36  ;;  %1599 = vmatmul.bf16.gmra.mxu1 %v9533_v37  ;;  %v7039_v34 = vor.u32 %v8410_v33, %v7038_v11  ;;  %v6766_v47 = vld [vmem:[#allocation5 + $0x148] sm:$0xf]  ;;  %12071 = vst [vmem:[#allocation20_spill] sm:$0xff] %v9650_v63  ;;  %v8306_v45 = vld [vmem:[#allocation5 + $0x34] sm:$0xf0] }
 0x130   : > { %8818 = vtanh.f32 %v1500_v8  ;;  %1648 = vmatmul.bf16.gmra.mxu2 %v9535_v38  ;;  %1717 = vmatpush.bf16.msra.mxu0 %v6655_v18  ;;  %v6767_v10 = vor.u32 %v8342_v13, %v6766_v47  ;;  %v6895_v18 = vor.u32 %v8374_v4, %v6894_v51  ;;  %v8338_v6 = vld [vmem:[#allocation5 + $0x134] sm:$0xf0]  ;;  %v6878_v47 = vld [vmem:[#allocation5 + $0x228] sm:$0xf] }
 0x131   : > { %1697 = vmatmul.bf16.gmra.mxu3 %v9537_v39  ;;  %v8370_v51 = vld [vmem:[#allocation5 + $0x234] sm:$0xf0]  ;;  %v6751_v4 = vor.u32 %v8338_v6, %v6750_v44 }
 0x132   : > { %1864 = vmatpush.bf16.msra.mxu3 %v7039_v34  ;;  %1767 = vmatpush.bf16.msra.mxu1 %v6767_v10  ;;  %v6879_v13 = vor.u32 %v8370_v51, %v6878_v47  ;;  %v8366_v63 = vld [vmem:[#allocation5 + $0x214] sm:$0xf0] }
 0x133   : > { %v1453_v50 = vpop.f32.mrf.mxu2  ;;  %1816 = vmatpush.bf16.msra.mxu2 %v6895_v18 }
 0x134   : > { %v1454_v49 = vadd.f32 %v1453_v50, %v1405_v9  ;;  %v1502_v62 = vpop.f32.mrf.mxu3  ;;  %v1357_v8 = vpop.f32.mrf.mxu0  ;;  %1718 = vmatpush.bf16.msra.mxu0 %v6639_v7  ;;  %v7023_v9 = vor.u32 %v8406_v30, %v7022_v46  ;;  %v6622_v50 = vld [vmem:[#allocation5 + $0x28] sm:$0xf] }
 0x135   : > { %v1358_v15 = vadd.f32 %v1357_v8, %v9589_v29  ;;  %v1406_v31 = vpop.f32.mrf.mxu1  ;;  %v6623_v32 = vor.u32 %v8306_v45, %v6622_v50  ;;  %v6606_v7 = vld [vmem:[#allocation5 + $0x8] sm:$0xf]  ;;  %v8334_v45 = vld [vmem:[#allocation5 + $0x114] sm:$0xf0] }
 0x136   : > { %v9653_v19 = vpop.eup %8818  ;;  %v1503_v11 = vadd.f32 %v1502_v62, %v1454_v49  ;;  %v8402_v49 = vld [vmem:[#allocation5 + $0x334] sm:$0xf0]  ;;  %1865 = vmatpush.bf16.msra.mxu3 %v7023_v9  ;;  %1768 = vmatpush.bf16.msra.mxu1 %v6751_v4  ;;  %v6862_v8 = vld [vmem:[#allocation5 + $0x208] sm:$0xf] }
 0x137   : > { %12072 = vst [vmem:[#allocation21_spill] sm:$0xff] %v9653_v19  ;;  %v1407_v33 = vadd.f32 %v1406_v31, %v1358_v15  ;;  %v7007_v34 = vor.u32 %v8402_v49, %v7006_v35  ;;  %v8302_v15 = vld [vmem:[#allocation5 + $0x14] sm:$0xf0]  ;;  %v6734_v31 = vld [vmem:[#allocation5 + $0x108] sm:$0xf]  ;;  %1817 = vmatpush.bf16.msra.mxu2 %v6879_v13  ;;  %v6863_v9 = vor.u32 %v8366_v63, %v6862_v8 }
 0x138   : > { %1719 = vmatpush.bf16.msra.mxu0 %v6623_v32  ;;  %v6607_v50 = vor.u32 %v8302_v15, %v6606_v7  ;;  %v6735_v6 = vor.u32 %v8334_v45, %v6734_v31  ;;  %v6990_v32 = vld [vmem:[#allocation5 + $0x308] sm:$0xf]  ;;  %v8398_v35 = vld [vmem:[#allocation5 + $0x314] sm:$0xf0]  ;;  %8820 = vtanh.f32 %v1503_v11 }
 0x139   : > { %v6991_v51 = vor.u32 %v8398_v35, %v6990_v32 }
 0x13a   : > { %1866 = vmatpush.bf16.msra.mxu3 %v7007_v34  ;;  %1769 = vmatpush.bf16.msra.mxu1 %v6735_v6 }
 0x13b   : > { %v1455_v62 = vpop.f32.mrf.mxu2  ;;  %1818 = vmatpush.bf16.msra.mxu2 %v6863_v9 }
 0x13c   : > { %v1456_v10 = vadd.f32 %v1455_v62, %v1407_v33  ;;  %v1504_v46 = vpop.f32.mrf.mxu3  ;;  %v1360_v30 = vpop.f32.mrf.mxu0  ;;  %1720 = vmatpush.bf16.msra.mxu0 %v6607_v50 }
 0x13d   : > { %v1361_v18 = vadd.f32 %v1360_v30, %v9589_v29  ;;  %v1409_v44 = vpop.f32.mrf.mxu1 }
 0x13e   : > { %v1505_v47 = vadd.f32 %v1504_v46, %v1456_v10  ;;  %1867 = vmatpush.bf16.msra.mxu3 %v6991_v51  ;;  %v9662_v49 = vpop.eup %8820 }
 0x13f   : > { %v1410_v33 = vadd.f32 %v1409_v44, %v1361_v18  ;;  %1555 = vmatmul.bf16.gmra.mxu0 %v9551_v48  ;;  %1604 = vmatmul.bf16.gmra.mxu1 %v9553_v60  ;;  %12073 = vst [vmem:[#allocation22_spill] sm:$0xff] %v9662_v49  ;;  %v8352_v49 = vld [vmem:[#allocation5 + $0x1ac] sm:$0xf] }
 0x140   : > { %8822 = vtanh.f32 %v1505_v47  ;;  %1653 = vmatmul.bf16.gmra.mxu2 %v9555_v61 }
 0x141   : > { %1702 = vmatmul.bf16.gmra.mxu3 %v9557_v5 }
 0x143   : > { %v1458_v63 = vpop.f32.mrf.mxu2 }
 0x144   : > { %v1459_v8 = vadd.f32 %v1458_v63, %v1410_v33  ;;  %v1507_v4 = vpop.f32.mrf.mxu3  ;;  %v1362_v13 = vpop.f32.mrf.mxu0 }
 0x145   : > { %v1363_v11 = vadd.f32 %v1362_v13, %v9589_v29  ;;  %v1411_v34 = vpop.f32.mrf.mxu1 }
 0x146   : > { %v9665_v62 = vpop.eup %8822  ;;  %v1508_v7 = vadd.f32 %v1507_v4, %v1459_v8 }
 0x147   : > { %12074 = vst [vmem:[#allocation23_spill] sm:$0xff] %v9665_v62  ;;  %v1412_v15 = vadd.f32 %v1411_v34, %v1363_v11  ;;  %v9682_v34 = vperm.slane %v9586_v28, 1  ;;  %v6816_v62 = vld [vmem:[#allocation5 + $0x1b8] sm:$0xf0] }
 0x148   : > { %8824 = vtanh.f32 %v1508_v7 }
 0x14b   : > { %v1460_v10 = vpop.f32.mrf.mxu2 }
 0x14c   : > { %v1461_v46 = vadd.f32 %v1460_v10, %v1412_v15  ;;  %v1509_v30 = vpop.f32.mrf.mxu3  ;;  %v1365_v50 = vpop.f32.mrf.mxu0 }
 0x14d   : > { %v1366_v45 = vadd.f32 %v1365_v50, %v9589_v29  ;;  %v1414_v18 = vpop.f32.mrf.mxu1 }
 0x14e   : > { %v1510_v44 = vadd.f32 %v1509_v30, %v1461_v46  ;;  %v9674_v51 = vpop.eup %8824 }
 0x14f   : > { %v1415_v6 = vadd.f32 %v1414_v18, %v1366_v45  ;;  %1560 = vmatmul.bf16.gmra.mxu0 %v9571_v20  ;;  %1609 = vmatmul.bf16.gmra.mxu1 %v9573_v21  ;;  %12075 = vst [vmem:[#allocation24_spill] sm:$0xff] %v9674_v51 }
 0x150   : > { %8826 = vtanh.f32 %v1510_v44  ;;  %1658 = vmatmul.bf16.gmra.mxu2 %v9575_v22 }
 0x151   : > { %1707 = vmatmul.bf16.gmra.mxu3 %v9577_v23 }
 0x153   : > { %v1463_v9 = vpop.f32.mrf.mxu2 }
 0x154   : > { %v1464_v32 = vadd.f32 %v1463_v9, %v1415_v6  ;;  %v1512_v35 = vpop.f32.mrf.mxu3  ;;  %v1367_v47 = vpop.f32.mrf.mxu0 }
 0x155   : > { %v1368_v33 = vadd.f32 %v1367_v47, %v9589_v29  ;;  %v1416_v63 = vpop.f32.mrf.mxu1 }
 0x156   : > { %v9677_v8 = vpop.eup %8826  ;;  %v1513_v4 = vadd.f32 %v1512_v35, %v1464_v32 }
 0x157   : > { %12076 = vst [vmem:[#allocation25_spill] sm:$0xff] %v9677_v8  ;;  %v1417_v13 = vadd.f32 %v1416_v63, %v1368_v33 }
 0x158   : > { %8828 = vtanh.f32 %v1513_v4 }
 0x15b   : > { %v1465_v7 = vpop.f32.mrf.mxu2 }
 0x15c   : > { %v1466_v15 = vadd.f32 %v1465_v7, %v1417_v13  ;;  %v1514_v10 = vpop.f32.mrf.mxu3  ;;  %v1526_v46 = vpop.f32.mrf.mxu0 }
 0x15d   : > { %v1527_v30 = vadd.f32 %v1526_v46, %v9682_v34  ;;  %v1575_v50 = vpop.f32.mrf.mxu1 }
 0x15e   : > { %v1515_v45 = vadd.f32 %v1514_v10, %v1466_v15  ;;  %v9689_v9 = vpop.eup %8828 }
 0x15f   : > { %v1576_v29 = vadd.f32 %v1575_v50, %v1527_v30  ;;  %1721 = vmatmul.bf16.vlgmr.msra.gmra.mxu0 %v9431_v40  ;;  %1770 = vmatmul.bf16.vlgmr.msra.gmra.mxu1 %v9433_v41  ;;  %12077 = vst [vmem:[#allocation26_spill] sm:$0xff] %v9689_v9 }
 0x160   : > { %8830 = vtanh.f32 %v1515_v45  ;;  %1819 = vmatmul.bf16.vlgmr.msra.gmra.mxu2 %v9435_v42 }
 0x161   : > { %1868 = vmatmul.bf16.vlgmr.msra.gmra.mxu3 %v9437_v43 }
 0x163   : > { %v1624_v28 = vpop.f32.mrf.mxu2 }
 0x164   : > { %v1625_v18 = vadd.f32 %v1624_v28, %v1576_v29  ;;  %v1673_v44 = vpop.f32.mrf.mxu3  ;;  %v1528_v6 = vpop.f32.mrf.mxu0 }
 0x165   : > { %v1529_v32 = vadd.f32 %v1528_v6, %v9682_v34  ;;  %v1577_v35 = vpop.f32.mrf.mxu1 }
 0x166   : > { %v9692_v47 = vpop.eup %8830  ;;  %v1674_v33 = vadd.f32 %v1673_v44, %v1625_v18 }
 0x167   : > { %12078 = vst [vmem:[#allocation27_spill] sm:$0xff] %v9692_v47  ;;  %v1578_v63 = vadd.f32 %v1577_v35, %v1529_v32 }
 0x168   : > { %8832 = vtanh.f32 %v1674_v33 }
 0x16b   : > { %v1626_v13 = vpop.f32.mrf.mxu2 }
 0x16c   : > { %v1627_v7 = vadd.f32 %v1626_v13, %v1578_v63  ;;  %v1675_v15 = vpop.f32.mrf.mxu3  ;;  %v1531_v10 = vpop.f32.mrf.mxu0 }
 0x16d   : > { %v1532_v46 = vadd.f32 %v1531_v10, %v9682_v34  ;;  %v1580_v30 = vpop.f32.mrf.mxu1 }
 0x16e   : > { %v1676_v50 = vadd.f32 %v1675_v15, %v1627_v7  ;;  %v9701_v6 = vpop.eup %8832 }
 0x16f   : > { %v1581_v45 = vadd.f32 %v1580_v30, %v1532_v46  ;;  %1726 = vmatmul.bf16.gmra.mxu0 %v9451_v52  ;;  %1775 = vmatmul.bf16.gmra.mxu1 %v9453_v53 }
 0x170   : > { %8834 = vtanh.f32 %v1676_v50  ;;  %1824 = vmatmul.bf16.gmra.mxu2 %v9455_v54 }
 0x171   : > { %1873 = vmatmul.bf16.gmra.mxu3 %v9457_v55 }
 0x173   : > { %v1629_v29 = vpop.f32.mrf.mxu2 }
 0x174   : > { %v1630_v28 = vadd.f32 %v1629_v29, %v1581_v45  ;;  %v1678_v18 = vpop.f32.mrf.mxu3  ;;  %v1533_v44 = vpop.f32.mrf.mxu0 }
 0x175   : > { %v1534_v32 = vadd.f32 %v1533_v44, %v9682_v34  ;;  %v1582_v35 = vpop.f32.mrf.mxu1  ;;  %v8328_v44 = vld [vmem:[#allocation5 + $0xec] sm:$0xf] }
 0x176   : > { %v9704_v33 = vpop.eup %8834  ;;  %v1679_v63 = vadd.f32 %v1678_v18, %v1630_v28  ;;  %v8392_v28 = vld [vmem:[#allocation5 + $0x2ec] sm:$0xf]  ;;  %v6976_v18 = vld [vmem:[#allocation5 + $0x2f8] sm:$0xf0] }
 0x177   : > { %v1583_v7 = vadd.f32 %v1582_v35, %v1534_v32  ;;  %v6979_v32 = vor.u32 %v8392_v28, %v6976_v18  ;;  %v6720_v35 = vld [vmem:[#allocation5 + $0xf8] sm:$0xf0] }
 0x178   : > { %8836 = vtanh.f32 %v1679_v63 }
 0x179   : > { %2007 = vmatpush.bf16.msrb.mxu2 %v6979_v32 }
 0x17b   : > { %v1631_v15 = vpop.f32.mrf.mxu2 }
 0x17c   : > { %v1632_v10 = vadd.f32 %v1631_v15, %v1583_v7  ;;  %v1680_v46 = vpop.f32.mrf.mxu3  ;;  %v1536_v30 = vpop.f32.mrf.mxu0  ;;  %v8424_v7 = vld [vmem:[#allocation5 + $0x3ec] sm:$0xf]  ;;  %v7104_v15 = vld [vmem:[#allocation5 + $0x3f8] sm:$0xf0] }
 0x17d   : > { %v1537_v50 = vadd.f32 %v1536_v30, %v9682_v34  ;;  %v1585_v45 = vpop.f32.mrf.mxu1  ;;  %v7107_v63 = vor.u32 %v8424_v7, %v7104_v15 }
 0x17e   : > { %v1681_v29 = vadd.f32 %v1680_v46, %v1632_v10  ;;  %v6723_v10 = vor.u32 %v8328_v44, %v6720_v35  ;;  %v8360_v44 = vld [vmem:[#allocation5 + $0x1ec] sm:$0xf]  ;;  %v6848_v35 = vld [vmem:[#allocation5 + $0x1f8] sm:$0xf0] }
 0x17f   : > { %v1586_v4 = vadd.f32 %v1585_v45, %v1537_v50  ;;  %1731 = vmatmul.bf16.gmra.mxu0 %v9471_v0  ;;  %1780 = vmatmul.bf16.gmra.mxu1 %v9473_v1 }
 0x180   : > { %8838 = vtanh.f32 %v1681_v29  ;;  %1829 = vmatmul.bf16.gmra.mxu2 %v9475_v2  ;;  %v9713_v29 = vpop.eup %8836  ;;  %1909 = vmatpush.bf16.msrb.mxu0 %v6723_v10 }
 0x181   : > { %1878 = vmatmul.bf16.gmra.mxu3 %v9477_v3  ;;  %12079 = vst [vmem:[#allocation28_spill] sm:$0xff] %v9713_v29  ;;  %v8412_v29 = vld [vmem:[#allocation5 + $0x38c] sm:$0xf] }
 0x182   : > { %2056 = vmatpush.bf16.msrb.mxu3 %v7107_v63 }
 0x183   : > { %v1634_v30 = vpop.f32.mrf.mxu2 }
 0x184   : > { %v1635_v46 = vadd.f32 %v1634_v30, %v1586_v4  ;;  %v1683_v50 = vpop.f32.mrf.mxu3  ;;  %v1538_v45 = vpop.f32.mrf.mxu0  ;;  %v6851_v4 = vor.u32 %v8360_v44, %v6848_v35  ;;  %v8420_v44 = vld [vmem:[#allocation5 + $0x3cc] sm:$0xf]  ;;  %v7088_v35 = vld [vmem:[#allocation5 + $0x3d8] sm:$0xf0] }
 0x185   : > { %v1539_v11 = vadd.f32 %v1538_v45, %v9682_v34  ;;  %v1587_v31 = vpop.f32.mrf.mxu1 }
 0x186   : > { %v9716_v13 = vpop.eup %8838  ;;  %v1684_v28 = vadd.f32 %v1683_v50, %v1635_v46  ;;  %1958 = vmatpush.bf16.msrb.mxu1 %v6851_v4  ;;  %v8324_v46 = vld [vmem:[#allocation5 + $0xcc] sm:$0xf] }
 0x187   : > { %12080 = vst [vmem:[#allocation29_spill] sm:$0xff] %v9716_v13  ;;  %v1588_v18 = vadd.f32 %v1587_v31, %v1539_v11  ;;  %v8388_v31 = vld [vmem:[#allocation5 + $0x2cc] sm:$0xf]  ;;  %v6960_v11 = vld [vmem:[#allocation5 + $0x2d8] sm:$0xf0] }
 0x188   : > { %8840 = vtanh.f32 %v1684_v28  ;;  %v6963_v50 = vor.u32 %v8388_v31, %v6960_v11  ;;  %v7091_v28 = vor.u32 %v8420_v44, %v7088_v35 }
 0x18a   : > { %2008 = vmatpush.bf16.msrb.mxu2 %v6963_v50  ;;  %2057 = vmatpush.bf16.msrb.mxu3 %v7091_v28 }
 0x18b   : > { %v1636_v7 = vpop.f32.mrf.mxu2 }
 0x18c   : > { %v1637_v32 = vadd.f32 %v1636_v7, %v1588_v18  ;;  %v1685_v15 = vpop.f32.mrf.mxu3  ;;  %v1541_v30 = vpop.f32.mrf.mxu0  ;;  %v6704_v18 = vld [vmem:[#allocation5 + $0xd8] sm:$0xf0] }
 0x18d   : > { %v1542_v45 = vadd.f32 %v1541_v30, %v9682_v34  ;;  %v1590_v47 = vpop.f32.mrf.mxu1  ;;  %v6707_v7 = vor.u32 %v8324_v46, %v6704_v18  ;;  %v8356_v46 = vld [vmem:[#allocation5 + $0x1cc] sm:$0xf]  ;;  %v6832_v18 = vld [vmem:[#allocation5 + $0x1d8] sm:$0xf0] }
 0x18e   : > { %v1686_v10 = vadd.f32 %v1685_v15, %v1637_v32  ;;  %v9725_v30 = vpop.eup %8840 }
 0x18f   : > { %v1591_v63 = vadd.f32 %v1590_v47, %v1542_v45  ;;  %1736 = vmatmul.bf16.gmra.mxu0 %v9491_v24  ;;  %1785 = vmatmul.bf16.gmra.mxu1 %v9493_v25  ;;  %12081 = vst [vmem:[#allocation30_spill] sm:$0xff] %v9725_v30  ;;  %v8380_v30 = vld [vmem:[#allocation5 + $0x28c] sm:$0xf] }
 0x190   : > { %8842 = vtanh.f32 %v1686_v10  ;;  %1834 = vmatmul.bf16.gmra.mxu2 %v9495_v26  ;;  %1910 = vmatpush.bf16.msrb.mxu0 %v6707_v7 }
 0x191   : > { %1883 = vmatmul.bf16.gmra.mxu3 %v9497_v27 }
 0x193   : > { %v1639_v4 = vpop.f32.mrf.mxu2 }
 0x194   : > { %v1640_v47 = vadd.f32 %v1639_v4, %v1591_v63  ;;  %v1688_v32 = vpop.f32.mrf.mxu3  ;;  %v1543_v15 = vpop.f32.mrf.mxu0  ;;  %v6835_v63 = vor.u32 %v8356_v46, %v6832_v18  ;;  %v8416_v46 = vld [vmem:[#allocation5 + $0x3ac] sm:$0xf]  ;;  %v7072_v18 = vld [vmem:[#allocation5 + $0x3b8] sm:$0xf0] }
 0x195   : > { %v1544_v45 = vadd.f32 %v1543_v15, %v9682_v34  ;;  %v1592_v10 = vpop.f32.mrf.mxu1 }
 0x196   : > { %v9728_v9 = vpop.eup %8842  ;;  %v1689_v31 = vadd.f32 %v1688_v32, %v1640_v47  ;;  %1959 = vmatpush.bf16.msrb.mxu1 %v6835_v63  ;;  %v8384_v47 = vld [vmem:[#allocation5 + $0x2ac] sm:$0xf]  ;;  %v6944_v32 = vld [vmem:[#allocation5 + $0x2b8] sm:$0xf0] }
 0x197   : > { %12082 = vst [vmem:[#allocation31_spill] sm:$0xff] %v9728_v9  ;;  %v1593_v11 = vadd.f32 %v1592_v10, %v1544_v45  ;;  %v8320_v45 = vld [vmem:[#allocation5 + $0xac] sm:$0xf]  ;;  %v6947_v10 = vor.u32 %v8384_v47, %v6944_v32  ;;  %v6928_v9 = vld [vmem:[#allocation5 + $0x298] sm:$0xf0] }
 0x198   : > { %8844 = vtanh.f32 %v1689_v31  ;;  %v7075_v31 = vor.u32 %v8416_v46, %v7072_v18  ;;  %v6672_v46 = vld [vmem:[#allocation5 + $0x98] sm:$0xf0]  ;;  %v8348_v18 = vld [vmem:[#allocation5 + $0x18c] sm:$0xf] }
 0x199   : > { %2009 = vmatpush.bf16.msrb.mxu2 %v6947_v10  ;;  %v8316_v10 = vld [vmem:[#allocation5 + $0x8c] sm:$0xf] }
 0x19a   : > { %2058 = vmatpush.bf16.msrb.mxu3 %v7075_v31  ;;  %v6800_v31 = vld [vmem:[#allocation5 + $0x198] sm:$0xf0] }
 0x19b   : > { %v1641_v44 = vpop.f32.mrf.mxu2 }
 0x19c   : > { %v1642_v50 = vadd.f32 %v1641_v44, %v1593_v11  ;;  %v1690_v35 = vpop.f32.mrf.mxu3  ;;  %v1546_v4 = vpop.f32.mrf.mxu0  ;;  %v6688_v11 = vld [vmem:[#allocation5 + $0xb8] sm:$0xf0] }
 0x19d   : > { %v1547_v15 = vadd.f32 %v1546_v4, %v9682_v34  ;;  %v1595_v8 = vpop.f32.mrf.mxu1  ;;  %v6691_v44 = vor.u32 %v8320_v45, %v6688_v11  ;;  %v7056_v45 = vld [vmem:[#allocation5 + $0x398] sm:$0xf0] }
 0x19e   : > { %v1691_v7 = vadd.f32 %v1690_v35, %v1642_v50  ;;  %v9737_v4 = vpop.eup %8844 }
 0x19f   : > { %v1596_v28 = vadd.f32 %v1595_v8, %v1547_v15  ;;  %1741 = vmatmul.bf16.gmra.mxu0 %v9511_v56  ;;  %1790 = vmatmul.bf16.gmra.mxu1 %v9513_v57  ;;  %12083 = vst [vmem:[#allocation32_spill] sm:$0xff] %v9737_v4  ;;  %v8372_v4 = vld [vmem:[#allocation5 + $0x24c] sm:$0xf] }
 0x1a0   : > { %8846 = vtanh.f32 %v1691_v7  ;;  %1839 = vmatmul.bf16.gmra.mxu2 %v9515_v58  ;;  %1911 = vmatpush.bf16.msrb.mxu0 %v6691_v44  ;;  %v6675_v44 = vor.u32 %v8316_v10, %v6672_v46  ;;  %v8344_v10 = vld [vmem:[#allocation5 + $0x16c] sm:$0xf]  ;;  %v6912_v46 = vld [vmem:[#allocation5 + $0x278] sm:$0xf0] }
 0x1a1   : > { %1888 = vmatmul.bf16.gmra.mxu3 %v9517_v59 }
 0x1a3   : > { %v1644_v63 = vpop.f32.mrf.mxu2 }
 0x1a4   : > { %v1645_v8 = vadd.f32 %v1644_v63, %v1596_v28  ;;  %v1693_v50 = vpop.f32.mrf.mxu3  ;;  %v1548_v35 = vpop.f32.mrf.mxu0  ;;  %v6819_v28 = vor.u32 %v8352_v49, %v6816_v62  ;;  %1912 = vmatpush.bf16.msrb.mxu0 %v6675_v44  ;;  %v7059_v62 = vor.u32 %v8412_v29, %v7056_v45  ;;  %v8408_v45 = vld [vmem:[#allocation5 + $0x36c] sm:$0xf] }
 0x1a5   : > { %v1549_v15 = vadd.f32 %v1548_v35, %v9682_v34  ;;  %v1597_v7 = vpop.f32.mrf.mxu1  ;;  %v8308_v44 = vld [vmem:[#allocation5 + $0x4c] sm:$0xf] }
 0x1a6   : > { %v9740_v51 = vpop.eup %8846  ;;  %v1694_v47 = vadd.f32 %v1693_v50, %v1645_v8  ;;  %1960 = vmatpush.bf16.msrb.mxu1 %v6819_v28  ;;  %2059 = vmatpush.bf16.msrb.mxu3 %v7059_v62 }
 0x1a7   : > { %12084 = vst [vmem:[#allocation33_spill] sm:$0xff] %v9740_v51  ;;  %v1598_v32 = vadd.f32 %v1597_v7, %v1549_v15  ;;  %v6803_v15 = vor.u32 %v8348_v18, %v6800_v31  ;;  %v6931_v7 = vor.u32 %v8380_v30, %v6928_v9  ;;  %v6784_v9 = vld [vmem:[#allocation5 + $0x178] sm:$0xf0]  ;;  %v8376_v30 = vld [vmem:[#allocation5 + $0x26c] sm:$0xf] }
 0x1a8   : > { %8848 = vtanh.f32 %v1694_v47  ;;  %v6787_v29 = vor.u32 %v8344_v10, %v6784_v9  ;;  %v6915_v47 = vor.u32 %v8376_v30, %v6912_v46  ;;  %v7040_v18 = vld [vmem:[#allocation5 + $0x378] sm:$0xf0]  ;;  %v8404_v30 = vld [vmem:[#allocation5 + $0x34c] sm:$0xf] }
 0x1a9   : > { %2010 = vmatpush.bf16.msrb.mxu2 %v6931_v7  ;;  %v6640_v31 = vld [vmem:[#allocation5 + $0x58] sm:$0xf0] }
 0x1aa   : > { %1961 = vmatpush.bf16.msrb.mxu1 %v6803_v15  ;;  %v6896_v51 = vld [vmem:[#allocation5 + $0x258] sm:$0xf0] }
 0x1ab   : > { %v1646_v11 = vpop.f32.mrf.mxu2  ;;  %v7024_v46 = vld [vmem:[#allocation5 + $0x358] sm:$0xf0] }
 0x1ac   : > { %v1647_v63 = vadd.f32 %v1646_v11, %v1598_v32  ;;  %v1695_v35 = vpop.f32.mrf.mxu3  ;;  %v1551_v19 = vpop.f32.mrf.mxu0  ;;  %v8312_v32 = vld [vmem:[#allocation5 + $0x6c] sm:$0xf]  ;;  %v6656_v11 = vld [vmem:[#allocation5 + $0x78] sm:$0xf0] }
 0x1ad   : > { %v1552_v8 = vadd.f32 %v1551_v19, %v9682_v34  ;;  %v1600_v50 = vpop.f32.mrf.mxu1  ;;  %v6659_v19 = vor.u32 %v8312_v32, %v6656_v11  ;;  %v6643_v32 = vor.u32 %v8308_v44, %v6640_v31  ;;  %v6768_v11 = vld [vmem:[#allocation5 + $0x158] sm:$0xf0]  ;;  %2011 = vmatpush.bf16.msrb.mxu2 %v6915_v47  ;;  %v8336_v31 = vld [vmem:[#allocation5 + $0x12c] sm:$0xf] }
 0x1ae   : > { %v1696_v49 = vadd.f32 %v1695_v35, %v1647_v63  ;;  %v7043_v63 = vor.u32 %v8408_v45, %v7040_v18  ;;  %1962 = vmatpush.bf16.msrb.mxu1 %v6787_v29  ;;  %v9749_v7 = vpop.eup %8848  ;;  %v6624_v44 = vld [vmem:[#allocation5 + $0x38] sm:$0xf0] }
 0x1af   : > { %v1601_v28 = vadd.f32 %v1600_v50, %v1552_v8  ;;  %1746 = vmatmul.bf16.gmra.mxu0 %v9531_v36  ;;  %1795 = vmatmul.bf16.gmra.mxu1 %v9533_v37  ;;  %v8340_v8 = vld [vmem:[#allocation5 + $0x14c] sm:$0xf]  ;;  %12085 = vst [vmem:[#allocation34_spill] sm:$0xff] %v9749_v7  ;;  %v6752_v47 = vld [vmem:[#allocation5 + $0x138] sm:$0xf0] }
 0x1b0   : > { %8850 = vtanh.f32 %v1696_v49  ;;  %1844 = vmatmul.bf16.gmra.mxu2 %v9535_v38  ;;  %1913 = vmatpush.bf16.msrb.mxu0 %v6659_v19  ;;  %v6771_v62 = vor.u32 %v8340_v8, %v6768_v11  ;;  %v6899_v19 = vor.u32 %v8372_v4, %v6896_v51  ;;  %v8368_v8 = vld [vmem:[#allocation5 + $0x22c] sm:$0xf]  ;;  %v6880_v51 = vld [vmem:[#allocation5 + $0x238] sm:$0xf0]  ;;  %v6755_v4 = vor.u32 %v8336_v31, %v6752_v47 }
 0x1b1   : > { %1893 = vmatmul.bf16.gmra.mxu3 %v9537_v39  ;;  %v6883_v11 = vor.u32 %v8368_v8, %v6880_v51  ;;  %v6864_v7 = vld [vmem:[#allocation5 + $0x218] sm:$0xf0] }
 0x1b2   : > { %2060 = vmatpush.bf16.msrb.mxu3 %v7043_v63  ;;  %1963 = vmatpush.bf16.msrb.mxu1 %v6771_v62 }
 0x1b3   : > { %v1649_v35 = vpop.f32.mrf.mxu2  ;;  %2012 = vmatpush.bf16.msrb.mxu2 %v6899_v19 }
 0x1b4   : > { %v1650_v50 = vadd.f32 %v1649_v35, %v1601_v28  ;;  %v1698_v15 = vpop.f32.mrf.mxu3  ;;  %v1553_v49 = vpop.f32.mrf.mxu0  ;;  %1914 = vmatpush.bf16.msrb.mxu0 %v6643_v32  ;;  %v7027_v28 = vor.u32 %v8404_v30, %v7024_v46  ;;  %v8304_v35 = vld [vmem:[#allocation5 + $0x2c] sm:$0xf] }
 0x1b5   : > { %v1554_v10 = vadd.f32 %v1553_v49, %v9682_v34  ;;  %v1602_v9 = vpop.f32.mrf.mxu1  ;;  %v6627_v13 = vor.u32 %v8304_v35, %v6624_v44  ;;  %v8300_v32 = vld [vmem:[#allocation5 + $0xc] sm:$0xf]  ;;  %v6736_v44 = vld [vmem:[#allocation5 + $0x118] sm:$0xf0] }
 0x1b6   : > { %v9752_v29 = vpop.eup %8850  ;;  %v1699_v45 = vadd.f32 %v1698_v15, %v1650_v50  ;;  %v7008_v50 = vld [vmem:[#allocation5 + $0x338] sm:$0xf0]  ;;  %2061 = vmatpush.bf16.msrb.mxu3 %v7027_v28  ;;  %1964 = vmatpush.bf16.msrb.mxu1 %v6755_v4  ;;  %v8364_v49 = vld [vmem:[#allocation5 + $0x20c] sm:$0xf] }
 0x1b7   : > { %v1603_v18 = vadd.f32 %v1602_v9, %v1554_v10  ;;  %v7011_v63 = vor.u32 %v8400_v12, %v7008_v50  ;;  %v6608_v10 = vld [vmem:[#allocation5 + $0x18] sm:$0xf0]  ;;  %v8332_v9 = vld [vmem:[#allocation5 + $0x10c] sm:$0xf]  ;;  %2013 = vmatpush.bf16.msrb.mxu2 %v6883_v11  ;;  %v6867_v28 = vor.u32 %v8364_v49, %v6864_v7 }
 0x1b8   : > { %1915 = vmatpush.bf16.msrb.mxu0 %v6627_v13  ;;  %v6611_v35 = vor.u32 %v8300_v32, %v6608_v10  ;;  %v6739_v47 = vor.u32 %v8332_v9, %v6736_v44  ;;  %v8396_v13 = vld [vmem:[#allocation5 + $0x30c] sm:$0xf]  ;;  %v6992_v12 = vld [vmem:[#allocation5 + $0x318] sm:$0xf0]  ;;  %8852 = vtanh.f32 %v1699_v45 }
 0x1b9   : > { %v6995_v51 = vor.u32 %v8396_v13, %v6992_v12 }
 0x1ba   : > { %2062 = vmatpush.bf16.msrb.mxu3 %v7011_v63  ;;  %1965 = vmatpush.bf16.msrb.mxu1 %v6739_v47 }
 0x1bb   : > { %v1651_v15 = vpop.f32.mrf.mxu2  ;;  %2014 = vmatpush.bf16.msrb.mxu2 %v6867_v28 }
 0x1bc   : > { %v1652_v62 = vadd.f32 %v1651_v15, %v1603_v18  ;;  %v1700_v30 = vpop.f32.mrf.mxu3  ;;  %v1556_v46 = vpop.f32.mrf.mxu0  ;;  %1916 = vmatpush.bf16.msrb.mxu0 %v6611_v35 }
 0x1bd   : > { %v1557_v19 = vadd.f32 %v1556_v46, %v9682_v34  ;;  %v1605_v31 = vpop.f32.mrf.mxu1 }
 0x1be   : > { %v1701_v8 = vadd.f32 %v1700_v30, %v1652_v62  ;;  %2063 = vmatpush.bf16.msrb.mxu3 %v6995_v51  ;;  %v9761_v50 = vpop.eup %8852 }
 0x1bf   : > { %v1606_v18 = vadd.f32 %v1605_v31, %v1557_v19  ;;  %1751 = vmatmul.bf16.gmra.mxu0 %v9551_v48  ;;  %1800 = vmatmul.bf16.gmra.mxu1 %v9553_v60 }
 0x1c0   : > { %8854 = vtanh.f32 %v1701_v8  ;;  %1849 = vmatmul.bf16.gmra.mxu2 %v9555_v61 }
 0x1c1   : > { %1898 = vmatmul.bf16.gmra.mxu3 %v9557_v5 }
 0x1c3   : > { %v1654_v7 = vpop.f32.mrf.mxu2 }
 0x1c4   : > { %v1655_v49 = vadd.f32 %v1654_v7, %v1606_v18  ;;  %v1703_v4 = vpop.f32.mrf.mxu3  ;;  %v1558_v11 = vpop.f32.mrf.mxu0 }
 0x1c5   : > { %v1559_v45 = vadd.f32 %v1558_v11, %v9682_v34  ;;  %v1607_v63 = vpop.f32.mrf.mxu1 }
 0x1c6   : > { %v9764_v15 = vpop.eup %8854  ;;  %v1704_v32 = vadd.f32 %v1703_v4, %v1655_v49 }
 0x1c7   : > { %v1608_v10 = vadd.f32 %v1607_v63, %v1559_v45  ;;  %v2190_v9 = vpack.c.bf16 %v9764_v15, %v9761_v50  ;;  %v9783_v63 = vld [vmem:[%s11889_s2] sm:$0xf] }
 0x1c8   : > { %8856 = vtanh.f32 %v1704_v32  ;;  %v9786_v32 = vperm.slane %v9783_v63, 2 }
 0x1cb   : > { %v1656_v62 = vpop.f32.mrf.mxu2 }
 0x1cc   : > { %v1657_v30 = vadd.f32 %v1656_v62, %v1608_v10  ;;  %v1705_v46 = vpop.f32.mrf.mxu3  ;;  %v1561_v35 = vpop.f32.mrf.mxu0 }
 0x1cd   : > { %v1562_v44 = vadd.f32 %v1561_v35, %v9682_v34  ;;  %v1610_v19 = vpop.f32.mrf.mxu1 }
 0x1ce   : > { %v1706_v31 = vadd.f32 %v1705_v46, %v1657_v30  ;;  %v9773_v51 = vpop.eup %8856 }
 0x1cf   : > { %v1611_v47 = vadd.f32 %v1610_v19, %v1562_v44  ;;  %1756 = vmatmul.bf16.gmra.mxu0 %v9571_v20  ;;  %1805 = vmatmul.bf16.gmra.mxu1 %v9573_v21 }
 0x1d0   : > { %8858 = vtanh.f32 %v1706_v31  ;;  %1854 = vmatmul.bf16.gmra.mxu2 %v9575_v22 }
 0x1d1   : > { %1903 = vmatmul.bf16.gmra.mxu3 %v9577_v23 }
 0x1d3   : > { %v1659_v28 = vpop.f32.mrf.mxu2 }
 0x1d4   : > { %v1660_v13 = vadd.f32 %v1659_v28, %v1611_v47  ;;  %v1708_v12 = vpop.f32.mrf.mxu3  ;;  %v1563_v8 = vpop.f32.mrf.mxu0 }
 0x1d5   : > { %v1564_v18 = vadd.f32 %v1563_v8, %v9682_v34  ;;  %v1612_v7 = vpop.f32.mrf.mxu1 }
 0x1d6   : > { %v9776_v49 = vpop.eup %8858  ;;  %v1709_v4 = vadd.f32 %v1708_v12, %v1660_v13 }
 0x1d7   : > { %v1613_v11 = vadd.f32 %v1612_v7, %v1564_v18  ;;  %v2194_v45 = vpack.c.bf16 %v9776_v49, %v9773_v51 }
 0x1d8   : > { %8860 = vtanh.f32 %v1709_v4 }
 0x1db   : > { %v1661_v10 = vpop.f32.mrf.mxu2 }
 0x1dc   : > { %v1662_v62 = vadd.f32 %v1661_v10, %v1613_v11  ;;  %v1710_v30 = vpop.f32.mrf.mxu3  ;;  %v1722_v34 = vpop.f32.mrf.mxu0 }
 0x1dd   : > { %v1723_v46 = vadd.f32 %v1722_v34, %v9786_v32  ;;  %v1771_v35 = vpop.f32.mrf.mxu1 }
 0x1de   : > { %v1711_v44 = vadd.f32 %v1710_v30, %v1662_v62  ;;  %v9793_v12 = vpop.eup %8860 }
 0x1df   : > { %v1772_v19 = vadd.f32 %v1771_v35, %v1723_v46  ;;  %1917 = vmatmul.bf16.vlgmr.msrb.gmra.mxu0 %v9431_v40  ;;  %1966 = vmatmul.bf16.vlgmr.msrb.gmra.mxu1 %v9433_v41 }
 0x1e0   : > { %8862 = vtanh.f32 %v1711_v44  ;;  %2015 = vmatmul.bf16.vlgmr.msrb.gmra.mxu2 %v9435_v42 }
 0x1e1   : > { %2064 = vmatmul.bf16.vlgmr.msrb.gmra.mxu3 %v9437_v43 }
 0x1e3   : > { %v1820_v31 = vpop.f32.mrf.mxu2 }
 0x1e4   : > { %v1821_v47 = vadd.f32 %v1820_v31, %v1772_v19  ;;  %v1869_v28 = vpop.f32.mrf.mxu3  ;;  %v1724_v13 = vpop.f32.mrf.mxu0 }
 0x1e5   : > { %v1725_v8 = vadd.f32 %v1724_v13, %v9786_v32  ;;  %v1773_v18 = vpop.f32.mrf.mxu1 }
 0x1e6   : > { %v9796_v7 = vpop.eup %8862  ;;  %v1870_v4 = vadd.f32 %v1869_v28, %v1821_v47 }
 0x1e7   : > { %v1774_v40 = vadd.f32 %v1773_v18, %v1725_v8  ;;  %v2198_v41 = vpack.c.bf16 %v9796_v7, %v9793_v12 }
 0x1e8   : > { %8864 = vtanh.f32 %v1870_v4 }
 0x1eb   : > { %v1822_v11 = vpop.f32.mrf.mxu2 }
 0x1ec   : > { %v1823_v42 = vadd.f32 %v1822_v11, %v1774_v40  ;;  %v1871_v10 = vpop.f32.mrf.mxu3  ;;  %v1727_v43 = vpop.f32.mrf.mxu0 }
 0x1ed   : > { %v1728_v62 = vadd.f32 %v1727_v43, %v9786_v32  ;;  %v1776_v30 = vpop.f32.mrf.mxu1 }
 0x1ee   : > { %v1872_v34 = vadd.f32 %v1871_v10, %v1823_v42  ;;  %v9805_v47 = vpop.eup %8864 }
 0x1ef   : > { %v1777_v46 = vadd.f32 %v1776_v30, %v1728_v62  ;;  %1922 = vmatmul.bf16.gmra.mxu0 %v9451_v52  ;;  %1971 = vmatmul.bf16.gmra.mxu1 %v9453_v53 }
 0x1f0   : > { %8866 = vtanh.f32 %v1872_v34  ;;  %2020 = vmatmul.bf16.gmra.mxu2 %v9455_v54 }
 0x1f1   : > { %2069 = vmatmul.bf16.gmra.mxu3 %v9457_v55 }
 0x1f3   : > { %v1825_v35 = vpop.f32.mrf.mxu2 }
 0x1f4   : > { %v1826_v44 = vadd.f32 %v1825_v35, %v1777_v46  ;;  %v1874_v19 = vpop.f32.mrf.mxu3  ;;  %v1729_v31 = vpop.f32.mrf.mxu0 }
 0x1f5   : > { %v1730_v28 = vadd.f32 %v1729_v31, %v9786_v32  ;;  %v1778_v13 = vpop.f32.mrf.mxu1 }
 0x1f6   : > { %v9808_v8 = vpop.eup %8866  ;;  %v1875_v18 = vadd.f32 %v1874_v19, %v1826_v44 }
 0x1f7   : > { %v2171_v52 = vpack.c.bf16 %v9808_v8, %v9805_v47  ;;  %v1779_v53 = vadd.f32 %v1778_v13, %v1730_v28 }
 0x1f8   : > { %8868 = vtanh.f32 %v1875_v18 }
 0x1fb   : > { %v1827_v4 = vpop.f32.mrf.mxu2 }
 0x1fc   : > { %v1828_v54 = vadd.f32 %v1827_v4, %v1779_v53  ;;  %v1876_v40 = vpop.f32.mrf.mxu3  ;;  %v1732_v55 = vpop.f32.mrf.mxu0 }
 0x1fd   : > { %v1733_v11 = vadd.f32 %v1732_v55, %v9786_v32  ;;  %v1781_v42 = vpop.f32.mrf.mxu1 }
 0x1fe   : > { %v1877_v10 = vadd.f32 %v1876_v40, %v1828_v54  ;;  %v9817_v35 = vpop.eup %8868 }
 0x1ff   : > { %v1782_v43 = vadd.f32 %v1781_v42, %v1733_v11  ;;  %1927 = vmatmul.bf16.gmra.mxu0 %v9471_v0  ;;  %1976 = vmatmul.bf16.gmra.mxu1 %v9473_v1 }
 0x200   : > { %8870 = vtanh.f32 %v1877_v10  ;;  %2025 = vmatmul.bf16.gmra.mxu2 %v9475_v2 }
 0x201   : > { %2074 = vmatmul.bf16.gmra.mxu3 %v9477_v3 }
 0x203   : > { %v1830_v62 = vpop.f32.mrf.mxu2 }
 0x204   : > { %v1831_v30 = vadd.f32 %v1830_v62, %v1782_v43  ;;  %v1879_v34 = vpop.f32.mrf.mxu3  ;;  %v1734_v46 = vpop.f32.mrf.mxu0 }
 0x205   : > { %v1735_v44 = vadd.f32 %v1734_v46, %v9786_v32  ;;  %v1783_v19 = vpop.f32.mrf.mxu1 }
 0x206   : > { %v9820_v31 = vpop.eup %8870  ;;  %v1880_v28 = vadd.f32 %v1879_v34, %v1831_v30 }
 0x207   : > { %v1784_v0 = vadd.f32 %v1783_v19, %v1735_v44  ;;  %v2175_v1 = vpack.c.bf16 %v9820_v31, %v9817_v35 }
 0x208   : > { %8872 = vtanh.f32 %v1880_v28 }
 0x20b   : > { %v1832_v13 = vpop.f32.mrf.mxu2 }
 0x20c   : > { %v1833_v2 = vadd.f32 %v1832_v13, %v1784_v0  ;;  %v1881_v18 = vpop.f32.mrf.mxu3  ;;  %v1737_v3 = vpop.f32.mrf.mxu0 }
 0x20d   : > { %v1738_v53 = vadd.f32 %v1737_v3, %v9786_v32  ;;  %v1786_v4 = vpop.f32.mrf.mxu1 }
 0x20e   : > { %v1882_v54 = vadd.f32 %v1881_v18, %v1833_v2  ;;  %v9829_v43 = vpop.eup %8872 }
 0x20f   : > { %v1787_v40 = vadd.f32 %v1786_v4, %v1738_v53  ;;  %1932 = vmatmul.bf16.gmra.mxu0 %v9491_v24  ;;  %1981 = vmatmul.bf16.gmra.mxu1 %v9493_v25  ;;  %v8434_v53 = vld [vmem:[%s11890_s3 + $0x38] sm:$0xff] }
 0x210   : > { %8874 = vtanh.f32 %v1882_v54  ;;  %2030 = vmatmul.bf16.gmra.mxu2 %v9495_v26  ;;  %v8450_v26 = vld [vmem:[%s11890_s3 + $0xb8] sm:$0xff]  ;;  %2457 = vmatpush.bf16.msra.mxu0 %v8434_v53  ;;  %v8447_v53 = vld [vmem:[%s11890_s3 + $0xa0] sm:$0xff] }
 0x211   : > { %2079 = vmatmul.bf16.gmra.mxu3 %v9497_v27  ;;  %v8458_v27 = vld [vmem:[%s11890_s3 + $0xf8] sm:$0xff]  ;;  %2555 = vmatpush.bf16.msra.mxu2 %v8450_v26  ;;  %v8432_v26 = vld [vmem:[%s11890_s3 + $0x28] sm:$0xff] }
 0x212   : > { %2604 = vmatpush.bf16.msra.mxu3 %v8458_v27  ;;  %v8442_v4 = vld [vmem:[%s11890_s3 + $0x78] sm:$0xff]  ;;  %v8440_v27 = vld [vmem:[%s11890_s3 + $0x68] sm:$0xff] }
 0x213   : > { %v1835_v55 = vpop.f32.mrf.mxu2  ;;  %2506 = vmatpush.bf16.msra.mxu1 %v8442_v4 }
 0x214   : > { %v1836_v11 = vadd.f32 %v1835_v55, %v1787_v40  ;;  %v1884_v42 = vpop.f32.mrf.mxu3  ;;  %v1739_v10 = vpop.f32.mrf.mxu0 }
 0x215   : > { %v1740_v62 = vadd.f32 %v1739_v10, %v9786_v32  ;;  %v1788_v30 = vpop.f32.mrf.mxu1 }
 0x216   : > { %v9832_v34 = vpop.eup %8874  ;;  %v1885_v46 = vadd.f32 %v1884_v42, %v1836_v11  ;;  %v8449_v11 = vld [vmem:[%s11890_s3 + $0xb0] sm:$0xff] }
 0x217   : > { %v1789_v24 = vadd.f32 %v1788_v30, %v1740_v62  ;;  %v2179_v25 = vpack.c.bf16 %v9832_v34, %v9829_v43  ;;  %2556 = vmatpush.bf16.msra.mxu2 %v8449_v11 }
 0x218   : > { %8876 = vtanh.f32 %v1885_v46 }
 0x21b   : > { %v1837_v44 = vpop.f32.mrf.mxu2 }
 0x21c   : > { %v1838_v19 = vadd.f32 %v1837_v44, %v1789_v24  ;;  %v1886_v28 = vpop.f32.mrf.mxu3  ;;  %v1742_v0 = vpop.f32.mrf.mxu0  ;;  %v8448_v44 = vld [vmem:[%s11890_s3 + $0xa8] sm:$0xff] }
 0x21d   : > { %v1743_v13 = vadd.f32 %v1742_v0, %v9786_v32  ;;  %v1791_v2 = vpop.f32.mrf.mxu1  ;;  %2557 = vmatpush.bf16.msra.mxu2 %v8448_v44 }
 0x21e   : > { %v1887_v18 = vadd.f32 %v1886_v28, %v1838_v19  ;;  %v9862_v42 = vpop.eup %8876  ;;  %v8457_v19 = vld [vmem:[%s11890_s3 + $0xf0] sm:$0xff] }
 0x21f   : > { %v1792_v3 = vadd.f32 %v1791_v2, %v1743_v13  ;;  %1937 = vmatmul.bf16.gmra.mxu0 %v9511_v56  ;;  %1986 = vmatmul.bf16.gmra.mxu1 %v9513_v57  ;;  %v8433_v57 = vld [vmem:[%s11890_s3 + $0x30] sm:$0xff] }
 0x220   : > { %8878 = vtanh.f32 %v1887_v18  ;;  %2035 = vmatmul.bf16.gmra.mxu2 %v9515_v58  ;;  %v8441_v58 = vld [vmem:[%s11890_s3 + $0x70] sm:$0xff]  ;;  %2458 = vmatpush.bf16.msra.mxu0 %v8433_v57  ;;  %v8431_v18 = vld [vmem:[%s11890_s3 + $0x20] sm:$0xff]  ;;  %v8438_v57 = vld [vmem:[%s11890_s3 + $0x58] sm:$0xff] }
 0x221   : > { %2084 = vmatmul.bf16.gmra.mxu3 %v9517_v59  ;;  %2507 = vmatpush.bf16.msra.mxu1 %v8441_v58  ;;  %v8446_v58 = vld [vmem:[%s11890_s3 + $0x98] sm:$0xff] }
 0x222   : > { %2605 = vmatpush.bf16.msra.mxu3 %v8457_v19  ;;  %2558 = vmatpush.bf16.msra.mxu2 %v8447_v53 }
 0x223   : > { %v1840_v54 = vpop.f32.mrf.mxu2 }
 0x224   : > { %v1841_v40 = vadd.f32 %v1840_v54, %v1792_v3  ;;  %v1889_v56 = vpop.f32.mrf.mxu3  ;;  %v1744_v55 = vpop.f32.mrf.mxu0  ;;  %2459 = vmatpush.bf16.msra.mxu0 %v8432_v26  ;;  %v8439_v3 = vld [vmem:[%s11890_s3 + $0x60] sm:$0xff] }
 0x225   : > { %v1745_v59 = vadd.f32 %v1744_v55, %v9786_v32  ;;  %v1793_v10 = vpop.f32.mrf.mxu1  ;;  %2508 = vmatpush.bf16.msra.mxu1 %v8440_v27  ;;  %v8430_v55 = vld [vmem:[%s11890_s3 + $0x18] sm:$0xff] }
 0x226   : > { %v9865_v62 = vpop.eup %8878  ;;  %v1890_v30 = vadd.f32 %v1889_v56, %v1841_v40  ;;  %2559 = vmatpush.bf16.msra.mxu2 %v8446_v58 }
 0x227   : > { %v1794_v46 = vadd.f32 %v1793_v10, %v1745_v59  ;;  %v2183_v24 = vpack.c.bf16 %v9865_v62, %v9862_v42  ;;  %v8429_v59 = vld [vmem:[%s11890_s3 + $0x10] sm:$0xff] }
 0x228   : > { %2460 = vmatpush.bf16.msra.mxu0 %v8431_v18  ;;  %8880 = vtanh.f32 %v1890_v30  ;;  %v8437_v10 = vld [vmem:[%s11890_s3 + $0x50] sm:$0xff]  ;;  %v8456_v18 = vld [vmem:[%s11890_s3 + $0xe8] sm:$0xff] }
 0x229   : > { %2509 = vmatpush.bf16.msra.mxu1 %v8439_v3  ;;  %v8445_v30 = vld [vmem:[%s11890_s3 + $0x90] sm:$0xff]  ;;  %2606 = vmatpush.bf16.msra.mxu3 %v8456_v18 }
 0x22a   : > { %2560 = vmatpush.bf16.msra.mxu2 %v8445_v30 }
 0x22b   : > { %v1842_v28 = vpop.f32.mrf.mxu2 }
 0x22c   : > { %v1843_v0 = vadd.f32 %v1842_v28, %v1794_v46  ;;  %v1891_v13 = vpop.f32.mrf.mxu3  ;;  %v1747_v2 = vpop.f32.mrf.mxu0  ;;  %2461 = vmatpush.bf16.msra.mxu0 %v8430_v55  ;;  %v8443_v55 = vld [vmem:[%s11890_s3 + $0x80] sm:$0xff] }
 0x22d   : > { %v1748_v4 = vadd.f32 %v1747_v2, %v9786_v32  ;;  %v1796_v54 = vpop.f32.mrf.mxu1  ;;  %2510 = vmatpush.bf16.msra.mxu1 %v8438_v57  ;;  %v8444_v2 = vld [vmem:[%s11890_s3 + $0x88] sm:$0xff] }
 0x22e   : > { %v1892_v40 = vadd.f32 %v1891_v13, %v1843_v0  ;;  %v8428_v0 = vld [vmem:[%s11890_s3 + $0x8] sm:$0xff]  ;;  %2561 = vmatpush.bf16.msra.mxu2 %v8444_v2 }
 0x22f   : > { %v1797_v56 = vadd.f32 %v1796_v54, %v1748_v4  ;;  %1942 = vmatmul.bf16.gmra.mxu0 %v9531_v36  ;;  %1991 = vmatmul.bf16.gmra.mxu1 %v9533_v37  ;;  %v8436_v13 = vld [vmem:[%s11890_s3 + $0x48] sm:$0xff] }
 0x230   : > { %8882 = vtanh.f32 %v1892_v40  ;;  %2040 = vmatmul.bf16.gmra.mxu2 %v9535_v38  ;;  %2462 = vmatpush.bf16.msra.mxu0 %v8429_v59  ;;  %v8427_v40 = vld [vmem:[%s11890_s3] sm:$0xff] }
 0x231   : > { %2089 = vmatmul.bf16.gmra.mxu3 %v9537_v39  ;;  %v9913_v39 = vpop.eup %8880  ;;  %2511 = vmatpush.bf16.msra.mxu1 %v8437_v10 }
 0x232   : > { %2562 = vmatpush.bf16.msra.mxu2 %v8443_v55 }
 0x233   : > { %v1845_v36 = vpop.f32.mrf.mxu2 }
 0x234   : > { %v1846_v37 = vadd.f32 %v1845_v36, %v1797_v56  ;;  %v1894_v38 = vpop.f32.mrf.mxu3  ;;  %v1749_v11 = vpop.f32.mrf.mxu0  ;;  %2463 = vmatpush.bf16.msra.mxu0 %v8428_v0  ;;  %v8435_v56 = vld [vmem:[%s11890_s3 + $0x40] sm:$0xff] }
 0x235   : > { %v1750_v46 = vadd.f32 %v1749_v11, %v9786_v32  ;;  %v1798_v26 = vpop.f32.mrf.mxu1  ;;  %2512 = vmatpush.bf16.msra.mxu1 %v8436_v13 }
 0x236   : > { %v9916_v27 = vpop.eup %8882  ;;  %v1895_v44 = vadd.f32 %v1894_v38, %v1846_v37 }
 0x237   : > { %v1799_v19 = vadd.f32 %v1798_v26, %v1750_v46  ;;  %v2187_v28 = vpack.c.bf16 %v9916_v27, %v9913_v39 }
 0x238   : > { %2464 = vmatpush.bf16.msra.mxu0 %v8427_v40  ;;  %8884 = vtanh.f32 %v1895_v44 }
 0x239   : > { %2513 = vmatpush.bf16.msra.mxu1 %v8435_v56  ;;  %v8452_v56 = vld [vmem:[%s11890_s3 + $0xc8] sm:$0xff] }
 0x23b   : > { %v1847_v3 = vpop.f32.mrf.mxu2 }
 0x23c   : > { %v1848_v53 = vadd.f32 %v1847_v3, %v1799_v19  ;;  %v1896_v4 = vpop.f32.mrf.mxu3  ;;  %v1752_v54 = vpop.f32.mrf.mxu0 }
 0x23d   : > { %v1753_v57 = vadd.f32 %v1752_v54, %v9786_v32  ;;  %v1801_v58 = vpop.f32.mrf.mxu1 }
 0x23e   : > { %v1897_v36 = vadd.f32 %v1896_v4, %v1848_v53  ;;  %v9946_v30 = vpop.eup %8884  ;;  %v8453_v4 = vld [vmem:[%s11890_s3 + $0xd0] sm:$0xff] }
 0x23f   : > { %v1802_v37 = vadd.f32 %v1801_v58, %v1753_v57  ;;  %1947 = vmatmul.bf16.gmra.mxu0 %v9551_v48  ;;  %1996 = vmatmul.bf16.gmra.mxu1 %v9553_v60  ;;  %v8455_v48 = vld [vmem:[%s11890_s3 + $0xe0] sm:$0xff] }
 0x240   : > { %8886 = vtanh.f32 %v1897_v36  ;;  %2045 = vmatmul.bf16.gmra.mxu2 %v9555_v61  ;;  %2607 = vmatpush.bf16.msra.mxu3 %v8455_v48 }
 0x241   : > { %2094 = vmatmul.bf16.gmra.mxu3 %v9557_v5  ;;  %v8454_v5 = vld [vmem:[%s11890_s3 + $0xd8] sm:$0xff] }
 0x243   : > { %v1850_v38 = vpop.f32.mrf.mxu2 }
 0x244   : > { %v1851_v11 = vadd.f32 %v1850_v38, %v1802_v37  ;;  %v1899_v59 = vpop.f32.mrf.mxu3  ;;  %v1754_v10 = vpop.f32.mrf.mxu0  ;;  %2608 = vmatpush.bf16.msra.mxu3 %v8454_v5 }
 0x245   : > { %v1755_v46 = vadd.f32 %v1754_v10, %v9786_v32  ;;  %v1803_v26 = vpop.f32.mrf.mxu1 }
 0x246   : > { %v9952_v44 = vpop.eup %8886  ;;  %v1900_v60 = vadd.f32 %v1899_v59, %v1851_v11 }
 0x247   : > { %v1804_v19 = vadd.f32 %v1803_v26, %v1755_v46  ;;  %v2191_v61 = vpack.c.bf16 %v9952_v44, %v9946_v30  ;;  %v9981_v46 = vperm.slane %v9783_v63, 3 }
 0x248   : > { %8888 = vtanh.f32 %v1900_v60  ;;  %2609 = vmatpush.bf16.msra.mxu3 %v8453_v4 }
 0x24b   : > { %v1852_v0 = vpop.f32.mrf.mxu2 }
 0x24c   : > { %v1853_v13 = vadd.f32 %v1852_v0, %v1804_v19  ;;  %v1901_v2 = vpop.f32.mrf.mxu3  ;;  %v1757_v18 = vpop.f32.mrf.mxu0  ;;  %2610 = vmatpush.bf16.msra.mxu3 %v8452_v56  ;;  %v12086_v0 = vpack.c.bf16 %v9605_v17, %v9602_v14 }
 0x24d   : > { %v1758_v3 = vadd.f32 %v1757_v18, %v9786_v32  ;;  %v1806_v53 = vpop.f32.mrf.mxu1 }
 0x24e   : > { %v1902_v54 = vadd.f32 %v1901_v2, %v1853_v13  ;;  %v9970_v37 = vpop.eup %8888  ;;  %v12087_v13 = vpack.c.bf16 %v9704_v33, %v9701_v6 }
 0x24f   : > { %v1807_v40 = vadd.f32 %v1806_v53, %v1758_v3  ;;  %1952 = vmatmul.bf16.gmra.mxu0 %v9571_v20  ;;  %2001 = vmatmul.bf16.gmra.mxu1 %v9573_v21  ;;  %v8451_v21 = vld [vmem:[%s11890_s3 + $0xc0] sm:$0xff] }
 0x250   : > { %8890 = vtanh.f32 %v1902_v54  ;;  %2050 = vmatmul.bf16.gmra.mxu2 %v9575_v22  ;;  %2611 = vmatpush.bf16.msra.mxu3 %v8451_v21  ;;  %v12091_v21 = vld [vmem:[#allocation28_spill] sm:$0xff] }
 0x251   : > { %2099 = vmatmul.bf16.gmra.mxu3 %v9577_v23 }
 0x253   : > { %v1855_v55 = vpop.f32.mrf.mxu2 }
 0x254   : > { %v1856_v57 = vadd.f32 %v1855_v55, %v1807_v40  ;;  %v1904_v58 = vpop.f32.mrf.mxu3  ;;  %v1759_v36 = vpop.f32.mrf.mxu0 }
 0x255   : > { %v1760_v20 = vadd.f32 %v1759_v36, %v9786_v32  ;;  %v1808_v38 = vpop.f32.mrf.mxu1  ;;  %v12088_v36 = vld [vmem:[#allocation15_spill] sm:$0xff] }
 0x256   : > { %v9976_v22 = vpop.eup %8890  ;;  %v1905_v23 = vadd.f32 %v1904_v58, %v1856_v57 }
 0x257   : > { %v1809_v11 = vadd.f32 %v1808_v38, %v1760_v20  ;;  %v2195_v59 = vpack.c.bf16 %v9976_v22, %v9970_v37  ;;  %v12089_v20 = vpack.c.bf16 %v9617_v16, %v12088_v36  ;;  %v12090_v38 = vld [vmem:[#allocation29_spill] sm:$0xff] }
 0x258   : > { %8892 = vtanh.f32 %v1905_v23  ;;  %v12092_v23 = vpack.c.bf16 %v12090_v38, %v12091_v21 }
 0x25b   : > { %v1857_v10 = vpop.f32.mrf.mxu2 }
 0x25c   : > { %v1858_v26 = vadd.f32 %v1857_v10, %v1809_v11  ;;  %v1906_v48 = vpop.f32.mrf.mxu3  ;;  %v1918_v32 = vpop.f32.mrf.mxu0 }
 0x25d   : > { %v1967_v60 = vpop.f32.mrf.mxu1  ;;  %v1919_v5 = vadd.f32 %v1918_v32, %v9981_v46 }
 0x25e   : > { %v1907_v19 = vadd.f32 %v1906_v48, %v1858_v26  ;;  %v9993_v53 = vpop.eup %8892 }
 0x25f   : > { %2465 = vmatmul.bf16.vlgmr.msra.gmra.mxu0 %v12086_v0  ;;  %2514 = vmatmul.bf16.vlgmr.msra.gmra.mxu1 %v12087_v13  ;;  %v1968_v63 = vadd.f32 %v1967_v60, %v1919_v5 }
 0x260   : > { %8894 = vtanh.f32 %v1907_v19  ;;  %2563 = vmatmul.bf16.vlgmr.msra.gmra.mxu2 %v2171_v52 }
 0x263   : > { %v2016_v2 = vpop.f32.mrf.mxu2 }
 0x264   : > { %v2065_v18 = vpop.f32.mrf.mxu3  ;;  %v1920_v3 = vpop.f32.mrf.mxu0  ;;  %v2017_v17 = vadd.f32 %v2016_v2, %v1968_v63 }
 0x265   : > { %v1969_v4 = vpop.f32.mrf.mxu1  ;;  %v1921_v14 = vadd.f32 %v1920_v3, %v9981_v46 }
 0x266   : > { %v9995_v54 = vpop.eup %8894  ;;  %v2066_v40 = vadd.f32 %v2065_v18, %v2017_v17  ;;  %v12094_v17 = vld [vmem:[#allocation16_spill] sm:$0xff] }
 0x267   : > { %v2199_v6 = vpack.c.bf16 %v9995_v54, %v9993_v53  ;;  %v1970_v33 = vadd.f32 %v1969_v4, %v1921_v14  ;;  %v12093_v14 = vld [vmem:[#allocation17_spill] sm:$0xff] }
 0x268   : > { %8896 = vtanh.f32 %v2066_v40  ;;  %v12096_v40 = vld [vmem:[#allocation31_spill] sm:$0xff] }
 0x26b   : > { %v2018_v56 = vpop.f32.mrf.mxu2 }
 0x26c   : > { %v2019_v47 = vadd.f32 %v2018_v56, %v1970_v33  ;;  %v2067_v8 = vpop.f32.mrf.mxu3  ;;  %v1923_v52 = vpop.f32.mrf.mxu0  ;;  %v12095_v33 = vpack.c.bf16 %v12093_v14, %v12094_v17  ;;  %v12097_v56 = vld [vmem:[#allocation30_spill] sm:$0xff] }
 0x26d   : > { %v1972_v55 = vpop.f32.mrf.mxu1  ;;  %v1924_v58 = vadd.f32 %v1923_v52, %v9981_v46 }
 0x26e   : > { %v2068_v57 = vadd.f32 %v2067_v8, %v2019_v47  ;;  %v8897_v32 = vpop.eup %8896  ;;  %v12098_v47 = vpack.c.bf16 %v12096_v40, %v12097_v56 }
 0x26f   : > { %2470 = vmatmul.bf16.gmra.mxu0 %v12089_v20  ;;  %2519 = vmatmul.bf16.gmra.mxu1 %v12092_v23  ;;  %v1973_v11 = vadd.f32 %v1972_v55, %v1924_v58 }
 0x270   : > { %8898 = vtanh.f32 %v2068_v57  ;;  %2568 = vmatmul.bf16.gmra.mxu2 %v2175_v1 }
 0x273   : > { %v2021_v10 = vpop.f32.mrf.mxu2 }
 0x274   : > { %v2070_v26 = vpop.f32.mrf.mxu3  ;;  %v1925_v48 = vpop.f32.mrf.mxu0  ;;  %v2022_v0 = vadd.f32 %v2021_v10, %v1973_v11 }
 0x275   : > { %v1974_v60 = vpop.f32.mrf.mxu1  ;;  %v1926_v5 = vadd.f32 %v1925_v48, %v9981_v46 }
 0x276   : > { %v8899_v19 = vpop.eup %8898  ;;  %v2071_v63 = vadd.f32 %v2070_v26, %v2022_v0  ;;  %v12102_v0 = vld [vmem:[#allocation33_spill] sm:$0xff] }
 0x277   : > { %v2172_v16 = vpack.c.bf16 %v8899_v19, %v8897_v32  ;;  %v1975_v13 = vadd.f32 %v1974_v60, %v1926_v5  ;;  %v12099_v19 = vld [vmem:[#allocation19_spill] sm:$0xff]  ;;  %v12100_v5 = vld [vmem:[#allocation18_spill] sm:$0xff] }
 0x278   : > { %8900 = vtanh.f32 %v2071_v63 }
 0x279   : > { %2612 = vmatmul.bf16.vlgmr.msra.gmra.mxu3 %v2172_v16  ;;  %v12101_v16 = vpack.c.bf16 %v12099_v19, %v12100_v5 }
 0x27b   : > { %v2023_v2 = vpop.f32.mrf.mxu2 }
 0x27c   : > { %v2024_v18 = vadd.f32 %v2023_v2, %v1975_v13  ;;  %v2072_v3 = vpop.f32.mrf.mxu3  ;;  %v1928_v4 = vpop.f32.mrf.mxu0  ;;  %v12103_v13 = vld [vmem:[#allocation32_spill] sm:$0xff] }
 0x27d   : > { %v1977_v35 = vpop.f32.mrf.mxu1  ;;  %v1929_v1 = vadd.f32 %v1928_v4, %v9981_v46  ;;  %v12104_v63 = vpack.c.bf16 %v12102_v0, %v12103_v13  ;;  %v12110_v13 = vld [vmem:[#allocation23_spill] sm:$0xff] }
 0x27e   : > { %v2073_v31 = vadd.f32 %v2072_v3, %v2024_v18  ;;  %v8901_v58 = vpop.eup %8900 }
 0x27f   : > { %2475 = vmatmul.bf16.gmra.mxu0 %v12095_v33  ;;  %2524 = vmatmul.bf16.gmra.mxu1 %v12098_v47  ;;  %v1978_v8 = vadd.f32 %v1977_v35, %v1929_v1 }
 0x280   : > { %8902 = vtanh.f32 %v2073_v31  ;;  %2573 = vmatmul.bf16.gmra.mxu2 %v2179_v25 }
 0x283   : > { %v2026_v52 = vpop.f32.mrf.mxu2 }
 0x284   : > { %v2075_v55 = vpop.f32.mrf.mxu3  ;;  %v1930_v57 = vpop.f32.mrf.mxu0  ;;  %v2027_v21 = vadd.f32 %v2026_v52, %v1978_v8 }
 0x285   : > { %v1979_v36 = vpop.f32.mrf.mxu1  ;;  %v1931_v38 = vadd.f32 %v1930_v57, %v9981_v46  ;;  %v12105_v57 = vld [vmem:[#allocation21_spill] sm:$0xff] }
 0x286   : > { %v8903_v20 = vpop.eup %8902  ;;  %v2076_v10 = vadd.f32 %v2075_v55, %v2027_v21 }
 0x287   : > { %v2176_v23 = vpack.c.bf16 %v8903_v20, %v8901_v58  ;;  %v1980_v11 = vadd.f32 %v1979_v36, %v1931_v38  ;;  %v12106_v58 = vld [vmem:[#allocation20_spill] sm:$0xff]  ;;  %v12108_v20 = vld [vmem:[#allocation34_spill] sm:$0xff] }
 0x288   : > { %8904 = vtanh.f32 %v2076_v10  ;;  %v12107_v36 = vpack.c.bf16 %v12105_v57, %v12106_v58  ;;  %v12109_v38 = vpack.c.bf16 %v9752_v29, %v12108_v20 }
 0x289   : > { %2617 = vmatmul.bf16.gmra.mxu3 %v2176_v23 }
 0x28b   : > { %v2028_v26 = vpop.f32.mrf.mxu2 }
 0x28c   : > { %v2029_v48 = vadd.f32 %v2028_v26, %v1980_v11  ;;  %v2077_v32 = vpop.f32.mrf.mxu3  ;;  %v1933_v60 = vpop.f32.mrf.mxu0 }
 0x28d   : > { %v1982_v43 = vpop.f32.mrf.mxu1  ;;  %v1934_v25 = vadd.f32 %v1933_v60, %v9981_v46 }
 0x28e   : > { %v2078_v34 = vadd.f32 %v2077_v32, %v2029_v48  ;;  %v8905_v35 = vpop.eup %8904 }
 0x28f   : > { %2480 = vmatmul.bf16.gmra.mxu0 %v12101_v16  ;;  %2529 = vmatmul.bf16.gmra.mxu1 %v12104_v63  ;;  %v1983_v2 = vadd.f32 %v1982_v43, %v1934_v25  ;;  %v12111_v63 = vld [vmem:[#allocation22_spill] sm:$0xff] }
 0x290   : > { %8906 = vtanh.f32 %v2078_v34  ;;  %2578 = vmatmul.bf16.gmra.mxu2 %v2183_v24 }
 0x293   : > { %v2031_v18 = vpop.f32.mrf.mxu2 }
 0x294   : > { %v2080_v3 = vpop.f32.mrf.mxu3  ;;  %v1935_v4 = vpop.f32.mrf.mxu0  ;;  %v2032_v17 = vadd.f32 %v2031_v18, %v1983_v2  ;;  %v12112_v2 = vpack.c.bf16 %v12110_v13, %v12111_v63 }
 0x295   : > { %v1984_v31 = vpop.f32.mrf.mxu1  ;;  %v1936_v14 = vadd.f32 %v1935_v4, %v9981_v46 }
 0x296   : > { %v8907_v1 = vpop.eup %8906  ;;  %v2081_v56 = vadd.f32 %v2080_v3, %v2032_v17 }
 0x297   : > { %v2180_v33 = vpack.c.bf16 %v8907_v1, %v8905_v35  ;;  %v1985_v40 = vadd.f32 %v1984_v31, %v1936_v14 }
 0x298   : > { %8908 = vtanh.f32 %v2081_v56 }
 0x299   : > { %2622 = vmatmul.bf16.gmra.mxu3 %v2180_v33 }
 0x29b   : > { %v2033_v47 = vpop.f32.mrf.mxu2 }
 0x29c   : > { %v2034_v8 = vadd.f32 %v2033_v47, %v1985_v40  ;;  %v2082_v52 = vpop.f32.mrf.mxu3  ;;  %v1938_v55 = vpop.f32.mrf.mxu0 }
 0x29d   : > { %v1987_v42 = vpop.f32.mrf.mxu1  ;;  %v1939_v24 = vadd.f32 %v1938_v55, %v9981_v46  ;;  %v12114_v55 = vld [vmem:[#allocation24_spill] sm:$0xff] }
 0x29e   : > { %v2083_v62 = vadd.f32 %v2082_v52, %v2034_v8  ;;  %v8909_v26 = vpop.eup %8908  ;;  %v12113_v52 = vld [vmem:[#allocation25_spill] sm:$0xff] }
 0x29f   : > { %2485 = vmatmul.bf16.gmra.mxu0 %v12107_v36  ;;  %2534 = vmatmul.bf16.gmra.mxu1 %v12109_v38  ;;  %v1988_v21 = vadd.f32 %v1987_v42, %v1939_v24  ;;  %v12115_v42 = vpack.c.bf16 %v12113_v52, %v12114_v55 }
 0x2a0   : > { %8910 = vtanh.f32 %v2083_v62  ;;  %2583 = vmatmul.bf16.gmra.mxu2 %v2187_v28 }
 0x2a3   : > { %v2036_v23 = vpop.f32.mrf.mxu2 }
 0x2a4   : > { %v2085_v11 = vpop.f32.mrf.mxu3  ;;  %v1940_v10 = vpop.f32.mrf.mxu0  ;;  %v2037_v43 = vadd.f32 %v2036_v23, %v1988_v21 }
 0x2a5   : > { %v1989_v48 = vpop.f32.mrf.mxu1  ;;  %v1941_v60 = vadd.f32 %v1940_v10, %v9981_v46 }
 0x2a6   : > { %v8911_v32 = vpop.eup %8910  ;;  %v2086_v19 = vadd.f32 %v2085_v11, %v2037_v43 }
 0x2a7   : > { %v2184_v34 = vpack.c.bf16 %v8911_v32, %v8909_v26  ;;  %v1990_v25 = vadd.f32 %v1989_v48, %v1941_v60  ;;  %v12116_v32 = vld [vmem:[#allocation27_spill] sm:$0xff]  ;;  %v12117_v60 = vld [vmem:[#allocation26_spill] sm:$0xff] }
 0x2a8   : > { %8912 = vtanh.f32 %v2086_v19  ;;  %v12118_v43 = vpack.c.bf16 %v12116_v32, %v12117_v60 }
 0x2a9   : > { %2627 = vmatmul.bf16.gmra.mxu3 %v2184_v34 }
 0x2ab   : > { %v2038_v29 = vpop.f32.mrf.mxu2 }
 0x2ac   : > { %v2039_v5 = vadd.f32 %v2038_v29, %v1990_v25  ;;  %v2087_v16 = vpop.f32.mrf.mxu3  ;;  %v1943_v0 = vpop.f32.mrf.mxu0 }
 0x2ad   : > { %v1992_v39 = vpop.f32.mrf.mxu1  ;;  %v1944_v28 = vadd.f32 %v1943_v0, %v9981_v46 }
 0x2ae   : > { %v2088_v27 = vadd.f32 %v2087_v16, %v2039_v5  ;;  %v8913_v31 = vpop.eup %8912 }
 0x2af   : > { %2490 = vmatmul.bf16.gmra.mxu0 %v12112_v2  ;;  %2539 = vmatmul.bf16.gmra.mxu1 %v2190_v9  ;;  %v1993_v18 = vadd.f32 %v1992_v39, %v1944_v28 }
 0x2b0   : > { %8914 = vtanh.f32 %v2088_v27  ;;  %2588 = vmatmul.bf16.gmra.mxu2 %v2191_v61 }
 0x2b3   : > { %v2041_v3 = vpop.f32.mrf.mxu2 }
 0x2b4   : > { %v2090_v4 = vpop.f32.mrf.mxu3  ;;  %v1945_v35 = vpop.f32.mrf.mxu0  ;;  %v2042_v33 = vadd.f32 %v2041_v3, %v1993_v18 }
 0x2b5   : > { %v1994_v1 = vpop.f32.mrf.mxu1  ;;  %v1946_v17 = vadd.f32 %v1945_v35, %v9981_v46 }
 0x2b6   : > { %v8915_v14 = vpop.eup %8914  ;;  %v2091_v47 = vadd.f32 %v2090_v4, %v2042_v33 }
 0x2b7   : > { %v2188_v40 = vpack.c.bf16 %v8915_v14, %v8913_v31  ;;  %v1995_v56 = vadd.f32 %v1994_v1, %v1946_v17 }
 0x2b8   : > { %8916 = vtanh.f32 %v2091_v47 }
 0x2b9   : > { %2632 = vmatmul.bf16.gmra.mxu3 %v2188_v40 }
 0x2bb   : > { %v2043_v50 = vpop.f32.mrf.mxu2 }
 0x2bc   : > { %v2044_v15 = vadd.f32 %v2043_v50, %v1995_v56  ;;  %v2092_v9 = vpop.f32.mrf.mxu3  ;;  %v1948_v8 = vpop.f32.mrf.mxu0 }
 0x2bd   : > { %v1997_v30 = vpop.f32.mrf.mxu1  ;;  %v1949_v61 = vadd.f32 %v1948_v8, %v9981_v46 }
 0x2be   : > { %v2093_v44 = vadd.f32 %v2092_v9, %v2044_v15  ;;  %v8917_v36 = vpop.eup %8916 }
 0x2bf   : > { %2495 = vmatmul.bf16.gmra.mxu0 %v12115_v42  ;;  %2544 = vmatmul.bf16.gmra.mxu1 %v2194_v45  ;;  %v1998_v62 = vadd.f32 %v1997_v30, %v1949_v61  ;;  %v9242_v30 = vmov -inf  }
 0x2c0   : > { %8918 = vtanh.f32 %v2093_v44  ;;  %2593 = vmatmul.bf16.gmra.mxu2 %v2195_v59  ;;  %v10078_v44 = vsel %vm2678_vm0, -1e+30, %v9242_v30 }
 0x2c3   : > { %v2046_v24 = vpop.f32.mrf.mxu2 }
 0x2c4   : > { %v2095_v57 = vpop.f32.mrf.mxu3  ;;  %v1950_v58 = vpop.f32.mrf.mxu0  ;;  %v2047_v23 = vadd.f32 %v2046_v24, %v1998_v62 }
 0x2c5   : > { %v1999_v20 = vpop.f32.mrf.mxu1  ;;  %v1951_v21 = vadd.f32 %v1950_v58, %v9981_v46 }
 0x2c6   : > { %v8919_v38 = vpop.eup %8918  ;;  %v2096_v26 = vadd.f32 %v2095_v57, %v2047_v23 }
 0x2c7   : > { %v2192_v11 = vpack.c.bf16 %v8919_v38, %v8917_v36  ;;  %v2000_v10 = vadd.f32 %v1999_v20, %v1951_v21 }
 0x2c8   : > { %8920 = vtanh.f32 %v2096_v26 }
 0x2c9   : > { %2637 = vmatmul.bf16.gmra.mxu3 %v2192_v11 }
 0x2cb   : > { %v2048_v51 = vpop.f32.mrf.mxu2 }
 0x2cc   : > { %v2049_v49 = vadd.f32 %v2048_v51, %v2000_v10  ;;  %v2097_v45 = vpop.f32.mrf.mxu3  ;;  %v1953_v48 = vpop.f32.mrf.mxu0 }
 0x2cd   : > { %v2002_v37 = vpop.f32.mrf.mxu1  ;;  %v1954_v59 = vadd.f32 %v1953_v48, %v9981_v46 }
 0x2ce   : > { %v2098_v22 = vadd.f32 %v2097_v45, %v2049_v49  ;;  %v8921_v5 = vpop.eup %8920 }
 0x2cf   : > { %2500 = vmatmul.bf16.gmra.mxu0 %v12118_v43  ;;  %2549 = vmatmul.bf16.gmra.mxu1 %v2198_v41  ;;  %v2003_v34 = vadd.f32 %v2002_v37, %v1954_v59 }
 0x2d0   : > { %8922 = vtanh.f32 %v2098_v22  ;;  %2598 = vmatmul.bf16.gmra.mxu2 %v2199_v6 }
 0x2d3   : > { %v2051_v25 = vpop.f32.mrf.mxu2 }
 0x2d4   : > { %v2100_v19 = vpop.f32.mrf.mxu3  ;;  %v1955_v29 = vpop.f32.mrf.mxu0  ;;  %v2052_v27 = vadd.f32 %v2051_v25, %v2003_v34  ;;  %v9243_v34 = vmov 0  }
 0x2d5   : > { %v2004_v16 = vpop.f32.mrf.mxu1  ;;  %v1956_v39 = vadd.f32 %v1955_v29, %v9981_v46  ;;  %8797 = vset.pattern.permute.xlu0 %v9243_v34  ;;  %8798 = vset.pattern.permute.xlu1 %v9243_v34 }
 0x2d6   : > { %v8923_v0 = vpop.eup %8922  ;;  %v2101_v63 = vadd.f32 %v2100_v19, %v2052_v27  ;;  %8799 = vset.pattern.permute.xlu2 %v9243_v34 }
 0x2d7   : > { %v2196_v28 = vpack.c.bf16 %v8923_v0, %v8921_v5  ;;  %v2005_v13 = vadd.f32 %v2004_v16, %v1956_v39 }
 0x2d8   : > { %8924 = vtanh.f32 %v2101_v63 }
 0x2d9   : > { %2642 = vmatmul.bf16.gmra.mxu3 %v2196_v28 }
 0x2db   : > { %v2053_v12 = vpop.f32.mrf.mxu2 }
 0x2dc   : > { %v2054_v7 = vadd.f32 %v2053_v12, %v2005_v13  ;;  %v2466_v41 = vpop.f32.mrf.mxu0  ;;  %v2102_v2 = vpop.f32.mrf.mxu3 }
 0x2dd   : > { %v2515_v53 = vpop.f32.mrf.mxu1 }
 0x2de   : > { %v2103_v54 = vadd.f32 %v2102_v2, %v2054_v7  ;;  %v8925_v3 = vpop.eup %8924  ;;  %v2516_v56 = vadd.f32 %v2515_v53, %v2466_v41 }
 0x2e0   : > { %8926 = vtanh.f32 %v2103_v54 }
 0x2e3   : > { %v2564_v6 = vpop.f32.mrf.mxu2 }
 0x2e4   : > { %v2468_v18 = vpop.f32.mrf.mxu0  ;;  %v2565_v47 = vadd.f32 %v2564_v6, %v2516_v56 }
 0x2e5   : > { %v2517_v4 = vpop.f32.mrf.mxu1 }
 0x2e6   : > { %v8927_v35 = vpop.eup %8926 }
 0x2e7   : > { %v2200_v31 = vpack.c.bf16 %v8927_v35, %v8925_v3 }
 0x2e9   : > { %2647 = vmatmul.bf16.gmra.mxu3 %v2200_v31 }
 0x2eb   : > { %v2566_v46 = vpop.f32.mrf.mxu2 }
 0x2ec   : > { %v2471_v1 = vpop.f32.mrf.mxu0 }
 0x2ed   : > { %v2520_v14 = vpop.f32.mrf.mxu1 }
 0x2ee   : > { %v2521_v21 = vadd.f32 %v2520_v14, %v2471_v1 }
 0x2f3   : > { %v2569_v17 = vpop.f32.mrf.mxu2 }
 0x2f4   : > { %v2473_v33 = vpop.f32.mrf.mxu0  ;;  %v2570_v11 = vadd.f32 %v2569_v17, %v2521_v21 }
 0x2f5   : > { %v2522_v40 = vpop.f32.mrf.mxu1 }
 0x2fb   : > { %v2571_v50 = vpop.f32.mrf.mxu2 }
 0x2fc   : > { %v2613_v15 = vpop.f32.mrf.mxu3  ;;  %v2476_v9 = vpop.f32.mrf.mxu0 }
 0x2fd   : > { %v2614_v8 = vadd.f32 %v2613_v15, %v2565_v47  ;;  %v2525_v61 = vpop.f32.mrf.mxu1 }
 0x2fe   : > { %v2526_v12 = vadd.f32 %v2525_v61, %v2476_v9 }
 0x2ff   : > { %v2679_v52 = vsel %vm2678_vm0, %v2614_v8, -inf }
 0x300   : > { %v2681_v55 = vmax.f32 %v2679_v52, %v10078_v44 }
 0x302   : > { %v2682_v42 = vrot.slane %v2681_v55, 4 }
 0x303   : > { %v2574_v62 = vpop.f32.mrf.mxu2 }
 0x304   : > { %v2683_v24 = vmax.f32 %v2681_v55, %v2682_v42  ;;  %v2615_v57 = vpop.f32.mrf.mxu3  ;;  %v2478_v58 = vpop.f32.mrf.mxu0  ;;  %v2575_v53 = vadd.f32 %v2574_v62, %v2526_v12 }
 0x305   : > { %v2527_v36 = vpop.f32.mrf.mxu1 }
 0x306   : > { %v2684_v20 = vrot.slane %v2683_v24, 2 }
 0x308   : > { %v2685_v38 = vmax.f32 %v2683_v24, %v2684_v20 }
 0x30a   : > { %v2686_v23 = vrot.slane %v2685_v38, 1 }
 0x30b   : > { %v2576_v10 = vpop.f32.mrf.mxu2 }
 0x30c   : > { %v2687_v26 = vmax.f32 %v2685_v38, %v2686_v23  ;;  %v2618_v51 = vpop.f32.mrf.mxu3  ;;  %v2481_v49 = vpop.f32.mrf.mxu0 }
 0x30d   : > { %v2619_v45 = vadd.f32 %v2618_v51, %v2570_v11  ;;  %v2530_v48 = vpop.f32.mrf.mxu1 }
 0x30e   : > { %v2751_v37 = vsub.f32 %v2614_v8, %v2687_v26  ;;  %v2752_v22 = vsub.f32 -1e+30, %v2687_v26  ;;  %v2531_v20 = vadd.f32 %v2530_v48, %v2481_v49 }
 0x30f   : > { %v2688_v59 = vsel %vm2678_vm0, %v2619_v45, -inf }
 0x310   : > { %v2767_v32 = vmul.f32 1.442695, %v2751_v37  ;;  %v2769_v60 = vmul.f32 1.442695, %v2752_v22  ;;  %v2690_v43 = vmax.f32 %v2688_v59, %v10078_v44 }
 0x312   : > { %8928 = vpow2.f32 %v2767_v32  ;;  %v2691_v25 = vrot.slane %v2690_v43, 4 }
 0x313   : > { %8930 = vpow2.f32 %v2769_v60  ;;  %v2579_v19 = vpop.f32.mrf.mxu2 }
 0x314   : > { %v2692_v29 = vmax.f32 %v2690_v43, %v2691_v25  ;;  %v2620_v5 = vpop.f32.mrf.mxu3  ;;  %v2483_v16 = vpop.f32.mrf.mxu0  ;;  %v2580_v11 = vadd.f32 %v2579_v19, %v2531_v20 }
 0x315   : > { %v2532_v0 = vpop.f32.mrf.mxu1 }
 0x316   : > { %v2693_v39 = vrot.slane %v2692_v29, 2 }
 0x318   : > { %v8929_v27 = vpop.eup %8928  ;;  %v2694_v28 = vmax.f32 %v2692_v29, %v2693_v39 }
 0x319   : > { %v10084_v13 = vpop.eup %8930  ;;  %v2799_v63 = vsel %vm2678_vm0, %v8929_v27, 0.0 }
 0x31a   : > { %v2800_v7 = vsel %vm2678_vm0, %v10084_v13, 0.0  ;;  %v2695_v41 = vrot.slane %v2694_v28, 1 }
 0x31b   : > { %v2801_v2 = vadd.f32 %v2800_v7, %v2799_v63  ;;  %v2581_v54 = vpop.f32.mrf.mxu2 }
 0x31c   : > { %v2696_v6 = vmax.f32 %v2694_v28, %v2695_v41  ;;  %v2623_v18 = vpop.f32.mrf.mxu3  ;;  %v10089_v3 = vpop.f32.mrf.mxu0 }
 0x31d   : > { %v2802_v4 = vrot.slane %v2801_v2, 4  ;;  %v2624_v35 = vadd.f32 %v2623_v18, %v2575_v53  ;;  %v10091_v31 = vpop.f32.mrf.mxu1 }
 0x31e   : > { %v2753_v46 = vsub.f32 %v2619_v45, %v2696_v6  ;;  %v2754_v1 = vsub.f32 -1e+30, %v2696_v6 }
 0x31f   : > { %v2697_v14 = vsel %vm2678_vm0, %v2624_v35, -inf  ;;  %v2803_v17 = vadd.f32 %v2802_v4, %v2801_v2 }
 0x320   : > { %v2771_v33 = vmul.f32 1.442695, %v2753_v46  ;;  %v2773_v40 = vmul.f32 1.442695, %v2754_v1  ;;  %v2699_v56 = vmax.f32 %v2697_v14, %v10078_v44 }
 0x321   : > { %v2804_v47 = vrot.slane %v2803_v17, 2 }
 0x322   : > { %8932 = vpow2.f32 %v2771_v33  ;;  %v2700_v50 = vrot.slane %v2699_v56, 4 }
 0x323   : > { %8934 = vpow2.f32 %v2773_v40  ;;  %v2584_v15 = vpop.f32.mrf.mxu2  ;;  %v2805_v9 = vadd.f32 %v2804_v47, %v2803_v17 }
 0x324   : > { %v2701_v8 = vmax.f32 %v2699_v56, %v2700_v50  ;;  %v2625_v30 = vpop.f32.mrf.mxu3  ;;  %v2488_v61 = vpop.f32.mrf.mxu0 }
 0x325   : > { %v2537_v52 = vpop.f32.mrf.mxu1  ;;  %v2806_v55 = vrot.slane %v2805_v9, 1 }
 0x326   : > { %v2702_v42 = vrot.slane %v2701_v8, 2 }
 0x327   : > { %v2807_v62 = vadd.f32 %v2806_v55, %v2805_v9 }
 0x328   : > { %v10095_v24 = vpop.eup %8932  ;;  %v2703_v57 = vmax.f32 %v2701_v8, %v2702_v42 }
 0x329   : > { %v10097_v58 = vpop.eup %8934  ;;  %v2808_v36 = vsel %vm2678_vm0, %v10095_v24, 0.0  ;;  %8936 = vrcp.f32 %v2807_v62 }
 0x32a   : > { %v2809_v38 = vsel %vm2678_vm0, %v10097_v58, 0.0  ;;  %v2704_v21 = vrot.slane %v2703_v57, 1 }
 0x32b   : > { %v2810_v23 = vadd.f32 %v2809_v38, %v2808_v36  ;;  %v2586_v10 = vpop.f32.mrf.mxu2 }
 0x32c   : > { %v2705_v26 = vmax.f32 %v2703_v57, %v2704_v21  ;;  %v2628_v51 = vpop.f32.mrf.mxu3  ;;  %v10103_v45 = vpop.f32.mrf.mxu0 }
 0x32d   : > { %v2811_v37 = vrot.slane %v2810_v23, 4  ;;  %v2629_v22 = vadd.f32 %v2628_v51, %v2580_v11  ;;  %v10105_v59 = vpop.f32.mrf.mxu1 }
 0x32e   : > { %v2755_v32 = vsub.f32 %v2624_v35, %v2705_v26  ;;  %v2756_v60 = vsub.f32 -1e+30, %v2705_v26  ;;  %v2536_v35 = vadd.f32 %v10091_v31, %v10089_v3 }
 0x32f   : > { %v8937_v43 = vpop.eup %8936  ;;  %v2706_v49 = vsel %vm2678_vm0, %v2629_v22, -inf  ;;  %v2812_v48 = vadd.f32 %v2811_v37, %v2810_v23 }
 0x330   : > { %v2775_v34 = vmul.f32 1.442695, %v2755_v32  ;;  %v2777_v25 = vmul.f32 1.442695, %v2756_v60  ;;  %v2708_v29 = vmax.f32 %v2706_v49, %v10078_v44  ;;  %v2879_v19 = vmul.f32 %v8937_v43, %v8929_v27 }
 0x331   : > { %v2813_v5 = vrot.slane %v2812_v48, 2  ;;  %v2880_v18 = vmul.f32 %v8937_v43, %v10084_v13  ;;  %v2585_v17 = vadd.f32 %v2584_v15, %v2536_v35  ;;  %v2541_v43 = vadd.f32 %v10105_v59, %v10103_v45 }
 0x332   : > { %8938 = vpow2.f32 %v2775_v34  ;;  %v2709_v16 = vrot.slane %v2708_v29, 4  ;;  %2961 = vperm.xlu0 %8797, %v2879_v19  }
 0x333   : > { %8940 = vpow2.f32 %v2777_v25  ;;  %v2589_v0 = vpop.f32.mrf.mxu2  ;;  %v2814_v39 = vadd.f32 %v2813_v5, %v2812_v48 }
 0x334   : > { %v2710_v28 = vmax.f32 %v2708_v29, %v2709_v16  ;;  %v2630_v63 = vpop.f32.mrf.mxu3  ;;  %v2493_v12 = vpop.f32.mrf.mxu0  ;;  %v2590_v25 = vadd.f32 %v2589_v0, %v2541_v43 }
 0x335   : > { %v2542_v7 = vpop.f32.mrf.mxu1  ;;  %v2815_v41 = vrot.slane %v2814_v39, 1 }
 0x336   : > { %v2711_v2 = vrot.slane %v2710_v28, 2 }
 0x337   : > { %v2816_v53 = vadd.f32 %v2815_v41, %v2814_v39 }
 0x338   : > { %v10109_v54 = vpop.eup %8938  ;;  %v2712_v6 = vmax.f32 %v2710_v28, %v2711_v2 }
 0x339   : > { %v10112_v27 = vpop.eup %8940  ;;  %v2817_v4 = vsel %vm2678_vm0, %v10109_v54, 0.0  ;;  %8942 = vrcp.f32 %v2816_v53 }
 0x33a   : > { %v2818_v46 = vsel %vm2678_vm0, %v10112_v27, 0.0  ;;  %v2713_v1 = vrot.slane %v2712_v6, 1  ;;  %2966 = vperm.xlu0 %8797, %v2880_v18  }
 0x33b   : > { %v2819_v14 = vadd.f32 %v2818_v46, %v2817_v4  ;;  %v2591_v33 = vpop.f32.mrf.mxu2 }
 0x33c   : > { %v2714_v40 = vmax.f32 %v2712_v6, %v2713_v1  ;;  %v2633_v56 = vpop.f32.mrf.mxu3  ;;  %v10120_v13 = vpop.f32.mrf.mxu0 }
 0x33d   : > { %v2820_v47 = vrot.slane %v2819_v14, 4  ;;  %v2634_v50 = vadd.f32 %v2633_v56, %v2585_v17  ;;  %v10122_v9 = vpop.f32.mrf.mxu1 }
 0x33e   : > { %v2757_v8 = vsub.f32 %v2629_v22, %v2714_v40  ;;  %v2758_v30 = vsub.f32 -1e+30, %v2714_v40 }
 0x33f   : > { %v8943_v3 = vpop.eup %8942  ;;  %v2715_v31 = vsel %vm2678_vm0, %v2634_v50, -inf  ;;  %v2821_v61 = vadd.f32 %v2820_v47, %v2819_v14 }
 0x340   : > { %v2779_v52 = vmul.f32 1.442695, %v2757_v8  ;;  %v2781_v55 = vmul.f32 1.442695, %v2758_v30  ;;  %v2717_v42 = vmax.f32 %v2715_v31, %v10078_v44  ;;  %v2881_v15 = vmul.f32 %v8943_v3, %v10095_v24 }
 0x341   : > { %v2822_v62 = vrot.slane %v2821_v61, 2  ;;  %v2882_v32 = vmul.f32 %v8943_v3, %v10097_v58  ;;  %v2546_v3 = vadd.f32 %v10122_v9, %v10120_v13 }
 0x342   : > { %8944 = vpow2.f32 %v2779_v52  ;;  %v2718_v57 = vrot.slane %v2717_v42, 4  ;;  %2971 = vperm.xlu1 %8798, %v2881_v15  }
 0x343   : > { %8946 = vpow2.f32 %v2781_v55  ;;  %v2594_v36 = vpop.f32.mrf.mxu2  ;;  %v2823_v20 = vadd.f32 %v2822_v62, %v2821_v61 }
 0x344   : > { %v2719_v38 = vmax.f32 %v2717_v42, %v2718_v57  ;;  %v2635_v21 = vpop.f32.mrf.mxu3  ;;  %v2498_v23 = vpop.f32.mrf.mxu0  ;;  %v2595_v55 = vadd.f32 %v2594_v36, %v2546_v3 }
 0x345   : > { %v2547_v11 = vpop.f32.mrf.mxu1  ;;  %v2824_v10 = vrot.slane %v2823_v20, 1 }
 0x346   : > { %v2720_v26 = vrot.slane %v2719_v38, 2 }
 0x347   : > { %v2825_v51 = vadd.f32 %v2824_v10, %v2823_v20 }
 0x348   : > { %v10127_v37 = vpop.eup %8944  ;;  %v2721_v22 = vmax.f32 %v2719_v38, %v2720_v26 }
 0x349   : > { %v10130_v24 = vpop.eup %8946  ;;  %v2826_v60 = vsel %vm2678_vm0, %v10127_v37, 0.0  ;;  %8948 = vrcp.f32 %v2825_v51 }
 0x34a   : > { %v2827_v49 = vsel %vm2678_vm0, %v10130_v24, 0.0  ;;  %v2722_v48 = vrot.slane %v2721_v22, 1  ;;  %2976 = vperm.xlu1 %8798, %v2882_v32  }
 0x34b   : > { %v2828_v34 = vadd.f32 %v2827_v49, %v2826_v60  ;;  %v2596_v29 = vpop.f32.mrf.mxu2 }
 0x34c   : > { %v2723_v19 = vmax.f32 %v2721_v22, %v2722_v48  ;;  %v2638_v5 = vpop.f32.mrf.mxu3  ;;  %v10138_v58 = vpop.f32.mrf.mxu0 }
 0x34d   : > { %v2829_v16 = vrot.slane %v2828_v34, 4  ;;  %v2639_v39 = vadd.f32 %v2638_v5, %v2590_v25  ;;  %v10140_v28 = vpop.f32.mrf.mxu1 }
 0x34e   : > { %v2759_v63 = vsub.f32 %v2634_v50, %v2723_v19  ;;  %v2760_v12 = vsub.f32 -1e+30, %v2723_v19 }
 0x34f   : > { %v8949_v45 = vpop.eup %8948  ;;  %v2830_v59 = vadd.f32 %v2829_v16, %v2828_v34  ;;  %v2724_v7 = vsel %vm2678_vm0, %v2639_v39, -inf }
 0x350   : > { %v2783_v41 = vmul.f32 1.442695, %v2759_v63  ;;  %v2785_v2 = vmul.f32 1.442695, %v2760_v12  ;;  %v2726_v53 = vmax.f32 %v2724_v7, %v10078_v44  ;;  %v2883_v0 = vmul.f32 %v8949_v45, %v10109_v54 }
 0x351   : > { %v2831_v6 = vrot.slane %v2830_v59, 2  ;;  %v2884_v8 = vmul.f32 %v8949_v45, %v10112_v27 }
 0x352   : > { %8950 = vpow2.f32 %v2783_v41  ;;  %v2727_v18 = vrot.slane %v2726_v53, 4  ;;  %2981 = vperm.xlu2 %8799, %v2883_v0  }
 0x353   : > { %8952 = vpow2.f32 %v2785_v2  ;;  %v2599_v4 = vpop.f32.mrf.mxu2  ;;  %v2832_v35 = vadd.f32 %v2831_v6, %v2830_v59 }
 0x354   : > { %v2728_v46 = vmax.f32 %v2726_v53, %v2727_v18  ;;  %v2640_v1 = vpop.f32.mrf.mxu3  ;;  %v2503_v14 = vpop.f32.mrf.mxu0 }
 0x355   : > { %v2552_v17 = vpop.f32.mrf.mxu1  ;;  %v2833_v33 = vrot.slane %v2832_v35, 1 }
 0x356   : > { %v2729_v40 = vrot.slane %v2728_v46, 2 }
 0x357   : > { %v2834_v56 = vadd.f32 %v2833_v33, %v2832_v35 }
 0x358   : > { %v8951_v47 = vpop.eup %8950  ;;  %v2730_v50 = vmax.f32 %v2728_v46, %v2729_v40 }
 0x359   : > { %v8953_v30 = vpop.eup %8952  ;;  %v2835_v54 = vsel %vm2678_vm0, %v8951_v47, 0.0  ;;  %8954 = vrcp.f32 %v2834_v56 }
 0x35a   : > { %v2836_v31 = vsel %vm2678_vm0, %v8953_v30, 0.0  ;;  %v2731_v61 = vrot.slane %v2730_v50, 1  ;;  %2986 = vperm.xlu2 %8799, %v2884_v8  }
 0x35b   : > { %v2837_v52 = vadd.f32 %v2836_v31, %v2835_v54  ;;  %v2601_v42 = vpop.f32.mrf.mxu2 }
 0x35c   : > { %v2732_v15 = vmax.f32 %v2730_v50, %v2731_v61  ;;  %v2643_v62 = vpop.f32.mrf.mxu3 }
 0x35d   : > { %v2838_v57 = vrot.slane %v2837_v52, 4  ;;  %v2644_v20 = vadd.f32 %v2643_v62, %v2595_v55 }
 0x35e   : > { %v2761_v38 = vsub.f32 %v2639_v39, %v2732_v15  ;;  %v2762_v27 = vsub.f32 -1e+30, %v2732_v15 }
 0x35f   : > { %v8955_v21 = vpop.eup %8954  ;;  %v2839_v23 = vadd.f32 %v2838_v57, %v2837_v52  ;;  %v2733_v11 = vsel %vm2678_vm0, %v2644_v20, -inf }
 0x360   : > { %v2787_v10 = vmul.f32 1.442695, %v2761_v38  ;;  %v2789_v13 = vmul.f32 1.442695, %v2762_v27  ;;  %v2735_v9 = vmax.f32 %v2733_v11, %v10078_v44  ;;  %v2886_v26 = vmul.f32 %v8955_v21, %v10130_v24 }
 0x361   : > { %v2885_v51 = vmul.f32 %v8955_v21, %v10127_v37  ;;  %v2840_v36 = vrot.slane %v2839_v23, 2  ;;  %v2551_v37 = vadd.f32 %v10140_v28, %v10138_v58 }
 0x362   : > { %8956 = vpow2.f32 %v2787_v10  ;;  %v2736_v22 = vrot.slane %v2735_v9, 4  ;;  %2996 = vperm.xlu1 %8798, %v2886_v26  }
 0x363   : > { %8958 = vpow2.f32 %v2789_v13  ;;  %2991 = vperm.xlu0 %8797, %v2885_v51   ;;  %v2841_v32 = vadd.f32 %v2840_v36, %v2839_v23  ;;  %v2600_v63 = vadd.f32 %v2599_v4, %v2551_v37 }
 0x364   : > { %v2737_v60 = vmax.f32 %v2735_v9, %v2736_v22  ;;  %v2645_v43 = vpop.f32.mrf.mxu3 }
 0x365   : > { %v2842_v49 = vrot.slane %v2841_v32, 1 }
 0x366   : > { %v2738_v48 = vrot.slane %v2737_v60, 2 }
 0x367   : > { %v2843_v34 = vadd.f32 %v2842_v49, %v2841_v32 }
 0x368   : > { %v8957_v25 = vpop.eup %8956  ;;  %v2739_v29 = vmax.f32 %v2737_v60, %v2738_v48 }
 0x369   : > { %v8959_v19 = vpop.eup %8958  ;;  %v2844_v5 = vsel %vm2678_vm0, %v8957_v25, 0.0  ;;  %8960 = vrcp.f32 %v2843_v34 }
 0x36a   : > { %v2845_v24 = vsel %vm2678_vm0, %v8959_v19, 0.0  ;;  %v2740_v16 = vrot.slane %v2739_v29, 1 }
 0x36b   : > { %v2846_v39 = vadd.f32 %v2845_v24, %v2844_v5  ;;  %v352_v24 = vld [vmem:[%s9409_s23 + $0x8] sm:$0xff] }
 0x36c   : > { %v2741_v12 = vmax.f32 %v2739_v29, %v2740_v16  ;;  %v2648_v45 = vpop.f32.mrf.mxu3 }
 0x36d   : > { %v2847_v59 = vrot.slane %v2846_v39, 4  ;;  %v2649_v7 = vadd.f32 %v2648_v45, %v2600_v63  ;;  %v2897_v63 = vunpack.c.l.bf16 %v352_v24  ;;  %v353_v45 = vld [vmem:[%s9409_s23 + $0x10] sm:$0xff] }
 0x36e   : > { %v2763_v41 = vsub.f32 %v2644_v20, %v2741_v12  ;;  %v2764_v2 = vsub.f32 -1e+30, %v2741_v12  ;;  %v2898_v12 = vunpack.c.h.bf16 %v352_v24 }
 0x36f   : > { %v8961_v53 = vpop.eup %8960  ;;  %v2848_v0 = vadd.f32 %v2847_v59, %v2846_v39  ;;  %v2742_v6 = vsel %vm2678_vm0, %v2649_v7, -inf  ;;  %v351_v39 = vld [vmem:[%s9409_s23] sm:$0xff]  ;;  %v354_v59 = vld [vmem:[%s9409_s23 + $0x18] sm:$0xff] }
 0x370   : > { %v2791_v18 = vmul.f32 1.442695, %v2763_v41  ;;  %v2793_v35 = vmul.f32 1.442695, %v2764_v2  ;;  %v2744_v58 = vmax.f32 %v2742_v6, %v10078_v44  ;;  %v2888_v28 = vmul.f32 %v8961_v53, %v8953_v30 }
 0x371   : > { %v2887_v46 = vmul.f32 %v8961_v53, %v8951_v47  ;;  %v2849_v1 = vrot.slane %v2848_v0, 2  ;;  %v2896_v41 = vunpack.c.h.bf16 %v351_v39  ;;  %v2899_v2 = vunpack.c.l.bf16 %v353_v45 }
 0x372   : > { %8962 = vpow2.f32 %v2791_v18  ;;  %v2745_v14 = vrot.slane %v2744_v58, 4  ;;  %3006 = vperm.xlu0 %8797, %v2888_v28   ;;  %v2900_v53 = vunpack.c.h.bf16 %v353_v45  ;;  %v2902_v6 = vunpack.c.h.bf16 %v354_v59 }
 0x373   : > { %8964 = vpow2.f32 %v2793_v35  ;;  %3001 = vperm.xlu2 %8799, %v2887_v46   ;;  %v2850_v4 = vadd.f32 %v2849_v1, %v2848_v0  ;;  %v2901_v0 = vunpack.c.l.bf16 %v354_v59 }
 0x374   : > { %v2746_v17 = vmax.f32 %v2744_v58, %v2745_v14  ;;  %v2650_v33 = vpop.f32.mrf.mxu3 }
 0x375   : > { %v2851_v40 = vrot.slane %v2850_v4, 1 }
 0x376   : > { %v2747_v56 = vrot.slane %v2746_v17, 2 }
 0x377   : > { %v2852_v50 = vadd.f32 %v2851_v40, %v2850_v4 }
 0x378   : > { %v8963_v8 = vpop.eup %8962  ;;  %v2748_v54 = vmax.f32 %v2746_v17, %v2747_v56 }
 0x379   : > { %v8965_v3 = vpop.eup %8964  ;;  %v2853_v31 = vsel %vm2678_vm0, %v8963_v8, 0.0  ;;  %8966 = vrcp.f32 %v2852_v50 }
 0x37a   : > { %v2854_v44 = vsel %vm2678_vm0, %v8965_v3, 0.0  ;;  %v2749_v47 = vrot.slane %v2748_v54, 1 }
 0x37b   : > { %v2855_v30 = vadd.f32 %v2854_v44, %v2853_v31 }
 0x37c   : > { %v2750_v61 = vmax.f32 %v2748_v54, %v2749_v47 }
 0x37d   : > { %v2856_v52 = vrot.slane %v2855_v30, 4 }
 0x37e   : > { %v2765_v55 = vsub.f32 %v2649_v7, %v2750_v61  ;;  %v2766_v42 = vsub.f32 -1e+30, %v2750_v61  ;;  %v2895_v7 = vunpack.c.l.bf16 %v351_v39 }
 0x37f   : > { %v8967_v15 = vpop.eup %8966  ;;  %v2857_v62 = vadd.f32 %v2856_v52, %v2855_v30 }
 0x380   : > { %v2795_v57 = vmul.f32 1.442695, %v2765_v55  ;;  %v2797_v20 = vmul.f32 1.442695, %v2766_v42  ;;  %v2890_v38 = vmul.f32 %v8967_v15, %v8959_v19  ;;  %v2889_v27 = vmul.f32 %v8967_v15, %v8957_v25 }
 0x381   : > { %v2858_v21 = vrot.slane %v2857_v62, 2 }
 0x382   : > { %8968 = vpow2.f32 %v2795_v57  ;;  %3016 = vperm.xlu2 %8799, %v2890_v38   ;;  %3011 = vperm.xlu1 %8798, %v2889_v27  }
 0x383   : > { %8970 = vpow2.f32 %v2797_v20  ;;  %v2859_v23 = vadd.f32 %v2858_v21, %v2857_v62 }
 0x385   : > { %v2860_v11 = vrot.slane %v2859_v23, 1 }
 0x387   : > { %v2861_v10 = vadd.f32 %v2860_v11, %v2859_v23 }
 0x388   : > { %v8969_v13 = vpop.eup %8968 }
 0x389   : > { %v8971_v9 = vpop.eup %8970  ;;  %v2862_v26 = vsel %vm2678_vm0, %v8969_v13, 0.0  ;;  %8972 = vrcp.f32 %v2861_v10 }
 0x38a   : > { %v2863_v51 = vsel %vm2678_vm0, %v8971_v9, 0.0 }
 0x38b   : > { %v2864_v36 = vadd.f32 %v2863_v51, %v2862_v26 }
 0x38d   : > { %v2865_v22 = vrot.slane %v2864_v36, 4 }
 0x38f   : > { %v8973_v32 = vpop.eup %8972  ;;  %v2866_v60 = vadd.f32 %v2865_v22, %v2864_v36 }
 0x390   : > { %v2892_v43 = vmul.f32 %v8973_v32, %v8965_v3  ;;  %v2891_v49 = vmul.f32 %v8973_v32, %v8963_v8 }
 0x391   : > { %v2867_v48 = vrot.slane %v2866_v60, 2 }
 0x392   : > { %3026 = vperm.xlu1 %8798, %v2892_v43   ;;  %3021 = vperm.xlu0 %8797, %v2891_v49  }
 0x393   : > { %v2868_v34 = vadd.f32 %v2867_v48, %v2866_v60 }
 0x395   : > { %v2869_v25 = vrot.slane %v2868_v34, 1 }
 0x397   : > { %v2870_v29 = vadd.f32 %v2869_v25, %v2868_v34 }
 0x399   : > { %8974 = vrcp.f32 %v2870_v29 }
 0x39f   : > { %v8975_v19 = vpop.eup %8974 }
 0x3a0   : > { %v2894_v5 = vmul.f32 %v8975_v19, %v8971_v9  ;;  %v2893_v37 = vmul.f32 %v8975_v19, %v8969_v13 }
 0x3a2   : > { %3036 = vperm.xlu0 %8797, %v2894_v5   ;;  %3031 = vperm.xlu2 %8799, %v2893_v37  }
 0x3a4   : > { %v2962_v16 = vpop.permute.xlu0 %2961 }
 0x3a5   : > { %v3041_v18 = vmul.f32 %v2962_v16, %v2897_v63  ;;  %v3042_v35 = vmul.f32 %v2962_v16, %v2898_v12  ;;  %v3039_v58 = vmul.f32 %v2962_v16, %v2895_v7  ;;  %v3040_v28 = vmul.f32 %v2962_v16, %v2896_v41 }
 0x3a7   : > { %v3329_v33 = vmul.f32 %v3041_v18, %v2897_v63  ;;  %v3330_v40 = vmul.f32 %v3042_v35, %v2898_v12  ;;  %v3327_v30 = vmul.f32 %v3039_v58, %v2895_v7  ;;  %v3328_v55 = vmul.f32 %v3040_v28, %v2896_v41 }
 0x3ac   : > { %v2967_v46 = vpop.permute.xlu0 %2966  ;;  %v2982_v37 = vpop.permute.xlu2 %2981 }
 0x3ad   : > { %v3043_v1 = vmul.f32 %v2967_v46, %v2899_v2  ;;  %v3044_v14 = vmul.f32 %v2967_v46, %v2900_v53  ;;  %v3045_v4 = vmul.f32 %v2967_v46, %v2901_v0  ;;  %v3046_v17 = vmul.f32 %v2967_v46, %v2902_v6 }
 0x3af   : > { %v3103_v56 = vadd.f32 %v3043_v1, %v3039_v58  ;;  %v3110_v50 = vadd.f32 %v3044_v14, %v3040_v28  ;;  %v3117_v8 = vadd.f32 %v3045_v4, %v3041_v18  ;;  %v3124_v54 = vadd.f32 %v3046_v17, %v3042_v35 }
 0x3b0   : > { %v3331_v3 = vmul.f32 %v3043_v1, %v2899_v2  ;;  %v3332_v31 = vmul.f32 %v3044_v14, %v2900_v53  ;;  %v3333_v44 = vmul.f32 %v3045_v4, %v2901_v0  ;;  %v3334_v47 = vmul.f32 %v3046_v17, %v2902_v6  ;;  %v360_v6 = vld [vmem:[%s9409_s23 + $0x48] sm:$0xff]  ;;  %v362_v1 = vld [vmem:[%s9409_s23 + $0x58] sm:$0xff]  ;;  %v10191_v17 = vld [vmem:[%s9409_s23 + $0x40] sm:$0xff] }
 0x3b1   : > { %v3118_v61 = vrot.slane %v3117_v8, 4  ;;  %v3125_v52 = vrot.slane %v3124_v54, 4  ;;  %v3104_v42 = vrot.slane %v3103_v56, 4  ;;  %v3111_v57 = vrot.slane %v3110_v50, 4 }
 0x3b2   : > { %v3405_v15 = vadd.f32 %v3333_v44, %v3329_v33  ;;  %v3412_v62 = vadd.f32 %v3334_v47, %v3330_v40  ;;  %v3391_v27 = vadd.f32 %v3331_v3, %v3327_v30  ;;  %v3398_v21 = vadd.f32 %v3332_v31, %v3328_v55  ;;  %v10194_v40 = vld [vmem:[%s9409_s23 + $0x20] sm:$0xff]  ;;  %v361_v44 = vld [vmem:[%s9409_s23 + $0x50] sm:$0xff] }
 0x3b3   : > { %v3119_v20 = vadd.f32 %v3118_v61, %v3117_v8  ;;  %v3126_v38 = vadd.f32 %v3125_v52, %v3124_v54  ;;  %v3105_v9 = vadd.f32 %v3104_v42, %v3103_v56  ;;  %v3112_v36 = vadd.f32 %v3111_v57, %v3110_v50  ;;  %v10197_v56 = vld [vmem:[%s9409_s23 + $0x28] sm:$0xff] }
 0x3b4   : > { %v3406_v23 = vrot.slane %v3405_v15, 4  ;;  %v3413_v11 = vrot.slane %v3412_v62, 4  ;;  %v3392_v60 = vrot.slane %v3391_v27, 4  ;;  %v3399_v43 = vrot.slane %v3398_v21, 4  ;;  %v2987_v47 = vpop.permute.xlu2 %2986 }
 0x3b5   : > { %v3120_v10 = vrot.slane %v3119_v20, 2  ;;  %v3127_v13 = vrot.slane %v3126_v38, 2  ;;  %v3106_v29 = vrot.slane %v3105_v9, 2  ;;  %v3113_v24 = vrot.slane %v3112_v36, 2 }
 0x3b6   : > { %v3407_v26 = vadd.f32 %v3406_v23, %v3405_v15  ;;  %v3414_v51 = vadd.f32 %v3413_v11, %v3412_v62  ;;  %v3393_v63 = vadd.f32 %v3392_v60, %v3391_v27  ;;  %v3400_v12 = vadd.f32 %v3399_v43, %v3398_v21 }
 0x3b7   : > { %v3121_v22 = vadd.f32 %v3120_v10, %v3119_v20  ;;  %v3128_v32 = vadd.f32 %v3127_v13, %v3126_v38  ;;  %v3107_v2 = vadd.f32 %v3106_v29, %v3105_v9  ;;  %v3114_v18 = vadd.f32 %v3113_v24, %v3112_v36 }
 0x3b8   : > { %v3408_v49 = vrot.slane %v3407_v26, 2  ;;  %v3415_v48 = vrot.slane %v3414_v51, 2  ;;  %v3394_v35 = vrot.slane %v3393_v63, 2  ;;  %v3401_v58 = vrot.slane %v3400_v12, 2 }
 0x3b9   : > { %v3122_v34 = vrot.slane %v3121_v22, 1  ;;  %v3129_v25 = vrot.slane %v3128_v32, 1  ;;  %v2913_v14 = vunpack.c.l.bf16 %v360_v6  ;;  %v3108_v4 = vrot.slane %v3107_v2, 1 }
 0x3ba   : > { %v3409_v19 = vadd.f32 %v3408_v49, %v3407_v26  ;;  %v3416_v5 = vadd.f32 %v3415_v48, %v3414_v51  ;;  %v2914_v33 = vunpack.c.h.bf16 %v360_v6  ;;  %v2917_v50 = vunpack.c.l.bf16 %v362_v1 }
 0x3bb   : > { %v10168_v16 = vadd.f32 %v3122_v34, %v3121_v22  ;;  %v10170_v39 = vadd.f32 %v3129_v25, %v3128_v32  ;;  %v2918_v8 = vunpack.c.h.bf16 %v362_v1  ;;  %v3115_v54 = vrot.slane %v3114_v18, 1 }
 0x3bc   : > { %v3410_v45 = vrot.slane %v3409_v19, 1  ;;  %v3417_v59 = vrot.slane %v3416_v5, 1  ;;  %v3395_v3 = vadd.f32 %v3394_v35, %v3393_v63  ;;  %v3402_v31 = vadd.f32 %v3401_v58, %v3400_v12 }
 0x3bd   : > { %v10174_v7 = vmul.f32 %v10168_v16, %v10168_v16  ;;  %v10178_v41 = vmul.f32 %v10170_v39, %v10170_v39  ;;  %v2911_v30 = vunpack.c.l.bf16 %v10191_v17  ;;  %v2912_v61 = vunpack.c.h.bf16 %v10191_v17 }
 0x3be   : > { %v10180_v53 = vadd.f32 %v3410_v45, %v3409_v19  ;;  %v10182_v0 = vadd.f32 %v3417_v59, %v3416_v5  ;;  %v3057_v52 = vmul.f32 %v2982_v37, %v2913_v14  ;;  %v3109_v55 = vadd.f32 %v3108_v4, %v3107_v2 }
 0x3bf   : > { %v2903_v42 = vunpack.c.l.bf16 %v10194_v40  ;;  %v2904_v15 = vunpack.c.h.bf16 %v10194_v40  ;;  %v2905_v62 = vunpack.c.l.bf16 %v10197_v56  ;;  %v3058_v57 = vmul.f32 %v2982_v37, %v2914_v33 }
 0x3c0   : > { %v3649_v28 = vsub.f32 %v10180_v53, %v10174_v7  ;;  %v3650_v46 = vsub.f32 %v10182_v0, %v10178_v41  ;;  %v2915_v20 = vunpack.c.l.bf16 %v361_v44  ;;  %v3061_v38 = vmul.f32 %v2987_v47, %v2917_v50  ;;  %v358_v0 = vld [vmem:[%s9409_s23 + $0x38] sm:$0xff] }
 0x3c1   : > { %v3062_v27 = vmul.f32 %v2987_v47, %v2918_v8  ;;  %v3116_v21 = vadd.f32 %v3115_v54, %v3114_v18  ;;  %v3396_v23 = vrot.slane %v3395_v3, 1  ;;  %v3403_v11 = vrot.slane %v3402_v31, 1  ;;  %v2972_v54 = vpop.permute.xlu1 %2971 }
 0x3c2   : > { %v2916_v10 = vunpack.c.h.bf16 %v361_v44  ;;  %v3345_v13 = vmul.f32 %v3057_v52, %v2913_v14  ;;  %v3173_v9 = vadd.f32 %v3061_v38, %v3057_v52  ;;  %v3349_v51 = vmul.f32 %v3061_v38, %v2917_v50 }
 0x3c3   : > { %v3180_v26 = vadd.f32 %v3062_v27, %v3058_v57  ;;  %v3615_v36 = vmul.f32 %v3109_v55, %v3109_v55  ;;  %v3055_v22 = vmul.f32 %v2982_v37, %v2911_v30  ;;  %v3056_v32 = vmul.f32 %v2982_v37, %v2912_v61 }
 0x3c4   : > { %v2906_v60 = vunpack.c.h.bf16 %v10197_v56  ;;  %v3059_v43 = vmul.f32 %v2987_v47, %v2915_v20  ;;  %v3174_v49 = vrot.slane %v3173_v9, 4  ;;  %v3461_v34 = vadd.f32 %v3349_v51, %v3345_v13 }
 0x3c5   : > { %v3181_v48 = vrot.slane %v3180_v26, 4  ;;  %v3397_v25 = vadd.f32 %v3396_v23, %v3395_v3  ;;  %v3404_v29 = vadd.f32 %v3403_v11, %v3402_v31  ;;  %v3616_v19 = vmul.f32 %v3116_v21, %v3116_v21 }
 0x3c6   : > { %v3350_v5 = vmul.f32 %v3062_v27, %v2918_v8  ;;  %v4095_v24 = vpack.c.bf16 %v3109_v55, %v3109_v55  ;;  %v3060_v63 = vmul.f32 %v2987_v47, %v2916_v10  ;;  %v3175_v12 = vadd.f32 %v3174_v49, %v3173_v9 }
 0x3c7   : > { %v3182_v45 = vadd.f32 %v3181_v48, %v3180_v26  ;;  %v4096_v59 = vpack.c.bf16 %v3116_v21, %v3116_v21  ;;  %v4097_v2 = vpack.c.bf16 %v10168_v16, %v10168_v16  ;;  %v4098_v37 = vpack.c.bf16 %v10170_v39, %v10170_v39 }
 0x3c8   : > { %v3346_v6 = vmul.f32 %v3058_v57, %v2914_v33  ;;  %v3176_v18 = vrot.slane %v3175_v12, 2  ;;  %v3347_v58 = vmul.f32 %v3059_v43, %v2915_v20  ;;  %v3462_v1 = vrot.slane %v3461_v34, 4 }
 0x3c9   : > { %v3183_v35 = vrot.slane %v3182_v45, 2  ;;  %v3647_v14 = vsub.f32 %v3397_v25, %v3615_v36  ;;  %v3343_v4 = vmul.f32 %v3055_v22, %v2911_v30  ;;  %v3159_v50 = vadd.f32 %v3059_v43, %v3055_v22 }
 0x3ca   : > { %v3468_v8 = vadd.f32 %v3350_v5, %v3346_v6  ;;  %v3166_v3 = vadd.f32 %v3060_v63, %v3056_v32  ;;  %v3177_v31 = vadd.f32 %v3176_v18, %v3175_v12  ;;  %v3463_v47 = vadd.f32 %v3462_v1, %v3461_v34 }
 0x3cb   : > { %v3184_v44 = vadd.f32 %v3183_v35, %v3182_v45  ;;  %v3648_v52 = vsub.f32 %v3404_v29, %v3616_v19  ;;  %v10212_v55 = vunpack.c.l.b16 %v4095_v24  ;;  %v3348_v16 = vmul.f32 %v3060_v63, %v2916_v10  ;;  %v10249_v63 = vld [vmem:[%s9409_s23 + $0x30] sm:$0xff] }
 0x3cc   : > { %v3469_v38 = vrot.slane %v3468_v8, 4  ;;  %v3178_v39 = vrot.slane %v3177_v31, 1  ;;  %v3447_v57 = vadd.f32 %v3347_v58, %v3343_v4  ;;  %v3464_v27 = vrot.slane %v3463_v47, 2 }
 0x3cd   : > { %v3185_v33 = vrot.slane %v3184_v44, 1  ;;  %v10214_v20 = vunpack.c.l.b16 %v4096_v59  ;;  %v10216_v21 = vunpack.c.l.b16 %v4097_v2  ;;  %v3160_v30 = vrot.slane %v3159_v50, 4  ;;  %v2977_v2 = vpop.permute.xlu1 %2976 }
 0x3ce   : > { %v3470_v23 = vadd.f32 %v3469_v38, %v3468_v8  ;;  %v3344_v11 = vmul.f32 %v3056_v32, %v2912_v61  ;;  %v3167_v13 = vrot.slane %v3166_v3, 4  ;;  %v10220_v9 = vadd.f32 %v3178_v39, %v3177_v31 }
 0x3cf   : > { %v3465_v26 = vadd.f32 %v3464_v27, %v3463_v47  ;;  %v10222_v51 = vmax.f32 %v3647_v14, 1e-05  ;;  %v10224_v10 = vunpack.c.l.b16 %v4098_v37  ;;  %v10226_v36 = vadd.f32 %v3185_v33, %v3184_v44 }
 0x3d0   : > { %v3471_v22 = vrot.slane %v3470_v23, 2  ;;  %v3448_v43 = vrot.slane %v3447_v57, 4  ;;  %v3454_v49 = vadd.f32 %v3348_v16, %v3344_v11  ;;  %v10230_v17 = vmul.f32 %v10220_v9, %v10220_v9 }
 0x3d1   : > { %12119 = vst [vmem:[#allocation15_spill] sm:$0xff] %v10222_v51  ;;  %v3466_v48 = vrot.slane %v3465_v26, 1  ;;  %v10232_v61 = vmax.f32 %v3648_v52, 1e-05  ;;  %v10237_v32 = vmax.f32 %v3649_v28, 1e-05  ;;  %v3161_v34 = vadd.f32 %v3160_v30, %v3159_v50 }
 0x3d2   : > { %v3472_v25 = vadd.f32 %v3471_v22, %v3470_v23  ;;  %v10242_v29 = vmax.f32 %v3650_v46, 1e-05  ;;  %v3047_v19 = vmul.f32 %v2972_v54, %v2903_v42  ;;  %v3168_v5 = vadd.f32 %v3167_v13, %v3166_v3 }
 0x3d3   : > { %12120 = vst [vmem:[#allocation29_spill] sm:$0xff] %v10232_v61  ;;  %v10246_v24 = vadd.f32 %v3466_v48, %v3465_v26  ;;  %v3048_v7 = vmul.f32 %v2972_v54, %v2904_v15  ;;  %v3049_v53 = vmul.f32 %v2972_v54, %v2905_v62  ;;  %v10257_v41 = vmul.f32 %v10226_v36, %v10226_v36 }
 0x3d4   : > { %12121 = vst [vmem:[#allocation28_spill] sm:$0xff] %v10237_v32  ;;  %v3473_v28 = vrot.slane %v3472_v25, 1  ;;  %v3050_v46 = vmul.f32 %v2972_v54, %v2906_v60  ;;  %v3449_v12 = vadd.f32 %v3448_v43, %v3447_v57  ;;  %v3455_v45 = vrot.slane %v3454_v49, 4 }
 0x3d5   : > { %12122 = vst [vmem:[#allocation17_spill] sm:$0xff] %v10242_v29  ;;  %v3657_v59 = vsub.f32 %v10246_v24, %v10230_v17  ;;  %v3162_v37 = vrot.slane %v3161_v34, 2  ;;  %v2907_v18 = vunpack.c.l.bf16 %v10249_v63  ;;  %v2908_v35 = vunpack.c.h.bf16 %v10249_v63 }
 0x3d6   : > { %v10264_v6 = vadd.f32 %v3473_v28, %v3472_v25  ;;  %v10270_v58 = vmul.f32 %v3047_v19, %v2903_v42  ;;  %v3169_v1 = vrot.slane %v3168_v5, 2  ;;  %v2909_v14 = vunpack.c.l.bf16 %v358_v0 }
 0x3d7   : > { %v2910_v4 = vunpack.c.h.bf16 %v358_v0  ;;  %v10274_v50 = vmul.f32 %v3048_v7, %v2904_v15  ;;  %v3051_v54 = vmul.f32 %v2977_v2, %v2907_v18  ;;  %v3052_v3 = vmul.f32 %v2977_v2, %v2908_v35 }
 0x3d8   : > { %v3450_v31 = vrot.slane %v3449_v12, 2  ;;  %v3456_v44 = vadd.f32 %v3455_v45, %v3454_v49  ;;  %v3053_v47 = vmul.f32 %v2977_v2, %v2909_v14  ;;  %v3337_v42 = vmul.f32 %v3049_v53, %v2905_v62 }
 0x3d9   : > { %v3054_v52 = vmul.f32 %v2977_v2, %v2910_v4  ;;  %v3163_v16 = vadd.f32 %v3162_v37, %v3161_v34  ;;  %v3131_v38 = vadd.f32 %v3051_v54, %v3047_v19  ;;  %v3138_v39 = vadd.f32 %v3052_v3, %v3048_v7 }
 0x3da   : > { %v3170_v33 = vadd.f32 %v3169_v1, %v3168_v5  ;;  %v3145_v57 = vadd.f32 %v3053_v47, %v3049_v53  ;;  %v3341_v15 = vmul.f32 %v3053_v47, %v2909_v14  ;;  %v3338_v27 = vmul.f32 %v3050_v46, %v2906_v60 }
 0x3db   : > { %v3152_v40 = vadd.f32 %v3054_v52, %v3050_v46  ;;  %v3132_v30 = vrot.slane %v3131_v38, 4  ;;  %v3139_v23 = vrot.slane %v3138_v39, 4  ;;  %v3342_v11 = vmul.f32 %v3054_v52, %v2910_v4 }
 0x3dc   : > { %v3451_v13 = vadd.f32 %v3450_v31, %v3449_v12  ;;  %v3457_v26 = vrot.slane %v3456_v44, 2  ;;  %v3146_v22 = vrot.slane %v3145_v57, 4  ;;  %v3433_v62 = vadd.f32 %v3341_v15, %v3337_v42 }
 0x3dd   : > { %v3153_v43 = vrot.slane %v3152_v40, 4  ;;  %v3133_v49 = vadd.f32 %v3132_v30, %v3131_v38  ;;  %v3140_v48 = vadd.f32 %v3139_v23, %v3138_v39  ;;  %v3440_v34 = vadd.f32 %v3342_v11, %v3338_v27 }
 0x3de   : > { %v3164_v25 = vrot.slane %v3163_v16, 1  ;;  %v3171_v19 = vrot.slane %v3170_v33, 1  ;;  %v3147_v5 = vadd.f32 %v3146_v22, %v3145_v57  ;;  %v3434_v28 = vrot.slane %v3433_v62, 4 }
 0x3df   : > { %v3154_v63 = vadd.f32 %v3153_v43, %v3152_v40  ;;  %v3134_v7 = vrot.slane %v3133_v49, 2  ;;  %v3141_v53 = vrot.slane %v3140_v48, 2  ;;  %v3441_v56 = vrot.slane %v3440_v34, 4 }
 0x3e0   : > { %v3452_v60 = vrot.slane %v3451_v13, 1  ;;  %v3458_v0 = vadd.f32 %v3457_v26, %v3456_v44  ;;  %v3148_v46 = vrot.slane %v3147_v5, 2  ;;  %v3435_v37 = vadd.f32 %v3434_v28, %v3433_v62 }
 0x3e1   : > { %v3155_v45 = vrot.slane %v3154_v63, 2  ;;  %v3135_v12 = vadd.f32 %v3134_v7, %v3133_v49  ;;  %v3142_v2 = vadd.f32 %v3141_v53, %v3140_v48  ;;  %v3442_v1 = vadd.f32 %v3441_v56, %v3440_v34 }
 0x3e2   : > { %v3149_v14 = vadd.f32 %v3148_v46, %v3147_v5  ;;  %v3339_v31 = vmul.f32 %v3051_v54, %v2907_v18  ;;  %v3340_v47 = vmul.f32 %v3052_v3, %v2908_v35  ;;  %v3436_v38 = vrot.slane %v3435_v37, 2 }
 0x3e3   : > { %v3156_v4 = vadd.f32 %v3155_v45, %v3154_v63  ;;  %v3136_v52 = vrot.slane %v3135_v12, 1  ;;  %v3143_v42 = vrot.slane %v3142_v2, 1  ;;  %v3443_v39 = vrot.slane %v3442_v1, 2 }
 0x3e4   : > { %v10282_v57 = vadd.f32 %v3164_v25, %v3163_v16  ;;  %v10284_v40 = vadd.f32 %v3171_v19, %v3170_v33  ;;  %v3150_v15 = vrot.slane %v3149_v14, 1  ;;  %v3437_v23 = vadd.f32 %v3436_v38, %v3435_v37  ;;  %v2997_v38 = vpop.permute.xlu1 %2996 }
 0x3e5   : > { %v3157_v44 = vrot.slane %v3156_v4, 1  ;;  %v10286_v27 = vadd.f32 %v3136_v52, %v3135_v12  ;;  %v10288_v30 = vadd.f32 %v3143_v42, %v3142_v2  ;;  %v3444_v11 = vadd.f32 %v3443_v39, %v3442_v1  ;;  %v10339_v39 = vld [vmem:[%s9409_s23 + $0x60] sm:$0xff] }
 0x3e6   : > { %v3151_v26 = vadd.f32 %v3150_v15, %v3149_v14  ;;  %v3419_v18 = vadd.f32 %v3339_v31, %v10270_v58  ;;  %v3426_v35 = vadd.f32 %v3340_v47, %v10274_v50  ;;  %v3453_v54 = vadd.f32 %v3452_v60, %v3451_v13  ;;  %v10327_v47 = vld [vmem:[%s9409_s23 + $0x70] sm:$0xff] }
 0x3e7   : > { %v3158_v22 = vadd.f32 %v3157_v44, %v3156_v4  ;;  %v3459_v3 = vrot.slane %v3458_v0, 1  ;;  %v3438_v16 = vrot.slane %v3437_v23, 1  ;;  %v3445_v43 = vrot.slane %v3444_v11, 1 }
 0x3e8   : > { %v3623_v33 = vmul.f32 %v10282_v57, %v10282_v57  ;;  %v10294_v49 = vmul.f32 %v3151_v26, %v3151_v26  ;;  %v4099_v58 = vpack.c.bf16 %v10286_v27, %v10286_v27  ;;  %v4100_v50 = vpack.c.bf16 %v10288_v30, %v10288_v30 }
 0x3e9   : > { %v10296_v48 = vmul.f32 %v3158_v22, %v3158_v22  ;;  %v10298_v62 = vadd.f32 %v3438_v16, %v3437_v23  ;;  %v10300_v34 = vadd.f32 %v3445_v43, %v3444_v11  ;;  %v3420_v13 = vrot.slane %v3419_v18, 4 }
 0x3ea   : > { %v3427_v25 = vrot.slane %v3426_v35, 4  ;;  %v4101_v19 = vpack.c.bf16 %v3151_v26, %v3151_v26  ;;  %v4102_v5 = vpack.c.bf16 %v3158_v22, %v3158_v22  ;;  %v5406_v53 = vunpack.c.l.b16 %v4099_v58 }
 0x3eb   : > { %v5407_v28 = vunpack.c.l.b16 %v4100_v50  ;;  %8976 = vrsqrt.f32 %v10222_v51  ;;  %v3624_v56 = vmul.f32 %v10284_v40, %v10284_v40  ;;  %v3460_v45 = vadd.f32 %v3459_v3, %v3458_v0 }
 0x3ec   : > { %v5408_v60 = vunpack.c.l.b16 %v4101_v19  ;;  %v5409_v46 = vunpack.c.l.b16 %v4102_v5  ;;  %v3655_v12 = vsub.f32 %v3453_v54, %v3623_v33  ;;  %v5434_v2 = vsel %vm4479_vm1, %v5406_v53, %v10212_v55 }
 0x3ed   : > { %v5441_v37 = vsel %vm4479_vm1, %v5407_v28, %v10214_v20  ;;  %8978 = vrsqrt.f32 %v10232_v61  ;;  %v4103_v4 = vpack.c.bf16 %v10282_v57, %v10282_v57  ;;  %v4104_v0 = vpack.c.bf16 %v10284_v40, %v10284_v40  ;;  %v366_v20 = vld [vmem:[%s9409_s23 + $0x78] sm:$0xff] }
 0x3ee   : > { %v5448_v1 = vsel %vm4479_vm1, %v5408_v60, %v10216_v21  ;;  %v5455_v14 = vsel %vm4479_vm1, %v5409_v46, %v10224_v10  ;;  %v3421_v31 = vadd.f32 %v3420_v13, %v3419_v18  ;;  %v3428_v55 = vadd.f32 %v3427_v25, %v3426_v35  ;;  %v2992_v13 = vpop.permute.xlu0 %2991 }
 0x3ef   : > { %8980 = vrsqrt.f32 %v10237_v32  ;;  %v4105_v21 = vpack.c.bf16 %v10220_v9, %v10220_v9  ;;  %v3656_v10 = vsub.f32 %v3460_v45, %v3624_v56  ;;  %v10334_v52 = vmax.f32 %v3655_v12, 1e-05  ;;  %v364_v9 = vld [vmem:[%s9409_s23 + $0x68] sm:$0xff] }
 0x3f0   : > { %8982 = vrsqrt.f32 %v10242_v29  ;;  %v4106_v42 = vpack.c.bf16 %v10226_v36, %v10226_v36  ;;  %v2923_v40 = vunpack.c.l.bf16 %v10327_v47  ;;  %v2924_v15 = vunpack.c.h.bf16 %v10327_v47 }
 0x3f1   : > { %12123 = vst [vmem:[#allocation16_spill] sm:$0xff] %v10334_v52  ;;  %v10341_v57 = vpop.eup %8976  ;;  %v2925_v44 = vunpack.c.l.bf16 %v366_v20  ;;  %v2926_v23 = vunpack.c.h.bf16 %v366_v20  ;;  %v5410_v11 = vunpack.c.l.b16 %v4103_v4  ;;  %v5411_v26 = vunpack.c.l.b16 %v4104_v0 }
 0x3f2   : > { %12124 = vst [vmem:[#allocation31_spill] sm:$0xff] %v10341_v57  ;;  %v3422_v22 = vrot.slane %v3421_v31, 2  ;;  %v3429_v18 = vrot.slane %v3428_v55, 2  ;;  %v5412_v54 = vunpack.c.l.b16 %v4105_v21  ;;  %v2919_v3 = vunpack.c.l.bf16 %v10339_v39 }
 0x3f3   : > { %v10346_v35 = vpop.eup %8978  ;;  %v3069_v36 = vmul.f32 %v2997_v38, %v2925_v44  ;;  %v2920_v16 = vunpack.c.h.bf16 %v10339_v39  ;;  %v5413_v43 = vunpack.c.l.b16 %v4106_v42  ;;  %v3070_v33 = vmul.f32 %v2997_v38, %v2926_v23 }
 0x3f4   : > { %12125 = vst [vmem:[#allocation30_spill] sm:$0xff] %v10346_v35  ;;  %v2921_v58 = vunpack.c.l.bf16 %v364_v9  ;;  %v2922_v50 = vunpack.c.h.bf16 %v364_v9  ;;  %v10352_v19 = vmax.f32 %v3656_v10, 1e-05  ;;  %v3067_v5 = vmul.f32 %v2997_v38, %v2923_v40 }
 0x3f5   : > { %v10350_v25 = vpop.eup %8980  ;;  %v3068_v53 = vmul.f32 %v2997_v38, %v2924_v15  ;;  %v3423_v56 = vadd.f32 %v3422_v22, %v3421_v31  ;;  %v3430_v60 = vadd.f32 %v3429_v18, %v3428_v55  ;;  %v10359_v46 = vsel %vm4481_vm2, %v5412_v54, %v5448_v1 }
 0x3f6   : > { %12126 = vst [vmem:[#allocation19_spill] sm:$0xff] %v10350_v25  ;;  %v10356_v28 = vpop.eup %8982  ;;  %v10362_v45 = vsel %vm4481_vm2, %v5413_v43, %v5455_v14  ;;  %v3357_v12 = vmul.f32 %v3069_v36, %v2925_v44  ;;  %v3063_v4 = vmul.f32 %v2992_v13, %v2919_v3  ;;  %v3064_v0 = vmul.f32 %v2992_v13, %v2920_v16 }
 0x3f7   : > { %12127 = vst [vmem:[#allocation18_spill] sm:$0xff] %v10352_v19  ;;  %v3065_v20 = vmul.f32 %v2992_v13, %v2921_v58  ;;  %v3358_v21 = vmul.f32 %v3070_v33, %v2926_v23  ;;  %v3066_v10 = vmul.f32 %v2992_v13, %v2922_v50  ;;  %v10367_v42 = vsel %vm4481_vm2, %v5410_v11, %v5434_v2 }
 0x3f8   : > { %12128 = vst [vmem:[#allocation33_spill] sm:$0xff] %v10356_v28  ;;  %v10370_v31 = vsel %vm4481_vm2, %v5411_v26, %v5441_v37  ;;  %8984 = vrsqrt.f32 %v10334_v52  ;;  %v3187_v1 = vadd.f32 %v3067_v5, %v3063_v4  ;;  %v3194_v55 = vadd.f32 %v3068_v53, %v3064_v0 }
 0x3f9   : > { %v3201_v14 = vadd.f32 %v3069_v36, %v3065_v20  ;;  %v10376_v38 = vmax.f32 %v3657_v59, 1e-05  ;;  %v3208_v44 = vadd.f32 %v3070_v33, %v3066_v10  ;;  %v3353_v9 = vmul.f32 %v3065_v20, %v2921_v58 }
 0x3fa   : > { %v3354_v23 = vmul.f32 %v3066_v10, %v2922_v50  ;;  %v3424_v22 = vrot.slane %v3423_v56, 1  ;;  %v3188_v18 = vrot.slane %v3187_v1, 4  ;;  %v3195_v2 = vrot.slane %v3194_v55, 4 }
 0x3fb   : > { %12129 = vst [vmem:[#allocation32_spill] sm:$0xff] %v10376_v38  ;;  %v3202_v11 = vrot.slane %v3201_v14, 4  ;;  %v3431_v54 = vrot.slane %v3430_v60, 1  ;;  %v3209_v37 = vrot.slane %v3208_v44, 4  ;;  %v3489_v26 = vadd.f32 %v3357_v12, %v3353_v9 }
 0x3fc   : > { %v3496_v43 = vadd.f32 %v3358_v21, %v3354_v23  ;;  %v10380_v13 = vmul.f32 %v10286_v27, %v10286_v27  ;;  %v3189_v36 = vadd.f32 %v3188_v18, %v3187_v1  ;;  %v3196_v7 = vadd.f32 %v3195_v2, %v3194_v55 }
 0x3fd   : > { %v3203_v17 = vadd.f32 %v3202_v11, %v3201_v14  ;;  %v10384_v24 = vmul.f32 %v10288_v30, %v10288_v30  ;;  %v3210_v59 = vadd.f32 %v3209_v37, %v3208_v44  ;;  %v3490_v33 = vrot.slane %v3489_v26, 4 }
 0x3fe   : > { %v3497_v58 = vrot.slane %v3496_v43, 4  ;;  %v10386_v50 = vpop.eup %8984  ;;  %v3355_v20 = vmul.f32 %v3067_v5, %v2923_v40  ;;  %v3190_v10 = vrot.slane %v3189_v36, 2  ;;  %v3197_v12 = vrot.slane %v3196_v7, 2 }
 0x3ff   : > { %12130 = vst [vmem:[#allocation21_spill] sm:$0xff] %v10386_v50  ;;  %v3204_v21 = vrot.slane %v3203_v17, 2  ;;  %v3211_v9 = vrot.slane %v3210_v59, 2  ;;  %v3351_v23 = vmul.f32 %v3063_v4, %v2919_v3  ;;  %v3491_v27 = vadd.f32 %v3490_v33, %v3489_v26 }
 0x400   : > { %v3498_v63 = vadd.f32 %v3497_v58, %v3496_v43  ;;  %v3425_v1 = vadd.f32 %v3424_v22, %v3423_v56  ;;  %v3191_v55 = vadd.f32 %v3190_v10, %v3189_v36  ;;  %v3198_v14 = vadd.f32 %v3197_v12, %v3196_v7  ;;  %v367_v10 = vld [vmem:[%s9409_s23 + $0x80] sm:$0xff] }
 0x401   : > { %v3205_v18 = vadd.f32 %v3204_v21, %v3203_v17  ;;  %v3356_v30 = vmul.f32 %v3068_v53, %v2924_v15  ;;  %v3212_v44 = vadd.f32 %v3211_v9, %v3210_v59  ;;  %v3492_v2 = vrot.slane %v3491_v27, 2 }
 0x402   : > { %v3499_v11 = vrot.slane %v3498_v63, 2  ;;  %v3192_v37 = vrot.slane %v3191_v55, 1  ;;  %v3199_v8 = vrot.slane %v3198_v14, 1  ;;  %v3352_v5 = vmul.f32 %v3064_v0, %v2920_v16 }
 0x403   : > { %v3206_v40 = vrot.slane %v3205_v18, 1  ;;  %v3213_v50 = vrot.slane %v3212_v44, 1  ;;  %v3475_v3 = vadd.f32 %v3355_v20, %v3351_v23  ;;  %v3493_v4 = vadd.f32 %v3492_v2, %v3491_v27 }
 0x404   : > { %v3500_v56 = vadd.f32 %v3499_v11, %v3498_v63  ;;  %v3432_v22 = vadd.f32 %v3431_v54, %v3430_v60  ;;  %v10392_v7 = vadd.f32 %v3192_v37, %v3191_v55  ;;  %v10394_v26 = vadd.f32 %v3199_v8, %v3198_v14  ;;  %v368_v54 = vld [vmem:[%s9409_s23 + $0x88] sm:$0xff] }
 0x405   : > { %v3207_v47 = vadd.f32 %v3206_v40, %v3205_v18  ;;  %8986 = vrsqrt.f32 %v10352_v19  ;;  %v3214_v15 = vadd.f32 %v3213_v50, %v3212_v44  ;;  %v3494_v53 = vrot.slane %v3493_v4, 1 }
 0x406   : > { %v3501_v43 = vrot.slane %v3500_v56, 1  ;;  %v12131_v39 = vsub.f32 %v10264_v6, %v10257_v41  ;;  %v3651_v0 = vsub.f32 %v3425_v1, %v10380_v13  ;;  %v3482_v63 = vadd.f32 %v3356_v30, %v3352_v5  ;;  %v3002_v1 = vpop.permute.xlu2 %3001  ;;  %v369_v30 = vld [vmem:[%s9409_s23 + $0x90] sm:$0xff] }
 0x407   : > { %v10403_v60 = vmul.f32 %v3207_v47, %v3207_v47  ;;  %v3476_v8 = vrot.slane %v3475_v3, 4  ;;  %v10406_v36 = vadd.f32 %v3494_v53, %v3493_v4  ;;  %v10410_v59 = vmul.f32 %v3214_v15, %v3214_v15 }
 0x408   : > { %v10400_v16 = vmax.f32 %v12131_v39, 1e-05  ;;  %v10408_v17 = vadd.f32 %v3501_v43, %v3500_v56  ;;  %v3652_v33 = vsub.f32 %v3432_v22, %v10384_v24  ;;  %v4107_v41 = vpack.c.bf16 %v10392_v7, %v10392_v7  ;;  %v3007_v22 = vpop.permute.xlu0 %3006 }
 0x409   : > { %v4108_v6 = vpack.c.bf16 %v10394_v26, %v10394_v26  ;;  %v4109_v13 = vpack.c.bf16 %v3207_v47, %v3207_v47  ;;  %v4110_v20 = vpack.c.bf16 %v3214_v15, %v3214_v15  ;;  %v2929_v12 = vunpack.c.l.bf16 %v368_v54 }
 0x40a   : > { %12132 = vst [vmem:[#allocation20_spill] sm:$0xff] %v10400_v16  ;;  %v5414_v21 = vunpack.c.l.b16 %v4107_v41  ;;  %v2930_v27 = vunpack.c.h.bf16 %v368_v54  ;;  %v3477_v55 = vadd.f32 %v3476_v8, %v3475_v3  ;;  %v3483_v14 = vrot.slane %v3482_v63, 4  ;;  %v370_v3 = vld [vmem:[%s9409_s23 + $0x98] sm:$0xff] }
 0x40b   : > { %v5415_v24 = vunpack.c.l.b16 %v4108_v6  ;;  %v5416_v9 = vunpack.c.l.b16 %v4109_v13  ;;  %v10422_v23 = vpop.eup %8986  ;;  %v5417_v18 = vunpack.c.l.b16 %v4110_v20  ;;  %8988 = vrsqrt.f32 %v10376_v38 }
 0x40c   : > { %12133 = vst [vmem:[#allocation34_spill] sm:$0xff] %v10422_v23  ;;  %v10428_v44 = vsel %vm4483_vm3, %v5414_v21, %v10367_v42  ;;  %8990 = vrsqrt.f32 %v10400_v16  ;;  %v10439_v37 = vmax.f32 %v3651_v0, 1e-05  ;;  %v2927_v40 = vunpack.c.l.bf16 %v367_v10 }
 0x40d   : > { %12134 = vst [vmem:[#allocation23_spill] sm:$0xff] %v10428_v44  ;;  %v10432_v2 = vsel %vm4483_vm3, %v5415_v24, %v10370_v31  ;;  %v10436_v11 = vsel %vm4483_vm3, %v5416_v9, %v10359_v46  ;;  %v10443_v5 = vsel %vm4483_vm3, %v5417_v18, %v10362_v45  ;;  %v10446_v42 = vmax.f32 %v3652_v33, 1e-05 }
 0x40e   : > { %12135 = vst [vmem:[#allocation22_spill] sm:$0xff] %v10432_v2  ;;  %v2928_v4 = vunpack.c.h.bf16 %v367_v10  ;;  %v3073_v56 = vmul.f32 %v3002_v1, %v2929_v12  ;;  %v2931_v31 = vunpack.c.l.bf16 %v369_v30  ;;  %v3074_v47 = vmul.f32 %v3002_v1, %v2930_v27  ;;  %v10466_v2 = vld [vmem:[%s9409_s23 + $0xb0] sm:$0xff] }
 0x40f   : > { %12136 = vst [vmem:[#allocation25_spill] sm:$0xff] %v10436_v11  ;;  %v3478_v15 = vrot.slane %v3477_v55, 2  ;;  %v3484_v46 = vadd.f32 %v3483_v14, %v3482_v63  ;;  %v2932_v53 = vunpack.c.h.bf16 %v369_v30  ;;  %v12140_v43 = vsub.f32 %v10298_v62, %v10294_v49 }
 0x410   : > { %12137 = vst [vmem:[#allocation24_spill] sm:$0xff] %v10439_v37  ;;  %v12142_v45 = vsub.f32 %v10300_v34, %v10296_v48  ;;  %v2933_v54 = vunpack.c.l.bf16 %v370_v3  ;;  %v2934_v8 = vunpack.c.h.bf16 %v370_v3  ;;  %8992 = vrsqrt.f32 %v10439_v37 }
 0x411   : > { %12138 = vst [vmem:[#allocation27_spill] sm:$0xff] %v10443_v5  ;;  %v10451_v39 = vmax.f32 %v12140_v43, 1e-05  ;;  %v3071_v33 = vmul.f32 %v3002_v1, %v2927_v40  ;;  %v3075_v41 = vmul.f32 %v3007_v22, %v2931_v31  ;;  %v3076_v6 = vmul.f32 %v3007_v22, %v2932_v53  ;;  %v10459_v13 = vpop.eup %8988 }
 0x412   : > { %12139 = vst [vmem:[#allocation26_spill] sm:$0xff] %v10446_v42  ;;  %v10456_v0 = vmax.f32 %v12142_v45, 1e-05  ;;  %v3072_v63 = vmul.f32 %v3002_v1, %v2928_v4  ;;  %v3361_v20 = vmul.f32 %v3073_v56, %v2929_v12  ;;  %v3077_v10 = vmul.f32 %v3007_v22, %v2933_v54  ;;  %v10461_v62 = vpop.eup %8990 }
 0x413   : > { %12141 = vst [vmem:[#allocation35_spill] sm:$0xff] %v10451_v39  ;;  %v3078_v49 = vmul.f32 %v3007_v22, %v2934_v8  ;;  %v3362_v21 = vmul.f32 %v3074_v47, %v2930_v27  ;;  %v3479_v24 = vadd.f32 %v3478_v15, %v3477_v55  ;;  %v3485_v48 = vrot.slane %v3484_v46, 2 }
 0x414   : > { %12143 = vst [vmem:[#allocation36_spill] sm:$0xff] %v10456_v0  ;;  %v3215_v34 = vadd.f32 %v3075_v41, %v3071_v33  ;;  %v3229_v9 = vadd.f32 %v3077_v10, %v3073_v56  ;;  %v3365_v18 = vmul.f32 %v3077_v10, %v2933_v54  ;;  %v3359_v3 = vmul.f32 %v3071_v33, %v2927_v40 }
 0x415   : > { %12144 = vst [vmem:[#allocation37_spill] sm:$0xff] %v10459_v13  ;;  %v3236_v14 = vadd.f32 %v3078_v49, %v3074_v47  ;;  %v3366_v30 = vmul.f32 %v3078_v49, %v2934_v8  ;;  %v3222_v43 = vadd.f32 %v3076_v6, %v3072_v63  ;;  %v3363_v45 = vmul.f32 %v3075_v41, %v2931_v31 }
 0x416   : > { %12145 = vst [vmem:[#allocation38_spill] sm:$0xff] %v10461_v62  ;;  %v3364_v50 = vmul.f32 %v3076_v6, %v2932_v53  ;;  %v3230_v58 = vrot.slane %v3229_v9, 4  ;;  %v3517_v12 = vadd.f32 %v3365_v18, %v3361_v20  ;;  %v10463_v22 = vpop.eup %8992  ;;  %v3360_v11 = vmul.f32 %v3072_v63, %v2928_v4 }
 0x417   : > { %v3237_v1 = vrot.slane %v3236_v14, 4  ;;  %v3524_v5 = vadd.f32 %v3366_v30, %v3362_v21  ;;  %12146 = vst [vmem:[#allocation39_spill] sm:$0xff] %v10463_v22  ;;  %v3480_v27 = vrot.slane %v3479_v24, 1  ;;  %v3486_v55 = vadd.f32 %v3485_v48, %v3484_v46  ;;  %v3017_v30 = vpop.permute.xlu2 %3016 }
 0x418   : > { %v3216_v15 = vrot.slane %v3215_v34, 4  ;;  %v3231_v56 = vadd.f32 %v3230_v58, %v3229_v9  ;;  %v3518_v54 = vrot.slane %v3517_v12, 4  ;;  %8994 = vrsqrt.f32 %v10446_v42  ;;  %v374_v58 = vld [vmem:[%s9409_s23 + $0xb8] sm:$0xff] }
 0x419   : > { %v3238_v47 = vadd.f32 %v3237_v1, %v3236_v14  ;;  %v3525_v40 = vrot.slane %v3524_v5, 4  ;;  %v3223_v31 = vrot.slane %v3222_v43, 4  ;;  %v3503_v53 = vadd.f32 %v3363_v45, %v3359_v3 }
 0x41a   : > { %v3510_v8 = vadd.f32 %v3364_v50, %v3360_v11  ;;  %v3232_v33 = vrot.slane %v3231_v56, 2  ;;  %v3519_v6 = vadd.f32 %v3518_v54, %v3517_v12  ;;  %v10469_v4 = vadd.f32 %v3480_v27, %v3479_v24 }
 0x41b   : > { %v3239_v41 = vrot.slane %v3238_v47, 2  ;;  %v3526_v20 = vadd.f32 %v3525_v40, %v3524_v5  ;;  %v3487_v46 = vrot.slane %v3486_v55, 1  ;;  %v2939_v63 = vunpack.c.l.bf16 %v10466_v2 }
 0x41c   : > { %v3217_v10 = vadd.f32 %v3216_v15, %v3215_v34  ;;  %v3233_v49 = vadd.f32 %v3232_v33, %v3231_v56  ;;  %v3520_v48 = vrot.slane %v3519_v6, 2  ;;  %v10475_v14 = vmul.f32 %v10392_v7, %v10392_v7 }
 0x41d   : > { %v3240_v21 = vadd.f32 %v3239_v41, %v3238_v47  ;;  %v3527_v9 = vrot.slane %v3526_v20, 2  ;;  %v3224_v50 = vadd.f32 %v3223_v31, %v3222_v43  ;;  %v3504_v11 = vrot.slane %v3503_v53, 4  ;;  %v371_v41 = vld [vmem:[%s9409_s23 + $0xa0] sm:$0xff] }
 0x41e   : > { %v3511_v18 = vrot.slane %v3510_v8, 4  ;;  %v3234_v5 = vrot.slane %v3233_v49, 1  ;;  %v3521_v3 = vadd.f32 %v3520_v48, %v3519_v6  ;;  %v10477_v1 = vpop.eup %8994  ;;  %v2940_v34 = vunpack.c.h.bf16 %v10466_v2 }
 0x41f   : > { %v3241_v24 = vrot.slane %v3240_v21, 1  ;;  %v3528_v45 = vadd.f32 %v3527_v9, %v3526_v20  ;;  %12147 = vst [vmem:[#allocation40_spill] sm:$0xff] %v10477_v1  ;;  %v2941_v12 = vunpack.c.l.bf16 %v374_v58  ;;  %v2942_v27 = vunpack.c.h.bf16 %v374_v58 }
 0x420   : > { %v3218_v15 = vrot.slane %v3217_v10, 2  ;;  %v10480_v56 = vadd.f32 %v3234_v5, %v3233_v49  ;;  %v3522_v43 = vrot.slane %v3521_v3, 1  ;;  %v3083_v54 = vmul.f32 %v3017_v30, %v2939_v63 }
 0x421   : > { %v10482_v7 = vadd.f32 %v3241_v24, %v3240_v21  ;;  %v3529_v47 = vrot.slane %v3528_v45, 1  ;;  %v3225_v40 = vrot.slane %v3224_v50, 2  ;;  %v3505_v31 = vadd.f32 %v3504_v11, %v3503_v53  ;;  %v372_v11 = vld [vmem:[%s9409_s23 + $0xa8] sm:$0xff] }
 0x422   : > { %12148 = vst [vmem:[#allocation41_spill] sm:$0xff] %v10480_v56  ;;  %v3512_v33 = vadd.f32 %v3511_v18, %v3510_v8  ;;  %v10485_v6 = vadd.f32 %v3522_v43, %v3521_v3  ;;  %v10491_v2 = vmul.f32 %v10480_v56, %v10480_v56  ;;  %8996 = vrsqrt.f32 %v10451_v39 }
 0x423   : > { %12149 = vst [vmem:[#allocation42_spill] sm:$0xff] %v10482_v7  ;;  %v10487_v20 = vadd.f32 %v3529_v47, %v3528_v45  ;;  %v10495_v58 = vmul.f32 %v10482_v7, %v10482_v7  ;;  %v3084_v49 = vmul.f32 %v3017_v30, %v2940_v34  ;;  %v3085_v21 = vmul.f32 %v3017_v30, %v2941_v12  ;;  %v3012_v45 = vpop.permute.xlu1 %3011 }
 0x424   : > { %v3086_v48 = vmul.f32 %v3017_v30, %v2942_v27  ;;  %v3219_v53 = vadd.f32 %v3218_v15, %v3217_v10  ;;  %v2935_v18 = vunpack.c.l.bf16 %v371_v41  ;;  %8998 = vrsqrt.f32 %v10456_v0 }
 0x425   : > { %v10504_v5 = vadd.f32 %v3487_v46, %v3486_v55  ;;  %v10508_v24 = vmul.f32 %v10394_v26, %v10394_v26  ;;  %v3226_v3 = vadd.f32 %v3225_v40, %v3224_v50  ;;  %v3659_v10 = vsub.f32 %v10469_v4, %v10475_v14 }
 0x426   : > { %v3371_v30 = vmul.f32 %v3083_v54, %v2939_v63  ;;  %v3506_v15 = vrot.slane %v3505_v31, 2  ;;  %v3513_v43 = vrot.slane %v3512_v33, 2  ;;  %v3372_v47 = vmul.f32 %v3084_v49, %v2940_v34 }
 0x427   : > { %v2936_v9 = vunpack.c.h.bf16 %v371_v41  ;;  %v2937_v8 = vunpack.c.l.bf16 %v372_v11  ;;  %v2938_v44 = vunpack.c.h.bf16 %v372_v11  ;;  %v3373_v7 = vmul.f32 %v3085_v21, %v2941_v12 }
 0x428   : > { %v3374_v56 = vmul.f32 %v3086_v48, %v2942_v27  ;;  %v3220_v55 = vrot.slane %v3219_v53, 1  ;;  %v3079_v46 = vmul.f32 %v3012_v45, %v2935_v18  ;;  %v10512_v62 = vpop.eup %8996  ;;  %v3227_v26 = vrot.slane %v3226_v3, 1 }
 0x429   : > { %12150 = vst [vmem:[#allocation43_spill] sm:$0xff] %v10512_v62  ;;  %v3080_v16 = vmul.f32 %v3012_v45, %v2936_v9  ;;  %v3081_v50 = vmul.f32 %v3012_v45, %v2937_v8  ;;  %v3082_v40 = vmul.f32 %v3012_v45, %v2938_v44  ;;  %v3507_v13 = vadd.f32 %v3506_v15, %v3505_v31 }
 0x42a   : > { %v3514_v38 = vadd.f32 %v3513_v43, %v3512_v33  ;;  %v3243_v4 = vadd.f32 %v3083_v54, %v3079_v46  ;;  %v3367_v63 = vmul.f32 %v3079_v46, %v2935_v18  ;;  %v10514_v14 = vpop.eup %8998  ;;  %v10516_v46 = vadd.f32 %v3220_v55, %v3219_v53 }
 0x42b   : > { %12151 = vst [vmem:[#allocation44_spill] sm:$0xff] %v10514_v14  ;;  %v3250_v34 = vadd.f32 %v3084_v49, %v3080_v16  ;;  %v3257_v41 = vadd.f32 %v3085_v21, %v3081_v50  ;;  %v3264_v23 = vadd.f32 %v3086_v48, %v3082_v40  ;;  %v3368_v11 = vmul.f32 %v3080_v16, %v2936_v9  ;;  %v7302_v14 = vld [vmem:[#allocation8 + $0x80] sm:$0xf] }
 0x42c   : > { %v3244_v12 = vrot.slane %v3243_v4, 4  ;;  %v3369_v27 = vmul.f32 %v3081_v50, %v2937_v8  ;;  %v3370_v19 = vmul.f32 %v3082_v40, %v2938_v44  ;;  %v3531_v52 = vadd.f32 %v3371_v30, %v3367_v63  ;;  %12152 = vst [vmem:[#allocation45_spill] sm:$0xff] %v10516_v46 }
 0x42d   : > { %v3251_v0 = vrot.slane %v3250_v34, 4  ;;  %v3258_v62 = vrot.slane %v3257_v41, 4  ;;  %v3265_v39 = vrot.slane %v3264_v23, 4  ;;  %v3538_v1 = vadd.f32 %v3372_v47, %v3368_v11 }
 0x42e   : > { %v3245_v42 = vadd.f32 %v3244_v12, %v3243_v4  ;;  %v3532_v45 = vrot.slane %v3531_v52, 4  ;;  %v3545_v31 = vadd.f32 %v3373_v7, %v3369_v27  ;;  %v3552_v33 = vadd.f32 %v3374_v56, %v3370_v19 }
 0x42f   : > { %v3508_v54 = vrot.slane %v3507_v13, 1  ;;  %v3252_v18 = vadd.f32 %v3251_v0, %v3250_v34  ;;  %v3266_v15 = vadd.f32 %v3265_v39, %v3264_v23  ;;  %v3539_v43 = vrot.slane %v3538_v1, 4 }
 0x430   : > { %v3246_v49 = vrot.slane %v3245_v42, 2  ;;  %v3259_v21 = vadd.f32 %v3258_v62, %v3257_v41  ;;  %v3533_v48 = vadd.f32 %v3532_v45, %v3531_v52  ;;  %v3553_v16 = vrot.slane %v3552_v33, 4 }
 0x431   : > { %v3253_v9 = vrot.slane %v3252_v18, 2  ;;  %v3267_v8 = vrot.slane %v3266_v15, 2  ;;  %v3540_v44 = vadd.f32 %v3539_v43, %v3538_v1  ;;  %v3546_v30 = vrot.slane %v3545_v31, 4  ;;  %v10554_v43 = vld [vmem:[%s9409_s23 + $0xe0] sm:$0xff] }
 0x432   : > { %v10518_v50 = vadd.f32 %v3227_v26, %v3226_v3  ;;  %v3515_v47 = vrot.slane %v3514_v38, 1  ;;  %v3554_v40 = vadd.f32 %v3553_v16, %v3552_v33  ;;  %v3660_v19 = vsub.f32 %v10504_v5, %v10508_v24 }
 0x433   : > { %v10522_v0 = vmax.f32 %v3659_v10, 1e-05  ;;  %v3509_v23 = vadd.f32 %v3508_v54, %v3507_v13  ;;  %v3268_v39 = vadd.f32 %v3267_v8, %v3266_v15  ;;  %v3247_v62 = vadd.f32 %v3246_v49, %v3245_v42  ;;  %v10557_v49 = vld [vmem:[%s9409_s23 + $0xe8] sm:$0xff]  ;;  %v377_v8 = vld [vmem:[%s9409_s23 + $0xd0] sm:$0xff] }
 0x434   : > { %12153 = vst [vmem:[#allocation46_spill] sm:$0xff] %v10518_v50  ;;  %v3260_v52 = vrot.slane %v3259_v21, 2  ;;  %v3534_v56 = vrot.slane %v3533_v48, 2  ;;  %v3555_v7 = vrot.slane %v3554_v40, 2  ;;  %v3254_v4 = vadd.f32 %v3253_v9, %v3252_v18 }
 0x435   : > { %12154 = vst [vmem:[#allocation47_spill] sm:$0xff] %v10522_v0  ;;  %v3269_v1 = vrot.slane %v3268_v39, 1  ;;  %v3541_v63 = vrot.slane %v3540_v44, 2  ;;  %v3547_v53 = vadd.f32 %v3546_v30, %v3545_v31  ;;  %v3516_v55 = vadd.f32 %v3515_v47, %v3514_v38 }
 0x436   : > { %v3631_v3 = vmul.f32 %v10516_v46, %v10516_v46  ;;  %v3632_v26 = vmul.f32 %v10518_v50, %v10518_v50  ;;  %v3556_v5 = vadd.f32 %v3555_v7, %v3554_v40  ;;  %v10528_v24 = vmax.f32 %v3660_v19, 1e-05  ;;  %v3027_v7 = vpop.permute.xlu1 %3026 }
 0x437   : > { %v12156_v42 = vsub.f32 %v10406_v36, %v10403_v60  ;;  %v12158_v10 = vsub.f32 %v10408_v17, %v10410_v59  ;;  %v10540_v38 = vadd.f32 %v3269_v1, %v3268_v39  ;;  %v3248_v41 = vrot.slane %v3247_v62, 1 }
 0x438   : > { %12155 = vst [vmem:[#allocation48_spill] sm:$0xff] %v10528_v24  ;;  %v3261_v11 = vadd.f32 %v3260_v52, %v3259_v21  ;;  %v3535_v12 = vadd.f32 %v3534_v56, %v3533_v48  ;;  %v3557_v27 = vrot.slane %v3556_v5, 1  ;;  %v3255_v45 = vrot.slane %v3254_v4, 1  ;;  %v378_v56 = vld [vmem:[%s9409_s23 + $0xd8] sm:$0xff] }
 0x439   : > { %v10533_v13 = vmax.f32 %v12156_v42, 1e-05  ;;  %v10538_v34 = vmax.f32 %v12158_v10, 1e-05  ;;  %12160 = vst [vmem:[#allocation51_spill] sm:$0xff] %v10540_v38  ;;  %v3542_v31 = vadd.f32 %v3541_v63, %v3540_v44  ;;  %v3548_v33 = vrot.slane %v3547_v53, 2 }
 0x43a   : > { %v10544_v60 = vmul.f32 %v10540_v38, %v10540_v38  ;;  %9000 = vrsqrt.f32 %v10522_v0  ;;  %v3663_v36 = vsub.f32 %v3509_v23, %v3631_v3  ;;  %v3664_v17 = vsub.f32 %v3516_v55, %v3632_v26  ;;  %v10699_v0 = vld [vmem:[#allocation8 + $0x1a0] sm:$0xf] }
 0x43b   : > { %12157 = vst [vmem:[#allocation49_spill] sm:$0xff] %v10533_v13  ;;  %v10547_v59 = vadd.f32 %v3557_v27, %v3556_v5  ;;  %9002 = vrsqrt.f32 %v10528_v24  ;;  %v3262_v54 = vrot.slane %v3261_v11, 1  ;;  %v3536_v18 = vrot.slane %v3535_v12, 1  ;;  %v3022_v27 = vpop.permute.xlu0 %3021 }
 0x43c   : > { %12159 = vst [vmem:[#allocation50_spill] sm:$0xff] %v10538_v34  ;;  %9004 = vrsqrt.f32 %v10533_v13  ;;  %v10559_v21 = vadd.f32 %v3248_v41, %v3247_v62  ;;  %v10561_v48 = vadd.f32 %v3255_v45, %v3254_v4  ;;  %v3543_v16 = vrot.slane %v3542_v31, 1 }
 0x43d   : > { %v10563_v9 = vadd.f32 %v3548_v33, %v3547_v53  ;;  %9006 = vrsqrt.f32 %v10538_v34  ;;  %v10567_v44 = vmax.f32 %v3663_v36, 1e-05  ;;  %v10569_v30 = vmax.f32 %v3664_v17, 1e-05  ;;  %v375_v53 = vld [vmem:[%s9409_s23 + $0xc0] sm:$0xff] }
 0x43e   : > { %12161 = vst [vmem:[#allocation52_spill] sm:$0xff] %v10559_v21  ;;  %v12165_v47 = vsub.f32 %v10485_v6, %v10491_v2  ;;  %v12167_v19 = vsub.f32 %v10487_v20, %v10495_v58  ;;  %v10587_v1 = vadd.f32 %v3262_v54, %v3261_v11  ;;  %v10589_v6 = vadd.f32 %v3536_v18, %v3535_v12  ;;  %v376_v20 = vld [vmem:[%s9409_s23 + $0xc8] sm:$0xff]  ;;  %v7606_v17 = vld [vmem:[#allocation8 + $0x2e0] sm:$0xf]  ;;  %v8681_v54 = vld [vmem:[#allocation8 + $0x2ec] sm:$0xf0] }
 0x43f   : > { %12162 = vst [vmem:[#allocation53_spill] sm:$0xff] %v10561_v48  ;;  %v2947_v2 = vunpack.c.l.bf16 %v377_v8  ;;  %v2948_v63 = vunpack.c.h.bf16 %v377_v8  ;;  %v10595_v55 = vadd.f32 %v3543_v16, %v3542_v31  ;;  %v10600_v26 = vmul.f32 %v10559_v21, %v10559_v21 }
 0x440   : > { %12163 = vst [vmem:[#allocation54_spill] sm:$0xff] %v10567_v44  ;;  %v10574_v40 = vmax.f32 %v12165_v47, 1e-05  ;;  %v10579_v23 = vmax.f32 %v12167_v19, 1e-05  ;;  %v10585_v4 = vpop.eup %9000  ;;  %v10604_v5 = vmul.f32 %v10561_v48, %v10561_v48  ;;  %v2949_v41 = vunpack.c.l.bf16 %v378_v56 }
 0x441   : > { %12164 = vst [vmem:[#allocation55_spill] sm:$0xff] %v10569_v30  ;;  %v10593_v58 = vpop.eup %9002  ;;  %v2950_v11 = vunpack.c.h.bf16 %v378_v56  ;;  %v3091_v12 = vmul.f32 %v3027_v7, %v2947_v2  ;;  %v3092_v45 = vmul.f32 %v3027_v7, %v2948_v63  ;;  %v2943_v31 = vunpack.c.l.bf16 %v375_v53 }
 0x442   : > { %12166 = vst [vmem:[#allocation56_spill] sm:$0xff] %v10574_v40  ;;  %v10606_v42 = vpop.eup %9004  ;;  %v2944_v33 = vunpack.c.h.bf16 %v375_v53  ;;  %v2945_v36 = vunpack.c.l.bf16 %v376_v20  ;;  %v3093_v16 = vmul.f32 %v3027_v7, %v2949_v41  ;;  %v2946_v19 = vunpack.c.h.bf16 %v376_v20 }
 0x443   : > { %12168 = vst [vmem:[#allocation57_spill] sm:$0xff] %v10579_v23  ;;  %v10609_v18 = vpop.eup %9006  ;;  %v3094_v8 = vmul.f32 %v3027_v7, %v2950_v11  ;;  %v3379_v47 = vmul.f32 %v3091_v12, %v2947_v2  ;;  %v3380_v15 = vmul.f32 %v3092_v45, %v2948_v63  ;;  %v3087_v52 = vmul.f32 %v3022_v27, %v2943_v31 }
 0x444   : > { %12169 = vst [vmem:[#allocation58_spill] sm:$0xff] %v10585_v4  ;;  %v3088_v62 = vmul.f32 %v3022_v27, %v2944_v33  ;;  %v3089_v10 = vmul.f32 %v3022_v27, %v2945_v36  ;;  %v3381_v39 = vmul.f32 %v3093_v16, %v2949_v41  ;;  %v3090_v3 = vmul.f32 %v3022_v27, %v2946_v19 }
 0x445   : > { %12170 = vst [vmem:[#allocation59_spill] sm:$0xff] %v10587_v1  ;;  %v3382_v56 = vmul.f32 %v3094_v8, %v2950_v11  ;;  %v7607_v38 = vor.u32 %v8681_v54, %v7606_v17  ;;  %v3271_v48 = vadd.f32 %v3091_v12, %v3087_v52  ;;  %v3375_v50 = vmul.f32 %v3087_v52, %v2943_v31 }
 0x446   : > { %12171 = vst [vmem:[#allocation60_spill] sm:$0xff] %v10593_v58  ;;  %v3278_v21 = vadd.f32 %v3092_v45, %v3088_v62  ;;  %v3285_v53 = vadd.f32 %v3093_v16, %v3089_v10  ;;  %v3292_v46 = vadd.f32 %v3094_v8, %v3090_v3  ;;  %v3376_v34 = vmul.f32 %v3088_v62, %v2944_v33 }
 0x447   : > { %12172 = vst [vmem:[#allocation61_spill] sm:$0xff] %v10606_v42  ;;  %v3377_v42 = vmul.f32 %v3089_v10, %v2945_v36  ;;  %5188 = vmatpush.bf16.msrb.mxu2 %v7607_v38  ;;  %v3272_v7 = vrot.slane %v3271_v48, 4  ;;  %v3559_v63 = vadd.f32 %v3379_v47, %v3375_v50  ;;  %9008 = vrsqrt.f32 %v10567_v44 }
 0x448   : > { %12173 = vst [vmem:[#allocation62_spill] sm:$0xff] %v10609_v18  ;;  %v3378_v18 = vmul.f32 %v3090_v3, %v2946_v19  ;;  %v3279_v2 = vrot.slane %v3278_v21, 4  ;;  %v3286_v20 = vrot.slane %v3285_v53, 4  ;;  %v3293_v13 = vrot.slane %v3292_v46, 4 }
 0x449   : > { %v3566_v58 = vadd.f32 %v3380_v15, %v3376_v34  ;;  %v3573_v24 = vadd.f32 %v3381_v39, %v3377_v42  ;;  %v3273_v11 = vadd.f32 %v3272_v7, %v3271_v48  ;;  %v3560_v12 = vrot.slane %v3559_v63, 4 }
 0x44a   : > { %v3580_v41 = vadd.f32 %v3382_v56, %v3378_v18  ;;  %v3280_v27 = vadd.f32 %v3279_v2, %v3278_v21  ;;  %v3287_v17 = vadd.f32 %v3286_v20, %v3285_v53  ;;  %v3294_v45 = vadd.f32 %v3293_v13, %v3292_v46  ;;  %v3032_v56 = vpop.permute.xlu2 %3031 }
 0x44b   : > { %v3567_v54 = vrot.slane %v3566_v58, 4  ;;  %v3574_v52 = vrot.slane %v3573_v24, 4  ;;  %v3274_v62 = vrot.slane %v3273_v11, 2  ;;  %v3561_v38 = vadd.f32 %v3560_v12, %v3559_v63 }
 0x44c   : > { %v3581_v31 = vrot.slane %v3580_v41, 4  ;;  %v3281_v10 = vrot.slane %v3280_v27, 2  ;;  %v3288_v3 = vrot.slane %v3287_v17, 2  ;;  %v3295_v33 = vrot.slane %v3294_v45, 2 }
 0x44d   : > { %v3568_v36 = vadd.f32 %v3567_v54, %v3566_v58  ;;  %v3575_v16 = vadd.f32 %v3574_v52, %v3573_v24  ;;  %v3275_v8 = vadd.f32 %v3274_v62, %v3273_v11  ;;  %v3562_v39 = vrot.slane %v3561_v38, 2 }
 0x44e   : > { %v3582_v50 = vadd.f32 %v3581_v31, %v3580_v41  ;;  %v3282_v34 = vadd.f32 %v3281_v10, %v3280_v27  ;;  %v3289_v15 = vadd.f32 %v3288_v3, %v3287_v17  ;;  %v3296_v48 = vadd.f32 %v3295_v33, %v3294_v45 }
 0x44f   : > { %v3569_v21 = vrot.slane %v3568_v36, 2  ;;  %v3576_v42 = vrot.slane %v3575_v16, 2  ;;  %v3276_v46 = vrot.slane %v3275_v8, 1  ;;  %v3563_v19 = vadd.f32 %v3562_v39, %v3561_v38 }
 0x450   : > { %v3583_v18 = vrot.slane %v3582_v50, 2  ;;  %v3283_v13 = vrot.slane %v3282_v34, 1  ;;  %v3290_v47 = vrot.slane %v3289_v15, 1  ;;  %v3297_v53 = vrot.slane %v3296_v48, 1 }
 0x451   : > { %v3570_v7 = vadd.f32 %v3569_v21, %v3568_v36  ;;  %v3577_v2 = vadd.f32 %v3576_v42, %v3575_v16  ;;  %v10611_v58 = vadd.f32 %v3276_v46, %v3275_v8  ;;  %v3564_v41 = vrot.slane %v3563_v19, 1  ;;  %v8617_v21 = vld [vmem:[#allocation8 + $0xec] sm:$0xf0]  ;;  %v7478_v42 = vld [vmem:[#allocation8 + $0x1e0] sm:$0xf] }
 0x452   : > { %v3584_v20 = vadd.f32 %v3583_v18, %v3582_v50  ;;  %v10613_v24 = vadd.f32 %v3283_v13, %v3282_v34  ;;  %v10615_v63 = vadd.f32 %v3290_v47, %v3289_v15  ;;  %v10617_v11 = vadd.f32 %v3297_v53, %v3296_v48  ;;  %v7734_v50 = vld [vmem:[#allocation8 + $0x3e0] sm:$0xf]  ;;  %v8649_v18 = vld [vmem:[#allocation8 + $0x1ec] sm:$0xf0] }
 0x453   : > { %12174 = vst [vmem:[#allocation63_spill] sm:$0xff] %v10611_v58  ;;  %v3571_v27 = vrot.slane %v3570_v7, 1  ;;  %v3578_v17 = vrot.slane %v3577_v2, 1  ;;  %v12178_v45 = vrot.slane %v10563_v9, 1  ;;  %v10626_v52 = vmul.f32 %v10587_v1, %v10587_v1  ;;  %v8613_v53 = vld [vmem:[#allocation8 + $0xcc] sm:$0xf0] }
 0x454   : > { %12175 = vst [vmem:[#allocation64_spill] sm:$0xff] %v10613_v24  ;;  %v3585_v12 = vrot.slane %v3584_v20, 1  ;;  %v3667_v31 = vsub.f32 %v10589_v6, %v10600_v26  ;;  %v12179_v62 = vunpack.c.l.bf16 %v10554_v43  ;;  %v12180_v3 = vunpack.c.h.bf16 %v10554_v43  ;;  %v8713_v6 = vld [vmem:[#allocation8 + $0x3ec] sm:$0xf0]  ;;  %v7350_v26 = vld [vmem:[#allocation8 + $0xe0] sm:$0xf] }
 0x455   : > { %12176 = vst [vmem:[#allocation65_spill] sm:$0xff] %v10615_v63  ;;  %v10622_v54 = vadd.f32 %v12178_v45, %v10563_v9  ;;  %v12181_v33 = vunpack.c.l.bf16 %v10557_v49  ;;  %v10646_v16 = vmul.f32 %v10617_v11, %v10617_v11  ;;  %v12182_v8 = vunpack.c.h.bf16 %v10557_v49  ;;  %v7718_v45 = vld [vmem:[#allocation8 + $0x3c0] sm:$0xf] }
 0x456   : > { %12177 = vst [vmem:[#allocation66_spill] sm:$0xff] %v10617_v11  ;;  %v10632_v10 = vmul.f32 %v3032_v56, %v12179_v62  ;;  %v10636_v38 = vmul.f32 %v3032_v56, %v12180_v3  ;;  %v10642_v9 = vadd.f32 %v3585_v12, %v3584_v20  ;;  %v10652_v15 = vadd.f32 %v3564_v41, %v3563_v19  ;;  %v7590_v20 = vld [vmem:[#allocation8 + $0x2c0] sm:$0xf]  ;;  %v8677_v12 = vld [vmem:[#allocation8 + $0x2cc] sm:$0xf0] }
 0x457   : > { %v10640_v36 = vmul.f32 %v3032_v56, %v12181_v33  ;;  %v10650_v34 = vmul.f32 %v3032_v56, %v12182_v8  ;;  %v10656_v39 = vmul.f32 %v10611_v58, %v10611_v58  ;;  %v10660_v48 = vmul.f32 %v10613_v24, %v10613_v24  ;;  %v7334_v56 = vld [vmem:[#allocation8 + $0xc0] sm:$0xf]  ;;  %v8709_v62 = vld [vmem:[#allocation8 + $0x3cc] sm:$0xf0] }
 0x458   : > { %v10662_v46 = vadd.f32 %v3571_v27, %v3570_v7  ;;  %v10664_v13 = vadd.f32 %v3578_v17, %v3577_v2  ;;  %v10668_v47 = vmul.f32 %v10615_v63, %v10615_v63  ;;  %v10674_v41 = vmul.f32 %v10341_v57, %v10222_v51  ;;  %v7462_v27 = vld [vmem:[#allocation8 + $0x1c0] sm:$0xf]  ;;  %v8645_v17 = vld [vmem:[#allocation8 + $0x1cc] sm:$0xf0]  ;;  %v382_v63 = vld [vmem:[%s9409_s23 + $0xf8] sm:$0xff]  ;;  %v3037_v57 = vpop.permute.xlu0 %3036 }
 0x459   : > { %v3668_v7 = vsub.f32 %v10595_v55, %v10604_v5  ;;  %v10681_v3 = vmax.f32 %v3667_v31, 1e-05  ;;  %v12185_v33 = vunpack.c.l.bf16 %v10554_v43  ;;  %v12186_v19 = vunpack.c.h.bf16 %v10554_v43  ;;  %v381_v2 = vld [vmem:[%s9409_s23 + $0xf0] sm:$0xff]  ;;  %v10694_v24 = vld [vmem:[#allocation8 + $0xa0] sm:$0xf]  ;;  %s9181_s23 = scalar_lea.hbm %s11894_s7, 64 }
 0x45a   : > { %12183 = vst [vmem:[#allocation67_spill] sm:$0xff] %v10674_v41  ;;  %v12187_v55 = vunpack.c.l.bf16 %v10557_v49  ;;  %v12188_v58 = vunpack.c.h.bf16 %v10557_v49  ;;  %v7735_v1 = vor.u32 %v8713_v6, %v7734_v50  ;;  %v7351_v44 = vor.u32 %v8617_v21, %v7350_v26  ;;  %v10701_v43 = vld [vmem:[#allocation8 + $0x1ac] sm:$0xf0]  ;;  %v7702_v6 = vld [vmem:[#allocation8 + $0x3a0] sm:$0xf]  ;;  %p9183_p9 = scmp.lt.s32.totalorder %s9181_s23, %s9177_s28 }
 0x45b   : > { %12184 = vst [vmem:[#allocation68_spill] sm:$0xff] %v10681_v3  ;;  %v3383_v8 = vmul.f32 %v10632_v10, %v12185_v33  ;;  %v3384_v11 = vmul.f32 %v10636_v38, %v12186_v19  ;;  %v7479_v4 = vor.u32 %v8649_v18, %v7478_v42  ;;  %v8609_v33 = vld [vmem:[#allocation8 + $0xac] sm:$0xf0]  ;;  %v7591_v49 = vor.u32 %v8677_v12, %v7590_v20  ;;  %v10710_v12 = vpop.eup %9008 }
 0x45c   : > { %v3385_v5 = vmul.f32 %v10640_v36, %v12187_v55  ;;  %v3386_v31 = vmul.f32 %v10650_v34, %v12188_v58  ;;  %v7574_v58 = vld [vmem:[#allocation8 + $0x2a0] sm:$0xf]  ;;  %v8673_v50 = vld [vmem:[#allocation8 + $0x2ac] sm:$0xf0]  ;;  %5201 = vmatpush.bf16.msrb.mxu3 %v7735_v1  ;;  %5162 = vmatpush.bf16.msrb.mxu0 %v7351_v44  ;;  %v7335_v26 = vor.u32 %v8613_v53, %v7334_v56  ;;  %v2955_v42 = vunpack.c.l.bf16 %v381_v2  ;;  %p9184_p2 = por %p9183_p9, %p9182_p11 }
 0x45d   : > { %v7719_v21 = vor.u32 %v8709_v62, %v7718_v45  ;;  %v2956_v18 = vunpack.c.h.bf16 %v381_v2  ;;  %v8705_v41 = vld [vmem:[#allocation8 + $0x3ac] sm:$0xf0]  ;;  %5175 = vmatpush.bf16.msrb.mxu1 %v7479_v4  ;;  %v7463_v3 = vor.u32 %v8645_v17, %v7462_v27  ;;  %5189 = vmatpush.bf16.msrb.mxu2 %v7591_v49  ;;  %v2957_v55 = vunpack.c.l.bf16 %v382_v63  ;;  %12189 = vst [vmem:[#allocation69_spill] sm:$0xff] %v10710_v12  ;;  %v11008_v12 = vld [vmem:[#allocation8 + $0x64] sm:$0xf] }
 0x45e   : > { %v8605_v19 = vld [vmem:[#allocation8 + $0x8c] sm:$0xf0]  ;;  %v2958_v22 = vunpack.c.h.bf16 %v382_v63  ;;  %v7319_v20 = vor.u32 %v8609_v33, %v10694_v24  ;;  %v3099_v51 = vmul.f32 %v3037_v57, %v2955_v42  ;;  %v7447_v44 = vor.u32 %v10701_v43, %v10699_v0  ;;  %p9185_p10 = pnand %p9184_p2, %p9180_p8 }
 0x45f   : > { %v3100_v37 = vmul.f32 %v3037_v57, %v2956_v18  ;;  %v7575_v1 = vor.u32 %v8673_v50, %v7574_v58  ;;  %v3101_v56 = vmul.f32 %v3037_v57, %v2957_v55  ;;  %v7703_v2 = vor.u32 %v8705_v41, %v7702_v6 }
 0x460   : > { %v3102_v53 = vmul.f32 %v3037_v57, %v2958_v22  ;;  %v7303_v45 = vor.u32 %v8605_v19, %v7302_v14  ;;  %v10714_v62 = vmax.f32 %v3668_v7, 1e-05  ;;  %5163 = vmatpush.bf16.msrb.mxu0 %v7335_v26  ;;  %5202 = vmatpush.bf16.msrb.mxu3 %v7719_v21  ;;  %v3299_v4 = vadd.f32 %v3099_v51, %v10632_v10 }
 0x461   : > { %v3306_v24 = vadd.f32 %v3100_v37, %v10636_v38  ;;  %v3387_v63 = vmul.f32 %v3099_v51, %v2955_v42  ;;  %5176 = vmatpush.bf16.msrb.mxu1 %v7463_v3  ;;  %v3313_v27 = vadd.f32 %v3101_v56, %v10640_v36  ;;  %v3388_v0 = vmul.f32 %v3100_v37, %v2956_v18 }
 0x462   : > { %12190 = vst [vmem:[#allocation70_spill] sm:$0xff] %v10714_v62  ;;  %v3320_v17 = vadd.f32 %v3102_v53, %v10650_v34  ;;  %v3389_v33 = vmul.f32 %v3101_v56, %v2957_v55  ;;  %v3300_v43 = vrot.slane %v3299_v4, 4  ;;  %v3390_v41 = vmul.f32 %v3102_v53, %v2958_v22  ;;  %5190 = vmatpush.bf16.msrb.mxu2 %v7575_v1 }
 0x463   : > { %v3307_v57 = vrot.slane %v3306_v24, 4  ;;  %v3587_v14 = vadd.f32 %v3387_v63, %v3383_v8  ;;  %v3314_v7 = vrot.slane %v3313_v27, 4  ;;  %v3594_v49 = vadd.f32 %v3388_v0, %v3384_v11 }
 0x464   : > { %v3321_v19 = vrot.slane %v3320_v17, 4  ;;  %v3601_v58 = vadd.f32 %v3389_v33, %v3385_v5  ;;  %v3301_v10 = vadd.f32 %v3300_v43, %v3299_v4  ;;  %v3608_v51 = vadd.f32 %v3390_v41, %v3386_v31  ;;  %5164 = vmatpush.bf16.msrb.mxu0 %v7319_v20  ;;  %5203 = vmatpush.bf16.msrb.mxu3 %v7703_v2 }
 0x465   : > { %v3308_v50 = vadd.f32 %v3307_v57, %v3306_v24  ;;  %v3588_v38 = vrot.slane %v3587_v14, 4  ;;  %v3315_v36 = vadd.f32 %v3314_v7, %v3313_v27  ;;  %v3595_v34 = vrot.slane %v3594_v49, 4  ;;  %5177 = vmatpush.bf16.msrb.mxu1 %v7447_v44 }
 0x466   : > { %v3322_v3 = vadd.f32 %v3321_v19, %v3320_v17  ;;  %v3602_v37 = vrot.slane %v3601_v58, 4  ;;  %v3302_v55 = vrot.slane %v3301_v10, 2  ;;  %v3609_v8 = vrot.slane %v3608_v51, 4 }
 0x467   : > { %v3309_v6 = vrot.slane %v3308_v50, 2  ;;  %v3589_v22 = vadd.f32 %v3588_v38, %v3587_v14  ;;  %v3316_v26 = vrot.slane %v3315_v36, 2  ;;  %v3596_v42 = vadd.f32 %v3595_v34, %v3594_v49 }
 0x468   : > { %v3323_v21 = vrot.slane %v3322_v3, 2  ;;  %v3603_v11 = vadd.f32 %v3602_v37, %v3601_v58  ;;  %v3303_v5 = vadd.f32 %v3302_v55, %v3301_v10  ;;  %v3610_v56 = vadd.f32 %v3609_v8, %v3608_v51  ;;  %5165 = vmatpush.bf16.msrb.mxu0 %v7303_v45  ;;  %v8637_v37 = vld [vmem:[#allocation8 + $0x18c] sm:$0xf0]  ;;  %v7558_v55 = vld [vmem:[#allocation8 + $0x280] sm:$0xf] }
 0x469   : > { %v3310_v18 = vadd.f32 %v3309_v6, %v3308_v50  ;;  %v3590_v1 = vrot.slane %v3589_v22, 2  ;;  %v3317_v31 = vadd.f32 %v3316_v26, %v3315_v36  ;;  %v3597_v53 = vrot.slane %v3596_v42, 2  ;;  %v8701_v8 = vld [vmem:[#allocation8 + $0x38c] sm:$0xf0]  ;;  %v7286_v26 = vld [vmem:[#allocation8 + $0x60] sm:$0xf] }
 0x46a   : > { %v3324_v20 = vadd.f32 %v3323_v21, %v3322_v3  ;;  %v3604_v2 = vrot.slane %v3603_v11, 2  ;;  %v3304_v4 = vrot.slane %v3303_v5, 1  ;;  %v3611_v63 = vrot.slane %v3610_v56, 2  ;;  %v8601_v21 = vld [vmem:[#allocation8 + $0x6c] sm:$0xf0] }
 0x46b   : > { %v3311_v24 = vrot.slane %v3310_v18, 1  ;;  %v3591_v44 = vadd.f32 %v3590_v1, %v3589_v22  ;;  %v3318_v27 = vrot.slane %v3317_v31, 1  ;;  %v3598_v0 = vadd.f32 %v3597_v53, %v3596_v42  ;;  %v10783_v53 = vld [vmem:[#allocation8 + $0x260] sm:$0xf] }
 0x46c   : > { %v3325_v17 = vrot.slane %v3324_v20, 1  ;;  %v3605_v33 = vadd.f32 %v3604_v2, %v3603_v11  ;;  %v10720_v43 = vadd.f32 %v3304_v4, %v3303_v5  ;;  %v3612_v14 = vadd.f32 %v3611_v63, %v3610_v56  ;;  %v10797_v2 = vld [vmem:[#allocation8 + $0x26c] sm:$0xf0]  ;;  %v10799_v4 = vld [vmem:[#allocation8 + $0x360] sm:$0xf]  ;;  %v12210_v63 = vld [vmem:[#allocation24_spill] sm:$0xff] }
 0x46d   : > { %v10722_v57 = vadd.f32 %v3311_v24, %v3310_v18  ;;  %v3592_v41 = vrot.slane %v3591_v44, 1  ;;  %v10724_v7 = vadd.f32 %v3318_v27, %v3317_v31  ;;  %v3599_v19 = vrot.slane %v3598_v0, 1  ;;  %v10779_v31 = vld [vmem:[#allocation8 + $0x160] sm:$0xf] }
 0x46e   : > { %12191 = vst [vmem:[#allocation71_spill] sm:$0xff] %v10720_v43  ;;  %v10726_v45 = vadd.f32 %v3325_v17, %v3324_v20  ;;  %v3606_v49 = vrot.slane %v3605_v33, 1  ;;  %9010 = vrsqrt.f32 %v10569_v30  ;;  %v12195_v58 = vsub.f32 %v10622_v54, %v10626_v52  ;;  %v7430_v52 = vld [vmem:[#allocation8 + $0x180] sm:$0xf]  ;;  %v10781_v20 = vld [vmem:[#allocation8 + $0x16c] sm:$0xf0] }
 0x46f   : > { %12192 = vst [vmem:[#allocation72_spill] sm:$0xff] %v10722_v57  ;;  %v12197_v50 = vsub.f32 %v10547_v59, %v10544_v60  ;;  %v3613_v51 = vrot.slane %v3612_v14, 1  ;;  %9012 = vrsqrt.f32 %v10574_v40  ;;  %v12199_v36 = vsub.f32 %v10652_v15, %v10656_v39  ;;  %v8669_v60 = vld [vmem:[#allocation8 + $0x28c] sm:$0xf0]  ;;  %v7686_v39 = vld [vmem:[#allocation8 + $0x380] sm:$0xf] }
 0x470   : > { %12193 = vst [vmem:[#allocation73_spill] sm:$0xff] %v10724_v7  ;;  %v10732_v10 = vmax.f32 %v12195_v58, 1e-05  ;;  %v10745_v34 = vadd.f32 %v3592_v41, %v3591_v44  ;;  %v10749_v54 = vmul.f32 %v10726_v45, %v10726_v45  ;;  %v10751_v59 = vadd.f32 %v3599_v19, %v3598_v0  ;;  %v12211_v27 = vld [vmem:[#allocation39_spill] sm:$0xff]  ;;  %v10814_v17 = vld [vmem:[#allocation8 + $0x36c] sm:$0xf0] }
 0x471   : > { %12194 = vst [vmem:[#allocation74_spill] sm:$0xff] %v10726_v45  ;;  %v10737_v38 = vmax.f32 %v12197_v50, 1e-05  ;;  %v10743_v3 = vmax.f32 %v12199_v36, 1e-05  ;;  %v10753_v6 = vadd.f32 %v3613_v51, %v3612_v14  ;;  %v10757_v22 = vmul.f32 %v10720_v43, %v10720_v43 }
 0x472   : > { %12196 = vst [vmem:[#allocation75_spill] sm:$0xff] %v10732_v10  ;;  %v10761_v15 = vmul.f32 %v10722_v57, %v10722_v57  ;;  %v12201_v42 = vsub.f32 %v10662_v46, %v10660_v48  ;;  %v12203_v5 = vsub.f32 %v10664_v13, %v10668_v47  ;;  %v10773_v1 = vadd.f32 %v3606_v49, %v3605_v33  ;;  %v10816_v0 = vld [vmem:[#allocation8 + $0x40] sm:$0xf]  ;;  %v10818_v33 = vld [vmem:[#allocation8 + $0x4c] sm:$0xf0]  ;;  %v12216_v57 = vld [vmem:[#allocation40_spill] sm:$0xff] }
 0x473   : > { %12198 = vst [vmem:[#allocation76_spill] sm:$0xff] %v10737_v38  ;;  %v10777_v56 = vmul.f32 %v10724_v7, %v10724_v7  ;;  %v10787_v48 = vmul.f32 %v10346_v35, %v10232_v61  ;;  %9014 = vrsqrt.f32 %v10579_v23  ;;  %v12206_v46 = vsub.f32 %v10642_v9, %v10646_v16  ;;  %v12212_v16 = vld [vmem:[#allocation68_spill] sm:$0xff]  ;;  %v10826_v50 = vld [vmem:[#allocation8 + $0x140] sm:$0xf]  ;;  %v10828_v51 = vld [vmem:[#allocation8 + $0x14c] sm:$0xf0] }
 0x474   : > { %12200 = vst [vmem:[#allocation77_spill] sm:$0xff] %v10743_v3  ;;  %v10766_v11 = vmax.f32 %v12201_v42, 1e-05  ;;  %v10771_v18 = vmax.f32 %v12203_v5, 1e-05  ;;  %v10803_v24 = vmul.f32 %v10350_v25, %v10237_v32  ;;  %v10807_v44 = vmul.f32 %v10356_v28, %v10242_v29  ;;  %v10820_v41 = vpop.eup %9010  ;;  %v12215_v7 = vld [vmem:[#allocation26_spill] sm:$0xff] }
 0x475   : > { %12205 = vst [vmem:[#allocation80_spill] sm:$0xff] %v10787_v48  ;;  %v10793_v13 = vmax.f32 %v12206_v46, 1e-05  ;;  %v10811_v9 = vmul.f32 %v12211_v27, %v12210_v63  ;;  %9016 = vrsqrt.f32 %v12212_v16  ;;  %v3675_v14 = vsub.f32 %v10745_v34, %v10757_v22  ;;  %v10830_v36 = vld [vmem:[#allocation8 + $0x240] sm:$0xf]  ;;  %v10838_v47 = vpop.eup %9012 }
 0x476   : > { %12202 = vst [vmem:[#allocation78_spill] sm:$0xff] %v10766_v11  ;;  %v3676_v19 = vsub.f32 %v10751_v59, %v10761_v15  ;;  %v7431_v49 = vor.u32 %v8637_v37, %v7430_v52  ;;  %v7559_v58 = vor.u32 %v8669_v60, %v7558_v55  ;;  %v10832_v42 = vld [vmem:[#allocation8 + $0x24c] sm:$0xf0]  ;;  %v10834_v5 = vld [vmem:[#allocation8 + $0x340] sm:$0xf]  ;;  %9018 = vrsqrt.f32 %v10714_v62 }
 0x477   : > { %12204 = vst [vmem:[#allocation79_spill] sm:$0xff] %v10771_v18  ;;  %v10836_v46 = vld [vmem:[#allocation8 + $0x34c] sm:$0xf0]  ;;  %v3677_v34 = vsub.f32 %v10773_v1, %v10777_v56  ;;  %v7687_v52 = vor.u32 %v8701_v8, %v7686_v39  ;;  %v7287_v37 = vor.u32 %v8601_v21, %v7286_v26  ;;  %v10843_v55 = vld [vmem:[#allocation8 + $0x20] sm:$0xf]  ;;  %v10857_v43 = vmul.f32 %v12216_v57, %v12215_v7 }
 0x478   : > { %12207 = vst [vmem:[#allocation81_spill] sm:$0xff] %v10793_v13  ;;  %v10845_v60 = vld [vmem:[#allocation8 + $0x2c] sm:$0xf0]  ;;  %v10847_v59 = vld [vmem:[#allocation8 + $0x120] sm:$0xf]  ;;  %9020 = vrsqrt.f32 %v10732_v10  ;;  %5178 = vmatpush.bf16.msrb.mxu1 %v7431_v49  ;;  %5191 = vmatpush.bf16.msrb.mxu2 %v7559_v58  ;;  %v7415_v39 = vor.u32 %v10781_v20, %v10779_v31  ;;  %v7543_v8 = vor.u32 %v10797_v2, %v10783_v53 }
 0x479   : > { %12208 = vst [vmem:[#allocation82_spill] sm:$0xff] %v10803_v24  ;;  %v10849_v22 = vld [vmem:[#allocation8 + $0x12c] sm:$0xf0]  ;;  %v10851_v15 = vld [vmem:[#allocation8 + $0x220] sm:$0xf]  ;;  %9022 = vrsqrt.f32 %v10737_v38  ;;  %5204 = vmatpush.bf16.msrb.mxu3 %v7687_v52  ;;  %5166 = vmatpush.bf16.msrb.mxu0 %v7287_v37  ;;  %v7671_v31 = vor.u32 %v10814_v17, %v10799_v4  ;;  %v7271_v20 = vor.u32 %v10818_v33, %v10816_v0  ;;  %v10901_v4 = vpop.eup %9014  ;;  %v12232_v17 = vld [vmem:[#allocation36_spill] sm:$0xff] }
 0x47a   : > { %12209 = vst [vmem:[#allocation83_spill] sm:$0xff] %v10807_v44  ;;  %v10853_v45 = vld [vmem:[#allocation8 + $0x22c] sm:$0xf0]  ;;  %v10864_v26 = vld [vmem:[#allocation8 + $0x320] sm:$0xf]  ;;  %v12233_v0 = vld [vmem:[#allocation44_spill] sm:$0xff]  ;;  %9024 = vrsqrt.f32 %v10743_v3  ;;  %v7527_v24 = vor.u32 %v10832_v42, %v10830_v36  ;;  %v7255_v36 = vor.u32 %v10845_v60, %v10843_v55 }
 0x47b   : > { %12213 = vst [vmem:[#allocation39_spill] sm:$0xff] %v10820_v41  ;;  %v10866_v21 = vld [vmem:[#allocation8 + $0x32c] sm:$0xf0]  ;;  %v10868_v1 = vld [vmem:[#allocation8] sm:$0xf]  ;;  %v10905_v33 = vmul.f32 %v12233_v0, %v12232_v17  ;;  %9026 = vrsqrt.f32 %v10766_v11 }
 0x47c   : > { %12214 = vst [vmem:[#allocation84_spill] sm:$0xff] %v10838_v47  ;;  %v10870_v56 = vld [vmem:[#allocation8 + $0xc] sm:$0xf0]  ;;  %v10872_v23 = vld [vmem:[#allocation8 + $0x100] sm:$0xf]  ;;  %5179 = vmatpush.bf16.msrb.mxu1 %v7415_v39  ;;  %5192 = vmatpush.bf16.msrb.mxu2 %v7543_v8  ;;  %9028 = vrsqrt.f32 %v10771_v18 }
 0x47d   : > { %12217 = vst [vmem:[#allocation85_spill] sm:$0xff] %v10857_v43  ;;  %v10874_v29 = vld [vmem:[#allocation8 + $0x10c] sm:$0xf0]  ;;  %v12220_v49 = vld [vmem:[#allocation35_spill] sm:$0xff]  ;;  %v10895_v47 = vld [vmem:[#allocation8 + $0xf0] sm:$0xf0]  ;;  %5205 = vmatpush.bf16.msrb.mxu3 %v7671_v31  ;;  %5167 = vmatpush.bf16.msrb.mxu0 %v7271_v20 }
 0x47e   : > { %12218 = vst [vmem:[#allocation86_spill] sm:$0xff] %v10872_v23  ;;  %v12221_v58 = vld [vmem:[#allocation43_spill] sm:$0xff]  ;;  %v10887_v2 = vld [vmem:[#allocation8 + $0x20c] sm:$0xf0]  ;;  %v10899_v37 = vld [vmem:[#allocation8 + $0x1f0] sm:$0xf0] }
 0x47f   : > { %12219 = vst [vmem:[#allocation87_spill] sm:$0xff] %v10874_v29  ;;  %v10878_v13 = vmul.f32 %v12221_v58, %v12220_v49  ;;  %v10885_v53 = vld [vmem:[#allocation8 + $0x200] sm:$0xf]  ;;  %v10891_v44 = vld [vmem:[#allocation8 + $0x30c] sm:$0xf0] }
 0x480   : > { %12223 = vst [vmem:[#allocation89_spill] sm:$0xff] %v10885_v53  ;;  %v10889_v28 = vld [vmem:[#allocation8 + $0x300] sm:$0xf]  ;;  %v10893_v10 = vld [vmem:[#allocation8 + $0xe4] sm:$0xf]  ;;  %5193 = vmatpush.bf16.msrb.mxu2 %v7527_v24  ;;  %v12254_v24 = vor.u32 %v10836_v46, %v10834_v5  ;;  %v12265_v5 = vor.u32 %v10849_v22, %v10847_v59  ;;  %v12266_v46 = vor.u32 %v10853_v45, %v10851_v15 }
 0x481   : > { %12222 = vst [vmem:[#allocation88_spill] sm:$0xff] %v10878_v13  ;;  %v10897_v52 = vld [vmem:[#allocation8 + $0x1e4] sm:$0xf]  ;;  %v10908_v38 = vmax.f32 %v3675_v14, 1e-05  ;;  %v10928_v14 = vpop.eup %9016  ;;  %5168 = vmatpush.bf16.msrb.mxu0 %v7255_v36  ;;  %v12271_v45 = vor.u32 %v10866_v21, %v10864_v26  ;;  %v12272_v22 = vor.u32 %v10870_v56, %v10868_v1  ;;  %v3761_v26 = vmul.f32 %v12211_v27, %v10811_v9 }
 0x482   : > { %12224 = vst [vmem:[#allocation90_spill] sm:$0xff] %v10887_v2  ;;  %v10910_v40 = vmax.f32 %v3676_v19, 1e-05  ;;  %v10912_v49 = vld [vmem:[#allocation8 + $0x2e4] sm:$0xf]  ;;  %v10973_v8 = vpop.eup %9018  ;;  %5206 = vmatpush.bf16.msrb.mxu3 %v12254_v24 }
 0x483   : > { %12225 = vst [vmem:[#allocation91_spill] sm:$0xff] %v10889_v28  ;;  %v10914_v32 = vld [vmem:[#allocation8 + $0x2f0] sm:$0xf0]  ;;  %v10916_v58 = vld [vmem:[#allocation8 + $0x3e4] sm:$0xf]  ;;  %v10998_v60 = vpop.eup %9020  ;;  %9030 = vrsqrt.f32 %v10908_v38 }
 0x484   : > { %12226 = vst [vmem:[#allocation92_spill] sm:$0xff] %v10891_v44  ;;  %v10918_v13 = vld [vmem:[#allocation8 + $0x3f0] sm:$0xf0]  ;;  %v10920_v25 = vld [vmem:[#allocation8 + $0xc4] sm:$0xf]  ;;  %9032 = vrsqrt.f32 %v10910_v40  ;;  %5194 = vmatpush.bf16.msrb.mxu2 %v12266_v46 }
 0x485   : > { %12227 = vst [vmem:[#allocation93_spill] sm:$0xff] %v10893_v10  ;;  %v10924_v17 = vld [vmem:[#allocation8 + $0x1c4] sm:$0xf]  ;;  %v10926_v0 = vld [vmem:[#allocation8 + $0x1d0] sm:$0xf0]  ;;  %5169 = vmatpush.bf16.msrb.mxu0 %v12272_v22  ;;  %v3762_v22 = vmul.f32 0.5, %v3761_v26 }
 0x486   : > { %12228 = vst [vmem:[#allocation94_spill] sm:$0xff] %v10895_v47  ;;  %v10930_v19 = vmax.f32 %v3677_v34, 1e-05  ;;  %v10938_v41 = vld [vmem:[#allocation8 + $0x2c4] sm:$0xf]  ;;  %5207 = vmatpush.bf16.msrb.mxu3 %v12271_v45  ;;  %v12287_v26 = vld [vmem:[#allocation58_spill] sm:$0xff] }
 0x487   : > { %12229 = vst [vmem:[#allocation95_spill] sm:$0xff] %v10897_v52  ;;  %v10940_v30 = vld [vmem:[#allocation8 + $0x2d0] sm:$0xf0]  ;;  %v10942_v7 = vld [vmem:[#allocation8 + $0x3c4] sm:$0xf] }
 0x488   : > { %12230 = vst [vmem:[#allocation96_spill] sm:$0xff] %v10899_v37  ;;  %v10944_v61 = vld [vmem:[#allocation8 + $0x3d0] sm:$0xf0]  ;;  %v10946_v57 = vld [vmem:[#allocation8 + $0xa4] sm:$0xf]  ;;  %9034 = vrsqrt.f32 %v10930_v19 }
 0x489   : > { %12231 = vst [vmem:[#allocation97_spill] sm:$0xff] %v10901_v4  ;;  %v10922_v4 = vld [vmem:[#allocation8 + $0xd0] sm:$0xf0]  ;;  %v10961_v43 = vld [vmem:[#allocation8 + $0x1a4] sm:$0xf] }
 0x48a   : > { %12234 = vst [vmem:[#allocation98_spill] sm:$0xff] %v10905_v33  ;;  %v7399_v33 = vor.u32 %v10828_v51, %v10826_v50  ;;  %v10948_v34 = vld [vmem:[#allocation8 + $0xb0] sm:$0xf0]  ;;  %v12241_v50 = vsub.f32 %v10753_v6, %v10749_v54  ;;  %v10965_v48 = vld [vmem:[#allocation8 + $0x2a4] sm:$0xf] }
 0x48b   : > { %12235 = vst [vmem:[#allocation99_spill] sm:$0xff] %v10908_v38  ;;  %v10963_v35 = vld [vmem:[#allocation8 + $0x1b0] sm:$0xf0]  ;;  %v10969_v6 = vld [vmem:[#allocation8 + $0x3a4] sm:$0xf] }
 0x48c   : > { %12236 = vst [vmem:[#allocation100_spill] sm:$0xff] %v10910_v40  ;;  %v10953_v51 = vmax.f32 %v12241_v50, 1e-05  ;;  %v10967_v54 = vld [vmem:[#allocation8 + $0x2b0] sm:$0xf0]  ;;  %5180 = vmatpush.bf16.msrb.mxu1 %v7399_v33  ;;  %v12269_v40 = vld [vmem:[#allocation67_spill] sm:$0xff] }
 0x48d   : > { %12237 = vst [vmem:[#allocation101_spill] sm:$0xff] %v10924_v17  ;;  %v10971_v39 = vld [vmem:[#allocation8 + $0x3b0] sm:$0xf0]  ;;  %v10982_v62 = vld [vmem:[#allocation8 + $0x84] sm:$0xf]  ;;  %v12275_v1 = vld [vmem:[#allocation94_spill] sm:$0xff] }
 0x48e   : > { %12238 = vst [vmem:[#allocation102_spill] sm:$0xff] %v10926_v0  ;;  %v10984_v42 = vld [vmem:[#allocation8 + $0x90] sm:$0xf0]  ;;  %v10990_v11 = vld [vmem:[#allocation8 + $0x284] sm:$0xf] }
 0x48f   : > { %12239 = vst [vmem:[#allocation103_spill] sm:$0xff] %v10928_v14  ;;  %v10992_v31 = vld [vmem:[#allocation8 + $0x290] sm:$0xf0]  ;;  %v10994_v20 = vld [vmem:[#allocation8 + $0x384] sm:$0xf]  ;;  %v11024_v14 = vpop.eup %9022 }
 0x490   : > { %12240 = vst [vmem:[#allocation104_spill] sm:$0xff] %v10930_v19  ;;  %v10996_v55 = vld [vmem:[#allocation8 + $0x390] sm:$0xf0]  ;;  %v11012_v23 = vld [vmem:[#allocation8 + $0x164] sm:$0xf]  ;;  %5181 = vmatpush.bf16.msrb.mxu1 %v12265_v5  ;;  %v12278_v5 = vld [vmem:[#allocation16_spill] sm:$0xff] }
 0x491   : > { %12242 = vst [vmem:[#allocation105_spill] sm:$0xff] %v10953_v51  ;;  %v10986_v51 = vld [vmem:[#allocation8 + $0x184] sm:$0xf]  ;;  %v11010_v63 = vld [vmem:[#allocation8 + $0x70] sm:$0xf0]  ;;  %vm3814_vm8 = vcmp.eq.f32.partialorder %v12278_v5, inf }
 0x492   : > { %12243 = vst [vmem:[#allocation106_spill] sm:$0xff] %v10973_v8  ;;  %v10988_v8 = vld [vmem:[#allocation8 + $0x190] sm:$0xf0]  ;;  %v11020_v53 = vld [vmem:[#allocation8 + $0x364] sm:$0xf]  ;;  %vm3816_vm9 = vcmp.eq.f32.partialorder %v12278_v5, 0.0 }
 0x493   : > { %12244 = vst [vmem:[#allocation107_spill] sm:$0xff] %v10992_v31  ;;  %v11014_v29 = vld [vmem:[#allocation8 + $0x170] sm:$0xf0]  ;;  %v11034_v44 = vld [vmem:[#allocation8 + $0x44] sm:$0xf] }
 0x494   : > { %12245 = vst [vmem:[#allocation108_spill] sm:$0xff] %v10994_v20  ;;  %v11018_v50 = vld [vmem:[#allocation8 + $0x270] sm:$0xf0]  ;;  %v11038_v47 = vld [vmem:[#allocation8 + $0x144] sm:$0xf] }
 0x495   : > { %12246 = vst [vmem:[#allocation109_spill] sm:$0xff] %v10996_v55  ;;  %v11022_v3 = vld [vmem:[#allocation8 + $0x370] sm:$0xf0]  ;;  %v11051_v16 = vld [vmem:[#allocation8 + $0x244] sm:$0xf] }
 0x496   : > { %12247 = vst [vmem:[#allocation110_spill] sm:$0xff] %v10998_v60  ;;  %v11016_v60 = vld [vmem:[#allocation8 + $0x264] sm:$0xf]  ;;  %v11036_v2 = vld [vmem:[#allocation8 + $0x50] sm:$0xf0] }
 0x497   : > { %12248 = vst [vmem:[#allocation111_spill] sm:$0xff] %v11018_v50  ;;  %v11040_v10 = vld [vmem:[#allocation8 + $0x150] sm:$0xf0]  ;;  %v11055_v17 = vld [vmem:[#allocation8 + $0x344] sm:$0xf] }
 0x498   : > { %12249 = vst [vmem:[#allocation112_spill] sm:$0xff] %v11020_v53  ;;  %v11053_v0 = vld [vmem:[#allocation8 + $0x250] sm:$0xf0]  ;;  %v11069_v18 = vld [vmem:[#allocation8 + $0x24] sm:$0xf] }
 0x499   : > { %12250 = vst [vmem:[#allocation113_spill] sm:$0xff] %v11022_v3  ;;  %v11067_v52 = vld [vmem:[#allocation8 + $0x350] sm:$0xf0]  ;;  %v11081_v28 = vld [vmem:[#allocation8 + $0x124] sm:$0xf] }
 0x49a   : > { %12251 = vst [vmem:[#allocation114_spill] sm:$0xff] %v11024_v14  ;;  %v11042_v14 = vpop.eup %9024  ;;  %v11083_v37 = vld [vmem:[#allocation8 + $0x130] sm:$0xf0]  ;;  %v11085_v33 = vld [vmem:[#allocation8 + $0x224] sm:$0xf] }
 0x49b   : > { %12252 = vst [vmem:[#allocation115_spill] sm:$0xff] %v11042_v14  ;;  %v11071_v14 = vld [vmem:[#allocation8 + $0x30] sm:$0xf0]  ;;  %v11087_v38 = vpop.eup %9026  ;;  %v11099_v20 = vld [vmem:[#allocation8 + $0x324] sm:$0xf] }
 0x49c   : > { %12253 = vst [vmem:[#allocation116_spill] sm:$0xff] %v11055_v17  ;;  %v11097_v55 = vld [vmem:[#allocation8 + $0x230] sm:$0xf0]  ;;  %v11118_v53 = vld [vmem:[#allocation8 + $0x104] sm:$0xf]  ;;  %v11141_v21 = vpop.eup %9028 }
 0x49d   : > { %12255 = vst [vmem:[#allocation117_spill] sm:$0xff] %v11067_v52  ;;  %v11101_v31 = vld [vmem:[#allocation8 + $0x330] sm:$0xf0]  ;;  %v12270_v50 = vld [vmem:[#allocation31_spill] sm:$0xff]  ;;  %v11156_v52 = vpop.eup %9030 }
 0x49e   : > { %12256 = vst [vmem:[#allocation118_spill] sm:$0xff] %v11069_v18  ;;  %v11116_v3 = vld [vmem:[#allocation8 + $0x10] sm:$0xf0]  ;;  %v3713_v59 = vmul.f32 %v12270_v50, %v12269_v40  ;;  %v11135_v24 = vld [vmem:[#allocation8 + $0x204] sm:$0xf] }
 0x49f   : > { %12257 = vst [vmem:[#allocation119_spill] sm:$0xff] %v11071_v14  ;;  %v11133_v46 = vld [vmem:[#allocation8 + $0x110] sm:$0xf0]  ;;  %v11152_v36 = vld [vmem:[#allocation8 + $0x304] sm:$0xf] }
 0x4a0   : > { %12258 = vst [vmem:[#allocation120_spill] sm:$0xff] %v11081_v28  ;;  %v11137_v40 = vld [vmem:[#allocation8 + $0x210] sm:$0xf0]  ;;  %v3714_v9 = vmul.f32 0.5, %v3713_v59  ;;  %v12280_v15 = vld [vmem:[#allocation87_spill] sm:$0xff]  ;;  %v12283_v28 = vld [vmem:[#allocation90_spill] sm:$0xff] }
 0x4a1   : > { %12259 = vst [vmem:[#allocation121_spill] sm:$0xff] %v11083_v37  ;;  %v12274_v45 = vld [vmem:[#allocation93_spill] sm:$0xff]  ;;  %v12289_v18 = vld [vmem:[#allocation91_spill] sm:$0xff] }
 0x4a2   : > { %12260 = vst [vmem:[#allocation122_spill] sm:$0xff] %v11085_v33  ;;  %v12276_v56 = vor.u32 %v12274_v45, %v12275_v1  ;;  %v11154_v19 = vld [vmem:[#allocation8 + $0x310] sm:$0xf0]  ;;  %v12294_v45 = vor.u32 %v10912_v49, %v10914_v32  ;;  %v12299_v32 = vor.u32 %v10920_v25, %v10922_v4 }
 0x4a3   : > { %12261 = vst [vmem:[#allocation123_spill] sm:$0xff] %v11087_v38  ;;  %v11114_v38 = vld [vmem:[#allocation8 + $0x4] sm:$0xf]  ;;  %v12284_v59 = vld [vmem:[#allocation89_spill] sm:$0xff] }
 0x4a4   : > { %12262 = vst [vmem:[#allocation124_spill] sm:$0xff] %v11097_v55  ;;  %5214 = vmatpush.bf16.msra.mxu0 %v12276_v56  ;;  %v12277_v56 = vld [vmem:[#allocation15_spill] sm:$0xff]  ;;  %v12281_v55 = vld [vmem:[#allocation86_spill] sm:$0xff]  ;;  %v12285_v14 = vor.u32 %v12283_v28, %v12284_v59  ;;  %v3763_v59 = vsub.f32 1.5, %v3762_v22  ;;  %v12302_v4 = vld [vmem:[#allocation101_spill] sm:$0xff] }
 0x4a5   : > { %12263 = vst [vmem:[#allocation125_spill] sm:$0xff] %v11099_v20  ;;  %vm3718_vm4 = vcmp.eq.f32.partialorder %v12277_v56, inf  ;;  %v12282_v33 = vor.u32 %v12280_v15, %v12281_v55  ;;  %v12288_v20 = vld [vmem:[#allocation92_spill] sm:$0xff]  ;;  %v12291_v55 = vld [vmem:[#allocation95_spill] sm:$0xff]  ;;  %vm3720_vm5 = vcmp.eq.f32.partialorder %v12277_v56, 0.0 }
 0x4a6   : > { %12264 = vst [vmem:[#allocation126_spill] sm:$0xff] %v11101_v31  ;;  %5195 = vmatpush.bf16.msrb.mxu2 %v12285_v14  ;;  %v12290_v17 = vor.u32 %v12288_v20, %v12289_v18  ;;  %v3721_v14 = vand.u32 2147483648, %v12277_v56  ;;  %v12295_v18 = vor.u32 %v10916_v58, %v10918_v13  ;;  %v12296_v20 = vld [vmem:[#allocation24_spill] sm:$0xff]  ;;  %v3764_v13 = vmul.f32 %v12211_v27, %v3763_v59 }
 0x4a7   : > { %12267 = vst [vmem:[#allocation127_spill] sm:$0xff] %v11114_v38  ;;  %5182 = vmatpush.bf16.msrb.mxu1 %v12282_v33  ;;  %v12286_v38 = vld [vmem:[#allocation47_spill] sm:$0xff]  ;;  %v12292_v33 = vld [vmem:[#allocation96_spill] sm:$0xff]  ;;  %vm3766_vm6 = vcmp.eq.f32.partialorder %v12296_v20, inf  ;;  %vm3768_vm7 = vcmp.eq.f32.partialorder %v12296_v20, 0.0 }
 0x4a8   : > { %12268 = vst [vmem:[#allocation128_spill] sm:$0xff] %v11116_v3  ;;  %v3715_v3 = vsub.f32 1.5, %v3714_v9  ;;  %v3856_v31 = vmul.f32 %v12287_v26, %v12286_v38  ;;  %5208 = vmatpush.bf16.msrb.mxu3 %v12290_v17  ;;  %v12293_v15 = vor.u32 %v12291_v55, %v12292_v33  ;;  %v11187_v9 = vpop.eup %9032  ;;  %v12297_v55 = vld [vmem:[#allocation54_spill] sm:$0xff]  ;;  %5215 = vmatpush.bf16.msra.mxu0 %v12299_v32  ;;  %vm3862_vm10 = vcmp.eq.f32.partialorder %v12286_v38, inf }
 0x4a9   : > { %12273 = vst [vmem:[#allocation67_spill] sm:$0xff] %v11141_v21  ;;  %v12279_v21 = vld [vmem:[#allocation21_spill] sm:$0xff]  ;;  %v12303_v32 = vld [vmem:[#allocation102_spill] sm:$0xff]  ;;  %v3765_v59 = vmul.f32 %v3764_v13, %v12296_v20  ;;  %vm3864_vm11 = vcmp.eq.f32.partialorder %v12286_v38, 0.0  ;;  %v12307_v13 = vor.u32 %v10946_v57, %v10948_v34  ;;  %vm3910_vm12 = vcmp.eq.f32.partialorder %v12297_v55, inf }
 0x4aa   : > { %v3808_v37 = vmul.f32 %v12279_v21, %v12278_v5  ;;  %5240 = vmatpush.bf16.msra.mxu2 %v12294_v45  ;;  %v3716_v17 = vmul.f32 %v12270_v50, %v3715_v3  ;;  %v3857_v22 = vmul.f32 %v12287_v26, %v3856_v31  ;;  %v3769_v3 = vand.u32 2147483648, %v12296_v20  ;;  %v12300_v45 = vld [vmem:[#allocation68_spill] sm:$0xff] }
 0x4ab   : > { %5227 = vmatpush.bf16.msra.mxu1 %v12293_v15  ;;  %v11201_v15 = vpop.eup %9034  ;;  %v12304_v27 = vor.u32 %v12302_v4, %v12303_v32  ;;  %vm3912_vm13 = vcmp.eq.f32.partialorder %v12297_v55, 0.0  ;;  %v12308_v57 = vor.u32 %v10961_v43, %v10963_v35  ;;  %v3767_v34 = vsel %vm3766_vm6, %v12296_v20, %v3765_v59 }
 0x4ac   : > { %v3809_v1 = vmul.f32 %v12279_v21, %v3808_v37  ;;  %5253 = vmatpush.bf16.msra.mxu3 %v12295_v18  ;;  %v12298_v37 = vld [vmem:[#allocation69_spill] sm:$0xff]  ;;  %v3717_v58 = vmul.f32 %v3716_v17, %v12277_v56  ;;  %v3858_v50 = vmul.f32 0.5, %v3857_v22  ;;  %v12301_v18 = vld [vmem:[#allocation103_spill] sm:$0xff]  ;;  %v12305_v17 = vor.u32 %v10938_v41, %v10940_v30  ;;  %5216 = vmatpush.bf16.msra.mxu0 %v12307_v13 }
 0x4ad   : > { %v3904_v33 = vmul.f32 %v12298_v37, %v12297_v55  ;;  %v3952_v25 = vmul.f32 %v12301_v18, %v12300_v45  ;;  %v12306_v22 = vor.u32 %v10942_v7, %v10944_v61  ;;  %vm3958_vm14 = vcmp.eq.f32.partialorder %v12300_v45, inf }
 0x4ae   : > { %v3810_v49 = vmul.f32 0.5, %v3809_v1  ;;  %v3817_v1 = vand.u32 2147483648, %v12278_v5  ;;  %5241 = vmatpush.bf16.msra.mxu2 %v12305_v17  ;;  %v3719_v61 = vsel %vm3718_vm4, %v12277_v56, %v3717_v58  ;;  %v12312_v58 = vor.u32 %v10969_v6, %v10971_v39  ;;  %v12314_v6 = vld [vmem:[#allocation99_spill] sm:$0xff] }
 0x4af   : > { %v3905_v31 = vmul.f32 %v12298_v37, %v3904_v33  ;;  %5228 = vmatpush.bf16.msra.mxu1 %v12304_v27  ;;  %v3859_v33 = vsub.f32 1.5, %v3858_v50  ;;  %v3953_v32 = vmul.f32 %v12301_v18, %v3952_v25  ;;  %v3865_v27 = vand.u32 2147483648, %v12286_v38  ;;  %v12309_v50 = vld [vmem:[#allocation77_spill] sm:$0xff] }
 0x4b0   : > { %v3811_v28 = vsub.f32 1.5, %v3810_v49  ;;  %5254 = vmatpush.bf16.msra.mxu3 %v12306_v22  ;;  %v12313_v17 = vor.u32 %v10982_v62, %v10984_v42  ;;  %v3722_v22 = vsel %vm3720_vm5, %v3721_v14, %v3719_v61  ;;  %v4048_v39 = vmul.f32 %v11156_v52, %v12314_v6  ;;  %v12319_v61 = vld [vmem:[#allocation109_spill] sm:$0xff] }
 0x4b1   : > { %v3906_v4 = vmul.f32 0.5, %v3905_v31  ;;  %v3860_v30 = vmul.f32 %v12287_v26, %v3859_v33  ;;  %v3954_v41 = vmul.f32 0.5, %v3953_v32  ;;  %v12310_v31 = vld [vmem:[#allocation115_spill] sm:$0xff]  ;;  %v12311_v26 = vor.u32 %v10965_v48, %v10967_v54 }
 0x4b2   : > { %v3812_v49 = vmul.f32 %v12279_v21, %v3811_v28  ;;  %v3913_v28 = vand.u32 2147483648, %v12297_v55  ;;  %v4000_v25 = vmul.f32 %v12310_v31, %v12309_v50  ;;  %5217 = vmatpush.bf16.msra.mxu0 %v12313_v17  ;;  %v12315_v14 = vor.u32 %v10986_v51, %v10988_v8  ;;  %v12316_v32 = vld [vmem:[#allocation107_spill] sm:$0xff] }
 0x4b3   : > { %v3907_v7 = vsub.f32 1.5, %v3906_v4  ;;  %5229 = vmatpush.bf16.msra.mxu1 %v12308_v57  ;;  %5242 = vmatpush.bf16.msra.mxu2 %v12311_v26  ;;  %v3861_v35 = vmul.f32 %v3860_v30, %v12286_v38  ;;  %v3955_v59 = vsub.f32 1.5, %v3954_v41  ;;  %v12317_v13 = vor.u32 %v10990_v11, %v12316_v32  ;;  %v12325_v26 = vld [vmem:[#allocation112_spill] sm:$0xff] }
 0x4b4   : > { %v3813_v21 = vmul.f32 %v3812_v49, %v12278_v5  ;;  %5255 = vmatpush.bf16.msra.mxu3 %v12312_v58  ;;  %v4001_v54 = vmul.f32 %v12310_v31, %v4000_v25  ;;  %v12318_v49 = vld [vmem:[#allocation108_spill] sm:$0xff]  ;;  %vm3960_vm15 = vcmp.eq.f32.partialorder %v12300_v45, 0.0  ;;  %vm4006_vm0 = vcmp.eq.f32.partialorder %v12309_v50, inf  ;;  %v12326_v58 = vld [vmem:[#allocation113_spill] sm:$0xff] }
 0x4b5   : > { %v3908_v43 = vmul.f32 %v12298_v37, %v3907_v7  ;;  %v3770_v37 = vsel %vm3768_vm7, %v3769_v3, %v3767_v34  ;;  %v3863_v62 = vsel %vm3862_vm10, %v12286_v38, %v3861_v35  ;;  %v3956_v56 = vmul.f32 %v12301_v18, %v3955_v59 }
 0x4b6   : > { %v3815_v48 = vsel %vm3814_vm8, %v12278_v5, %v3813_v21  ;;  %v3866_v4 = vsel %vm3864_vm11, %v3865_v27, %v3863_v62  ;;  %v4002_v20 = vmul.f32 0.5, %v4001_v54  ;;  %v4049_v3 = vmul.f32 %v11156_v52, %v4048_v39  ;;  %v12331_v62 = vld [vmem:[#allocation116_spill] sm:$0xff] }
 0x4b7   : > { %v3909_v42 = vmul.f32 %v3908_v43, %v12297_v55  ;;  %5230 = vmatpush.bf16.msra.mxu1 %v12315_v14  ;;  %v3818_v33 = vsel %vm3816_vm9, %v3817_v1, %v3815_v48  ;;  %5243 = vmatpush.bf16.msra.mxu2 %v12317_v13  ;;  %v12320_v18 = vor.u32 %v12318_v49, %v12319_v61  ;;  %v3961_v38 = vand.u32 2147483648, %v12300_v45  ;;  %v12334_v14 = vld [vmem:[#allocation80_spill] sm:$0xff] }
 0x4b8   : > { %v3957_v8 = vmul.f32 %v3956_v56, %v12300_v45  ;;  %v4255_v5 = vpack.c.bf16 %v3722_v22, %v3722_v22  ;;  %v12321_v1 = vor.u32 %v11008_v12, %v11010_v63  ;;  %v4003_v27 = vsub.f32 1.5, %v4002_v20  ;;  %v12336_v20 = vld [vmem:[#allocation118_spill] sm:$0xff] }
 0x4b9   : > { %5256 = vmatpush.bf16.msra.mxu3 %v12320_v18  ;;  %v3911_v51 = vsel %vm3910_vm12, %v12297_v55, %v3909_v42  ;;  %v4050_v30 = vmul.f32 0.5, %v4049_v3  ;;  %v4259_v7 = vpack.c.bf16 %v3770_v37, %v3770_v37  ;;  %v4263_v57 = vpack.c.bf16 %v3818_v33, %v3818_v33  ;;  %v12332_v42 = vld [vmem:[#allocation117_spill] sm:$0xff]  ;;  %v12335_v33 = vld [vmem:[#allocation30_spill] sm:$0xff]  ;;  %v12337_v3 = vld [vmem:[#allocation119_spill] sm:$0xff] }
 0x4ba   : > { %5218 = vmatpush.bf16.msra.mxu0 %v12321_v1  ;;  %v3914_v11 = vsel %vm3912_vm13, %v3913_v28, %v3911_v51  ;;  %v3959_v41 = vsel %vm3958_vm14, %v12300_v45, %v3957_v8  ;;  %v12322_v34 = vor.u32 %v11012_v23, %v11014_v29  ;;  %v4004_v63 = vmul.f32 %v12310_v31, %v4003_v27  ;;  %v12323_v28 = vld [vmem:[#allocation111_spill] sm:$0xff]  ;;  %v12339_v18 = vld [vmem:[#allocation120_spill] sm:$0xff]  ;;  %v12340_v51 = vld [vmem:[#allocation121_spill] sm:$0xff] }
 0x4bb   : > { %v3962_v12 = vsel %vm3960_vm15, %v3961_v38, %v3959_v41  ;;  %v4051_v55 = vsub.f32 1.5, %v4050_v30  ;;  %v4267_v21 = vpack.c.bf16 %v3866_v4, %v3866_v4  ;;  %v12324_v25 = vor.u32 %v11016_v60, %v12323_v28  ;;  %v12343_v27 = vld [vmem:[#allocation40_spill] sm:$0xff]  ;;  %v12351_v28 = vld [vmem:[#allocation34_spill] sm:$0xff] }
 0x4bc   : > { %5231 = vmatpush.bf16.msra.mxu1 %v12322_v34  ;;  %v12327_v35 = vor.u32 %v12325_v26, %v12326_v58  ;;  %vm4008_vm4 = vcmp.eq.f32.partialorder %v12309_v50, 0.0  ;;  %v4009_v45 = vand.u32 2147483648, %v12309_v50  ;;  %v4271_v43 = vpack.c.bf16 %v3914_v11, %v3914_v11  ;;  %v12342_v11 = vld [vmem:[#allocation85_spill] sm:$0xff]  ;;  %v12345_v41 = vld [vmem:[#allocation124_spill] sm:$0xff]  ;;  %v12348_v34 = vld [vmem:[#allocation126_spill] sm:$0xff] }
 0x4bd   : > { %5244 = vmatpush.bf16.msra.mxu2 %v12324_v25  ;;  %v4451_v29 = vunpack.c.l.b16 %v4259_v7  ;;  %v12328_v23 = vor.u32 %v11034_v44, %v11036_v2  ;;  %v4005_v31 = vmul.f32 %v4004_v63, %v12309_v50  ;;  %v4052_v59 = vmul.f32 %v11156_v52, %v4051_v55  ;;  %v12344_v7 = vld [vmem:[#allocation122_spill] sm:$0xff]  ;;  %v12352_v26 = vld [vmem:[#allocation127_spill] sm:$0xff]  ;;  %v12353_v58 = vld [vmem:[#allocation128_spill] sm:$0xff] }
 0x4be   : > { %5257 = vmatpush.bf16.msra.mxu3 %v12327_v35  ;;  %v4275_v60 = vpack.c.bf16 %v3962_v12, %v3962_v12  ;;  %v4447_v17 = vunpack.c.l.b16 %v4255_v5  ;;  %vm4054_vm5 = vcmp.eq.f32.partialorder %v12314_v6, inf  ;;  %vm4056_vm6 = vcmp.eq.f32.partialorder %v12314_v6, 0.0 }
 0x4bf   : > { %5219 = vmatpush.bf16.msra.mxu0 %v12328_v23  ;;  %v4057_v22 = vand.u32 2147483648, %v12314_v6  ;;  %v4455_v48 = vunpack.c.l.b16 %v4263_v57  ;;  %v12329_v54 = vor.u32 %v11038_v47, %v11040_v10  ;;  %v4007_v44 = vsel %vm4006_vm0, %v12309_v50, %v4005_v31 }
 0x4c0   : > { %v4053_v2 = vmul.f32 %v4052_v59, %v12314_v6  ;;  %v4459_v52 = vunpack.c.l.b16 %v4267_v21  ;;  %v4480_v39 = vsel %vm4479_vm1, %v4451_v29, %v4447_v17  ;;  %v12330_v37 = vor.u32 %v11051_v16, %v11053_v0  ;;  %v12350_v21 = vld [vmem:[#allocation18_spill] sm:$0xff]  ;;  %v12355_v29 = vld [vmem:[#allocation29_spill] sm:$0xff] }
 0x4c1   : > { %5232 = vmatpush.bf16.msra.mxu1 %v12329_v54  ;;  %v12333_v56 = vor.u32 %v12331_v62, %v12332_v42  ;;  %v4010_v10 = vsel %vm4008_vm4, %v4009_v45, %v4007_v44  ;;  %v4463_v47 = vunpack.c.l.b16 %v4271_v43  ;;  %vm4485_vm7 = vcmask 1044484   ;;  %v12357_v44 = vld [vmem:[#allocation48_spill] sm:$0xff] }
 0x4c2   : > { %5245 = vmatpush.bf16.msra.mxu2 %v12330_v37  ;;  %v3725_v4 = vmul.f32 %v12335_v33, %v12334_v14  ;;  %v12338_v32 = vor.u32 %v12336_v20, %v12337_v3  ;;  %v4055_v16 = vsel %vm4054_vm5, %v12314_v6, %v4053_v2  ;;  %v4279_v0 = vpack.c.bf16 %v4010_v10, %v4010_v10  ;;  %v12347_v6 = vld [vmem:[#allocation125_spill] sm:$0xff]  ;;  %v12358_v2 = vld [vmem:[#allocation60_spill] sm:$0xff] }
 0x4c3   : > { %5258 = vmatpush.bf16.msra.mxu3 %v12333_v56  ;;  %v4467_v13 = vunpack.c.l.b16 %v4275_v60  ;;  %vm4487_vm8 = vcmask 1045509   ;;  %v4058_v50 = vsel %vm4056_vm6, %v4057_v22, %v4055_v16  ;;  %v4482_v49 = vsel %vm4481_vm2, %v4455_v48, %v4480_v39  ;;  %v12364_v16 = vld [vmem:[#allocation70_spill] sm:$0xff] }
 0x4c4   : > { %5220 = vmatpush.bf16.msra.mxu0 %v12338_v32  ;;  %vm4489_vm9 = vcmask 1046534   ;;  %v3726_v61 = vmul.f32 0.5, %v3725_v4  ;;  %v12341_v8 = vor.u32 %v12339_v18, %v12340_v51  ;;  %v4283_v38 = vpack.c.bf16 %v4058_v50, %v4058_v50 }
 0x4c5   : > { %v4471_v5 = vunpack.c.l.b16 %v4279_v0  ;;  %v4484_v1 = vsel %vm4483_vm3, %v4459_v52, %v4482_v49  ;;  %v3773_v30 = vmul.f32 %v12343_v27, %v12342_v11  ;;  %v12346_v57 = vor.u32 %v12344_v7, %v12345_v41  ;;  %v12365_v0 = vld [vmem:[#allocation106_spill] sm:$0xff] }
 0x4c6   : > { %5233 = vmatpush.bf16.msra.mxu1 %v12341_v8  ;;  %v12349_v12 = vor.u32 %v12347_v6, %v12348_v34  ;;  %v4486_v63 = vsel %vm4485_vm7, %v4463_v47, %v4484_v1  ;;  %vm12055_vm10 = vcmask 1047559   ;;  %v3727_v55 = vsub.f32 1.5, %v3726_v61  ;;  %v12363_v47 = vld [vmem:[#allocation39_spill] sm:$0xff]  ;;  %v12366_v11 = vld [vmem:[#allocation78_spill] sm:$0xff] }
 0x4c7   : > { %5246 = vmatpush.bf16.msra.mxu2 %v12346_v57  ;;  %v3820_v25 = vmul.f32 %v12351_v28, %v12350_v21  ;;  %v12354_v35 = vor.u32 %v12352_v26, %v12353_v58  ;;  %v4475_v45 = vunpack.c.l.b16 %v4283_v38  ;;  %v4488_v43 = vsel %vm4487_vm8, %v4467_v13, %v4486_v63 }
 0x4c8   : > { %5259 = vmatpush.bf16.msra.mxu3 %v12349_v12  ;;  %vm3730_vm11 = vcmp.eq.f32.partialorder %v12355_v29, inf  ;;  %v3774_v23 = vmul.f32 0.5, %v3773_v30  ;;  %v4490_v31 = vsel %vm4489_vm9, %v4471_v5, %v4488_v43  ;;  %v3728_v59 = vmul.f32 %v12335_v33, %v3727_v55 }
 0x4c9   : > { %5221 = vmatpush.bf16.msra.mxu0 %v12354_v35  ;;  %vm3732_vm12 = vcmp.eq.f32.partialorder %v12355_v29, 0.0  ;;  %v3821_v60 = vmul.f32 %v12351_v28, %v3820_v25  ;;  %v12356_v17 = vor.u32 %v11118_v53, %v11133_v46  ;;  %v4492_v22 = vsel %vm12055_vm10, %v4475_v45, %v4490_v31  ;;  %v12361_v46 = vld [vmem:[#allocation26_spill] sm:$0xff]  ;;  %v12368_v25 = vld [vmem:[#allocation100_spill] sm:$0xff] }
 0x4ca   : > { %v3733_v48 = vand.u32 2147483648, %v12355_v29  ;;  %v3775_v54 = vsub.f32 1.5, %v3774_v23  ;;  %v3868_v52 = vmul.f32 %v12358_v2, %v12357_v44  ;;  %v12359_v39 = vor.u32 %v11135_v24, %v11137_v40  ;;  %v12362_v40 = vld [vmem:[#allocation55_spill] sm:$0xff] }
 0x4cb   : > { %5234 = vmatpush.bf16.msra.mxu1 %v12356_v17  ;;  %v12360_v37 = vor.u32 %v11152_v36, %v11154_v19  ;;  %v11390_v62 = vpack.c.b16 %v4492_v22, %v4492_v22  ;;  %v3729_v53 = vmul.f32 %v3728_v59, %v12355_v29  ;;  %vm3778_vm13 = vcmp.eq.f32.partialorder %v12361_v46, inf }
 0x4cc   : > { %5247 = vmatpush.bf16.msra.mxu2 %v12359_v39  ;;  %v3822_v42 = vmul.f32 0.5, %v3821_v60  ;;  %v3776_v56 = vmul.f32 %v12343_v27, %v3775_v54  ;;  %vm3780_vm14 = vcmp.eq.f32.partialorder %v12361_v46, 0.0  ;;  %v3781_v10 = vand.u32 2147483648, %v12361_v46  ;;  %v12367_v27 = vld [vmem:[#allocation123_spill] sm:$0xff] }
 0x4cd   : > { %5260 = vmatpush.bf16.msra.mxu3 %v12360_v37  ;;  %v3869_v24 = vmul.f32 %v12358_v2, %v3868_v52  ;;  %v3916_v14 = vmul.f32 %v12363_v47, %v12362_v40  ;;  %5170 = vmatmul.bf16.vlgmr.msrb.gmra.mxu0 %v11390_v62  ;;  %vm3826_vm15 = vcmp.eq.f32.partialorder %v12350_v21, inf  ;;  %vm3828_vm0 = vcmp.eq.f32.partialorder %v12350_v21, 0.0 }
 0x4ce   : > { %v3823_v19 = vsub.f32 1.5, %v3822_v42  ;;  %v3829_v36 = vand.u32 2147483648, %v12350_v21  ;;  %v3731_v33 = vsel %vm3730_vm11, %v12355_v29, %v3729_v53  ;;  %v3777_v4 = vmul.f32 %v3776_v56, %v12361_v46 }
 0x4cf   : > { %v3870_v20 = vmul.f32 0.5, %v3869_v24  ;;  %v3917_v3 = vmul.f32 %v12363_v47, %v3916_v14  ;;  %vm3874_vm4 = vcmp.eq.f32.partialorder %v12357_v44, inf  ;;  %vm3876_vm5 = vcmp.eq.f32.partialorder %v12357_v44, 0.0 }
 0x4d0   : > { %v3824_v32 = vmul.f32 %v12351_v28, %v3823_v19  ;;  %v3964_v13 = vmul.f32 %v12365_v0, %v12364_v16  ;;  %v3877_v49 = vand.u32 2147483648, %v12357_v44  ;;  %vm3922_vm6 = vcmp.eq.f32.partialorder %v12362_v40, inf }
 0x4d1   : > { %v3871_v50 = vsub.f32 1.5, %v3870_v20  ;;  %v3918_v61 = vmul.f32 0.5, %v3917_v3  ;;  %v3734_v18 = vsel %vm3732_vm12, %v3733_v48, %v3731_v33  ;;  %vm3924_vm11 = vcmp.eq.f32.partialorder %v12362_v40, 0.0  ;;  %v12369_v33 = vld [vmem:[#allocation82_spill] sm:$0xff] }
 0x4d2   : > { %v3825_v51 = vmul.f32 %v3824_v32, %v12350_v21  ;;  %v3965_v8 = vmul.f32 %v12365_v0, %v3964_v13  ;;  %v3779_v38 = vsel %vm3778_vm13, %v12361_v46, %v3777_v4  ;;  %v4012_v30 = vmul.f32 %v12367_v27, %v12366_v11  ;;  %v12370_v4 = vld [vmem:[#allocation19_spill] sm:$0xff] }
 0x4d3   : > { %v3872_v5 = vmul.f32 %v12358_v2, %v3871_v50  ;;  %v3919_v1 = vsub.f32 1.5, %v3918_v61  ;;  %v3925_v41 = vand.u32 2147483648, %v12362_v40  ;;  %vm3970_vm12 = vcmp.eq.f32.partialorder %v12364_v16, inf }
 0x4d4   : > { %v3827_v7 = vsel %vm3826_vm15, %v12350_v21, %v3825_v51  ;;  %v3966_v57 = vmul.f32 0.5, %v3965_v8  ;;  %vm3972_vm13 = vcmp.eq.f32.partialorder %v12364_v16, 0.0  ;;  %v4013_v12 = vmul.f32 %v12367_v27, %v4012_v30  ;;  %v12372_v51 = vld [vmem:[#allocation43_spill] sm:$0xff] }
 0x4d5   : > { %v3873_v6 = vmul.f32 %v3872_v5, %v12357_v44  ;;  %v3920_v34 = vmul.f32 %v12363_v47, %v3919_v1  ;;  %v3782_v63 = vsel %vm3780_vm14, %v3781_v10, %v3779_v38  ;;  %v3830_v55 = vsel %vm3828_vm0, %v3829_v36, %v3827_v7  ;;  %v12373_v1 = vld [vmem:[#allocation28_spill] sm:$0xff] }
 0x4d6   : > { %v3967_v28 = vsub.f32 1.5, %v3966_v57  ;;  %v4060_v26 = vmul.f32 %v11187_v9, %v12368_v25  ;;  %v3973_v45 = vand.u32 2147483648, %v12364_v16  ;;  %v4014_v43 = vmul.f32 0.5, %v4013_v12  ;;  %v12375_v12 = vld [vmem:[#allocation37_spill] sm:$0xff] }
 0x4d7   : > { %v3875_v58 = vsel %vm3874_vm4, %v12357_v44, %v3873_v6  ;;  %v3921_v35 = vmul.f32 %v3920_v34, %v12362_v40  ;;  %v4256_v31 = vpack.c.bf16 %v3734_v18, %v3734_v18  ;;  %v4260_v17 = vpack.c.bf16 %v3782_v63, %v3782_v63  ;;  %v12371_v18 = vld [vmem:[#allocation88_spill] sm:$0xff] }
 0x4d8   : > { %v3878_v29 = vsel %vm3876_vm5, %v3877_v49, %v3875_v58  ;;  %v3968_v23 = vmul.f32 %v12365_v0, %v3967_v28  ;;  %v4061_v21 = vmul.f32 %v11187_v9, %v4060_v26  ;;  %v4015_v60 = vsub.f32 1.5, %v4014_v43  ;;  %v12374_v34 = vld [vmem:[#allocation32_spill] sm:$0xff]  ;;  %v12376_v26 = vld [vmem:[#allocation35_spill] sm:$0xff]  ;;  %v12378_v43 = vld [vmem:[#allocation61_spill] sm:$0xff] }
 0x4d9   : > { %v3923_v59 = vsel %vm3922_vm6, %v12362_v40, %v3921_v35  ;;  %v4264_v22 = vpack.c.bf16 %v3830_v55, %v3830_v55  ;;  %v4268_v44 = vpack.c.bf16 %v3878_v29, %v3878_v29  ;;  %vm4018_vm14 = vcmp.eq.f32.partialorder %v12366_v11, inf }
 0x4da   : > { %v3926_v48 = vsel %vm3924_vm11, %v3925_v41, %v3923_v59  ;;  %v3969_v54 = vmul.f32 %v3968_v23, %v12364_v16  ;;  %v4062_v2 = vmul.f32 0.5, %v4061_v21  ;;  %v4016_v52 = vmul.f32 %v12367_v27, %v4015_v60 }
 0x4db   : > { %v4448_v39 = vunpack.c.l.b16 %v4256_v31  ;;  %v4452_v37 = vunpack.c.l.b16 %v4260_v17  ;;  %v4021_v46 = vand.u32 2147483648, %v12366_v11  ;;  %v4272_v56 = vpack.c.bf16 %v3926_v48, %v3926_v48 }
 0x4dc   : > { %v3971_v53 = vsel %vm3970_vm12, %v12364_v16, %v3969_v54  ;;  %v4063_v42 = vsub.f32 1.5, %v4062_v2  ;;  %v4017_v24 = vmul.f32 %v4016_v52, %v12366_v11  ;;  %v4456_v40 = vunpack.c.l.b16 %v4264_v22  ;;  %v12379_v2 = vld [vmem:[#allocation56_spill] sm:$0xff] }
 0x4dd   : > { %v3974_v10 = vsel %vm3972_vm13, %v3973_v45, %v3971_v53  ;;  %v4493_v47 = vsel %vm4479_vm1, %v4452_v37, %v4448_v39  ;;  %v4460_v36 = vunpack.c.l.b16 %v4268_v44  ;;  %v3737_v20 = vmul.f32 %v12370_v4, %v12369_v33  ;;  %5222 = vmatmul.bf16.vlgmr.msra.gmra.mxu0 %v11390_v62  ;;  %v12377_v45 = vld [vmem:[#allocation49_spill] sm:$0xff]  ;;  %v12380_v44 = vld [vmem:[#allocation84_spill] sm:$0xff] }
 0x4de   : > { %v4064_v14 = vmul.f32 %v11187_v9, %v4063_v42  ;;  %v4276_v19 = vpack.c.bf16 %v3974_v10, %v3974_v10  ;;  %v4019_v3 = vsel %vm4018_vm14, %v12366_v11, %v4017_v24  ;;  %vm4020_vm15 = vcmp.eq.f32.partialorder %v12366_v11, 0.0 }
 0x4df   : > { %vm4066_vm0 = vcmp.eq.f32.partialorder %v12368_v25, inf  ;;  %v4069_v32 = vand.u32 2147483648, %v12368_v25  ;;  %v4022_v16 = vsel %vm4020_vm15, %v4021_v46, %v4019_v3  ;;  %v4464_v0 = vunpack.c.l.b16 %v4272_v56 }
 0x4e0   : > { %v4065_v9 = vmul.f32 %v4064_v14, %v12368_v25  ;;  %v4494_v13 = vsel %vm4481_vm2, %v4456_v40, %v4493_v47  ;;  %v4280_v50 = vpack.c.bf16 %v4022_v16, %v4022_v16  ;;  %v4468_v49 = vunpack.c.l.b16 %v4276_v19  ;;  %v12381_v47 = vld [vmem:[#allocation75_spill] sm:$0xff]  ;;  %v12382_v14 = vld [vmem:[#allocation110_spill] sm:$0xff] }
 0x4e1   : > { %v3738_v61 = vmul.f32 0.5, %v3737_v20  ;;  %v3785_v8 = vmul.f32 %v12372_v51, %v12371_v18  ;;  %vm4068_vm4 = vcmp.eq.f32.partialorder %v12368_v25, 0.0  ;;  %v4495_v5 = vsel %vm4483_vm3, %v4460_v36, %v4494_v13  ;;  %v12384_v16 = vld [vmem:[#allocation67_spill] sm:$0xff] }
 0x4e2   : > { %v4067_v38 = vsel %vm4066_vm0, %v12368_v25, %v4065_v9  ;;  %vm3742_vm5 = vcmp.eq.f32.partialorder %v12373_v1, inf  ;;  %v4472_v27 = vunpack.c.l.b16 %v4280_v50  ;;  %v4496_v57 = vsel %vm4485_vm7, %v4464_v0, %v4495_v5  ;;  %v12385_v5 = vld [vmem:[#allocation104_spill] sm:$0xff] }
 0x4e3   : > { %v4070_v11 = vsel %vm4068_vm4, %v4069_v32, %v4067_v38  ;;  %v3739_v30 = vsub.f32 1.5, %v3738_v61  ;;  %v3786_v7 = vmul.f32 0.5, %v3785_v8  ;;  %vm3744_vm6 = vcmp.eq.f32.partialorder %v12373_v1, 0.0  ;;  %v12383_v32 = vld [vmem:[#allocation79_spill] sm:$0xff] }
 0x4e4   : > { %v4284_v41 = vpack.c.bf16 %v4070_v11, %v4070_v11  ;;  %v3745_v6 = vand.u32 2147483648, %v12373_v1  ;;  %v3832_v63 = vmul.f32 %v12375_v12, %v12374_v34  ;;  %v4497_v55 = vsel %vm4487_vm8, %v4468_v49, %v4496_v57 }
 0x4e5   : > { %v3740_v28 = vmul.f32 %v12370_v4, %v3739_v30  ;;  %v3787_v25 = vsub.f32 1.5, %v3786_v7  ;;  %vm3790_vm11 = vcmp.eq.f32.partialorder %v12376_v26, inf  ;;  %vm3792_vm12 = vcmp.eq.f32.partialorder %v12376_v26, 0.0 }
 0x4e6   : > { %v4476_v58 = vunpack.c.l.b16 %v4284_v41  ;;  %v3833_v35 = vmul.f32 %v12375_v12, %v3832_v63  ;;  %v3880_v29 = vmul.f32 %v12378_v43, %v12377_v45  ;;  %v4498_v23 = vsel %vm4489_vm9, %v4472_v27, %v4497_v55 }
 0x4e7   : > { %v3741_v21 = vmul.f32 %v3740_v28, %v12373_v1  ;;  %v3788_v31 = vmul.f32 %v12372_v51, %v3787_v25  ;;  %v3793_v59 = vand.u32 2147483648, %v12376_v26  ;;  %vm3838_vm13 = vcmp.eq.f32.partialorder %v12374_v34, inf }
 0x4e8   : > { %v4499_v60 = vsel %vm12055_vm10, %v4476_v58, %v4498_v23  ;;  %v3834_v17 = vmul.f32 0.5, %v3833_v35  ;;  %v3881_v22 = vmul.f32 %v12378_v43, %v3880_v29  ;;  %vm3840_vm14 = vcmp.eq.f32.partialorder %v12374_v34, 0.0 }
 0x4e9   : > { %v11504_v48 = vpack.c.b16 %v4499_v60, %v4499_v60  ;;  %v3789_v54 = vmul.f32 %v3788_v31, %v12376_v26  ;;  %v3928_v52 = vmul.f32 %v12380_v44, %v12379_v2  ;;  %v3743_v39 = vsel %vm3742_vm5, %v12373_v1, %v3741_v21 }
 0x4ea   : > { %v3835_v37 = vsub.f32 1.5, %v3834_v17  ;;  %v3841_v53 = vand.u32 2147483648, %v12374_v34  ;;  %v3882_v46 = vmul.f32 0.5, %v3881_v22  ;;  %vm3886_vm15 = vcmp.eq.f32.partialorder %v12377_v45, inf }
 0x4eb   : > { %5183 = vmatmul.bf16.vlgmr.msrb.gmra.mxu1 %v11504_v48  ;;  %vm3888_vm0 = vcmp.eq.f32.partialorder %v12377_v45, 0.0  ;;  %v3889_v42 = vand.u32 2147483648, %v12377_v45  ;;  %v3929_v56 = vmul.f32 %v12380_v44, %v3928_v52  ;;  %v3791_v10 = vsel %vm3790_vm11, %v12376_v26, %v3789_v54  ;;  %v12387_v52 = vld [vmem:[#allocation33_spill] sm:$0xff] }
 0x4ec   : > { %v3836_v24 = vmul.f32 %v12375_v12, %v3835_v37  ;;  %v3883_v40 = vsub.f32 1.5, %v3882_v46  ;;  %v3976_v19 = vmul.f32 %v12382_v14, %v12381_v47  ;;  %v3746_v36 = vsel %vm3744_vm6, %v3745_v6, %v3743_v39 }
 0x4ed   : > { %v3930_v33 = vmul.f32 0.5, %v3929_v56  ;;  %vm3934_vm4 = vcmp.eq.f32.partialorder %v12379_v2, inf  ;;  %vm3936_vm5 = vcmp.eq.f32.partialorder %v12379_v2, 0.0  ;;  %v4024_v9 = vmul.f32 %v12384_v16, %v12383_v32 }
 0x4ee   : > { %v3837_v4 = vmul.f32 %v3836_v24, %v12374_v34  ;;  %v3884_v20 = vmul.f32 %v12378_v43, %v3883_v40  ;;  %v3977_v3 = vmul.f32 %v12382_v14, %v3976_v19  ;;  %v3794_v0 = vsel %vm3792_vm12, %v3793_v59, %v3791_v10 }
 0x4ef   : > { %v3931_v13 = vsub.f32 1.5, %v3930_v33  ;;  %v3937_v50 = vand.u32 2147483648, %v12379_v2  ;;  %vm3982_vm6 = vcmp.eq.f32.partialorder %v12381_v47, inf  ;;  %vm3984_vm11 = vcmp.eq.f32.partialorder %v12381_v47, 0.0 }
 0x4f0   : > { %v3839_v49 = vsel %vm3838_vm13, %v12374_v34, %v3837_v4  ;;  %v3885_v61 = vmul.f32 %v3884_v20, %v12377_v45  ;;  %v3978_v18 = vmul.f32 0.5, %v3977_v3  ;;  %v4025_v51 = vmul.f32 %v12384_v16, %v4024_v9  ;;  %v12388_v3 = vld [vmem:[#allocation98_spill] sm:$0xff]  ;;  %v12390_v9 = vld [vmem:[#allocation81_spill] sm:$0xff] }
 0x4f1   : > { %v3932_v8 = vmul.f32 %v12380_v44, %v3931_v13  ;;  %v3985_v38 = vand.u32 2147483648, %v12381_v47  ;;  %vm4030_vm12 = vcmp.eq.f32.partialorder %v12383_v32, inf  ;;  %v4072_v1 = vmul.f32 %v11201_v15, %v12385_v5  ;;  %v12386_v44 = vld [vmem:[#allocation83_spill] sm:$0xff] }
 0x4f2   : > { %v3842_v11 = vsel %vm3840_vm14, %v3841_v53, %v3839_v49  ;;  %v3887_v27 = vsel %vm3886_vm15, %v12377_v45, %v3885_v61  ;;  %v3979_v30 = vsub.f32 1.5, %v3978_v18  ;;  %v4026_v7 = vmul.f32 0.5, %v4025_v51  ;;  %v12391_v49 = vld [vmem:[#allocation105_spill] sm:$0xff] }
 0x4f3   : > { %vm4032_vm13 = vcmp.eq.f32.partialorder %v12383_v32, 0.0  ;;  %v3890_v41 = vsel %vm3888_vm0, %v3889_v42, %v3887_v27  ;;  %v3933_v57 = vmul.f32 %v3932_v8, %v12379_v2  ;;  %v4033_v6 = vand.u32 2147483648, %v12383_v32  ;;  %v12392_v18 = vld [vmem:[#allocation17_spill] sm:$0xff] }
 0x4f4   : > { %v4073_v12 = vmul.f32 %v11201_v15, %v4072_v1  ;;  %v3980_v34 = vmul.f32 %v12382_v14, %v3979_v30  ;;  %v4027_v63 = vsub.f32 1.5, %v4026_v7  ;;  %v4257_v55 = vpack.c.bf16 %v3746_v36, %v3746_v36  ;;  %v12394_v1 = vld [vmem:[#allocation38_spill] sm:$0xff] }
 0x4f5   : > { %v4261_v28 = vpack.c.bf16 %v3794_v0, %v3794_v0  ;;  %v3935_v25 = vsel %vm3934_vm4, %v12379_v2, %v3933_v57  ;;  %v4265_v58 = vpack.c.bf16 %v3842_v11, %v3842_v11  ;;  %v4269_v35 = vpack.c.bf16 %v3890_v41, %v3890_v41  ;;  %v12395_v41 = vld [vmem:[#allocation36_spill] sm:$0xff] }
 0x4f6   : > { %v4074_v26 = vmul.f32 0.5, %v4073_v12  ;;  %v3938_v45 = vsel %vm3936_vm5, %v3937_v50, %v3935_v25  ;;  %v3981_v43 = vmul.f32 %v3980_v34, %v12381_v47  ;;  %v4028_v29 = vmul.f32 %v12384_v16, %v4027_v63  ;;  %v12396_v12 = vld [vmem:[#allocation50_spill] sm:$0xff] }
 0x4f7   : > { %v4449_v23 = vunpack.c.l.b16 %v4257_v55  ;;  %v4273_v31 = vpack.c.bf16 %v3938_v45, %v3938_v45  ;;  %v4453_v59 = vunpack.c.l.b16 %v4261_v28  ;;  %v4457_v60 = vunpack.c.l.b16 %v4265_v58  ;;  %v12397_v34 = vld [vmem:[#allocation62_spill] sm:$0xff] }
 0x4f8   : > { %v4075_v21 = vsub.f32 1.5, %v4074_v26  ;;  %v3983_v17 = vsel %vm3982_vm6, %v12381_v47, %v3981_v43  ;;  %v4029_v22 = vmul.f32 %v4028_v29, %v12383_v32  ;;  %v4461_v54 = vunpack.c.l.b16 %v4269_v35 }
 0x4f9   : > { %v3749_v2 = vmul.f32 %v12387_v52, %v12386_v44  ;;  %v3986_v39 = vsel %vm3984_vm11, %v3985_v38, %v3983_v17  ;;  %v4465_v53 = vunpack.c.l.b16 %v4273_v31  ;;  %v4500_v46 = vsel %vm4479_vm1, %v4453_v59, %v4449_v23  ;;  %v12398_v31 = vld [vmem:[#allocation57_spill] sm:$0xff] }
 0x4fa   : > { %v4076_v37 = vmul.f32 %v11201_v15, %v4075_v21  ;;  %v4031_v42 = vsel %vm4030_vm12, %v12383_v32, %v4029_v22  ;;  %v4277_v56 = vpack.c.bf16 %v3986_v39, %v3986_v39  ;;  %v4501_v10 = vsel %vm4481_vm2, %v4457_v60, %v4500_v46  ;;  %v12389_v32 = vld [vmem:[#allocation44_spill] sm:$0xff]  ;;  %v12399_v59 = vld [vmem:[#allocation97_spill] sm:$0xff]  ;;  %v12401_v39 = vld [vmem:[#allocation114_spill] sm:$0xff] }
 0x4fb   : > { %v3750_v24 = vmul.f32 0.5, %v3749_v2  ;;  %v4034_v40 = vsel %vm4032_vm13, %v4033_v6, %v4031_v42  ;;  %vm4078_vm14 = vcmp.eq.f32.partialorder %v12385_v5, inf  ;;  %v4502_v15 = vsel %vm4483_vm3, %v4461_v54, %v4501_v10  ;;  %5235 = vmatmul.bf16.vlgmr.msra.gmra.mxu1 %v11504_v48  ;;  %v12400_v2 = vld [vmem:[#allocation76_spill] sm:$0xff] }
 0x4fc   : > { %v4077_v14 = vmul.f32 %v4076_v37, %v12385_v5  ;;  %v4081_v47 = vand.u32 2147483648, %v12385_v5  ;;  %v4281_v19 = vpack.c.bf16 %v4034_v40, %v4034_v40  ;;  %v4503_v36 = vsel %vm4485_vm7, %v4465_v53, %v4502_v15 }
 0x4fd   : > { %v3751_v33 = vsub.f32 1.5, %v3750_v24  ;;  %vm4080_vm15 = vcmp.eq.f32.partialorder %v12385_v5, 0.0  ;;  %v4469_v20 = vunpack.c.l.b16 %v4277_v56  ;;  %v3797_v16 = vmul.f32 %v12389_v32, %v12388_v3 }
 0x4fe   : > { %v4079_v4 = vsel %vm4078_vm14, %v12385_v5, %v4077_v14  ;;  %9036 = vrsqrt.f32 %v12390_v9  ;;  %v4473_v13 = vunpack.c.l.b16 %v4281_v19  ;;  %vm3754_vm0 = vcmp.eq.f32.partialorder %v12392_v18, inf  ;;  %v12393_v5 = vld [vmem:[#allocation20_spill] sm:$0xff] }
 0x4ff   : > { %v4082_v0 = vsel %vm4080_vm15, %v4081_v47, %v4079_v4  ;;  %v3752_v50 = vmul.f32 %v12387_v52, %v3751_v33  ;;  %9038 = vrsqrt.f32 %v12391_v49  ;;  %v3798_v51 = vmul.f32 0.5, %v3797_v16 }
 0x500   : > { %v4285_v61 = vpack.c.bf16 %v4082_v0, %v4082_v0  ;;  %vm3756_vm4 = vcmp.eq.f32.partialorder %v12392_v18, 0.0  ;;  %v3757_v38 = vand.u32 2147483648, %v12392_v18  ;;  %v3844_v11 = vmul.f32 %v12394_v1, %v12393_v5 }
 0x501   : > { %v3753_v8 = vmul.f32 %v3752_v50, %v12392_v18  ;;  %v4504_v30 = vsel %vm4487_vm8, %v4469_v20, %v4503_v36  ;;  %v3799_v7 = vsub.f32 1.5, %v3798_v51  ;;  %vm3802_vm5 = vcmp.eq.f32.partialorder %v12395_v41, inf }
 0x502   : > { %v4477_v27 = vunpack.c.l.b16 %v4285_v61  ;;  %v4505_v57 = vsel %vm4489_vm9, %v4473_v13, %v4504_v30  ;;  %vm3804_vm6 = vcmp.eq.f32.partialorder %v12395_v41, 0.0  ;;  %v3845_v6 = vmul.f32 %v12394_v1, %v3844_v11 }
 0x503   : > { %v3892_v63 = vmul.f32 %v12397_v34, %v12396_v12  ;;  %v3755_v28 = vsel %vm3754_vm0, %v12392_v18, %v3753_v8  ;;  %v3800_v25 = vmul.f32 %v12389_v32, %v3799_v7  ;;  %v3805_v26 = vand.u32 2147483648, %v12395_v41 }
 0x504   : > { %v4506_v55 = vsel %vm12055_vm10, %v4477_v27, %v4505_v57  ;;  %v9037_v58 = vpop.eup %9036  ;;  %v3846_v45 = vmul.f32 0.5, %v3845_v6  ;;  %vm3850_vm11 = vcmp.eq.f32.partialorder %v12393_v5, inf  ;;  %vm3852_vm12 = vcmp.eq.f32.partialorder %v12393_v5, 0.0 }
 0x505   : > { %v11614_v35 = vpack.c.b16 %v4506_v55, %v4506_v55  ;;  %v3893_v43 = vmul.f32 %v12397_v34, %v3892_v63  ;;  %v11618_v29 = vpop.eup %9038  ;;  %v3801_v23 = vmul.f32 %v3800_v25, %v12395_v41  ;;  %v3853_v21 = vand.u32 2147483648, %v12393_v5 }
 0x506   : > { %v3940_v60 = vmul.f32 %v12399_v59, %v12398_v31  ;;  %v3758_v17 = vsel %vm3756_vm4, %v3757_v38, %v3755_v28  ;;  %v3847_v22 = vsub.f32 1.5, %v3846_v45  ;;  %vm3898_vm13 = vcmp.eq.f32.partialorder %v12396_v12, inf }
 0x507   : > { %5196 = vmatmul.bf16.vlgmr.msrb.gmra.mxu2 %v11614_v35  ;;  %v3894_v54 = vmul.f32 0.5, %v3893_v43  ;;  %v3803_v44 = vsel %vm3802_vm5, %v12395_v41, %v3801_v23  ;;  %vm3900_vm14 = vcmp.eq.f32.partialorder %v12396_v12, 0.0  ;;  %v3988_v37 = vmul.f32 %v12401_v39, %v12400_v2 }
 0x508   : > { %v3941_v52 = vmul.f32 %v12399_v59, %v3940_v60  ;;  %v3848_v53 = vmul.f32 %v12394_v1, %v3847_v22  ;;  %v3901_v42 = vand.u32 2147483648, %v12396_v12  ;;  %vm3946_vm15 = vcmp.eq.f32.partialorder %v12398_v31, inf  ;;  %v7486_v22 = vld [vmem:[#allocation8 + $0x1e8] sm:$0xf] }
 0x509   : > { %v3895_v46 = vsub.f32 1.5, %v3894_v54  ;;  %vm3948_vm0 = vcmp.eq.f32.partialorder %v12398_v31, 0.0  ;;  %v3949_v10 = vand.u32 2147483648, %v12398_v31  ;;  %v3989_v24 = vmul.f32 %v12401_v39, %v3988_v37  ;;  %v8650_v54 = vld [vmem:[#allocation8 + $0x1f4] sm:$0xf0] }
 0x50a   : > { %v3942_v56 = vmul.f32 0.5, %v3941_v52  ;;  %v4036_v40 = vmul.f32 %v9037_v58, %v12390_v9  ;;  %v3806_v14 = vsel %vm3804_vm6, %v3805_v26, %v3803_v44  ;;  %v3849_v15 = vmul.f32 %v3848_v53, %v12393_v5  ;;  %v7614_v44 = vld [vmem:[#allocation8 + $0x2e8] sm:$0xf] }
 0x50b   : > { %v3896_v47 = vmul.f32 %v12397_v34, %v3895_v46  ;;  %vm3994_vm4 = vcmp.eq.f32.partialorder %v12400_v2, inf  ;;  %v3990_v36 = vmul.f32 0.5, %v3989_v24  ;;  %vm3996_vm5 = vcmp.eq.f32.partialorder %v12400_v2, 0.0  ;;  %v8682_v46 = vld [vmem:[#allocation8 + $0x2f4] sm:$0xf0] }
 0x50c   : > { %v3943_v19 = vsub.f32 1.5, %v3942_v56  ;;  %v3997_v33 = vand.u32 2147483648, %v12400_v2  ;;  %v4037_v4 = vmul.f32 %v9037_v58, %v4036_v40  ;;  %v3851_v20 = vsel %vm3850_vm11, %v12393_v5, %v3849_v15  ;;  %v7470_v40 = vld [vmem:[#allocation8 + $0x1c8] sm:$0xf] }
 0x50d   : > { %v3897_v3 = vmul.f32 %v3896_v47, %v12396_v12  ;;  %vm4042_vm6 = vcmp.eq.f32.partialorder %v12390_v9, inf  ;;  %v4084_v32 = vmul.f32 %v11618_v29, %v12391_v49  ;;  %v3854_v16 = vsel %vm3852_vm12, %v3853_v21, %v3851_v20  ;;  %v7358_v21 = vld [vmem:[#allocation8 + $0xe8] sm:$0xf] }
 0x50e   : > { %v3944_v0 = vmul.f32 %v12399_v59, %v3943_v19  ;;  %v3991_v13 = vsub.f32 1.5, %v3990_v36  ;;  %v4038_v50 = vmul.f32 0.5, %v4037_v4  ;;  %vm4044_vm10 = vcmp.eq.f32.partialorder %v12390_v9, 0.0  ;;  %v8618_v59 = vld [vmem:[#allocation8 + $0xf4] sm:$0xf0] }
 0x50f   : > { %v3899_v61 = vsel %vm3898_vm13, %v12396_v12, %v3897_v3  ;;  %v4045_v18 = vand.u32 2147483648, %v12390_v9  ;;  %v4085_v51 = vmul.f32 %v11618_v29, %v4084_v32  ;;  %v4093_v8 = vand.u32 2147483648, %v12391_v49  ;;  %v8678_v4 = vld [vmem:[#allocation8 + $0x2d4] sm:$0xf0] }
 0x510   : > { %v3902_v38 = vsel %vm3900_vm14, %v3901_v42, %v3899_v61  ;;  %v3945_v5 = vmul.f32 %v3944_v0, %v12398_v31  ;;  %v3992_v1 = vmul.f32 %v12401_v39, %v3991_v13  ;;  %v4039_v11 = vsub.f32 1.5, %v4038_v50  ;;  %v7342_v42 = vld [vmem:[#allocation8 + $0xc8] sm:$0xf]  ;;  %v8610_v61 = vld [vmem:[#allocation8 + $0xb4] sm:$0xf0] }
 0x511   : > { %vm4090_vm11 = vcmp.eq.f32.partialorder %v12391_v49, inf  ;;  %v4086_v27 = vmul.f32 0.5, %v4085_v51  ;;  %v4258_v30 = vpack.c.bf16 %v3758_v17, %v3758_v17  ;;  %v4262_v7 = vpack.c.bf16 %v3806_v14, %v3806_v14  ;;  %v8646_v14 = vld [vmem:[#allocation8 + $0x1d4] sm:$0xf0]  ;;  %v7326_v50 = vld [vmem:[#allocation8 + $0xa8] sm:$0xf] }
 0x512   : > { %v4266_v41 = vpack.c.bf16 %v3854_v16, %v3854_v16  ;;  %v3947_v57 = vsel %vm3946_vm15, %v12398_v31, %v3945_v5  ;;  %v3993_v6 = vmul.f32 %v3992_v1, %v12400_v2  ;;  %v4040_v34 = vmul.f32 %v9037_v58, %v4039_v11  ;;  %v7742_v51 = vld [vmem:[#allocation8 + $0x3e8] sm:$0xf]  ;;  %v8642_v1 = vld [vmem:[#allocation8 + $0x1b4] sm:$0xf0]  ;;  %v12402_v11 = vld [vmem:[#allocation45_spill] sm:$0xff] }
 0x513   : > { %v4270_v12 = vpack.c.bf16 %v3902_v38, %v3902_v38  ;;  %v3950_v63 = vsel %vm3948_vm0, %v3949_v10, %v3947_v57  ;;  %v4087_v55 = vsub.f32 1.5, %v4086_v27  ;;  %v4450_v28 = vunpack.c.l.b16 %v4258_v30  ;;  %v7454_v5 = vld [vmem:[#allocation8 + $0x1a8] sm:$0xf]  ;;  %v8714_v30 = vld [vmem:[#allocation8 + $0x3f4] sm:$0xf0] }
 0x514   : > { %v4454_v25 = vunpack.c.l.b16 %v4262_v7  ;;  %v3995_v26 = vsel %vm3994_vm4, %v12400_v2, %v3993_v6  ;;  %v4041_v45 = vmul.f32 %v4040_v34, %v12390_v9  ;;  %v4274_v43 = vpack.c.bf16 %v3950_v63, %v3950_v63  ;;  %v8614_v2 = vld [vmem:[#allocation8 + $0xd4] sm:$0xf0]  ;;  %v12404_v6 = vld [vmem:[#allocation41_spill] sm:$0xff] }
 0x515   : > { %v4458_v23 = vunpack.c.l.b16 %v4266_v41  ;;  %v3998_v58 = vsel %vm3996_vm5, %v3997_v33, %v3995_v26  ;;  %v4088_v60 = vmul.f32 %v11618_v29, %v4087_v55  ;;  %v4462_v31 = vunpack.c.l.b16 %v4270_v12  ;;  %v7598_v33 = vld [vmem:[#allocation8 + $0x2c8] sm:$0xf]  ;;  %v8674_v7 = vld [vmem:[#allocation8 + $0x2b4] sm:$0xf0] }
 0x516   : > { %v4507_v17 = vsel %vm4479_vm1, %v4454_v25, %v4450_v28  ;;  %v4043_v52 = vsel %vm4042_vm6, %v12390_v9, %v4041_v45  ;;  %v4278_v39 = vpack.c.bf16 %v3998_v58, %v3998_v58  ;;  %v4466_v37 = vunpack.c.l.b16 %v4274_v43  ;;  %v12403_v41 = vld [vmem:[#allocation46_spill] sm:$0xff]  ;;  %v12406_v25 = vld [vmem:[#allocation52_spill] sm:$0xff]  ;;  %v12407_v45 = vld [vmem:[#allocation53_spill] sm:$0xff] }
 0x517   : > { %v4508_v53 = vsel %vm4481_vm2, %v4458_v23, %v4507_v17  ;;  %v4046_v29 = vsel %vm4044_vm10, %v4045_v18, %v4043_v52  ;;  %v4089_v56 = vmul.f32 %v4088_v60, %v12391_v49  ;;  %v7359_v24 = vor.u32 %v8618_v59, %v7358_v21  ;;  %5248 = vmatmul.bf16.vlgmr.msra.gmra.mxu2 %v11614_v35  ;;  %v12405_v55 = vld [vmem:[#allocation42_spill] sm:$0xff]  ;;  %v7310_v21 = vld [vmem:[#allocation8 + $0x88] sm:$0xf]  ;;  %v12408_v58 = vld [vmem:[#allocation59_spill] sm:$0xff] }
 0x518   : > { %v4509_v10 = vsel %vm4483_vm3, %v4462_v31, %v4508_v53  ;;  %v4282_v15 = vpack.c.bf16 %v4046_v29, %v4046_v29  ;;  %v4470_v47 = vunpack.c.l.b16 %v4278_v39  ;;  %v7487_v36 = vor.u32 %v8650_v54, %v7486_v22  ;;  %v8606_v59 = vld [vmem:[#allocation8 + $0x94] sm:$0xf0]  ;;  %v7726_v22 = vld [vmem:[#allocation8 + $0x3c8] sm:$0xf]  ;;  %v12410_v39 = vld [vmem:[#allocation51_spill] sm:$0xff] }
 0x519   : > { %v4510_v19 = vsel %vm4485_vm7, %v4466_v37, %v4509_v10  ;;  %v4091_v9 = vsel %vm4090_vm11, %v12391_v49, %v4089_v56  ;;  %vm4092_vm1 = vcmp.eq.f32.partialorder %v12391_v49, 0.0  ;;  %5266 = vmatpush.bf16.msrb.mxu0 %v7359_v24  ;;  %v7615_v20 = vor.u32 %v8682_v46, %v7614_v44  ;;  %v7438_v44 = vld [vmem:[#allocation8 + $0x188] sm:$0xf]  ;;  %v8638_v52 = vld [vmem:[#allocation8 + $0x194] sm:$0xf0] }
 0x51a   : > { %v7343_v3 = vor.u32 %v8614_v2, %v7342_v42  ;;  %v4094_v32 = vsel %vm4092_vm1, %v4093_v8, %v4091_v9  ;;  %v4474_v16 = vunpack.c.l.b16 %v4282_v15  ;;  %v4511_v0 = vsel %vm4487_vm8, %v4470_v47, %v4510_v19  ;;  %5279 = vmatpush.bf16.msrb.mxu1 %v7487_v36  ;;  %v7582_v8 = vld [vmem:[#allocation8 + $0x2a8] sm:$0xf]  ;;  %v8710_v46 = vld [vmem:[#allocation8 + $0x3d4] sm:$0xf0] }
 0x51b   : > { %v7471_v13 = vor.u32 %v8646_v14, %v7470_v40  ;;  %v4286_v18 = vpack.c.bf16 %v4094_v32, %v4094_v32  ;;  %5292 = vmatpush.bf16.msrb.mxu2 %v7615_v20  ;;  %v7599_v38 = vor.u32 %v8678_v4, %v7598_v33  ;;  %v4111_v49 = vpack.c.bf16 %v12402_v11, %v12402_v11  ;;  %v7566_v42 = vld [vmem:[#allocation8 + $0x288] sm:$0xf]  ;;  %v8670_v2 = vld [vmem:[#allocation8 + $0x294] sm:$0xf0] }
 0x51c   : > { %v4512_v27 = vsel %vm4489_vm9, %v4474_v16, %v4511_v0  ;;  %v4112_v57 = vpack.c.bf16 %v12403_v41, %v12403_v41  ;;  %v4113_v34 = vpack.c.bf16 %v12404_v6, %v12404_v6  ;;  %v7327_v63 = vor.u32 %v8610_v61, %v7326_v50  ;;  %v7710_v15 = vld [vmem:[#allocation8 + $0x3a8] sm:$0xf]  ;;  %v8602_v36 = vld [vmem:[#allocation8 + $0x74] sm:$0xf0] }
 0x51d   : > { %v4478_v12 = vunpack.c.l.b16 %v4286_v18  ;;  %5267 = vmatpush.bf16.msrb.mxu0 %v7343_v3  ;;  %v4114_v28 = vpack.c.bf16 %v12405_v55, %v12405_v55  ;;  %v4115_v26 = vpack.c.bf16 %v12406_v25, %v12406_v25  ;;  %v4116_v43 = vpack.c.bf16 %v12407_v45, %v12407_v45  ;;  %v7294_v19 = vld [vmem:[#allocation8 + $0x68] sm:$0xf]  ;;  %v8706_v20 = vld [vmem:[#allocation8 + $0x3b4] sm:$0xf0]  ;;  %v12411_v18 = vld [vmem:[#allocation23_spill] sm:$0xff] }
 0x51e   : > { %5280 = vmatpush.bf16.msrb.mxu1 %v7471_v13  ;;  %v7455_v23 = vor.u32 %v8642_v1, %v7454_v5  ;;  %v4117_v60 = vpack.c.bf16 %v12408_v58, %v12408_v58  ;;  %vm12409_vm2 = vcmask 1047559   ;;  %v7743_v17 = vor.u32 %v8714_v30, %v7742_v51  ;;  %v7422_v32 = vld [vmem:[#allocation8 + $0x168] sm:$0xf]  ;;  %v8634_v16 = vld [vmem:[#allocation8 + $0x174] sm:$0xf0]  ;;  %v12413_v1 = vld [vmem:[#allocation25_spill] sm:$0xff] }
 0x51f   : > { %v4513_v31 = vsel %vm12409_vm2, %v4478_v12, %v4512_v27  ;;  %5293 = vmatpush.bf16.msrb.mxu2 %v7599_v38  ;;  %v7583_v54 = vor.u32 %v8674_v7, %v7582_v8  ;;  %v4118_v37 = vpack.c.bf16 %v12410_v39, %v12410_v39  ;;  %v5418_v29 = vunpack.c.l.b16 %v4111_v49  ;;  %v7550_v13 = vld [vmem:[#allocation8 + $0x268] sm:$0xf]  ;;  %v8666_v50 = vld [vmem:[#allocation8 + $0x274] sm:$0xf0]  ;;  %v12414_v55 = vld [vmem:[#allocation27_spill] sm:$0xff] }
 0x520   : > { %v11719_v53 = vpack.c.b16 %v4513_v31, %v4513_v31  ;;  %v5419_v56 = vunpack.c.l.b16 %v4112_v57  ;;  %v5420_v10 = vunpack.c.l.b16 %v4113_v34  ;;  %v7311_v24 = vor.u32 %v8606_v59, %v7310_v21  ;;  %v12412_v38 = vld [vmem:[#allocation22_spill] sm:$0xff]  ;;  %v7278_v30 = vld [vmem:[#allocation8 + $0x48] sm:$0xf]  ;;  %vm12423_vm3 = vmmov %vm12409_vm2 }
 0x521   : > { %5268 = vmatpush.bf16.msrb.mxu0 %v7327_v63  ;;  %v5422_v40 = vunpack.c.l.b16 %v4115_v26  ;;  %v5423_v14 = vunpack.c.l.b16 %v4116_v43  ;;  %v7439_v47 = vor.u32 %v8638_v52, %v7438_v44  ;;  %v5421_v33 = vunpack.c.l.b16 %v4114_v28  ;;  %v8598_v8 = vld [vmem:[#allocation8 + $0x54] sm:$0xf0]  ;;  %v7694_v57 = vld [vmem:[#allocation8 + $0x388] sm:$0xf]  ;;  %v12415_v44 = vld [vmem:[#allocation63_spill] sm:$0xff] }
 0x522   : > { %5209 = vmatmul.bf16.vlgmr.msrb.gmra.mxu3 %v11719_v53  ;;  %5281 = vmatpush.bf16.msrb.mxu1 %v7455_v23  ;;  %v5424_v4 = vunpack.c.l.b16 %v4117_v60  ;;  %v7727_v9 = vor.u32 %v8710_v46, %v7726_v22  ;;  %v7567_v3 = vor.u32 %v8670_v2, %v7566_v42  ;;  %v5425_v0 = vunpack.c.l.b16 %v4118_v37  ;;  %v7406_v34 = vld [vmem:[#allocation8 + $0x148] sm:$0xf]  ;;  %v8630_v12 = vld [vmem:[#allocation8 + $0x154] sm:$0xf0]  ;;  %v12417_v46 = vld [vmem:[#allocation65_spill] sm:$0xff] }
 0x523   : > { %5305 = vmatpush.bf16.msrb.mxu3 %v7743_v17  ;;  %5294 = vmatpush.bf16.msrb.mxu2 %v7583_v54  ;;  %v7295_v61 = vor.u32 %v8602_v36, %v7294_v19  ;;  %v5437_v51 = vsel %vm4485_vm7, %v5418_v29, %v12411_v18  ;;  %v5444_v5 = vsel %vm4485_vm7, %v5419_v56, %v12412_v38  ;;  %v8702_v25 = vld [vmem:[#allocation8 + $0x394] sm:$0xf0]  ;;  %v7534_v26 = vld [vmem:[#allocation8 + $0x248] sm:$0xf]  ;;  %v7488_v38 = vld [vmem:[#allocation8 + $0x1f8] sm:$0xf0] }
 0x524   : > { %v5451_v11 = vsel %vm4485_vm7, %v5420_v10, %v12413_v1  ;;  %v7711_v49 = vor.u32 %v8706_v20, %v7710_v15  ;;  %v7423_v27 = vor.u32 %v8634_v16, %v7422_v32  ;;  %v11729_v7 = vsel %vm4487_vm8, %v5422_v40, %v5437_v51  ;;  %v8662_v45 = vld [vmem:[#allocation8 + $0x254] sm:$0xf0]  ;;  %v7262_v59 = vld [vmem:[#allocation8 + $0x28] sm:$0xf]  ;;  %v8616_v16 = vld [vmem:[#allocation8 + $0xec] sm:$0xf] }
 0x525   : > { %5269 = vmatpush.bf16.msrb.mxu0 %v7311_v24  ;;  %v11732_v41 = vsel %vm4487_vm8, %v5423_v14, %v5444_v5  ;;  %v7551_v6 = vor.u32 %v8666_v50, %v7550_v13  ;;  %v11735_v63 = vsel %vm4487_vm8, %v5424_v4, %v5451_v11  ;;  %v5458_v28 = vsel %vm4485_vm7, %v5421_v33, %v12414_v55  ;;  %v8594_v58 = vld [vmem:[#allocation8 + $0x34] sm:$0xf0]  ;;  %v7678_v31 = vld [vmem:[#allocation8 + $0x368] sm:$0xf]  ;;  %v8648_v13 = vld [vmem:[#allocation8 + $0x1ec] sm:$0xf] }
 0x526   : > { %5282 = vmatpush.bf16.msrb.mxu1 %v7439_v47  ;;  %v11740_v43 = vsel %vm4487_vm8, %v5425_v0, %v5458_v28  ;;  %v7279_v23 = vor.u32 %v8598_v8, %v7278_v30  ;;  %v7407_v21 = vor.u32 %v8630_v12, %v7406_v34  ;;  %v7695_v60 = vor.u32 %v8702_v25, %v7694_v57  ;;  %v7390_v22 = vld [vmem:[#allocation8 + $0x128] sm:$0xf]  ;;  %v8626_v54 = vld [vmem:[#allocation8 + $0x134] sm:$0xf0]  ;;  %v7360_v0 = vld [vmem:[#allocation8 + $0xf8] sm:$0xf0] }
 0x527   : > { %5306 = vmatpush.bf16.msrb.mxu3 %v7727_v9  ;;  %5295 = vmatpush.bf16.msrb.mxu2 %v7567_v3  ;;  %v7535_v17 = vor.u32 %v8662_v45, %v7534_v26  ;;  %v4119_v52 = vpack.c.bf16 %v12415_v44, %v12415_v44  ;;  %v12416_v39 = vld [vmem:[#allocation64_spill] sm:$0xff]  ;;  %v4121_v42 = vpack.c.bf16 %v12417_v46, %v12417_v46  ;;  %v12418_v2 = vld [vmem:[#allocation66_spill] sm:$0xff]  ;;  %vm12424_vm7 = vmmov %vm12409_vm2 }
 0x528   : > { %v4120_v37 = vpack.c.bf16 %v12416_v39, %v12416_v39  ;;  %v4122_v29 = vpack.c.bf16 %v12418_v2, %v12418_v2  ;;  %v8698_v56 = vld [vmem:[#allocation8 + $0x374] sm:$0xf0]  ;;  %v7518_v10 = vld [vmem:[#allocation8 + $0x228] sm:$0xf]  ;;  %v7263_v15 = vor.u32 %v8594_v58, %v7262_v59  ;;  %v7391_v33 = vor.u32 %v8626_v54, %v7390_v22  ;;  %v8680_v5 = vld [vmem:[#allocation8 + $0x2ec] sm:$0xf] }
 0x529   : > { %5270 = vmatpush.bf16.msrb.mxu0 %v7295_v61  ;;  %v8658_v24 = vld [vmem:[#allocation8 + $0x234] sm:$0xf0]  ;;  %v7662_v40 = vld [vmem:[#allocation8 + $0x348] sm:$0xf]  ;;  %v7679_v3 = vor.u32 %v8698_v56, %v7678_v31  ;;  %v5426_v50 = vunpack.c.l.b16 %v4119_v52  ;;  %v5428_v18 = vunpack.c.l.b16 %v4121_v42  ;;  %v7616_v1 = vld [vmem:[#allocation8 + $0x2f8] sm:$0xf0]  ;;  %v7363_v30 = vor.u32 %v8616_v16, %v7360_v0 }
 0x52a   : > { %5283 = vmatpush.bf16.msrb.mxu1 %v7423_v27  ;;  %v8694_v14 = vld [vmem:[#allocation8 + $0x354] sm:$0xf0]  ;;  %v7246_v47 = vld [vmem:[#allocation8 + $0x8] sm:$0xf]  ;;  %v7519_v32 = vor.u32 %v8658_v24, %v7518_v10  ;;  %v5427_v61 = vunpack.c.l.b16 %v4120_v37  ;;  %v5429_v51 = vunpack.c.l.b16 %v4122_v29  ;;  %v7491_v57 = vor.u32 %v8648_v13, %v7488_v38  ;;  %v8612_v34 = vld [vmem:[#allocation8 + $0xcc] sm:$0xf] }
 0x52b   : > { %5307 = vmatpush.bf16.msrb.mxu3 %v7711_v49  ;;  %5296 = vmatpush.bf16.msrb.mxu2 %v7551_v6  ;;  %v8590_v19 = vld [vmem:[#allocation8 + $0x14] sm:$0xf0]  ;;  %v7374_v36 = vld [vmem:[#allocation8 + $0x108] sm:$0xf]  ;;  %v7663_v49 = vor.u32 %v8694_v14, %v7662_v40  ;;  %v7619_v6 = vor.u32 %v8680_v5, %v7616_v1  ;;  %v7344_v12 = vld [vmem:[#allocation8 + $0xd8] sm:$0xf0]  ;;  %v11753_v26 = vsel %vm4489_vm9, %v5426_v50, %v11729_v7 }
 0x52c   : > { %v8622_v4 = vld [vmem:[#allocation8 + $0x114] sm:$0xf0]  ;;  %v7502_v9 = vld [vmem:[#allocation8 + $0x208] sm:$0xf]  ;;  %v7247_v11 = vor.u32 %v8590_v19, %v7246_v47  ;;  %v8644_v25 = vld [vmem:[#allocation8 + $0x1cc] sm:$0xf]  ;;  %v11757_v45 = vsel %vm4489_vm9, %v5427_v61, %v11732_v41  ;;  %v7347_v7 = vor.u32 %v8612_v34, %v7344_v12 }
 0x52d   : > { %5271 = vmatpush.bf16.msrb.mxu0 %v7279_v23  ;;  %v8654_v20 = vld [vmem:[#allocation8 + $0x214] sm:$0xf0]  ;;  %v7375_v27 = vor.u32 %v8622_v4, %v7374_v36  ;;  %v7646_v55 = vld [vmem:[#allocation8 + $0x328] sm:$0xf]  ;;  %v11761_v23 = vsel %vm4489_vm9, %v5428_v18, %v11735_v63  ;;  %v7472_v59 = vld [vmem:[#allocation8 + $0x1d8] sm:$0xf0] }
 0x52e   : > { %5284 = vmatpush.bf16.msrb.mxu1 %v7407_v21  ;;  %v7503_v8 = vor.u32 %v8654_v20, %v7502_v9  ;;  %v8690_v28 = vld [vmem:[#allocation8 + $0x334] sm:$0xf0]  ;;  %v11765_v21 = vsel %vm4489_vm9, %v5429_v51, %v11740_v43  ;;  %v8676_v58 = vld [vmem:[#allocation8 + $0x2cc] sm:$0xf]  ;;  %v7630_v22 = vld [vmem:[#allocation8 + $0x308] sm:$0xf]  ;;  %v7475_v44 = vor.u32 %v8644_v25, %v7472_v59 }
 0x52f   : > { %5308 = vmatpush.bf16.msrb.mxu3 %v7695_v60  ;;  %5297 = vmatpush.bf16.msrb.mxu2 %v7535_v17  ;;  %v7600_v60 = vld [vmem:[#allocation8 + $0x2d8] sm:$0xf0]  ;;  %v7647_v31 = vor.u32 %v8690_v28, %v7646_v55  ;;  %v8608_v41 = vld [vmem:[#allocation8 + $0xac] sm:$0xf]  ;;  %v8686_v54 = vld [vmem:[#allocation8 + $0x314] sm:$0xf0] }
 0x530   : > { %v7328_v17 = vld [vmem:[#allocation8 + $0xb8] sm:$0xf0]  ;;  %v8712_v63 = vld [vmem:[#allocation8 + $0x3ec] sm:$0xf]  ;;  %v7603_v43 = vor.u32 %v8676_v58, %v7600_v60  ;;  %v12419_v29 = vld [vmem:[#allocation71_spill] sm:$0xff]  ;;  %v7631_v10 = vor.u32 %v8686_v54, %v7630_v22 }
 0x531   : > { %5272 = vmatpush.bf16.msrb.mxu0 %v7263_v15  ;;  %v7744_v52 = vld [vmem:[#allocation8 + $0x3f8] sm:$0xf0]  ;;  %v8640_v39 = vld [vmem:[#allocation8 + $0x1ac] sm:$0xf]  ;;  %v7331_v46 = vor.u32 %v8608_v41, %v7328_v17  ;;  %v4123_v56 = vpack.c.bf16 %v12419_v29, %v12419_v29  ;;  %vm12425_vm8 = vmmov %vm12409_vm2 }
 0x532   : > { %5261 = vmatmul.bf16.vlgmr.msra.gmra.mxu3 %v11719_v53  ;;  %5285 = vmatpush.bf16.msrb.mxu1 %v7391_v33  ;;  %v7456_v37 = vld [vmem:[#allocation8 + $0x1b8] sm:$0xf0]  ;;  %v8672_v42 = vld [vmem:[#allocation8 + $0x2ac] sm:$0xf]  ;;  %v7747_v47 = vor.u32 %v8712_v63, %v7744_v52  ;;  %v12421_v33 = vld [vmem:[#allocation73_spill] sm:$0xff] }
 0x533   : > { %5309 = vmatpush.bf16.msrb.mxu3 %v7679_v3  ;;  %5298 = vmatpush.bf16.msrb.mxu2 %v7519_v32  ;;  %v7584_v2 = vld [vmem:[#allocation8 + $0x2b8] sm:$0xf0]  ;;  %v8604_v24 = vld [vmem:[#allocation8 + $0x8c] sm:$0xf]  ;;  %v7459_v36 = vor.u32 %v8640_v39, %v7456_v37  ;;  %v4125_v4 = vpack.c.bf16 %v12421_v33, %v12421_v33  ;;  %v5430_v38 = vunpack.c.l.b16 %v4123_v56  ;;  %vm12426_vm9 = vmmov %vm12409_vm2 }
 0x534   : > { %v7312_v40 = vld [vmem:[#allocation8 + $0x98] sm:$0xf0]  ;;  %v12420_v14 = vld [vmem:[#allocation72_spill] sm:$0xff]  ;;  %v7587_v20 = vor.u32 %v8672_v42, %v7584_v2 }
 0x535   : > { %5273 = vmatpush.bf16.msrb.mxu0 %v7247_v11  ;;  %v4124_v15 = vpack.c.bf16 %v12420_v14, %v12420_v14  ;;  %v8708_v19 = vld [vmem:[#allocation8 + $0x3cc] sm:$0xf]  ;;  %v7728_v9 = vld [vmem:[#allocation8 + $0x3d8] sm:$0xf0]  ;;  %v7315_v13 = vor.u32 %v8604_v24, %v7312_v40 }
 0x536   : > { %5286 = vmatpush.bf16.msrb.mxu1 %v7375_v27  ;;  %v8636_v3 = vld [vmem:[#allocation8 + $0x18c] sm:$0xf]  ;;  %v7440_v32 = vld [vmem:[#allocation8 + $0x198] sm:$0xf0]  ;;  %v7731_v1 = vor.u32 %v8708_v19, %v7728_v9  ;;  %v8489_v9 = vld [vmem:[#allocation7 + $0xec] sm:$0xf0] }
 0x537   : > { %5310 = vmatpush.bf16.msrb.mxu3 %v7663_v49  ;;  %5299 = vmatpush.bf16.msrb.mxu2 %v7503_v8  ;;  %v12422_v16 = vld [vmem:[#allocation74_spill] sm:$0xff]  ;;  %v8668_v50 = vld [vmem:[#allocation8 + $0x28c] sm:$0xf]  ;;  %v5431_v5 = vunpack.c.l.b16 %v4124_v15  ;;  %v7443_v27 = vor.u32 %v8636_v3, %v7440_v32 }
 0x538   : > { %5274 = vmatmul.bf16.vlgmr.msrb.gmra.mxu0 %v11390_v62  ;;  %v4126_v0 = vpack.c.bf16 %v12422_v16, %v12422_v16  ;;  %v7568_v61 = vld [vmem:[#allocation8 + $0x298] sm:$0xf0]  ;;  %v8600_v18 = vld [vmem:[#allocation8 + $0x6c] sm:$0xf] }
 0x539   : > { %5318 = vmatpush.bf16.msra.mxu0 %v7363_v30  ;;  %5287 = vmatmul.bf16.vlgmr.msrb.gmra.mxu1 %v11504_v48  ;;  %v7296_v51 = vld [vmem:[#allocation8 + $0x78] sm:$0xf0]  ;;  %v8704_v11 = vld [vmem:[#allocation8 + $0x3ac] sm:$0xf]  ;;  %v5432_v30 = vunpack.c.l.b16 %v4125_v4  ;;  %v7571_v8 = vor.u32 %v8668_v50, %v7568_v61  ;;  %v11785_v41 = vsel %vm12424_vm7, %v5431_v5, %v11757_v45  ;;  %v7862_v4 = vld [vmem:[#allocation7 + $0xe0] sm:$0xf] }
 0x53a   : > { %5331 = vmatpush.bf16.msra.mxu1 %v7491_v57  ;;  %5300 = vmatmul.bf16.vlgmr.msrb.gmra.mxu2 %v11614_v35  ;;  %v7712_v49 = vld [vmem:[#allocation8 + $0x3b8] sm:$0xf0]  ;;  %v8632_v57 = vld [vmem:[#allocation8 + $0x16c] sm:$0xf]  ;;  %v5433_v34 = vunpack.c.l.b16 %v4126_v0  ;;  %v7299_v12 = vor.u32 %v8600_v18, %v7296_v51  ;;  %v7990_v50 = vld [vmem:[#allocation7 + $0x1e0] sm:$0xf]  ;;  %v7863_v18 = vor.u32 %v8489_v9, %v7862_v4 }
 0x53b   : > { %5344 = vmatpush.bf16.msra.mxu2 %v7619_v6  ;;  %5311 = vmatpush.bf16.msrb.mxu3 %v7647_v31  ;;  %v7424_v6 = vld [vmem:[#allocation8 + $0x178] sm:$0xf0]  ;;  %v8664_v55 = vld [vmem:[#allocation8 + $0x26c] sm:$0xf]  ;;  %v7715_v25 = vor.u32 %v8704_v11, %v7712_v49  ;;  %v11781_v31 = vsel %vm12423_vm3, %v5430_v38, %v11753_v26  ;;  %v8521_v61 = vld [vmem:[#allocation7 + $0x1ec] sm:$0xf0] }
 0x53c   : > { %v7552_v28 = vld [vmem:[#allocation8 + $0x278] sm:$0xf0]  ;;  %v8596_v59 = vld [vmem:[#allocation8 + $0x4c] sm:$0xf]  ;;  %v11793_v26 = vsel %vm12426_vm9, %v5433_v34, %v11765_v21  ;;  %v8118_v51 = vld [vmem:[#allocation7 + $0x2e0] sm:$0xf] }
 0x53d   : > { %5319 = vmatpush.bf16.msra.mxu0 %v7347_v7  ;;  %v7280_v58 = vld [vmem:[#allocation8 + $0x58] sm:$0xf0]  ;;  %v8700_v60 = vld [vmem:[#allocation8 + $0x38c] sm:$0xf]  ;;  %v7427_v7 = vor.u32 %v8632_v57, %v7424_v6  ;;  %v7555_v22 = vor.u32 %v8664_v55, %v7552_v28  ;;  %v8553_v38 = vld [vmem:[#allocation7 + $0x2ec] sm:$0xf0]  ;;  %v7991_v57 = vor.u32 %v8521_v61, %v7990_v50 }
 0x53e   : > { %5332 = vmatpush.bf16.msra.mxu1 %v7475_v44  ;;  %v7696_v17 = vld [vmem:[#allocation8 + $0x398] sm:$0xf0]  ;;  %v8628_v54 = vld [vmem:[#allocation8 + $0x14c] sm:$0xf]  ;;  %v11789_v44 = vsel %vm12425_vm8, %v5432_v30, %v11761_v23  ;;  %v7846_v11 = vld [vmem:[#allocation7 + $0xc0] sm:$0xf]  ;;  %v8119_v6 = vor.u32 %v8553_v38, %v8118_v51 }
 0x53f   : > { %5345 = vmatpush.bf16.msra.mxu2 %v7603_v43  ;;  %5312 = vmatpush.bf16.msrb.mxu3 %v7631_v10  ;;  %v7408_v63 = vld [vmem:[#allocation8 + $0x158] sm:$0xf0]  ;;  %v7283_v43 = vor.u32 %v8596_v59, %v7280_v58  ;;  %v8660_v52 = vld [vmem:[#allocation8 + $0x24c] sm:$0xf]  ;;  %v8485_v49 = vld [vmem:[#allocation7 + $0xcc] sm:$0xf0] }
 0x540   : > { %v7536_v39 = vld [vmem:[#allocation8 + $0x258] sm:$0xf0]  ;;  %v8592_v37 = vld [vmem:[#allocation8 + $0x2c] sm:$0xf]  ;;  %v7411_v2 = vor.u32 %v8628_v54, %v7408_v63  ;;  %v7974_v34 = vld [vmem:[#allocation7 + $0x1c0] sm:$0xf]  ;;  %v7847_v55 = vor.u32 %v8485_v49, %v7846_v11 }
 0x541   : > { %5320 = vmatpush.bf16.msra.mxu0 %v7331_v46  ;;  %v7264_v45 = vld [vmem:[#allocation8 + $0x38] sm:$0xf0]  ;;  %v7699_v46 = vor.u32 %v8700_v60, %v7696_v17  ;;  %v8696_v42 = vld [vmem:[#allocation8 + $0x36c] sm:$0xf]  ;;  %v7539_v56 = vor.u32 %v8660_v52, %v7536_v39  ;;  %v8102_v28 = vld [vmem:[#allocation7 + $0x2c0] sm:$0xf] }
 0x542   : > { %5333 = vmatpush.bf16.msra.mxu1 %v7459_v36  ;;  %5313 = vmatmul.bf16.vlgmr.msrb.gmra.mxu3 %v11719_v53  ;;  %v7680_v29 = vld [vmem:[#allocation8 + $0x378] sm:$0xf0]  ;;  %v8624_v23 = vld [vmem:[#allocation8 + $0x12c] sm:$0xf]  ;;  %v7267_v24 = vor.u32 %v8592_v37, %v7264_v45  ;;  %v7830_v58 = vld [vmem:[#allocation7 + $0xa0] sm:$0xf] }
 0x543   : > { %5357 = vmatpush.bf16.msra.mxu3 %v7747_v47  ;;  %5346 = vmatpush.bf16.msra.mxu2 %v7587_v20  ;;  %v7392_v10 = vld [vmem:[#allocation8 + $0x138] sm:$0xf0]  ;;  %v8656_v40 = vld [vmem:[#allocation8 + $0x22c] sm:$0xf]  ;;  %v7683_v19 = vor.u32 %v8696_v42, %v7680_v29  ;;  %v8481_v60 = vld [vmem:[#allocation7 + $0xac] sm:$0xf0] }
 0x544   : > { %v7520_v14 = vld [vmem:[#allocation8 + $0x238] sm:$0xf0]  ;;  %v8692_v15 = vld [vmem:[#allocation8 + $0x34c] sm:$0xf]  ;;  %v7395_v33 = vor.u32 %v8624_v23, %v7392_v10  ;;  %v8585_v63 = vld [vmem:[#allocation7 + $0x3ec] sm:$0xf0]  ;;  %v7831_v37 = vor.u32 %v8481_v60, %v7830_v58 }
 0x545   : > { %5321 = vmatpush.bf16.msra.mxu0 %v7315_v13  ;;  %v8588_v47 = vld [vmem:[#allocation8 + $0xc] sm:$0xf]  ;;  %v7248_v21 = vld [vmem:[#allocation8 + $0x18] sm:$0xf0]  ;;  %v7523_v20 = vor.u32 %v8656_v40, %v7520_v14  ;;  %v7958_v52 = vld [vmem:[#allocation7 + $0x1a0] sm:$0xf] }
 0x546   : > { %5334 = vmatpush.bf16.msra.mxu1 %v7443_v27  ;;  %v7664_v36 = vld [vmem:[#allocation8 + $0x358] sm:$0xf0]  ;;  %v8620_v3 = vld [vmem:[#allocation8 + $0x10c] sm:$0xf]  ;;  %v7251_v0 = vor.u32 %v8588_v47, %v7248_v21  ;;  %v8513_v39 = vld [vmem:[#allocation7 + $0x1ac] sm:$0xf0] }
 0x547   : > { %5358 = vmatpush.bf16.msra.mxu3 %v7731_v1  ;;  %5347 = vmatpush.bf16.msra.mxu2 %v7571_v8  ;;  %v7376_v32 = vld [vmem:[#allocation8 + $0x118] sm:$0xf0]  ;;  %v8652_v16 = vld [vmem:[#allocation8 + $0x20c] sm:$0xf]  ;;  %v7667_v5 = vor.u32 %v8692_v15, %v7664_v36  ;;  %v8086_v45 = vld [vmem:[#allocation7 + $0x2a0] sm:$0xf]  ;;  %v7959_v10 = vor.u32 %v8513_v39, %v7958_v52 }
 0x548   : > { %v7504_v13 = vld [vmem:[#allocation8 + $0x218] sm:$0xf0]  ;;  %v7379_v1 = vor.u32 %v8620_v3, %v7376_v32  ;;  %v8688_v27 = vld [vmem:[#allocation8 + $0x32c] sm:$0xf]  ;;  %v8477_v29 = vld [vmem:[#allocation7 + $0x8c] sm:$0xf0] }
 0x549   : > { %5322 = vmatpush.bf16.msra.mxu0 %v7299_v12  ;;  %v7648_v30 = vld [vmem:[#allocation8 + $0x338] sm:$0xf0]  ;;  %v7507_v8 = vor.u32 %v8652_v16, %v7504_v13  ;;  %v8517_v12 = vld [vmem:[#allocation7 + $0x1cc] sm:$0xf0]  ;;  %v8230_v23 = vld [vmem:[#allocation7 + $0x3c0] sm:$0xf] }
 0x54a   : > { %5335 = vmatpush.bf16.msra.mxu1 %v7427_v7  ;;  %v7651_v59 = vor.u32 %v8688_v27, %v7648_v30  ;;  %v8684_v7 = vld [vmem:[#allocation8 + $0x30c] sm:$0xf]  ;;  %v7632_v17 = vld [vmem:[#allocation8 + $0x318] sm:$0xf0]  ;;  %v7975_v54 = vor.u32 %v8517_v12, %v7974_v34  ;;  %v7942_v40 = vld [vmem:[#allocation7 + $0x180] sm:$0xf] }
 0x54b   : > { %5359 = vmatpush.bf16.msra.mxu3 %v7715_v25  ;;  %5348 = vmatpush.bf16.msra.mxu2 %v7555_v22  ;;  %v8549_v25 = vld [vmem:[#allocation7 + $0x2cc] sm:$0xf0]  ;;  %v8246_v22 = vld [vmem:[#allocation7 + $0x3e0] sm:$0xf]  ;;  %v7635_v42 = vor.u32 %v8684_v7, %v7632_v17  ;;  %v8487_v52 = vld [vmem:[#allocation7 + $0xe4] sm:$0xf] }
 0x54c   : > { %v8509_v14 = vld [vmem:[#allocation7 + $0x18c] sm:$0xf0]  ;;  %v8070_v15 = vld [vmem:[#allocation7 + $0x280] sm:$0xf]  ;;  %v7864_v39 = vld [vmem:[#allocation7 + $0xf0] sm:$0xf0] }
 0x54d   : > { %5323 = vmatpush.bf16.msra.mxu0 %v7283_v43  ;;  %v8103_v43 = vor.u32 %v8549_v25, %v8102_v28  ;;  %v8541_v47 = vld [vmem:[#allocation7 + $0x28c] sm:$0xf0]  ;;  %v7798_v21 = vld [vmem:[#allocation7 + $0x60] sm:$0xf] }
 0x54e   : > { %5336 = vmatpush.bf16.msra.mxu1 %v7411_v2  ;;  %v7814_v2 = vld [vmem:[#allocation7 + $0x80] sm:$0xf]  ;;  %v8577_v4 = vld [vmem:[#allocation7 + $0x3ac] sm:$0xf0]  ;;  %v8071_v9 = vor.u32 %v8541_v47, %v8070_v15  ;;  %v7848_v15 = vld [vmem:[#allocation7 + $0xd0] sm:$0xf0] }
 0x54f   : > { %5360 = vmatpush.bf16.msra.mxu3 %v7699_v46  ;;  %5349 = vmatpush.bf16.msra.mxu2 %v7539_v56  ;;  %v8545_v46 = vld [vmem:[#allocation7 + $0x2ac] sm:$0xf0]  ;;  %v8247_v56 = vor.u32 %v8585_v63, %v8246_v22  ;;  %v8214_v36 = vld [vmem:[#allocation7 + $0x3a0] sm:$0xf] }
 0x550   : > { %v8505_v3 = vld [vmem:[#allocation7 + $0x16c] sm:$0xf0]  ;;  %v8054_v16 = vld [vmem:[#allocation7 + $0x260] sm:$0xf]  ;;  %v8215_v61 = vor.u32 %v8577_v4, %v8214_v36  ;;  %v7976_v4 = vld [vmem:[#allocation7 + $0x1d0] sm:$0xf0] }
 0x551   : > { %5324 = vmatpush.bf16.msra.mxu0 %v7267_v24  ;;  %v8087_v24 = vor.u32 %v8545_v46, %v8086_v45  ;;  %v7782_v13 = vld [vmem:[#allocation7 + $0x40] sm:$0xf]  ;;  %v8469_v50 = vld [vmem:[#allocation7 + $0x4c] sm:$0xf0] }
 0x552   : > { %5337 = vmatpush.bf16.msra.mxu1 %v7395_v33  ;;  %v7943_v33 = vor.u32 %v8509_v14, %v7942_v40  ;;  %v8573_v38 = vld [vmem:[#allocation7 + $0x38c] sm:$0xf0]  ;;  %v7783_v49 = vor.u32 %v8469_v50, %v7782_v13  ;;  %v8038_v27 = vld [vmem:[#allocation7 + $0x240] sm:$0xf]  ;;  %v7832_v13 = vld [vmem:[#allocation7 + $0xb0] sm:$0xf0] }
 0x553   : > { %5361 = vmatpush.bf16.msra.mxu3 %v7683_v19  ;;  %5350 = vmatpush.bf16.msra.mxu2 %v7523_v20  ;;  %v8473_v19 = vld [vmem:[#allocation7 + $0x6c] sm:$0xf0]  ;;  %v7926_v20 = vld [vmem:[#allocation7 + $0x160] sm:$0xf] }
 0x554   : > { %v7799_v32 = vor.u32 %v8473_v19, %v7798_v21  ;;  %v7927_v51 = vor.u32 %v8505_v3, %v7926_v20  ;;  %v8501_v11 = vld [vmem:[#allocation7 + $0x14c] sm:$0xf0]  ;;  %v7766_v30 = vld [vmem:[#allocation7 + $0x20] sm:$0xf]  ;;  %v8547_v20 = vld [vmem:[#allocation7 + $0x2c4] sm:$0xf] }
 0x555   : > { %5325 = vmatpush.bf16.msra.mxu0 %v7251_v0  ;;  %v8537_v0 = vld [vmem:[#allocation7 + $0x26c] sm:$0xf0]  ;;  %v7894_v28 = vld [vmem:[#allocation7 + $0x120] sm:$0xf]  ;;  %v8104_v3 = vld [vmem:[#allocation7 + $0x2d0] sm:$0xf0] }
 0x556   : > { %5338 = vmatpush.bf16.msra.mxu1 %v7379_v1  ;;  %v7910_v1 = vld [vmem:[#allocation7 + $0x140] sm:$0xf]  ;;  %v8569_v12 = vld [vmem:[#allocation7 + $0x36c] sm:$0xf0] }
 0x557   : > { %5362 = vmatpush.bf16.msra.mxu3 %v7667_v5  ;;  %5351 = vmatpush.bf16.msra.mxu2 %v7507_v8  ;;  %v8055_v5 = vor.u32 %v8537_v0, %v8054_v16  ;;  %v8465_v8 = vld [vmem:[#allocation7 + $0x2c] sm:$0xf0]  ;;  %v7911_v34 = vor.u32 %v8501_v11, %v7910_v1  ;;  %v8022_v58 = vld [vmem:[#allocation7 + $0x220] sm:$0xf]  ;;  %v11801_v16 = vpack.c.b16 %v11781_v31, %v11781_v31  ;;  %v8479_v0 = vld [vmem:[#allocation7 + $0xa4] sm:$0xf] }
 0x558   : > { %5326 = vmatmul.bf16.vlgmr.msra.gmra.mxu0 %v11390_v62  ;;  %v8581_v62 = vld [vmem:[#allocation7 + $0x3cc] sm:$0xf0]  ;;  %v8166_v7 = vld [vmem:[#allocation7 + $0x340] sm:$0xf]  ;;  %v11810_v31 = vpack.c.b16 %v11789_v44, %v11789_v44  ;;  %v8107_v1 = vor.u32 %v8547_v20, %v8104_v3  ;;  %v8511_v11 = vld [vmem:[#allocation7 + $0x1a4] sm:$0xf] }
 0x559   : > { %6110 = vmatpush.bf16.msrb.mxu0 %v7863_v18  ;;  %5339 = vmatmul.bf16.vlgmr.msra.gmra.mxu1 %v11504_v48  ;;  %v7815_v48 = vor.u32 %v8477_v29, %v7814_v2  ;;  %v8198_v18 = vld [vmem:[#allocation7 + $0x380] sm:$0xf]  ;;  %v8497_v25 = vld [vmem:[#allocation7 + $0x12c] sm:$0xf0]  ;;  %v8184_v3 = vld [vmem:[#allocation7 + $0x370] sm:$0xf0] }
 0x55a   : > { %6123 = vmatpush.bf16.msrb.mxu1 %v7991_v57  ;;  %5352 = vmatmul.bf16.vlgmr.msra.gmra.mxu2 %v11614_v35  ;;  %v8231_v35 = vor.u32 %v8581_v62, %v8230_v23  ;;  %v8199_v57 = vor.u32 %v8573_v38, %v8198_v18  ;;  %v8529_v60 = vld [vmem:[#allocation7 + $0x22c] sm:$0xf0]  ;;  %v7750_v17 = vld [vmem:[#allocation7] sm:$0xf]  ;;  %v7992_v23 = vld [vmem:[#allocation7 + $0x1f0] sm:$0xf0] }
 0x55b   : > { %6136 = vmatpush.bf16.msrb.mxu2 %v8119_v6  ;;  %5363 = vmatpush.bf16.msra.mxu3 %v7651_v59  ;;  %v8182_v6 = vld [vmem:[#allocation7 + $0x360] sm:$0xf]  ;;  %v7767_v59 = vor.u32 %v8465_v8, %v7766_v30  ;;  %v8461_v22 = vld [vmem:[#allocation7 + $0xc] sm:$0xf0]  ;;  %v8551_v62 = vld [vmem:[#allocation7 + $0x2e4] sm:$0xf] }
 0x55c   : > { %v8565_v63 = vld [vmem:[#allocation7 + $0x34c] sm:$0xf0]  ;;  %v7878_v45 = vld [vmem:[#allocation7 + $0x100] sm:$0xf]  ;;  %v7751_v2 = vor.u32 %v8461_v22, %v7750_v17  ;;  %v8583_v18 = vld [vmem:[#allocation7 + $0x3e4] sm:$0xf]  ;;  %v11816_v22 = vpack.c.b16 %v11793_v26, %v11793_v26 }
 0x55d   : > { %6111 = vmatpush.bf16.msrb.mxu0 %v7847_v55  ;;  %v8493_v46 = vld [vmem:[#allocation7 + $0x10c] sm:$0xf0]  ;;  %v8167_v40 = vor.u32 %v8565_v63, %v8166_v7  ;;  %v8150_v47 = vld [vmem:[#allocation7 + $0x320] sm:$0xf]  ;;  %v8088_v30 = vld [vmem:[#allocation7 + $0x2b0] sm:$0xf0] }
 0x55e   : > { %6124 = vmatpush.bf16.msrb.mxu1 %v7975_v54  ;;  %v8183_v54 = vor.u32 %v8569_v12, %v8182_v6  ;;  %v8525_v29 = vld [vmem:[#allocation7 + $0x20c] sm:$0xf0]  ;;  %v7879_v14 = vor.u32 %v8493_v46, %v7878_v45  ;;  %v8134_v50 = vld [vmem:[#allocation7 + $0x300] sm:$0xf]  ;;  %v8475_v8 = vld [vmem:[#allocation7 + $0x84] sm:$0xf] }
 0x55f   : > { %6137 = vmatpush.bf16.msrb.mxu2 %v8103_v43  ;;  %5364 = vmatpush.bf16.msra.mxu3 %v7635_v42  ;;  %v7895_v43 = vor.u32 %v8497_v25, %v7894_v28  ;;  %v8006_v42 = vld [vmem:[#allocation7 + $0x200] sm:$0xf]  ;;  %v8561_v21 = vld [vmem:[#allocation7 + $0x32c] sm:$0xf0]  ;;  %v8232_v12 = vld [vmem:[#allocation7 + $0x3d0] sm:$0xf0] }
 0x560   : > { %v8007_v19 = vor.u32 %v8525_v29, %v8006_v42  ;;  %v8507_v28 = vld [vmem:[#allocation7 + $0x184] sm:$0xf]  ;;  %v7944_v25 = vld [vmem:[#allocation7 + $0x190] sm:$0xf0] }
 0x561   : > { %6112 = vmatpush.bf16.msrb.mxu0 %v7831_v37  ;;  %v8023_v37 = vor.u32 %v8529_v60, %v8022_v58  ;;  %v8539_v58 = vld [vmem:[#allocation7 + $0x284] sm:$0xf]  ;;  %v8072_v60 = vld [vmem:[#allocation7 + $0x290] sm:$0xf0] }
 0x562   : > { %6125 = vmatpush.bf16.msrb.mxu1 %v7959_v10  ;;  %5365 = vmatmul.bf16.vlgmr.msra.gmra.mxu3 %v11719_v53  ;;  %v8533_v53 = vld [vmem:[#allocation7 + $0x24c] sm:$0xf0]  ;;  %v7867_v10 = vor.u32 %v8487_v52, %v7864_v39  ;;  %v8471_v7 = vld [vmem:[#allocation7 + $0x64] sm:$0xf]  ;;  %v7800_v17 = vld [vmem:[#allocation7 + $0x70] sm:$0xf0]  ;;  %v8075_v39 = vor.u32 %v8539_v58, %v8072_v60 }
 0x563   : > { %6149 = vmatpush.bf16.msrb.mxu3 %v8247_v56  ;;  %6138 = vmatpush.bf16.msrb.mxu2 %v8087_v24  ;;  %v8039_v55 = vor.u32 %v8533_v53, %v8038_v27  ;;  %v8519_v56 = vld [vmem:[#allocation7 + $0x1e4] sm:$0xf]  ;;  %v8120_v24 = vld [vmem:[#allocation7 + $0x2f0] sm:$0xf0]  ;;  %v7835_v27 = vor.u32 %v8479_v0, %v7832_v13  ;;  %v7803_v46 = vor.u32 %v8471_v7, %v7800_v17  ;;  %v8126_v58 = vld [vmem:[#allocation7 + $0x2e8] sm:$0xf] }
 0x564   : > { %v8123_v36 = vor.u32 %v8551_v62, %v8120_v24  ;;  %v8543_v53 = vld [vmem:[#allocation7 + $0x2a4] sm:$0xf]  ;;  %v8216_v52 = vld [vmem:[#allocation7 + $0x3b0] sm:$0xf0]  ;;  %v8554_v60 = vld [vmem:[#allocation7 + $0x2f4] sm:$0xf0] }
 0x565   : > { %6113 = vmatpush.bf16.msrb.mxu0 %v7815_v48  ;;  %v8483_v48 = vld [vmem:[#allocation7 + $0xc4] sm:$0xf]  ;;  %v7928_v45 = vld [vmem:[#allocation7 + $0x170] sm:$0xf0] }
 0x566   : > { %6126 = vmatpush.bf16.msrb.mxu1 %v7943_v33  ;;  %v8515_v33 = vld [vmem:[#allocation7 + $0x1c4] sm:$0xf]  ;;  %v8200_v62 = vld [vmem:[#allocation7 + $0x390] sm:$0xf0] }
 0x567   : > { %6150 = vmatpush.bf16.msrb.mxu3 %v8231_v35  ;;  %6139 = vmatpush.bf16.msrb.mxu2 %v8071_v9  ;;  %v7995_v35 = vor.u32 %v8519_v56, %v7992_v23  ;;  %v7851_v9 = vor.u32 %v8483_v48, %v7848_v15  ;;  %v7979_v38 = vor.u32 %v8515_v33, %v7976_v4  ;;  %v8575_v63 = vld [vmem:[#allocation7 + $0x3a4] sm:$0xf]  ;;  %v7784_v56 = vld [vmem:[#allocation7 + $0x50] sm:$0xf0]  ;;  %v5171_v48 = vpop.f32.mrf.mxu0 }
 0x568   : > { %v8535_v42 = vld [vmem:[#allocation7 + $0x264] sm:$0xf]  ;;  %v8219_v26 = vor.u32 %v8575_v63, %v8216_v52  ;;  %v5184_v15 = vpop.f32.mrf.mxu1  ;;  %v7768_v33 = vld [vmem:[#allocation7 + $0x30] sm:$0xf0]  ;;  %v8486_v63 = vld [vmem:[#allocation7 + $0xd4] sm:$0xf0] }
 0x569   : > { %6114 = vmatpush.bf16.msrb.mxu0 %v7799_v32  ;;  %v8151_v32 = vor.u32 %v8561_v21, %v8150_v47  ;;  %v8467_v29 = vld [vmem:[#allocation7 + $0x44] sm:$0xf]  ;;  %v7896_v13 = vld [vmem:[#allocation7 + $0x130] sm:$0xf0] }
 0x56a   : > { %6127 = vmatpush.bf16.msrb.mxu1 %v7927_v51  ;;  %v11805_v51 = vpack.c.b16 %v11785_v41, %v11785_v41  ;;  %v8571_v23 = vld [vmem:[#allocation7 + $0x384] sm:$0xf]  ;;  %v7787_v47 = vor.u32 %v8467_v29, %v7784_v56  ;;  %v8518_v29 = vld [vmem:[#allocation7 + $0x1d4] sm:$0xf0] }
 0x56b   : > { %6151 = vmatpush.bf16.msrb.mxu3 %v8215_v61  ;;  %6140 = vmatpush.bf16.msrb.mxu2 %v8055_v5  ;;  %v8557_v61 = vld [vmem:[#allocation7 + $0x30c] sm:$0xf0]  ;;  %v8248_v5 = vld [vmem:[#allocation7 + $0x3f0] sm:$0xf0]  ;;  %v8531_v21 = vld [vmem:[#allocation7 + $0x244] sm:$0xf]  ;;  %v8203_v4 = vor.u32 %v8571_v23, %v8200_v62 }
 0x56c   : > { %v8135_v41 = vor.u32 %v8557_v61, %v8134_v50  ;;  %v8251_v6 = vor.u32 %v8583_v18, %v8248_v5  ;;  %v8495_v0 = vld [vmem:[#allocation7 + $0x124] sm:$0xf]  ;;  %v8024_v18 = vld [vmem:[#allocation7 + $0x230] sm:$0xf0]  ;;  %v8550_v23 = vld [vmem:[#allocation7 + $0x2d4] sm:$0xf0] }
 0x56d   : > { %6115 = vmatpush.bf16.msrb.mxu0 %v7783_v49  ;;  %v7960_v49 = vld [vmem:[#allocation7 + $0x1b0] sm:$0xf0]  ;;  %v8527_v61 = vld [vmem:[#allocation7 + $0x224] sm:$0xf]  ;;  %v7838_v62 = vld [vmem:[#allocation7 + $0xa8] sm:$0xf] }
 0x56e   : > { %6128 = vmatpush.bf16.msrb.mxu1 %v7911_v34  ;;  %v8579_v34 = vld [vmem:[#allocation7 + $0x3c4] sm:$0xf]  ;;  %v7963_v44 = vor.u32 %v8511_v11, %v7960_v49  ;;  %v8168_v49 = vld [vmem:[#allocation7 + $0x350] sm:$0xf0] }
 0x56f   : > { %6152 = vmatpush.bf16.msrb.mxu3 %v8199_v57  ;;  %6141 = vmatpush.bf16.msrb.mxu2 %v8039_v55  ;;  %v7816_v57 = vld [vmem:[#allocation7 + $0x90] sm:$0xf0]  ;;  %v8091_v55 = vor.u32 %v8543_v53, %v8088_v30  ;;  %v8459_v5 = vld [vmem:[#allocation7 + $0x4] sm:$0xf]  ;;  %v7870_v53 = vld [vmem:[#allocation7 + $0xe8] sm:$0xf] }
 0x570   : > { %v8490_v30 = vld [vmem:[#allocation7 + $0xf4] sm:$0xf0]  ;;  %v8559_v52 = vld [vmem:[#allocation7 + $0x324] sm:$0xf] }
 0x571   : > { %6116 = vmatpush.bf16.msrb.mxu0 %v7767_v59  ;;  %v7819_v59 = vor.u32 %v8475_v8, %v7816_v57  ;;  %v8491_v8 = vld [vmem:[#allocation7 + $0x104] sm:$0xf]  ;;  %v7880_v57 = vld [vmem:[#allocation7 + $0x110] sm:$0xf0] }
 0x572   : > { %6129 = vmatpush.bf16.msrb.mxu1 %v7895_v43  ;;  %v7947_v43 = vor.u32 %v8507_v28, %v7944_v25  ;;  %v7998_v28 = vld [vmem:[#allocation7 + $0x1e8] sm:$0xf]  ;;  %v8522_v25 = vld [vmem:[#allocation7 + $0x1f4] sm:$0xf0]  ;;  %v7883_v17 = vor.u32 %v8491_v8, %v7880_v57 }
 0x573   : > { %6153 = vmatpush.bf16.msrb.mxu3 %v8183_v54  ;;  %6142 = vmatpush.bf16.msrb.mxu2 %v8023_v37  ;;  %v8235_v54 = vor.u32 %v8579_v34, %v8232_v12  ;;  %v8503_v37 = vld [vmem:[#allocation7 + $0x164] sm:$0xf]  ;;  %v5173_v34 = vpop.f32.mrf.mxu0  ;;  %v8474_v8 = vld [vmem:[#allocation7 + $0x74] sm:$0xf0] }
 0x575   : > { %6117 = vmatpush.bf16.msrb.mxu0 %v7751_v2  ;;  %v8056_v2 = vld [vmem:[#allocation7 + $0x270] sm:$0xf0] }
 0x576   : > { %6130 = vmatpush.bf16.msrb.mxu1 %v7879_v14  ;;  %v8059_v24 = vor.u32 %v8535_v42, %v8056_v2  ;;  %v7912_v14 = vld [vmem:[#allocation7 + $0x150] sm:$0xf0]  ;;  %v8127_v42 = vor.u32 %v8554_v60, %v8126_v58  ;;  %v7982_v2 = vld [vmem:[#allocation7 + $0x1c8] sm:$0xf] }
 0x577   : > { %6154 = vmatpush.bf16.msrb.mxu3 %v8167_v40  ;;  %6143 = vmatpush.bf16.msrb.mxu2 %v8007_v19  ;;  %v8499_v40 = vld [vmem:[#allocation7 + $0x144] sm:$0xf]  ;;  %v8040_v19 = vld [vmem:[#allocation7 + $0x250] sm:$0xf0]  ;;  %v8062_v60 = vld [vmem:[#allocation7 + $0x268] sm:$0xf] }
 0x578   : > { %6118 = vmatmul.bf16.vlgmr.msrb.gmra.mxu0 %v11801_v16  ;;  %v7915_v20 = vor.u32 %v8499_v40, %v7912_v14  ;;  %v8555_v40 = vld [vmem:[#allocation7 + $0x304] sm:$0xf]  ;;  %v8136_v14 = vld [vmem:[#allocation7 + $0x310] sm:$0xf0] }
 0x579   : > { %6162 = vmatpush.bf16.msra.mxu0 %v7867_v10  ;;  %6131 = vmatmul.bf16.vlgmr.msrb.gmra.mxu1 %v11805_v51  ;;  %v7931_v10 = vor.u32 %v8503_v37, %v7928_v45  ;;  %v7999_v45 = vor.u32 %v8522_v25, %v7998_v28  ;;  %v7934_v25 = vld [vmem:[#allocation7 + $0x168] sm:$0xf] }
 0x57a   : > { %6175 = vmatpush.bf16.msra.mxu1 %v7995_v35  ;;  %6144 = vmatmul.bf16.vlgmr.msrb.gmra.mxu2 %v11810_v31  ;;  %v5185_v35 = vadd.f32 %v5184_v15, %v5171_v48  ;;  %v8254_v48 = vld [vmem:[#allocation7 + $0x3e8] sm:$0xf]  ;;  %v7983_v15 = vor.u32 %v8518_v29, %v7982_v2  ;;  %v8502_v29 = vld [vmem:[#allocation7 + $0x154] sm:$0xf0] }
 0x57b   : > { %6188 = vmatpush.bf16.msra.mxu2 %v8123_v36  ;;  %6155 = vmatpush.bf16.msrb.mxu3 %v8151_v32  ;;  %v8463_v36 = vld [vmem:[#allocation7 + $0x24] sm:$0xf]  ;;  %v8043_v32 = vor.u32 %v8531_v21, %v8040_v19  ;;  %v8586_v19 = vld [vmem:[#allocation7 + $0x3f4] sm:$0xf0]  ;;  %v7918_v2 = vld [vmem:[#allocation7 + $0x148] sm:$0xf] }
 0x57c   : > { %v7771_v50 = vor.u32 %v8463_v36, %v7768_v33  ;;  %v7966_v36 = vld [vmem:[#allocation7 + $0x1a8] sm:$0xf]  ;;  %v8514_v33 = vld [vmem:[#allocation7 + $0x1b4] sm:$0xf0] }
 0x57d   : > { %6163 = vmatpush.bf16.msra.mxu0 %v7851_v9  ;;  %v8567_v9 = vld [vmem:[#allocation7 + $0x364] sm:$0xf] }
 0x57e   : > { %6176 = vmatpush.bf16.msra.mxu1 %v7979_v38  ;;  %v8563_v38 = vld [vmem:[#allocation7 + $0x344] sm:$0xf]  ;;  %v8187_v11 = vor.u32 %v8567_v9, %v8184_v3  ;;  %v8546_v3 = vld [vmem:[#allocation7 + $0x2b4] sm:$0xf0] }
 0x57f   : > { %6189 = vmatpush.bf16.msra.mxu2 %v8107_v1  ;;  %6156 = vmatpush.bf16.msrb.mxu3 %v8135_v41  ;;  %v7752_v1 = vld [vmem:[#allocation7 + $0x10] sm:$0xf0]  ;;  %v8027_v41 = vor.u32 %v8527_v61, %v8024_v18  ;;  %v8171_v7 = vor.u32 %v8563_v38, %v8168_v49  ;;  %v8255_v61 = vor.u32 %v8586_v19, %v8254_v48  ;;  %v8238_v18 = vld [vmem:[#allocation7 + $0x3c8] sm:$0xf]  ;;  %v8510_v49 = vld [vmem:[#allocation7 + $0x194] sm:$0xf0] }
 0x580   : > { %v7755_v12 = vor.u32 %v8459_v5, %v7752_v1  ;;  %v7967_v38 = vor.u32 %v8514_v33, %v7966_v36  ;;  %v8582_v5 = vld [vmem:[#allocation7 + $0x3d4] sm:$0xf0]  ;;  %v8174_v33 = vld [vmem:[#allocation7 + $0x348] sm:$0xf] }
 0x581   : > { %6164 = vmatpush.bf16.msra.mxu0 %v7835_v27  ;;  %v7899_v27 = vor.u32 %v8495_v0, %v7896_v13  ;;  %v7822_v0 = vld [vmem:[#allocation7 + $0x88] sm:$0xf]  ;;  %v8478_v13 = vld [vmem:[#allocation7 + $0x94] sm:$0xf0]  ;;  %v8239_v57 = vor.u32 %v8582_v5, %v8238_v18 }
 0x582   : > { %6177 = vmatpush.bf16.msra.mxu1 %v7963_v44  ;;  %6157 = vmatmul.bf16.vlgmr.msrb.gmra.mxu3 %v11816_v22  ;;  %v5186_v44 = vpop.f32.mrf.mxu1  ;;  %v8570_v48 = vld [vmem:[#allocation7 + $0x374] sm:$0xf0]  ;;  %v7886_v18 = vld [vmem:[#allocation7 + $0x108] sm:$0xf] }
 0x583   : > { %6201 = vmatpush.bf16.msra.mxu3 %v8251_v6  ;;  %6190 = vmatpush.bf16.msra.mxu2 %v8091_v55  ;;  %v8523_v6 = vld [vmem:[#allocation7 + $0x204] sm:$0xf]  ;;  %v8008_v55 = vld [vmem:[#allocation7 + $0x210] sm:$0xf0]  ;;  %v8530_v36 = vld [vmem:[#allocation7 + $0x234] sm:$0xf0] }
 0x584   : > { %v8011_v37 = vor.u32 %v8523_v6, %v8008_v55  ;;  %v8222_v6 = vld [vmem:[#allocation7 + $0x3a8] sm:$0xf]  ;;  %v8578_v55 = vld [vmem:[#allocation7 + $0x3b4] sm:$0xf0] }
 0x585   : > { %6165 = vmatpush.bf16.msra.mxu0 %v7819_v59  ;;  %v7871_v59 = vor.u32 %v8490_v30, %v7870_v53  ;;  %v8078_v53 = vld [vmem:[#allocation7 + $0x288] sm:$0xf]  ;;  %v8542_v30 = vld [vmem:[#allocation7 + $0x294] sm:$0xf0] }
 0x586   : > { %6178 = vmatpush.bf16.msra.mxu1 %v7947_v43  ;;  %v8079_v28 = vor.u32 %v8542_v30, %v8078_v53  ;;  %v8014_v5 = vld [vmem:[#allocation7 + $0x208] sm:$0xf]  ;;  %v8000_v53 = vld [vmem:[#allocation7 + $0x1f8] sm:$0xf0] }
 0x587   : > { %6202 = vmatpush.bf16.msra.mxu3 %v8235_v54  ;;  %6191 = vmatpush.bf16.msra.mxu2 %v8075_v39  ;;  %v7854_v54 = vld [vmem:[#allocation7 + $0xc8] sm:$0xf]  ;;  %v8152_v39 = vld [vmem:[#allocation7 + $0x330] sm:$0xf0] }
 0x588   : > { %v7855_v56 = vor.u32 %v8486_v63, %v7854_v54  ;;  %v8470_v54 = vld [vmem:[#allocation7 + $0x54] sm:$0xf0] }
 0x589   : > { %6166 = vmatpush.bf16.msra.mxu0 %v7803_v46 }
 0x58a   : > { %6179 = vmatpush.bf16.msra.mxu1 %v7931_v10  ;;  %v5197_v43 = vpop.f32.mrf.mxu2  ;;  %v8155_v10 = vor.u32 %v8559_v52, %v8152_v39  ;;  %v5236_v21 = vpop.f32.mrf.mxu1  ;;  %v8206_v52 = vld [vmem:[#allocation7 + $0x388] sm:$0xf] }
 0x58b   : > { %6203 = vmatpush.bf16.msra.mxu3 %v8219_v26  ;;  %6192 = vmatpush.bf16.msra.mxu2 %v8059_v24  ;;  %v11819_v46 = vadd.f32 %v5197_v43, %v5185_v35  ;;  %v8110_v26 = vld [vmem:[#allocation7 + $0x2c8] sm:$0xf]  ;;  %v8482_v24 = vld [vmem:[#allocation7 + $0xb4] sm:$0xf0]  ;;  %v8223_v43 = vor.u32 %v8578_v55, %v8222_v6 }
 0x58c   : > { %v8111_v35 = vor.u32 %v8550_v23, %v8110_v26  ;;  %v7839_v9 = vor.u32 %v8482_v24, %v7838_v62  ;;  %v8046_v26 = vld [vmem:[#allocation7 + $0x248] sm:$0xf]  ;;  %v8534_v23 = vld [vmem:[#allocation7 + $0x254] sm:$0xf0] }
 0x58d   : > { %6167 = vmatpush.bf16.msra.mxu0 %v7787_v47  ;;  %v5223_v47 = vpop.f32.mrf.mxu0  ;;  %v8466_v62 = vld [vmem:[#allocation7 + $0x34] sm:$0xf0]  ;;  %v8158_v55 = vld [vmem:[#allocation7 + $0x328] sm:$0xf] }
 0x58e   : > { %6180 = vmatpush.bf16.msra.mxu1 %v7915_v20  ;;  %v8094_v20 = vld [vmem:[#allocation7 + $0x2a8] sm:$0xf] }
 0x58f   : > { %6204 = vmatpush.bf16.msra.mxu3 %v8203_v4  ;;  %6193 = vmatpush.bf16.msra.mxu2 %v8043_v32  ;;  %v5237_v4 = vadd.f32 %v5236_v21, %v5223_v47  ;;  %v8139_v32 = vor.u32 %v8555_v40, %v8136_v14  ;;  %v8095_v1 = vor.u32 %v8546_v3, %v8094_v20  ;;  %v8190_v40 = vld [vmem:[#allocation7 + $0x368] sm:$0xf]  ;;  %v8498_v21 = vld [vmem:[#allocation7 + $0x134] sm:$0xf0] }
 0x590   : > { %v7919_v14 = vor.u32 %v8502_v29, %v7918_v2  ;;  %v7902_v47 = vld [vmem:[#allocation7 + $0x128] sm:$0xf]  ;;  %v8191_v3 = vor.u32 %v8570_v48, %v8190_v40  ;;  %v8096_v40 = vld [vmem:[#allocation7 + $0x2b8] sm:$0xf0]  ;;  %v8476_v48 = vld [vmem:[#allocation7 + $0x8c] sm:$0xf] }
 0x591   : > { %6168 = vmatpush.bf16.msra.mxu0 %v7771_v50 }
 0x592   : > { %6181 = vmatpush.bf16.msra.mxu1 %v7899_v27  ;;  %v5199_v50 = vpop.f32.mrf.mxu2  ;;  %v7823_v27 = vor.u32 %v8478_v13, %v7822_v0  ;;  %v7903_v0 = vor.u32 %v8498_v21, %v7902_v47  ;;  %v8488_v13 = vld [vmem:[#allocation7 + $0xec] sm:$0xf] }
 0x593   : > { %6205 = vmatpush.bf16.msra.mxu3 %v8187_v11  ;;  %6194 = vmatpush.bf16.msra.mxu2 %v8027_v41  ;;  %v7950_v11 = vld [vmem:[#allocation7 + $0x188] sm:$0xf]  ;;  %v7872_v50 = vld [vmem:[#allocation7 + $0xf8] sm:$0xf0]  ;;  %v8580_v21 = vld [vmem:[#allocation7 + $0x3cc] sm:$0xf] }
 0x594   : > { %v7806_v41 = vld [vmem:[#allocation7 + $0x68] sm:$0xf]  ;;  %v7951_v34 = vor.u32 %v8510_v49, %v7950_v11  ;;  %v8526_v49 = vld [vmem:[#allocation7 + $0x214] sm:$0xf0] }
 0x595   : > { %6169 = vmatpush.bf16.msra.mxu0 %v7755_v12  ;;  %v5225_v44 = vpop.f32.mrf.mxu0  ;;  %v5238_v12 = vpop.f32.mrf.mxu1  ;;  %v7807_v58 = vor.u32 %v8474_v8, %v7806_v41  ;;  %v7875_v41 = vor.u32 %v8488_v13, %v7872_v50  ;;  %v8552_v8 = vld [vmem:[#allocation7 + $0x2ec] sm:$0xf] }
 0x596   : > { %6182 = vmatpush.bf16.msra.mxu1 %v7883_v17  ;;  %v7790_v17 = vld [vmem:[#allocation7 + $0x48] sm:$0xf]  ;;  %v8484_v44 = vld [vmem:[#allocation7 + $0xcc] sm:$0xf]  ;;  %v7856_v12 = vld [vmem:[#allocation7 + $0xd8] sm:$0xf0] }
 0x597   : > { %6206 = vmatpush.bf16.msra.mxu3 %v8171_v7  ;;  %6195 = vmatpush.bf16.msra.mxu2 %v8011_v37  ;;  %v8538_v7 = vld [vmem:[#allocation7 + $0x274] sm:$0xf0]  ;;  %v8576_v50 = vld [vmem:[#allocation7 + $0x3ac] sm:$0xf] }
 0x598   : > { %6170 = vmatmul.bf16.vlgmr.msra.gmra.mxu0 %v11801_v16 }
 0x599   : > { %6214 = vmatpush.bf16.msrb.mxu0 %v7871_v59  ;;  %6183 = vmatmul.bf16.vlgmr.msra.gmra.mxu1 %v11805_v51  ;;  %v8506_v59 = vld [vmem:[#allocation7 + $0x174] sm:$0xf0] }
 0x59a   : > { %6227 = vmatpush.bf16.msrb.mxu1 %v7999_v45  ;;  %6196 = vmatmul.bf16.vlgmr.msra.gmra.mxu2 %v11810_v31  ;;  %v5249_v63 = vpop.f32.mrf.mxu2  ;;  %v7935_v39 = vor.u32 %v8506_v59, %v7934_v25  ;;  %v8574_v45 = vld [vmem:[#allocation7 + $0x394] sm:$0xf0]  ;;  %v8015_v25 = vor.u32 %v8526_v49, %v8014_v5 }
 0x59b   : > { %6240 = vmatpush.bf16.msrb.mxu2 %v8127_v42  ;;  %6207 = vmatpush.bf16.msra.mxu3 %v8155_v10  ;;  %v11825_v37 = vadd.f32 %v5249_v63, %v5237_v4  ;;  %v8063_v42 = vor.u32 %v8538_v7, %v8062_v60  ;;  %v7774_v10 = vld [vmem:[#allocation7 + $0x28] sm:$0xf]  ;;  %v8207_v24 = vor.u32 %v8574_v45, %v8206_v52  ;;  %v8516_v60 = vld [vmem:[#allocation7 + $0x1cc] sm:$0xf]  ;;  %v7984_v7 = vld [vmem:[#allocation7 + $0x1d8] sm:$0xf0] }
 0x59c   : > { %v7775_v19 = vor.u32 %v8466_v62, %v7774_v10  ;;  %v7758_v4 = vld [vmem:[#allocation7 + $0x8] sm:$0xf]  ;;  %v7840_v52 = vld [vmem:[#allocation7 + $0xb8] sm:$0xf0]  ;;  %v8558_v45 = vld [vmem:[#allocation7 + $0x314] sm:$0xf0]  ;;  %v7987_v2 = vor.u32 %v8516_v60, %v7984_v7 }
 0x59d   : > { %6215 = vmatpush.bf16.msrb.mxu0 %v7855_v56  ;;  %v7791_v56 = vor.u32 %v8470_v54, %v7790_v17  ;;  %v8548_v17 = vld [vmem:[#allocation7 + $0x2cc] sm:$0xf]  ;;  %v8112_v54 = vld [vmem:[#allocation7 + $0x2d8] sm:$0xf0] }
 0x59e   : > { %6228 = vmatpush.bf16.msrb.mxu1 %v7983_v15  ;;  %v8047_v15 = vor.u32 %v8534_v23, %v8046_v26  ;;  %v8115_v26 = vor.u32 %v8548_v17, %v8112_v54  ;;  %v8512_v23 = vld [vmem:[#allocation7 + $0x1ac] sm:$0xf]  ;;  %v7968_v10 = vld [vmem:[#allocation7 + $0x1b8] sm:$0xf0] }
 0x59f   : > { %6241 = vmatpush.bf16.msrb.mxu2 %v8111_v35  ;;  %6208 = vmatpush.bf16.msra.mxu3 %v8139_v32  ;;  %v8030_v35 = vld [vmem:[#allocation7 + $0x228] sm:$0xf]  ;;  %v8566_v32 = vld [vmem:[#allocation7 + $0x354] sm:$0xf0]  ;;  %v8532_v7 = vld [vmem:[#allocation7 + $0x24c] sm:$0xf] }
 0x5a0   : > { %v8175_v6 = vor.u32 %v8566_v32, %v8174_v33  ;;  %v8508_v33 = vld [vmem:[#allocation7 + $0x18c] sm:$0xf]  ;;  %v7776_v54 = vld [vmem:[#allocation7 + $0x38] sm:$0xf0] }
 0x5a1   : > { %6216 = vmatpush.bf16.msrb.mxu0 %v7839_v9  ;;  %v8462_v9 = vld [vmem:[#allocation7 + $0x14] sm:$0xf0]  ;;  %v8472_v32 = vld [vmem:[#allocation7 + $0x6c] sm:$0xf] }
 0x5a2   : > { %6229 = vmatpush.bf16.msrb.mxu1 %v7967_v38  ;;  %6209 = vmatmul.bf16.vlgmr.msra.gmra.mxu3 %v11816_v22  ;;  %v5251_v20 = vpop.f32.mrf.mxu2  ;;  %v8494_v38 = vld [vmem:[#allocation7 + $0x114] sm:$0xf0]  ;;  %v7759_v11 = vor.u32 %v8462_v9, %v7758_v4  ;;  %v7952_v4 = vld [vmem:[#allocation7 + $0x198] sm:$0xf0]  ;;  %v8464_v17 = vld [vmem:[#allocation7 + $0x2c] sm:$0xf] }
 0x5a3   : > { %6253 = vmatpush.bf16.msrb.mxu3 %v8255_v61  ;;  %6242 = vmatpush.bf16.msrb.mxu2 %v8095_v1  ;;  %v8031_v61 = vor.u32 %v8530_v36, %v8030_v35  ;;  %v8240_v35 = vld [vmem:[#allocation7 + $0x3d8] sm:$0xf0]  ;;  %v8540_v20 = vld [vmem:[#allocation7 + $0x28c] sm:$0xf] }
 0x5a4   : > { %v8243_v13 = vor.u32 %v8580_v21, %v8240_v35 }
 0x5a5   : > { %6217 = vmatpush.bf16.msrb.mxu0 %v7823_v27  ;;  %v5210_v1 = vpop.f32.mrf.mxu3  ;;  %v8520_v27 = vld [vmem:[#allocation7 + $0x1ec] sm:$0xf] }
 0x5a6   : > { %6230 = vmatpush.bf16.msrb.mxu1 %v7951_v34  ;;  %v11828_v30 = vadd.f32 %v5210_v1, %v11819_v46  ;;  %v7887_v34 = vor.u32 %v8494_v38, %v7886_v18  ;;  %v8003_v59 = vor.u32 %v8520_v27, %v8000_v53  ;;  %v7859_v46 = vor.u32 %v8484_v44, %v7856_v12  ;;  %v8224_v38 = vld [vmem:[#allocation7 + $0x3b8] sm:$0xf0]  ;;  %v8504_v1 = vld [vmem:[#allocation7 + $0x16c] sm:$0xf] }
 0x5a7   : > { %6254 = vmatpush.bf16.msrb.mxu3 %v8239_v57  ;;  %6243 = vmatpush.bf16.msrb.mxu2 %v8079_v28  ;;  %v8128_v57 = vld [vmem:[#allocation7 + $0x2f8] sm:$0xf0]  ;;  %v8562_v28 = vld [vmem:[#allocation7 + $0x334] sm:$0xf0]  ;;  %v8227_v12 = vor.u32 %v8576_v50, %v8224_v38 }
 0x5a8   : > { %v8159_v63 = vor.u32 %v8562_v28, %v8158_v55  ;;  %v7792_v44 = vld [vmem:[#allocation7 + $0x58] sm:$0xf0]  ;;  %v8572_v55 = vld [vmem:[#allocation7 + $0x38c] sm:$0xf] }
 0x5a9   : > { %6218 = vmatpush.bf16.msrb.mxu0 %v7807_v58  ;;  %v8131_v58 = vor.u32 %v8552_v8, %v8128_v57  ;;  %v8536_v8 = vld [vmem:[#allocation7 + $0x26c] sm:$0xf]  ;;  %v8064_v57 = vld [vmem:[#allocation7 + $0x278] sm:$0xf0] }
 0x5aa   : > { %6231 = vmatpush.bf16.msrb.mxu1 %v7935_v39  ;;  %v8142_v39 = vld [vmem:[#allocation7 + $0x308] sm:$0xf]  ;;  %v8160_v50 = vld [vmem:[#allocation7 + $0x338] sm:$0xf0] }
 0x5ab   : > { %6255 = vmatpush.bf16.msrb.mxu3 %v8223_v43  ;;  %6244 = vmatpush.bf16.msrb.mxu2 %v8063_v42  ;;  %v8480_v43 = vld [vmem:[#allocation7 + $0xac] sm:$0xf] }
 0x5ac   : > { %v8584_v42 = vld [vmem:[#allocation7 + $0x3ec] sm:$0xf]  ;;  %v7843_v62 = vor.u32 %v8480_v43, %v7840_v52 }
 0x5ad   : > { %6219 = vmatpush.bf16.msrb.mxu0 %v7791_v56  ;;  %v5212_v29 = vpop.f32.mrf.mxu3  ;;  %v8256_v56 = vld [vmem:[#allocation7 + $0x3f8] sm:$0xf0]  ;;  %v8568_v43 = vld [vmem:[#allocation7 + $0x36c] sm:$0xf] }
 0x5ae   : > { %6232 = vmatpush.bf16.msrb.mxu1 %v7919_v14  ;;  %v8143_v14 = vor.u32 %v8558_v45, %v8142_v39  ;;  %v8259_v47 = vor.u32 %v8584_v42, %v8256_v56  ;;  %v8192_v45 = vld [vmem:[#allocation7 + $0x378] sm:$0xf0]  ;;  %v8496_v29 = vld [vmem:[#allocation7 + $0x12c] sm:$0xf] }
 0x5af   : > { %6256 = vmatpush.bf16.msrb.mxu3 %v8207_v24  ;;  %6245 = vmatpush.bf16.msrb.mxu2 %v8047_v15  ;;  %v8544_v24 = vld [vmem:[#allocation7 + $0x2ac] sm:$0xf]  ;;  %v7824_v15 = vld [vmem:[#allocation7 + $0x98] sm:$0xf0] }
 0x5b0   : > { %v8099_v36 = vor.u32 %v8544_v24, %v8096_v40  ;;  %v7827_v9 = vor.u32 %v8476_v48, %v7824_v15  ;;  %v7904_v56 = vld [vmem:[#allocation7 + $0x138] sm:$0xf0]  ;;  %v8528_v24 = vld [vmem:[#allocation7 + $0x22c] sm:$0xf]  ;;  %v8195_v15 = vor.u32 %v8568_v43, %v8192_v45 }
 0x5b1   : > { %6220 = vmatpush.bf16.msrb.mxu0 %v7775_v19  ;;  %v7971_v19 = vor.u32 %v8512_v23, %v7968_v10  ;;  %v8032_v40 = vld [vmem:[#allocation7 + $0x238] sm:$0xf0]  ;;  %v7907_v21 = vor.u32 %v8496_v29, %v7904_v56 }
 0x5b2   : > { %6233 = vmatpush.bf16.msrb.mxu1 %v7903_v0  ;;  %v7808_v0 = vld [vmem:[#allocation7 + $0x78] sm:$0xf0]  ;;  %v8035_v35 = vor.u32 %v8528_v24, %v8032_v40 }
 0x5b3   : > { %6257 = vmatpush.bf16.msrb.mxu3 %v8191_v3  ;;  %6246 = vmatpush.bf16.msrb.mxu2 %v8031_v61  ;;  %v8080_v3 = vld [vmem:[#allocation7 + $0x298] sm:$0xf0]  ;;  %v7955_v61 = vor.u32 %v8508_v33, %v7952_v4 }
 0x5b4   : > { %v8083_v5 = vor.u32 %v8540_v20, %v8080_v3  ;;  %v7760_v48 = vld [vmem:[#allocation7 + $0x18] sm:$0xf0] }
 0x5b5   : > { %6221 = vmatpush.bf16.msrb.mxu0 %v7759_v11  ;;  %v5262_v18 = vpop.f32.mrf.mxu3  ;;  %v7936_v11 = vld [vmem:[#allocation7 + $0x178] sm:$0xf0]  ;;  %v5275_v27 = vpop.f32.mrf.mxu0 }
 0x5b6   : > { %6234 = vmatpush.bf16.msrb.mxu1 %v7887_v34  ;;  %v11834_v49 = vadd.f32 %v5262_v18, %v11825_v37  ;;  %v5288_v53 = vpop.f32.mrf.mxu1  ;;  %v8468_v34 = vld [vmem:[#allocation7 + $0x4c] sm:$0xf]  ;;  %v7939_v28 = vor.u32 %v8504_v1, %v7936_v11  ;;  %v8067_v37 = vor.u32 %v8536_v8, %v8064_v57  ;;  %v7888_v33 = vld [vmem:[#allocation7 + $0x118] sm:$0xf0] }
 0x5b7   : > { %6258 = vmatpush.bf16.msrb.mxu3 %v8175_v6  ;;  %6247 = vmatpush.bf16.msrb.mxu2 %v8015_v25  ;;  %v5289_v6 = vadd.f32 %v5288_v53, %v5275_v27  ;;  %v8208_v25 = vld [vmem:[#allocation7 + $0x398] sm:$0xf0]  ;;  %v7795_v60 = vor.u32 %v8468_v34, %v7792_v44  ;;  %v8556_v1 = vld [vmem:[#allocation7 + $0x30c] sm:$0xf] }
 0x5b8   : > { %6222 = vmatmul.bf16.vlgmr.msrb.gmra.mxu0 %v11801_v16  ;;  %v8016_v20 = vld [vmem:[#allocation7 + $0x218] sm:$0xf0] }
 0x5b9   : > { %6266 = vmatpush.bf16.msra.mxu0 %v7875_v41  ;;  %6235 = vmatmul.bf16.vlgmr.msrb.gmra.mxu1 %v11805_v51  ;;  %v7811_v41 = vor.u32 %v8472_v32, %v7808_v0  ;;  %v8144_v11 = vld [vmem:[#allocation7 + $0x318] sm:$0xf0] }
 0x5ba   : > { %6279 = vmatpush.bf16.msra.mxu1 %v8003_v59  ;;  %6248 = vmatmul.bf16.vlgmr.msrb.gmra.mxu2 %v11810_v31  ;;  %v8500_v59 = vld [vmem:[#allocation7 + $0x14c] sm:$0xf]  ;;  %v8147_v27 = vor.u32 %v8556_v1, %v8144_v11 }
 0x5bb   : > { %6292 = vmatpush.bf16.msra.mxu2 %v8131_v58  ;;  %6259 = vmatpush.bf16.msrb.mxu3 %v8159_v63  ;;  %v7920_v58 = vld [vmem:[#allocation7 + $0x158] sm:$0xf0]  ;;  %v8211_v63 = vor.u32 %v8572_v55, %v8208_v25 }
 0x5bc   : > { %v7923_v52 = vor.u32 %v8500_v59, %v7920_v58 }
 0x5bd   : > { %6267 = vmatpush.bf16.msra.mxu0 %v7859_v46  ;;  %v8048_v46 = vld [vmem:[#allocation7 + $0x258] sm:$0xf0]  ;;  %v5264_v39 = vpop.f32.mrf.mxu3  ;;  %v5301_v42 = vpop.f32.mrf.mxu2 }
 0x5be   : > { %6280 = vmatpush.bf16.msra.mxu1 %v7987_v2  ;;  %v8051_v2 = vor.u32 %v8532_v7, %v8048_v46  ;;  %v5277_v23 = vpop.f32.mrf.mxu0  ;;  %v5290_v10 = vpop.f32.mrf.mxu1  ;;  %v6318_v7 = vld [vmem:[%s11893_s6] sm:$0xf] }
 0x5bf   : > { %6293 = vmatpush.bf16.msra.mxu2 %v8115_v26  ;;  %6260 = vmatpush.bf16.msrb.mxu3 %v8143_v14  ;;  %v5302_v26 = vadd.f32 %v5301_v42, %v5289_v6  ;;  %v8460_v14 = vld [vmem:[#allocation7 + $0xc] sm:$0xf]  ;;  %v6321_v10 = vperm.slane %v6318_v7, 1 }
 0x5c0   : > { %v7763_v4 = vor.u32 %v8460_v14, %v7760_v48 }
 0x5c1   : > { %6268 = vmatpush.bf16.msra.mxu0 %v7843_v62  ;;  %v7779_v62 = vor.u32 %v8464_v17, %v7776_v54  ;;  %v6320_v17 = vperm.slane %v6318_v7, 0 }
 0x5c2   : > { %6281 = vmatpush.bf16.msra.mxu1 %v7971_v19  ;;  %6261 = vmatmul.bf16.vlgmr.msrb.gmra.mxu3 %v11816_v22  ;;  %v8176_v19 = vld [vmem:[#allocation7 + $0x358] sm:$0xf0] }
 0x5c3   : > { %6305 = vmatpush.bf16.msra.mxu3 %v8259_v47  ;;  %6294 = vmatpush.bf16.msra.mxu2 %v8099_v36  ;;  %v8564_v47 = vld [vmem:[#allocation7 + $0x34c] sm:$0xf] }
 0x5c4   : > { %v8492_v36 = vld [vmem:[#allocation7 + $0x10c] sm:$0xf]  ;;  %v8179_v3 = vor.u32 %v8564_v47, %v8176_v19 }
 0x5c5   : > { %6269 = vmatpush.bf16.msra.mxu0 %v7827_v9  ;;  %v8524_v9 = vld [vmem:[#allocation7 + $0x20c] sm:$0xf]  ;;  %v7891_v32 = vor.u32 %v8492_v36, %v7888_v33  ;;  %v5314_v0 = vpop.f32.mrf.mxu3 }
 0x5c6   : > { %6282 = vmatpush.bf16.msra.mxu1 %v7955_v61  ;;  %v5303_v61 = vpop.f32.mrf.mxu2  ;;  %v8019_v18 = vor.u32 %v8524_v9, %v8016_v20  ;;  %v5315_v38 = vadd.f32 %v5314_v0, %v5302_v26 }
 0x5c7   : > { %6306 = vmatpush.bf16.msra.mxu3 %v8243_v13  ;;  %6295 = vmatpush.bf16.msra.mxu2 %v8083_v5  ;;  %v8560_v13 = vld [vmem:[#allocation7 + $0x32c] sm:$0xf] }
 0x5c8   : > { %v8163_v5 = vor.u32 %v8560_v13, %v8160_v50 }
 0x5c9   : > { %6270 = vmatpush.bf16.msra.mxu0 %v7811_v41 }
 0x5ca   : > { %6283 = vmatpush.bf16.msra.mxu1 %v7939_v28 }
 0x5cb   : > { %6307 = vmatpush.bf16.msra.mxu3 %v8227_v12  ;;  %6296 = vmatpush.bf16.msra.mxu2 %v8067_v37 }
 0x5cd   : > { %6271 = vmatpush.bf16.msra.mxu0 %v7795_v60  ;;  %v5316_v53 = vpop.f32.mrf.mxu3 }
 0x5ce   : > { %6284 = vmatpush.bf16.msra.mxu1 %v7923_v52 }
 0x5cf   : > { %6308 = vmatpush.bf16.msra.mxu3 %v8211_v63  ;;  %6297 = vmatpush.bf16.msra.mxu2 %v8051_v2 }
 0x5d1   : > { %6272 = vmatpush.bf16.msra.mxu0 %v7779_v62 }
 0x5d2   : > { %6285 = vmatpush.bf16.msra.mxu1 %v7907_v21 }
 0x5d3   : > { %6309 = vmatpush.bf16.msra.mxu3 %v8195_v15  ;;  %6298 = vmatpush.bf16.msra.mxu2 %v8035_v35 }
 0x5d5   : > { %6273 = vmatpush.bf16.msra.mxu0 %v7763_v4  ;;  %v5327_v41 = vpop.f32.mrf.mxu0  ;;  %v6322_v4 = vperm.slane %v6318_v7, 2 }
 0x5d6   : > { %6286 = vmatpush.bf16.msra.mxu1 %v7891_v32  ;;  %v5340_v8 = vpop.f32.mrf.mxu1 }
 0x5d7   : > { %6310 = vmatpush.bf16.msra.mxu3 %v8179_v3  ;;  %6299 = vmatpush.bf16.msra.mxu2 %v8019_v18  ;;  %v5341_v57 = vadd.f32 %v5340_v8, %v5327_v41 }
 0x5d8   : > { %6274 = vmatmul.bf16.vlgmr.msra.gmra.mxu0 %v11801_v16 }
 0x5d9   : > { %6287 = vmatmul.bf16.vlgmr.msra.gmra.mxu1 %v11805_v51 }
 0x5da   : > { %6300 = vmatmul.bf16.vlgmr.msra.gmra.mxu2 %v11810_v31 }
 0x5db   : > { %6311 = vmatpush.bf16.msra.mxu3 %v8163_v5 }
 0x5dd   : > { %v5353_v6 = vpop.f32.mrf.mxu2  ;;  %v5329_v34 = vpop.f32.mrf.mxu0 }
 0x5de   : > { %v5354_v44 = vadd.f32 %v5353_v6, %v5341_v57  ;;  %v5342_v12 = vpop.f32.mrf.mxu1 }
 0x5df   : > { %6312 = vmatpush.bf16.msra.mxu3 %v8147_v27  ;;  %v6323_v27 = vperm.slane %v6318_v7, 3 }
 0x5e2   : > { %6313 = vmatmul.bf16.vlgmr.msra.gmra.mxu3 %v11816_v22 }
 0x5e5   : > { %v5366_v55 = vpop.f32.mrf.mxu3  ;;  %v5355_v28 = vpop.f32.mrf.mxu2 }
 0x5e6   : > { %v5367_v16 = vadd.f32 %v5366_v55, %v5354_v44 }
 0x5ed   : > { %v5368_v51 = vpop.f32.mrf.mxu3 }
 0x5f5   : > { %v6119_v25 = vpop.f32.mrf.mxu0 }
 0x5f6   : > { %v6132_v37 = vpop.f32.mrf.mxu1  ;;  %v6120_v31 = vadd.f32 %v6119_v25, %v11828_v30 }
 0x5f8   : > { %v6133_v22 = vadd.f32 %v6132_v37, %v6120_v31 }
 0x5fd   : > { %v6145_v59 = vpop.f32.mrf.mxu2  ;;  %v6121_v58 = vpop.f32.mrf.mxu0 }
 0x5fe   : > { %v6134_v60 = vpop.f32.mrf.mxu1  ;;  %v6146_v46 = vadd.f32 %v6145_v59, %v6133_v22 }
 0x605   : > { %v6158_v54 = vpop.f32.mrf.mxu3  ;;  %v6147_v43 = vpop.f32.mrf.mxu2 }
 0x606   : > { %v6159_v63 = vadd.f32 %v6158_v54, %v6146_v46 }
 0x608   : > { %v6328_v52 = vadd.f32 %v6320_v17, %v6159_v63 }
 0x60a   : > { %6332 = vst [vmem:[%s11846_s16] sm:$0xff] %v6328_v52 }
 0x60d   : > { %v6160_v30 = vpop.f32.mrf.mxu3 }
 0x615   : > { %v6171_v39 = vpop.f32.mrf.mxu0 }
 0x616   : > { %v6184_v45 = vpop.f32.mrf.mxu1  ;;  %v6172_v42 = vadd.f32 %v6171_v39, %v11834_v49 }
 0x618   : > { %v6185_v26 = vadd.f32 %v6184_v45, %v6172_v42 }
 0x61d   : > { %v6197_v2 = vpop.f32.mrf.mxu2  ;;  %v6173_v29 = vpop.f32.mrf.mxu0 }
 0x61e   : > { %v6186_v56 = vpop.f32.mrf.mxu1  ;;  %v6198_v23 = vadd.f32 %v6197_v2, %v6185_v26 }
 0x625   : > { %v6210_v62 = vpop.f32.mrf.mxu3  ;;  %v6199_v40 = vpop.f32.mrf.mxu2 }
 0x626   : > { %v6211_v24 = vadd.f32 %v6210_v62, %v6198_v23 }
 0x628   : > { %v6329_v14 = vadd.f32 %v6321_v10, %v6211_v24 }
 0x62a   : > { %6333 = vst [vmem:[%s11846_s16 + $0x8] sm:$0xff] %v6329_v14 }
 0x62d   : > { %v6212_v48 = vpop.f32.mrf.mxu3 }
 0x635   : > { %v6223_v15 = vpop.f32.mrf.mxu0 }
 0x636   : > { %v6236_v47 = vpop.f32.mrf.mxu1  ;;  %v6224_v21 = vadd.f32 %v6223_v15, %v5315_v38 }
 0x638   : > { %v6237_v49 = vadd.f32 %v6236_v47, %v6224_v21 }
 0x63d   : > { %v6249_v19 = vpop.f32.mrf.mxu2  ;;  %v6225_v35 = vpop.f32.mrf.mxu0 }
 0x63e   : > { %v6238_v36 = vpop.f32.mrf.mxu1  ;;  %v6250_v33 = vadd.f32 %v6249_v19, %v6237_v49 }
 0x645   : > { %v6262_v9 = vpop.f32.mrf.mxu3  ;;  %v6251_v3 = vpop.f32.mrf.mxu2 }
 0x646   : > { %v6263_v20 = vadd.f32 %v6262_v9, %v6250_v33 }
 0x648   : > { %v6330_v32 = vadd.f32 %v6322_v4, %v6263_v20 }
 0x64a   : > { %6334 = vst [vmem:[%s11846_s16 + $0x10] sm:$0xff] %v6330_v32 }
 0x64d   : > { %v6264_v0 = vpop.f32.mrf.mxu3 }
 0x655   : > { %v6275_v13 = vpop.f32.mrf.mxu0 }
 0x656   : > { %v6288_v50 = vpop.f32.mrf.mxu1  ;;  %v6276_v61 = vadd.f32 %v6275_v13, %v5367_v16 }
 0x658   : > { %v6289_v1 = vadd.f32 %v6288_v50, %v6276_v61 }
 0x65d   : > { %v6277_v18 = vpop.f32.mrf.mxu0  ;;  %v6301_v38 = vpop.f32.mrf.mxu2 }
 0x65e   : > { %v6290_v5 = vpop.f32.mrf.mxu1  ;;  %v6302_v11 = vadd.f32 %v6301_v38, %v6289_v1 }
 0x665   : > { %v6314_v53 = vpop.f32.mrf.mxu3  ;;  %v6303_v8 = vpop.f32.mrf.mxu2 }
 0x666   : > { %v6315_v41 = vadd.f32 %v6314_v53, %v6302_v11 }
 0x668   : > { %v6331_v57 = vadd.f32 %v6323_v27, %v6315_v41 }
 0x66a   : > { %6335 = vst [vmem:[%s11846_s16 + $0x18] sm:$0xff] %v6331_v57 }
 0x66b   : > { %9188 = shalt.err (!%p9185_p10)
}
 0x66c   : > { %8730 = dma.vmem_to_hbm [thread:$0]  (%p9375_p3), %s6351_s11, 512, %s6353_s20, %s6337_s1  }
 0x66d   : > { %v6316_v6 = vpop.f32.mrf.mxu3 }
 0x66e PF: > { %s6364_s15 = sand.u32 1, %s9223_s24   ;;  %p12427_p12 = scmp.ge.s32.totalorder %s9235_s27, 2 }
 0x66f   : > { %s6365_s16 = scalar_lea.sflag [#allocation4], %s6364_s15 }
 0x670   : > { %p8747_p13 = pnand %p12427_p12, %p9319_p6 }
 0x672   : > { %p8748_p0 = pneg %p8747_p13 }
 0x674   : > { %9218 = dma.done.wait (%p8748_p0), %s6365_s16, 512  }
 0x675   : > { %9220 = vsyncadd (%p8748_p0), %s6365_s16, 4294966784  ;;  %p22_p5 = scmp.ge.s32.totalorder %s9357_s13, 4   ;;  %s12428_s24 = smov %s9227_s25 }
 0x676   : > { %s12429_s25 = smov %s9231_s26  ;;  %s12430_s26 = smov %s9371_s17 }
 0x677   : > { %s12431_s27 = smov %s9357_s13  ;;  %24 = sbr.rel (!%p22_p5) target bundleno = 9 (0x9), region = 105 }
 0x67c   :  { %6371 = vsyncpa [#allocation3], 1 }
 0x67d   :  { %6373 = vsyncpa [#allocation3 + $0x1], 1 }
 0x67e   :  { %6374 = vsyncpa [#allocation6], 1 }
 0x67f   :  { %6375 = vsyncpa [#allocation9], 1 }
 0x680   :  { %6376 = vsyncpa [#allocation4], 1 }
 0x681   :  { %6378 = vsyncpa [#allocation4 + $0x1], 1 }

</bundles_post_ra>
